<compile_context>
chip_gen: v7x
topology: tpu7x:2x2x1
jax: 0.10.0
libtpu: 0.0.40
codegen_flags: <defaults>
</compile_context>

<pallas_src>
import jax
import jax.numpy as jnp
from jax.experimental import pallas as pl
from jax.experimental.pallas import tpu as pltpu

H = W = 32                 # input spatial size implied by fc1 = Linear(16*5*5, 120)
IMG = H * W                # per-image lane stride (1024)
KHW = 5                    # conv kernel size
CPT = 8                    # sublane rows reserved per im2col tap (3 or 6 real + zero pad)
KCONV = KHW * KHW * CPT    # 200: K dim of both conv matmuls
C2 = 16                    # conv2 output channels
NFC1 = 400                 # fc1 fan-in (= 16*5*5)
OCP = 128                  # padded output-channel / fc width


def _lenet_kernel(x_ref, w1_ref, w2_ref, wf1_ref, wf2_ref, wf3_ref, b_ref,
                  out_ref):
    """Fused LeNet forward.

    x_ref   : (8, M)     f32   rows 0..2 = RGB (channel-major), rows 3..7 = 0,
                               lane m = n*1024 + h*32 + w
    w1_ref  : (128, 200) bf16  conv1 weights, col = (kh*5 + kw)*8 + cin
    w2_ref  : (128, 200) bf16  conv2 weights, col = (kh*5 + kw)*8 + cin
    wf1_ref : (128, 400) bf16  fc1 weights,   col = (ph*5 + pw)*16 + c
    wf2_ref : (128, 128) bf16
    wf3_ref : (128, 128) bf16
    b_ref   : (128, 8)   f32   column j = bias of layer j (conv1, conv2, fc1, fc2, fc3)
    out_ref : (N, 128, 1) f32  rows 0..9 of out_ref[n] = logits of image n
    """
    f32, bf16 = jnp.float32, jnp.bfloat16
    m = x_ref.shape[1]
    n_img = out_ref.shape[0]

    def pad_right(v, amount):
        # v has lane width m (a multiple of 128) -> aligned, cheap concat.
        return jnp.concatenate(
            [v, jnp.zeros((v.shape[0], amount), v.dtype)], axis=1)

    def conv_patches(v, step_h, step_w):
        # In-kernel im2col: row (kh*5+kw)*8 + c of the result holds
        # v[c, lane + kh*step_h + kw*step_w]   (zeros once shifted past m).
        vp = pad_right(v, 384)                  # max shift = 4*step_h + 4*step_w <= 264
        taps = []
        for kh in range(KHW):
            for kw in range(KHW):
                d = kh * step_h + kw * step_w
                taps.append(vp[:, d:d + m])     # (8, m) shifted lane slice
        return jnp.concatenate(taps, axis=0)    # (200, m), sublane-aligned concat

    def maxpool2x2(v, step_h, step_w):
        # max over lane offsets {0, step_w, step_h, step_h + step_w}.
        vp = pad_right(v, 128)
        mw = jnp.maximum(v, vp[:, step_w:step_w + m])
        mwp = pad_right(mw, 128)
        return jnp.maximum(mw, mwp[:, step_h:step_h + m])

    x = x_ref[...]                                          # (8, m) f32

    # ---- conv1 (5x5 valid) + bias + ReLU ----------------------------------
    # output pixel (n, h, w) lives on lane n*1024 + h*32 + w (valid h, w < 28)
    p1 = conv_patches(x, W, 1).astype(bf16)                 # (200, m)
    h1 = jnp.dot(w1_ref[...], p1, preferred_element_type=f32)
    h1 = jnp.maximum(h1 + b_ref[:, 0:1], 0.0)               # (128, m) f32

    # ---- pool1 (2x2/2): valid pooled pixels at lanes n*1024 + 64*ph + 2*pw --
    m1 = maxpool2x2(h1[0:CPT, :], W, 1)                     # (8, m); rows 6,7 = 0

    # ---- conv2 on the stride-2 sparse lane grid + bias + ReLU ---------------
    p2 = conv_patches(m1, 2 * W, 2).astype(bf16)            # (200, m)
    h2 = jnp.dot(w2_ref[...], p2, preferred_element_type=f32)
    h2 = jnp.maximum(h2 + b_ref[:, 1:2], 0.0)               # (128, m) f32

    # ---- pool2: valid pooled pixels at lanes n*1024 + 128*ph + 4*pw ---------
    m2 = maxpool2x2(h2[0:C2, :], 2 * W, 2)                  # (16, m) f32

    # ---- fully-connected head, one image (= one lane column) at a time -----
    wf1 = wf1_ref[...]
    wf2 = wf2_ref[...]
    wf3 = wf3_ref[...]
    for n in range(n_img):
        pieces = []
        for ph in range(KHW):
            for pw in range(KHW):
                lane = n * IMG + 4 * W * ph + 4 * pw
                pieces.append(m2[:, lane:lane + 1])         # (16, 1)
        xfc = jnp.concatenate(pieces, axis=0).astype(bf16)  # (400, 1)

        f1 = jnp.dot(wf1, xfc, preferred_element_type=f32) + b_ref[:, 2:3]
        f1 = jnp.maximum(f1, 0.0)
        f2 = jnp.dot(wf2, f1.astype(bf16), preferred_element_type=f32) + b_ref[:, 3:4]
        f2 = jnp.maximum(f2, 0.0)
        f3 = jnp.dot(wf3, f2.astype(bf16), preferred_element_type=f32) + b_ref[:, 4:5]
        out_ref[n] = f3                                     # (128, 1)


# --------------------------- host-side wrappers ------------------------------


def prepare_params(p):
    """One-time repack of PyTorch-layout parameters into MXU-friendly,
    zero-padded bf16 matrices (hoisted out of the per-call path)."""
    bf16 = jnp.bfloat16

    def conv_w(w):                                  # (OC, IC, 5, 5) -> (128, 200)
        oc, ic = w.shape[0], w.shape[1]
        wt = jnp.transpose(w, (0, 2, 3, 1))          # (OC, KH, KW, IC)
        wt = jnp.pad(wt, ((0, OCP - oc), (0, 0), (0, 0), (0, CPT - ic)))
        return wt.reshape(OCP, KCONV).astype(bf16)

    # fc1 flatten order in PyTorch is (c, ph, pw); the kernel gathers (ph, pw, c).
    wf1 = p["fc1_w"].reshape(120, C2, KHW, KHW)
    wf1 = jnp.transpose(wf1, (0, 2, 3, 1)).reshape(120, NFC1)
    wf1 = jnp.pad(wf1, ((0, OCP - 120), (0, 0))).astype(bf16)
    wf2 = jnp.pad(p["fc2_w"], ((0, OCP - 84), (0, OCP - 120))).astype(bf16)
    wf3 = jnp.pad(p["fc3_w"], ((0, OCP - 10), (0, OCP - 84))).astype(bf16)

    b = jnp.zeros((OCP, 8), jnp.float32)
    b = b.at[:6, 0].set(p["conv1_b"])
    b = b.at[:16, 1].set(p["conv2_b"])
    b = b.at[:120, 2].set(p["fc1_b"])
    b = b.at[:84, 3].set(p["fc2_b"])
    b = b.at[:10, 4].set(p["fc3_b"])

    return {"w1": conv_w(p["conv1_w"]), "w2": conv_w(p["conv2_w"]),
            "wf1": wf1, "wf2": wf2, "wf3": wf3, "b": b}


def lenet_forward(x_nchw, w):
    n, c, h, ww = x_nchw.shape
    assert (c, h, ww) == (3, H, W), "Net requires 3x32x32 inputs"
    m = n * IMG

    # NCHW -> channel-major (C, n*h*w) slab, channel rows padded 3 -> 8.
    xt = jnp.transpose(x_nchw.astype(jnp.float32), (1, 0, 2, 3)).reshape(3, m)
    xt = jnp.pad(xt, ((0, CPT - 3), (0, 0)))                 # (8, m)

    flops = 2 * (2 * OCP * KCONV * m + n * OCP * (NFC1 + 2 * OCP))
    bytes_accessed = (xt.size * 4 + w["b"].size * 4 + n * OCP * 4
                      + 2 * (w["w1"].size + w["w2"].size + w["wf1"].size
                             + w["wf2"].size + w["wf3"].size))

    def full(shape):
        return pl.BlockSpec(shape, lambda i: (0,) * len(shape))

    out = pl.pallas_call(
        _lenet_kernel,
        out_shape=jax.ShapeDtypeStruct((n, OCP, 1), jnp.float32),
        grid=(1,),
        in_specs=[
            full((CPT, m)),
            full((OCP, KCONV)),
            full((OCP, KCONV)),
            full((OCP, NFC1)),
            full((OCP, OCP)),
            full((OCP, OCP)),
            full((OCP, 8)),
        ],
        out_specs=full((n, OCP, 1)),
        compiler_params=pltpu.CompilerParams(
            dimension_semantics=("arbitrary",),
            vmem_limit_bytes=32 * 1024 * 1024),
        cost_estimate=pl.CostEstimate(flops=flops, transcendentals=0,
                                      bytes_accessed=bytes_accessed),
    )(xt, w["w1"], w["w2"], w["wf1"], w["wf2"], w["wf3"], w["b"])

    return out[:, :10, 0]                                    # (N, 10) logits


# ------------------------------- reference -----------------------------------


def reference_forward(x, p):
    """Plain-XLA reference with the same bf16-operand / f32-accumulate
    numerics as the kernel (PyTorch `Net` forward semantics)."""
    bf16, f32 = jnp.bfloat16, jnp.float32

    def conv(v, w, b):
        y = jax.lax.conv_general_dilated(
            v.astype(bf16), w.astype(bf16), (1, 1), "VALID",
            dimension_numbers=("NCHW", "OIHW", "NCHW"),
            preferred_element_type=f32)
        return jax.nn.relu(y + b.reshape(1, -1, 1, 1))

    def pool(v):
        return jax.lax.reduce_window(v, -jnp.inf, jax.lax.max,
                                     (1, 1, 2, 2), (1, 1, 2, 2), "VALID")

    def fc(v, w, b):
        return jnp.dot(v.astype(bf16), w.T.astype(bf16),
                       preferred_element_type=f32) + b

    v = pool(conv(x, p["conv1_w"], p["conv1_b"]))
    v = pool(conv(v, p["conv2_w"], p["conv2_b"]))
    v = v.reshape(v.shape[0], -1)
    v = jax.nn.relu(fc(v, p["fc1_w"], p["fc1_b"]))
    v = jax.nn.relu(fc(v, p["fc2_w"], p["fc2_b"]))
    return fc(v, p["fc3_w"], p["fc3_b"])


def init_params(key):
    ks = jax.random.split(key, 10)

    def wgt(k, shape, scale=0.05):
        return (scale * jax.random.normal(k, shape)).astype(jnp.float32)

    return {
        "conv1_w": wgt(ks[0], (6, 3, 5, 5)),
        "conv1_b": wgt(ks[1], (6,)),
        "conv2_w": wgt(ks[2], (16, 6, 5, 5)),
        "conv2_b": wgt(ks[3], (16,)),
        "fc1_w": wgt(ks[4], (120, 16 * 25)),
        "fc1_b": wgt(ks[5], (120,)),
        "fc2_w": wgt(ks[6], (84, 120)),
        "fc2_b": wgt(ks[7], (84,)),
        "fc3_w": wgt(ks[8], (10, 84)),
        "fc3_b": wgt(ks[9], (10,)),
    }


if __name__ == "__main__":
    key = jax.random.PRNGKey(0)
    pkey, xkey = jax.random.split(key)
    params = init_params(pkey)
    packed = prepare_params(params)

    # 32x32 input implied by fc1 = Linear(16*5*5, 120); small batch of 2.
    x = jax.random.normal(xkey, (2, 3, 32, 32), dtype=jnp.float32)

    fwd = jax.jit(lenet_forward)
    out = jax.block_until_ready(fwd(x, packed))
    assert out.shape == (2, 10), out.shape

    ref = jax.block_until_ready(reference_forward(x, params))
    assert jnp.allclose(out, ref, rtol=2e-3, atol=2e-3), (
        f"max abs diff {jnp.max(jnp.abs(out - ref))}")

    print("KERNEL_OK")
</pallas_src>

<mosaic_0001>
module attributes {stable_mosaic.version = 11 : i64} {
  func.func @_lenet_kernel(%arg0: i32, %arg1: memref<8x2048xf32, #tpu.memory_space<vmem>>, %arg2: memref<128x200xbf16, #tpu.memory_space<vmem>>, %arg3: memref<128x200xbf16, #tpu.memory_space<vmem>>, %arg4: memref<128x400xbf16, #tpu.memory_space<vmem>>, %arg5: memref<128x128xbf16, #tpu.memory_space<vmem>>, %arg6: memref<128x128xbf16, #tpu.memory_space<vmem>>, %arg7: memref<128x8xf32, #tpu.memory_space<vmem>>, %arg8: memref<2x128x1xf32, #tpu.memory_space<vmem>>) attributes {dimension_semantics = [#tpu.dimension_semantics<arbitrary>], iteration_bounds = array<i64: 1>, scalar_prefetch = 0 : i64, scratch_operands = 0 : i64, tpu.core_type = #tpu.core_type<tc>, window_params = [{pipeline_mode = #tpu.pipeline_mode<synchronous>, transform_indices = @transform_0, window_bounds = array<i64: 8, 2048>}, {pipeline_mode = #tpu.pipeline_mode<synchronous>, transform_indices = @transform_1, window_bounds = array<i64: 128, 200>}, {pipeline_mode = #tpu.pipeline_mode<synchronous>, transform_indices = @transform_2, window_bounds = array<i64: 128, 200>}, {pipeline_mode = #tpu.pipeline_mode<synchronous>, transform_indices = @transform_3, window_bounds = array<i64: 128, 400>}, {pipeline_mode = #tpu.pipeline_mode<synchronous>, transform_indices = @transform_4, window_bounds = array<i64: 128, 128>}, {pipeline_mode = #tpu.pipeline_mode<synchronous>, transform_indices = @transform_5, window_bounds = array<i64: 128, 128>}, {pipeline_mode = #tpu.pipeline_mode<synchronous>, transform_indices = @transform_6, window_bounds = array<i64: 128, 8>}, {pipeline_mode = #tpu.pipeline_mode<synchronous>, transform_indices = @transform_7, window_bounds = array<i64: 2, 128, 1>}]} {
    %c0 = arith.constant 0 : index
    %c0_0 = arith.constant 0 : index
    %0 = vector.load %arg1[%c0, %c0_0] : memref<8x2048xf32, #tpu.memory_space<vmem>>, vector<8x2048xf32>
    %cst = arith.constant 0.000000e+00 : f32
    %1 = vector.broadcast %cst : f32 to vector<8x384xf32>
    %2 = tpu.concatenate %0, %1 in 1 : vector<8x2048xf32>, vector<8x384xf32> -> vector<8x2432xf32>
    %3 = vector.extract_strided_slice %2 {offsets = [0, 0], sizes = [8, 2048], strides = [1, 1]} : vector<8x2432xf32> to vector<8x2048xf32>
    %4 = vector.extract_strided_slice %2 {offsets = [0, 1], sizes = [8, 2048], strides = [1, 1]} : vector<8x2432xf32> to vector<8x2048xf32>
    %5 = vector.extract_strided_slice %2 {offsets = [0, 2], sizes = [8, 2048], strides = [1, 1]} : vector<8x2432xf32> to vector<8x2048xf32>
    %6 = vector.extract_strided_slice %2 {offsets = [0, 3], sizes = [8, 2048], strides = [1, 1]} : vector<8x2432xf32> to vector<8x2048xf32>
    %7 = vector.extract_strided_slice %2 {offsets = [0, 4], sizes = [8, 2048], strides = [1, 1]} : vector<8x2432xf32> to vector<8x2048xf32>
    %8 = vector.extract_strided_slice %2 {offsets = [0, 32], sizes = [8, 2048], strides = [1, 1]} : vector<8x2432xf32> to vector<8x2048xf32>
    %9 = vector.extract_strided_slice %2 {offsets = [0, 33], sizes = [8, 2048], strides = [1, 1]} : vector<8x2432xf32> to vector<8x2048xf32>
    %10 = vector.extract_strided_slice %2 {offsets = [0, 34], sizes = [8, 2048], strides = [1, 1]} : vector<8x2432xf32> to vector<8x2048xf32>
    %11 = vector.extract_strided_slice %2 {offsets = [0, 35], sizes = [8, 2048], strides = [1, 1]} : vector<8x2432xf32> to vector<8x2048xf32>
    %12 = vector.extract_strided_slice %2 {offsets = [0, 36], sizes = [8, 2048], strides = [1, 1]} : vector<8x2432xf32> to vector<8x2048xf32>
    %13 = vector.extract_strided_slice %2 {offsets = [0, 64], sizes = [8, 2048], strides = [1, 1]} : vector<8x2432xf32> to vector<8x2048xf32>
    %14 = vector.extract_strided_slice %2 {offsets = [0, 65], sizes = [8, 2048], strides = [1, 1]} : vector<8x2432xf32> to vector<8x2048xf32>
    %15 = vector.extract_strided_slice %2 {offsets = [0, 66], sizes = [8, 2048], strides = [1, 1]} : vector<8x2432xf32> to vector<8x2048xf32>
    %16 = vector.extract_strided_slice %2 {offsets = [0, 67], sizes = [8, 2048], strides = [1, 1]} : vector<8x2432xf32> to vector<8x2048xf32>
    %17 = vector.extract_strided_slice %2 {offsets = [0, 68], sizes = [8, 2048], strides = [1, 1]} : vector<8x2432xf32> to vector<8x2048xf32>
    %18 = vector.extract_strided_slice %2 {offsets = [0, 96], sizes = [8, 2048], strides = [1, 1]} : vector<8x2432xf32> to vector<8x2048xf32>
    %19 = vector.extract_strided_slice %2 {offsets = [0, 97], sizes = [8, 2048], strides = [1, 1]} : vector<8x2432xf32> to vector<8x2048xf32>
    %20 = vector.extract_strided_slice %2 {offsets = [0, 98], sizes = [8, 2048], strides = [1, 1]} : vector<8x2432xf32> to vector<8x2048xf32>
    %21 = vector.extract_strided_slice %2 {offsets = [0, 99], sizes = [8, 2048], strides = [1, 1]} : vector<8x2432xf32> to vector<8x2048xf32>
    %22 = vector.extract_strided_slice %2 {offsets = [0, 100], sizes = [8, 2048], strides = [1, 1]} : vector<8x2432xf32> to vector<8x2048xf32>
    %23 = vector.extract_strided_slice %2 {offsets = [0, 128], sizes = [8, 2048], strides = [1, 1]} : vector<8x2432xf32> to vector<8x2048xf32>
    %24 = vector.extract_strided_slice %2 {offsets = [0, 129], sizes = [8, 2048], strides = [1, 1]} : vector<8x2432xf32> to vector<8x2048xf32>
    %25 = vector.extract_strided_slice %2 {offsets = [0, 130], sizes = [8, 2048], strides = [1, 1]} : vector<8x2432xf32> to vector<8x2048xf32>
    %26 = vector.extract_strided_slice %2 {offsets = [0, 131], sizes = [8, 2048], strides = [1, 1]} : vector<8x2432xf32> to vector<8x2048xf32>
    %27 = vector.extract_strided_slice %2 {offsets = [0, 132], sizes = [8, 2048], strides = [1, 1]} : vector<8x2432xf32> to vector<8x2048xf32>
    %28 = tpu.concatenate %3, %4, %5, %6, %7, %8, %9, %10, %11, %12, %13, %14, %15, %16, %17, %18 in 0 : vector<8x2048xf32>, vector<8x2048xf32>, vector<8x2048xf32>, vector<8x2048xf32>, vector<8x2048xf32>, vector<8x2048xf32>, vector<8x2048xf32>, vector<8x2048xf32>, vector<8x2048xf32>, vector<8x2048xf32>, vector<8x2048xf32>, vector<8x2048xf32>, vector<8x2048xf32>, vector<8x2048xf32>, vector<8x2048xf32>, vector<8x2048xf32> -> vector<128x2048xf32>
    %29 = tpu.concatenate %19, %20, %21, %22, %23, %24, %25, %26, %27 in 0 : vector<8x2048xf32>, vector<8x2048xf32>, vector<8x2048xf32>, vector<8x2048xf32>, vector<8x2048xf32>, vector<8x2048xf32>, vector<8x2048xf32>, vector<8x2048xf32>, vector<8x2048xf32> -> vector<72x2048xf32>
    %30 = tpu.concatenate %28, %29 in 0 : vector<128x2048xf32>, vector<72x2048xf32> -> vector<200x2048xf32>
    %31 = arith.truncf %30 : vector<200x2048xf32> to vector<200x2048xbf16>
    %c0_1 = arith.constant 0 : index
    %c0_2 = arith.constant 0 : index
    %32 = vector.load %arg2[%c0_1, %c0_2] : memref<128x200xbf16, #tpu.memory_space<vmem>>, vector<128x200xbf16>
    %cst_3 = arith.constant dense<0.000000e+00> : vector<128x2048xf32>
    %33 = tpu.matmul %32, %31, %cst_3 {dimension_numbers = #tpu.dot_dimension_numbers<[1], [0], [0], [1], [0, 0, 1, 1], [], []>} : vector<128x200xbf16>, vector<200x2048xbf16>, vector<128x2048xf32> -> vector<128x2048xf32>
    %c0_4 = arith.constant 0 : index
    %c0_5 = arith.constant 0 : index
    %34 = vector.load %arg7[%c0_4, %c0_5] : memref<128x8xf32, #tpu.memory_space<vmem>>, vector<128x1xf32>
    %35 = vector.broadcast %34 : vector<128x1xf32> to vector<128x2048xf32>
    %36 = arith.addf %33, %35 : vector<128x2048xf32>
    %cst_6 = arith.constant 0.000000e+00 : f32
    %37 = vector.broadcast %cst_6 : f32 to vector<128x2048xf32>
    %38 = arith.maximumf %36, %37 : vector<128x2048xf32>
    %39 = vector.extract_strided_slice %38 {offsets = [0, 0], sizes = [8, 2048], strides = [1, 1]} : vector<128x2048xf32> to vector<8x2048xf32>
    %cst_7 = arith.constant 0.000000e+00 : f32
    %40 = vector.broadcast %cst_7 : f32 to vector<8x128xf32>
    %41 = tpu.concatenate %39, %40 in 1 : vector<8x2048xf32>, vector<8x128xf32> -> vector<8x2176xf32>
    %42 = vector.extract_strided_slice %41 {offsets = [0, 1], sizes = [8, 2048], strides = [1, 1]} : vector<8x2176xf32> to vector<8x2048xf32>
    %43 = arith.maximumf %39, %42 : vector<8x2048xf32>
    %cst_8 = arith.constant 0.000000e+00 : f32
    %44 = vector.broadcast %cst_8 : f32 to vector<8x128xf32>
    %45 = tpu.concatenate %43, %44 in 1 : vector<8x2048xf32>, vector<8x128xf32> -> vector<8x2176xf32>
    %46 = vector.extract_strided_slice %45 {offsets = [0, 32], sizes = [8, 2048], strides = [1, 1]} : vector<8x2176xf32> to vector<8x2048xf32>
    %47 = arith.maximumf %43, %46 : vector<8x2048xf32>
    %cst_9 = arith.constant 0.000000e+00 : f32
    %48 = vector.broadcast %cst_9 : f32 to vector<8x384xf32>
    %49 = tpu.concatenate %47, %48 in 1 : vector<8x2048xf32>, vector<8x384xf32> -> vector<8x2432xf32>
    %50 = vector.extract_strided_slice %49 {offsets = [0, 0], sizes = [8, 2048], strides = [1, 1]} : vector<8x2432xf32> to vector<8x2048xf32>
    %51 = vector.extract_strided_slice %49 {offsets = [0, 2], sizes = [8, 2048], strides = [1, 1]} : vector<8x2432xf32> to vector<8x2048xf32>
    %52 = vector.extract_strided_slice %49 {offsets = [0, 4], sizes = [8, 2048], strides = [1, 1]} : vector<8x2432xf32> to vector<8x2048xf32>
    %53 = vector.extract_strided_slice %49 {offsets = [0, 6], sizes = [8, 2048], strides = [1, 1]} : vector<8x2432xf32> to vector<8x2048xf32>
    %54 = vector.extract_strided_slice %49 {offsets = [0, 8], sizes = [8, 2048], strides = [1, 1]} : vector<8x2432xf32> to vector<8x2048xf32>
    %55 = vector.extract_strided_slice %49 {offsets = [0, 64], sizes = [8, 2048], strides = [1, 1]} : vector<8x2432xf32> to vector<8x2048xf32>
    %56 = vector.extract_strided_slice %49 {offsets = [0, 66], sizes = [8, 2048], strides = [1, 1]} : vector<8x2432xf32> to vector<8x2048xf32>
    %57 = vector.extract_strided_slice %49 {offsets = [0, 68], sizes = [8, 2048], strides = [1, 1]} : vector<8x2432xf32> to vector<8x2048xf32>
    %58 = vector.extract_strided_slice %49 {offsets = [0, 70], sizes = [8, 2048], strides = [1, 1]} : vector<8x2432xf32> to vector<8x2048xf32>
    %59 = vector.extract_strided_slice %49 {offsets = [0, 72], sizes = [8, 2048], strides = [1, 1]} : vector<8x2432xf32> to vector<8x2048xf32>
    %60 = vector.extract_strided_slice %49 {offsets = [0, 128], sizes = [8, 2048], strides = [1, 1]} : vector<8x2432xf32> to vector<8x2048xf32>
    %61 = vector.extract_strided_slice %49 {offsets = [0, 130], sizes = [8, 2048], strides = [1, 1]} : vector<8x2432xf32> to vector<8x2048xf32>
    %62 = vector.extract_strided_slice %49 {offsets = [0, 132], sizes = [8, 2048], strides = [1, 1]} : vector<8x2432xf32> to vector<8x2048xf32>
    %63 = vector.extract_strided_slice %49 {offsets = [0, 134], sizes = [8, 2048], strides = [1, 1]} : vector<8x2432xf32> to vector<8x2048xf32>
    %64 = vector.extract_strided_slice %49 {offsets = [0, 136], sizes = [8, 2048], strides = [1, 1]} : vector<8x2432xf32> to vector<8x2048xf32>
    %65 = vector.extract_strided_slice %49 {offsets = [0, 192], sizes = [8, 2048], strides = [1, 1]} : vector<8x2432xf32> to vector<8x2048xf32>
    %66 = vector.extract_strided_slice %49 {offsets = [0, 194], sizes = [8, 2048], strides = [1, 1]} : vector<8x2432xf32> to vector<8x2048xf32>
    %67 = vector.extract_strided_slice %49 {offsets = [0, 196], sizes = [8, 2048], strides = [1, 1]} : vector<8x2432xf32> to vector<8x2048xf32>
    %68 = vector.extract_strided_slice %49 {offsets = [0, 198], sizes = [8, 2048], strides = [1, 1]} : vector<8x2432xf32> to vector<8x2048xf32>
    %69 = vector.extract_strided_slice %49 {offsets = [0, 200], sizes = [8, 2048], strides = [1, 1]} : vector<8x2432xf32> to vector<8x2048xf32>
    %70 = vector.extract_strided_slice %49 {offsets = [0, 256], sizes = [8, 2048], strides = [1, 1]} : vector<8x2432xf32> to vector<8x2048xf32>
    %71 = vector.extract_strided_slice %49 {offsets = [0, 258], sizes = [8, 2048], strides = [1, 1]} : vector<8x2432xf32> to vector<8x2048xf32>
    %72 = vector.extract_strided_slice %49 {offsets = [0, 260], sizes = [8, 2048], strides = [1, 1]} : vector<8x2432xf32> to vector<8x2048xf32>
    %73 = vector.extract_strided_slice %49 {offsets = [0, 262], sizes = [8, 2048], strides = [1, 1]} : vector<8x2432xf32> to vector<8x2048xf32>
    %74 = vector.extract_strided_slice %49 {offsets = [0, 264], sizes = [8, 2048], strides = [1, 1]} : vector<8x2432xf32> to vector<8x2048xf32>
    %75 = tpu.concatenate %50, %51, %52, %53, %54, %55, %56, %57, %58, %59, %60, %61, %62, %63, %64, %65 in 0 : vector<8x2048xf32>, vector<8x2048xf32>, vector<8x2048xf32>, vector<8x2048xf32>, vector<8x2048xf32>, vector<8x2048xf32>, vector<8x2048xf32>, vector<8x2048xf32>, vector<8x2048xf32>, vector<8x2048xf32>, vector<8x2048xf32>, vector<8x2048xf32>, vector<8x2048xf32>, vector<8x2048xf32>, vector<8x2048xf32>, vector<8x2048xf32> -> vector<128x2048xf32>
    %76 = tpu.concatenate %66, %67, %68, %69, %70, %71, %72, %73, %74 in 0 : vector<8x2048xf32>, vector<8x2048xf32>, vector<8x2048xf32>, vector<8x2048xf32>, vector<8x2048xf32>, vector<8x2048xf32>, vector<8x2048xf32>, vector<8x2048xf32>, vector<8x2048xf32> -> vector<72x2048xf32>
    %77 = tpu.concatenate %75, %76 in 0 : vector<128x2048xf32>, vector<72x2048xf32> -> vector<200x2048xf32>
    %78 = arith.truncf %77 : vector<200x2048xf32> to vector<200x2048xbf16>
    %c0_10 = arith.constant 0 : index
    %c0_11 = arith.constant 0 : index
    %79 = vector.load %arg3[%c0_10, %c0_11] : memref<128x200xbf16, #tpu.memory_space<vmem>>, vector<128x200xbf16>
    %cst_12 = arith.constant dense<0.000000e+00> : vector<128x2048xf32>
    %80 = tpu.matmul %79, %78, %cst_12 {dimension_numbers = #tpu.dot_dimension_numbers<[1], [0], [0], [1], [0, 0, 1, 1], [], []>} : vector<128x200xbf16>, vector<200x2048xbf16>, vector<128x2048xf32> -> vector<128x2048xf32>
    %c0_13 = arith.constant 0 : index
    %c1 = arith.constant 1 : index
    %81 = vector.load %arg7[%c0_13, %c1] : memref<128x8xf32, #tpu.memory_space<vmem>>, vector<128x1xf32>
    %82 = vector.broadcast %81 : vector<128x1xf32> to vector<128x2048xf32>
    %83 = arith.addf %80, %82 : vector<128x2048xf32>
    %cst_14 = arith.constant 0.000000e+00 : f32
    %84 = vector.broadcast %cst_14 : f32 to vector<128x2048xf32>
    %85 = arith.maximumf %83, %84 : vector<128x2048xf32>
    %86 = vector.extract_strided_slice %85 {offsets = [0, 0], sizes = [16, 2048], strides = [1, 1]} : vector<128x2048xf32> to vector<16x2048xf32>
    %cst_15 = arith.constant 0.000000e+00 : f32
    %87 = vector.broadcast %cst_15 : f32 to vector<16x128xf32>
    %88 = tpu.concatenate %86, %87 in 1 : vector<16x2048xf32>, vector<16x128xf32> -> vector<16x2176xf32>
    %89 = vector.extract_strided_slice %88 {offsets = [0, 2], sizes = [16, 2048], strides = [1, 1]} : vector<16x2176xf32> to vector<16x2048xf32>
    %90 = arith.maximumf %86, %89 : vector<16x2048xf32>
    %cst_16 = arith.constant 0.000000e+00 : f32
    %91 = vector.broadcast %cst_16 : f32 to vector<16x128xf32>
    %92 = tpu.concatenate %90, %91 in 1 : vector<16x2048xf32>, vector<16x128xf32> -> vector<16x2176xf32>
    %93 = vector.extract_strided_slice %92 {offsets = [0, 64], sizes = [16, 2048], strides = [1, 1]} : vector<16x2176xf32> to vector<16x2048xf32>
    %94 = arith.maximumf %90, %93 : vector<16x2048xf32>
    %c0_17 = arith.constant 0 : index
    %c0_18 = arith.constant 0 : index
    %95 = vector.load %arg4[%c0_17, %c0_18] : memref<128x400xbf16, #tpu.memory_space<vmem>>, vector<128x400xbf16>
    %c0_19 = arith.constant 0 : index
    %c0_20 = arith.constant 0 : index
    %96 = vector.load %arg5[%c0_19, %c0_20] : memref<128x128xbf16, #tpu.memory_space<vmem>>, vector<128x128xbf16>
    %c0_21 = arith.constant 0 : index
    %c0_22 = arith.constant 0 : index
    %97 = vector.load %arg6[%c0_21, %c0_22] : memref<128x128xbf16, #tpu.memory_space<vmem>>, vector<128x128xbf16>
    %98 = vector.extract_strided_slice %94 {offsets = [0, 0], sizes = [16, 1], strides = [1, 1]} : vector<16x2048xf32> to vector<16x1xf32>
    %99 = vector.extract_strided_slice %94 {offsets = [0, 4], sizes = [16, 1], strides = [1, 1]} : vector<16x2048xf32> to vector<16x1xf32>
    %100 = vector.extract_strided_slice %94 {offsets = [0, 8], sizes = [16, 1], strides = [1, 1]} : vector<16x2048xf32> to vector<16x1xf32>
    %101 = vector.extract_strided_slice %94 {offsets = [0, 12], sizes = [16, 1], strides = [1, 1]} : vector<16x2048xf32> to vector<16x1xf32>
    %102 = vector.extract_strided_slice %94 {offsets = [0, 16], sizes = [16, 1], strides = [1, 1]} : vector<16x2048xf32> to vector<16x1xf32>
    %103 = vector.extract_strided_slice %94 {offsets = [0, 128], sizes = [16, 1], strides = [1, 1]} : vector<16x2048xf32> to vector<16x1xf32>
    %104 = vector.extract_strided_slice %94 {offsets = [0, 132], sizes = [16, 1], strides = [1, 1]} : vector<16x2048xf32> to vector<16x1xf32>
    %105 = vector.extract_strided_slice %94 {offsets = [0, 136], sizes = [16, 1], strides = [1, 1]} : vector<16x2048xf32> to vector<16x1xf32>
    %106 = vector.extract_strided_slice %94 {offsets = [0, 140], sizes = [16, 1], strides = [1, 1]} : vector<16x2048xf32> to vector<16x1xf32>
    %107 = vector.extract_strided_slice %94 {offsets = [0, 144], sizes = [16, 1], strides = [1, 1]} : vector<16x2048xf32> to vector<16x1xf32>
    %108 = vector.extract_strided_slice %94 {offsets = [0, 256], sizes = [16, 1], strides = [1, 1]} : vector<16x2048xf32> to vector<16x1xf32>
    %109 = vector.extract_strided_slice %94 {offsets = [0, 260], sizes = [16, 1], strides = [1, 1]} : vector<16x2048xf32> to vector<16x1xf32>
    %110 = vector.extract_strided_slice %94 {offsets = [0, 264], sizes = [16, 1], strides = [1, 1]} : vector<16x2048xf32> to vector<16x1xf32>
    %111 = vector.extract_strided_slice %94 {offsets = [0, 268], sizes = [16, 1], strides = [1, 1]} : vector<16x2048xf32> to vector<16x1xf32>
    %112 = vector.extract_strided_slice %94 {offsets = [0, 272], sizes = [16, 1], strides = [1, 1]} : vector<16x2048xf32> to vector<16x1xf32>
    %113 = vector.extract_strided_slice %94 {offsets = [0, 384], sizes = [16, 1], strides = [1, 1]} : vector<16x2048xf32> to vector<16x1xf32>
    %114 = vector.extract_strided_slice %94 {offsets = [0, 388], sizes = [16, 1], strides = [1, 1]} : vector<16x2048xf32> to vector<16x1xf32>
    %115 = vector.extract_strided_slice %94 {offsets = [0, 392], sizes = [16, 1], strides = [1, 1]} : vector<16x2048xf32> to vector<16x1xf32>
    %116 = vector.extract_strided_slice %94 {offsets = [0, 396], sizes = [16, 1], strides = [1, 1]} : vector<16x2048xf32> to vector<16x1xf32>
    %117 = vector.extract_strided_slice %94 {offsets = [0, 400], sizes = [16, 1], strides = [1, 1]} : vector<16x2048xf32> to vector<16x1xf32>
    %118 = vector.extract_strided_slice %94 {offsets = [0, 512], sizes = [16, 1], strides = [1, 1]} : vector<16x2048xf32> to vector<16x1xf32>
    %119 = vector.extract_strided_slice %94 {offsets = [0, 516], sizes = [16, 1], strides = [1, 1]} : vector<16x2048xf32> to vector<16x1xf32>
    %120 = vector.extract_strided_slice %94 {offsets = [0, 520], sizes = [16, 1], strides = [1, 1]} : vector<16x2048xf32> to vector<16x1xf32>
    %121 = vector.extract_strided_slice %94 {offsets = [0, 524], sizes = [16, 1], strides = [1, 1]} : vector<16x2048xf32> to vector<16x1xf32>
    %122 = vector.extract_strided_slice %94 {offsets = [0, 528], sizes = [16, 1], strides = [1, 1]} : vector<16x2048xf32> to vector<16x1xf32>
    %123 = tpu.concatenate %98, %99, %100, %101, %102, %103, %104, %105, %106, %107, %108, %109, %110, %111, %112, %113 in 0 : vector<16x1xf32>, vector<16x1xf32>, vector<16x1xf32>, vector<16x1xf32>, vector<16x1xf32>, vector<16x1xf32>, vector<16x1xf32>, vector<16x1xf32>, vector<16x1xf32>, vector<16x1xf32>, vector<16x1xf32>, vector<16x1xf32>, vector<16x1xf32>, vector<16x1xf32>, vector<16x1xf32>, vector<16x1xf32> -> vector<256x1xf32>
    %124 = tpu.concatenate %114, %115, %116, %117, %118, %119, %120, %121, %122 in 0 : vector<16x1xf32>, vector<16x1xf32>, vector<16x1xf32>, vector<16x1xf32>, vector<16x1xf32>, vector<16x1xf32>, vector<16x1xf32>, vector<16x1xf32>, vector<16x1xf32> -> vector<144x1xf32>
    %125 = tpu.concatenate %123, %124 in 0 : vector<256x1xf32>, vector<144x1xf32> -> vector<400x1xf32>
    %126 = arith.truncf %125 : vector<400x1xf32> to vector<400x1xbf16>
    %cst_23 = arith.constant dense<0.000000e+00> : vector<128x1xf32>
    %127 = tpu.matmul %95, %126, %cst_23 {dimension_numbers = #tpu.dot_dimension_numbers<[1], [0], [0], [1], [0, 0, 1, 1], [], []>} : vector<128x400xbf16>, vector<400x1xbf16>, vector<128x1xf32> -> vector<128x1xf32>
    %c0_24 = arith.constant 0 : index
    %c2 = arith.constant 2 : index
    %128 = vector.load %arg7[%c0_24, %c2] : memref<128x8xf32, #tpu.memory_space<vmem>>, vector<128x1xf32>
    %129 = arith.addf %127, %128 : vector<128x1xf32>
    %cst_25 = arith.constant 0.000000e+00 : f32
    %130 = vector.broadcast %cst_25 : f32 to vector<128x1xf32>
    %131 = arith.maximumf %129, %130 : vector<128x1xf32>
    %132 = arith.truncf %131 : vector<128x1xf32> to vector<128x1xbf16>
    %cst_26 = arith.constant dense<0.000000e+00> : vector<128x1xf32>
    %133 = tpu.matmul %96, %132, %cst_26 {dimension_numbers = #tpu.dot_dimension_numbers<[1], [0], [0], [1], [0, 0, 1, 1], [], []>} : vector<128x128xbf16>, vector<128x1xbf16>, vector<128x1xf32> -> vector<128x1xf32>
    %c0_27 = arith.constant 0 : index
    %c3 = arith.constant 3 : index
    %134 = vector.load %arg7[%c0_27, %c3] : memref<128x8xf32, #tpu.memory_space<vmem>>, vector<128x1xf32>
    %135 = arith.addf %133, %134 : vector<128x1xf32>
    %cst_28 = arith.constant 0.000000e+00 : f32
    %136 = vector.broadcast %cst_28 : f32 to vector<128x1xf32>
    %137 = arith.maximumf %135, %136 : vector<128x1xf32>
    %138 = arith.truncf %137 : vector<128x1xf32> to vector<128x1xbf16>
    %cst_29 = arith.constant dense<0.000000e+00> : vector<128x1xf32>
    %139 = tpu.matmul %97, %138, %cst_29 {dimension_numbers = #tpu.dot_dimension_numbers<[1], [0], [0], [1], [0, 0, 1, 1], [], []>} : vector<128x128xbf16>, vector<128x1xbf16>, vector<128x1xf32> -> vector<128x1xf32>
    %c0_30 = arith.constant 0 : index
    %c4 = arith.constant 4 : index
    %140 = vector.load %arg7[%c0_30, %c4] : memref<128x8xf32, #tpu.memory_space<vmem>>, vector<128x1xf32>
    %141 = arith.addf %139, %140 : vector<128x1xf32>
    %c0_31 = arith.constant 0 : index
    %c0_32 = arith.constant 0 : index
    %c0_33 = arith.constant 0 : index
    %142 = vector.load %arg8[%c0_31, %c0_32, %c0_33] : memref<2x128x1xf32, #tpu.memory_space<vmem>>, vector<1x128x1xf32>
    %143 = vector.shape_cast %142 : vector<1x128x1xf32> to vector<128x1xf32>
    %144 = vector.shape_cast %141 : vector<128x1xf32> to vector<1x128x1xf32>
    tpu.vector_store %arg8[%c0_31, %c0_32, %c0_33], %144 {strides = array<i32>} : memref<2x128x1xf32, #tpu.memory_space<vmem>>, vector<1x128x1xf32>,
    %145 = vector.extract_strided_slice %94 {offsets = [0, 1024], sizes = [16, 1], strides = [1, 1]} : vector<16x2048xf32> to vector<16x1xf32>
    %146 = vector.extract_strided_slice %94 {offsets = [0, 1028], sizes = [16, 1], strides = [1, 1]} : vector<16x2048xf32> to vector<16x1xf32>
    %147 = vector.extract_strided_slice %94 {offsets = [0, 1032], sizes = [16, 1], strides = [1, 1]} : vector<16x2048xf32> to vector<16x1xf32>
    %148 = vector.extract_strided_slice %94 {offsets = [0, 1036], sizes = [16, 1], strides = [1, 1]} : vector<16x2048xf32> to vector<16x1xf32>
    %149 = vector.extract_strided_slice %94 {offsets = [0, 1040], sizes = [16, 1], strides = [1, 1]} : vector<16x2048xf32> to vector<16x1xf32>
    %150 = vector.extract_strided_slice %94 {offsets = [0, 1152], sizes = [16, 1], strides = [1, 1]} : vector<16x2048xf32> to vector<16x1xf32>
    %151 = vector.extract_strided_slice %94 {offsets = [0, 1156], sizes = [16, 1], strides = [1, 1]} : vector<16x2048xf32> to vector<16x1xf32>
    %152 = vector.extract_strided_slice %94 {offsets = [0, 1160], sizes = [16, 1], strides = [1, 1]} : vector<16x2048xf32> to vector<16x1xf32>
    %153 = vector.extract_strided_slice %94 {offsets = [0, 1164], sizes = [16, 1], strides = [1, 1]} : vector<16x2048xf32> to vector<16x1xf32>
    %154 = vector.extract_strided_slice %94 {offsets = [0, 1168], sizes = [16, 1], strides = [1, 1]} : vector<16x2048xf32> to vector<16x1xf32>
    %155 = vector.extract_strided_slice %94 {offsets = [0, 1280], sizes = [16, 1], strides = [1, 1]} : vector<16x2048xf32> to vector<16x1xf32>
    %156 = vector.extract_strided_slice %94 {offsets = [0, 1284], sizes = [16, 1], strides = [1, 1]} : vector<16x2048xf32> to vector<16x1xf32>
    %157 = vector.extract_strided_slice %94 {offsets = [0, 1288], sizes = [16, 1], strides = [1, 1]} : vector<16x2048xf32> to vector<16x1xf32>
    %158 = vector.extract_strided_slice %94 {offsets = [0, 1292], sizes = [16, 1], strides = [1, 1]} : vector<16x2048xf32> to vector<16x1xf32>
    %159 = vector.extract_strided_slice %94 {offsets = [0, 1296], sizes = [16, 1], strides = [1, 1]} : vector<16x2048xf32> to vector<16x1xf32>
    %160 = vector.extract_strided_slice %94 {offsets = [0, 1408], sizes = [16, 1], strides = [1, 1]} : vector<16x2048xf32> to vector<16x1xf32>
    %161 = vector.extract_strided_slice %94 {offsets = [0, 1412], sizes = [16, 1], strides = [1, 1]} : vector<16x2048xf32> to vector<16x1xf32>
    %162 = vector.extract_strided_slice %94 {offsets = [0, 1416], sizes = [16, 1], strides = [1, 1]} : vector<16x2048xf32> to vector<16x1xf32>
    %163 = vector.extract_strided_slice %94 {offsets = [0, 1420], sizes = [16, 1], strides = [1, 1]} : vector<16x2048xf32> to vector<16x1xf32>
    %164 = vector.extract_strided_slice %94 {offsets = [0, 1424], sizes = [16, 1], strides = [1, 1]} : vector<16x2048xf32> to vector<16x1xf32>
    %165 = vector.extract_strided_slice %94 {offsets = [0, 1536], sizes = [16, 1], strides = [1, 1]} : vector<16x2048xf32> to vector<16x1xf32>
    %166 = vector.extract_strided_slice %94 {offsets = [0, 1540], sizes = [16, 1], strides = [1, 1]} : vector<16x2048xf32> to vector<16x1xf32>
    %167 = vector.extract_strided_slice %94 {offsets = [0, 1544], sizes = [16, 1], strides = [1, 1]} : vector<16x2048xf32> to vector<16x1xf32>
    %168 = vector.extract_strided_slice %94 {offsets = [0, 1548], sizes = [16, 1], strides = [1, 1]} : vector<16x2048xf32> to vector<16x1xf32>
    %169 = vector.extract_strided_slice %94 {offsets = [0, 1552], sizes = [16, 1], strides = [1, 1]} : vector<16x2048xf32> to vector<16x1xf32>
    %170 = tpu.concatenate %145, %146, %147, %148, %149, %150, %151, %152, %153, %154, %155, %156, %157, %158, %159, %160 in 0 : vector<16x1xf32>, vector<16x1xf32>, vector<16x1xf32>, vector<16x1xf32>, vector<16x1xf32>, vector<16x1xf32>, vector<16x1xf32>, vector<16x1xf32>, vector<16x1xf32>, vector<16x1xf32>, vector<16x1xf32>, vector<16x1xf32>, vector<16x1xf32>, vector<16x1xf32>, vector<16x1xf32>, vector<16x1xf32> -> vector<256x1xf32>
    %171 = tpu.concatenate %161, %162, %163, %164, %165, %166, %167, %168, %169 in 0 : vector<16x1xf32>, vector<16x1xf32>, vector<16x1xf32>, vector<16x1xf32>, vector<16x1xf32>, vector<16x1xf32>, vector<16x1xf32>, vector<16x1xf32>, vector<16x1xf32> -> vector<144x1xf32>
    %172 = tpu.concatenate %170, %171 in 0 : vector<256x1xf32>, vector<144x1xf32> -> vector<400x1xf32>
    %173 = arith.truncf %172 : vector<400x1xf32> to vector<400x1xbf16>
    %cst_34 = arith.constant dense<0.000000e+00> : vector<128x1xf32>
    %174 = tpu.matmul %95, %173, %cst_34 {dimension_numbers = #tpu.dot_dimension_numbers<[1], [0], [0], [1], [0, 0, 1, 1], [], []>} : vector<128x400xbf16>, vector<400x1xbf16>, vector<128x1xf32> -> vector<128x1xf32>
    %c0_35 = arith.constant 0 : index
    %c2_36 = arith.constant 2 : index
    %175 = vector.load %arg7[%c0_35, %c2_36] : memref<128x8xf32, #tpu.memory_space<vmem>>, vector<128x1xf32>
    %176 = arith.addf %174, %175 : vector<128x1xf32>
    %cst_37 = arith.constant 0.000000e+00 : f32
    %177 = vector.broadcast %cst_37 : f32 to vector<128x1xf32>
    %178 = arith.maximumf %176, %177 : vector<128x1xf32>
    %179 = arith.truncf %178 : vector<128x1xf32> to vector<128x1xbf16>
    %cst_38 = arith.constant dense<0.000000e+00> : vector<128x1xf32>
    %180 = tpu.matmul %96, %179, %cst_38 {dimension_numbers = #tpu.dot_dimension_numbers<[1], [0], [0], [1], [0, 0, 1, 1], [], []>} : vector<128x128xbf16>, vector<128x1xbf16>, vector<128x1xf32> -> vector<128x1xf32>
    %c0_39 = arith.constant 0 : index
    %c3_40 = arith.constant 3 : index
    %181 = vector.load %arg7[%c0_39, %c3_40] : memref<128x8xf32, #tpu.memory_space<vmem>>, vector<128x1xf32>
    %182 = arith.addf %180, %181 : vector<128x1xf32>
    %cst_41 = arith.constant 0.000000e+00 : f32
    %183 = vector.broadcast %cst_41 : f32 to vector<128x1xf32>
    %184 = arith.maximumf %182, %183 : vector<128x1xf32>
    %185 = arith.truncf %184 : vector<128x1xf32> to vector<128x1xbf16>
    %cst_42 = arith.constant dense<0.000000e+00> : vector<128x1xf32>
    %186 = tpu.matmul %97, %185, %cst_42 {dimension_numbers = #tpu.dot_dimension_numbers<[1], [0], [0], [1], [0, 0, 1, 1], [], []>} : vector<128x128xbf16>, vector<128x1xbf16>, vector<128x1xf32> -> vector<128x1xf32>
    %c0_43 = arith.constant 0 : index
    %c4_44 = arith.constant 4 : index
    %187 = vector.load %arg7[%c0_43, %c4_44] : memref<128x8xf32, #tpu.memory_space<vmem>>, vector<128x1xf32>
    %188 = arith.addf %186, %187 : vector<128x1xf32>
    %c1_45 = arith.constant 1 : index
    %c0_46 = arith.constant 0 : index
    %c0_47 = arith.constant 0 : index
    %189 = vector.load %arg8[%c1_45, %c0_46, %c0_47] : memref<2x128x1xf32, #tpu.memory_space<vmem>>, vector<1x128x1xf32>
    %190 = vector.shape_cast %189 : vector<1x128x1xf32> to vector<128x1xf32>
    %191 = vector.shape_cast %188 : vector<128x1xf32> to vector<1x128x1xf32>
    tpu.vector_store %arg8[%c1_45, %c0_46, %c0_47], %191 {strides = array<i32>} : memref<2x128x1xf32, #tpu.memory_space<vmem>>, vector<1x128x1xf32>,
    return
  }
  func.func @transform_0(%arg0: i32) -> (i32, i32) {
    %c0_i32 = arith.constant 0 : i32
    %c0_i32_0 = arith.constant 0 : i32
    %c0_i32_1 = arith.constant 0 : i32
    return %c0_i32, %c0_i32_0 : i32, i32
  }
  func.func @transform_1(%arg0: i32) -> (i32, i32) {
    %c0_i32 = arith.constant 0 : i32
    %c0_i32_0 = arith.constant 0 : i32
    %c0_i32_1 = arith.constant 0 : i32
    return %c0_i32, %c0_i32_0 : i32, i32
  }
  func.func @transform_2(%arg0: i32) -> (i32, i32) {
    %c0_i32 = arith.constant 0 : i32
    %c0_i32_0 = arith.constant 0 : i32
    %c0_i32_1 = arith.constant 0 : i32
    return %c0_i32, %c0_i32_0 : i32, i32
  }
  func.func @transform_3(%arg0: i32) -> (i32, i32) {
    %c0_i32 = arith.constant 0 : i32
    %c0_i32_0 = arith.constant 0 : i32
    %c0_i32_1 = arith.constant 0 : i32
    return %c0_i32, %c0_i32_0 : i32, i32
  }
  func.func @transform_4(%arg0: i32) -> (i32, i32) {
    %c0_i32 = arith.constant 0 : i32
    %c0_i32_0 = arith.constant 0 : i32
    %c0_i32_1 = arith.constant 0 : i32
    return %c0_i32, %c0_i32_0 : i32, i32
  }
  func.func @transform_5(%arg0: i32) -> (i32, i32) {
    %c0_i32 = arith.constant 0 : i32
    %c0_i32_0 = arith.constant 0 : i32
    %c0_i32_1 = arith.constant 0 : i32
    return %c0_i32, %c0_i32_0 : i32, i32
  }
  func.func @transform_6(%arg0: i32) -> (i32, i32) {
    %c0_i32 = arith.constant 0 : i32
    %c0_i32_0 = arith.constant 0 : i32
    %c0_i32_1 = arith.constant 0 : i32
    return %c0_i32, %c0_i32_0 : i32, i32
  }
  func.func @transform_7(%arg0: i32) -> (i32, i32, i32) {
    %c0_i32 = arith.constant 0 : i32
    %c0_i32_0 = arith.constant 0 : i32
    %c0_i32_1 = arith.constant 0 : i32
    %c0_i32_2 = arith.constant 0 : i32
    return %c0_i32, %c0_i32_0, %c0_i32_1 : i32, i32, i32
  }
}

</mosaic_0001>

<bundles_post_ra>
// kernel: lenet_forward.1
= control target key start
LH: loop header
LB: loop body
LE: loop exit
PB: predicated region body
PF: predicated region fallthrough
CT: control target
= control target key end

     0   :  { %s10512_s9 = smov 126   ;;  %s10513_s10 = smov 127   ;;  %vm94_vm0 = vcmask 1039360   ;;  %vm161_vm1 = vcmask 1031168   ;;  %vm18582_vm2 = vcmask 1022976   ;;  %vm18560_vm3 = vcmask 785408   ;;  %s18534_s0 = inlined_call_operand.vmem [shape: f32[8,2048], index: 0, kind: input, shape index: {}]   ;;  %s18535_s1 = inlined_call_operand.vmem [shape: bf16[128,200], index: 1, kind: input, shape index: {}]   ;;  %s18536_s6 = inlined_call_operand.vmem [shape: f32[128,8], index: 6, kind: input, shape index: {}]   ;;  %s18537_s2 = inlined_call_operand.vmem [shape: bf16[128,200], index: 2, kind: input, shape index: {}]   ;;  %s18538_s3 = inlined_call_operand.vmem [shape: bf16[128,400], index: 3, kind: input, shape index: {}]   ;;  %s18539_s4 = inlined_call_operand.vmem [shape: bf16[128,128], index: 4, kind: input, shape index: {}]   ;;  %s18540_s5 = inlined_call_operand.vmem [shape: bf16[128,128], index: 5, kind: input, shape index: {}]   ;;  %s18541_s7 = inlined_call_operand.vmem [shape: f32[2,128,1], index: 7, kind: output, shape index: {}]  }
   0x1   :  { %v10583_v0 = vld [vmem:[%s18534_s0 + $0x8] sm:$0xff]  ;;  %v10588_v1 = vld [vmem:[%s18534_s0 + $0x10] sm:$0xff]  ;;  %v10593_v2 = vld [vmem:[%s18534_s0] sm:$0xff]  ;;  %s10514_s11 = smov 125   ;;  %s10515_s14 = smov 96   ;;  %vm429_vm4 = vcmask 777216  }
   0x2   :  { %v8102_v3 = vpack.i.bf16 %v10588_v1, %v10583_v0  ;;  %v10600_v4 = vld [vmem:[%s18534_s0 + $0x18] sm:$0xff]  ;;  %v10613_v6 = vld [vmem:[%s18534_s0 + $0x20] sm:$0xff]  ;;  %s10516_s15 = smov 97   ;;  %s10517_s16 = smov 95   ;;  %v10638_v9 = vld [vmem:[%s18534_s0 + $0x28] sm:$0xff]  ;;  %vm496_vm5 = vcmask 769024  }
   0x3   :  { %v8107_v5 = vpack.i.bf16 %v10593_v2, %v10600_v4  ;;  %v8137_v7 = vpack.i.bf16 %v10613_v6, %v10600_v4  ;;  %s10518_s17 = smov 94   ;;  %s10519_s18 = smov 93   ;;  %v8177_v8 = vpack.i.bf16 %v10600_v4, %v10593_v2  ;;  %v10644_v10 = vpack.i.bf16 %v10638_v9, %v10613_v6  ;;  %v10662_v11 = vld [vmem:[%s18534_s0 + $0x30] sm:$0xff]  ;;  %v34_v13 = vld [vmem:[%s18534_s0 + $0x38] sm:$0xff]  ;;  %v10684_v15 = vld [vmem:[%s18534_s0 + $0x40] sm:$0xff] }
   0x4   :  { %8103 = vrot.lane.b32.xlu1 %v8102_v3, %s10512_s9  ;;  %8093 = vrot.lane.b32.xlu0 %v8102_v3, %s10513_s10  ;;  %s10520_s19 = smov 124   ;;  %s10521_s20 = smov 92   ;;  %v8272_v12 = vpack.i.bf16 %v10662_v11, %v10638_v9  ;;  %v10679_v14 = vpack.i.bf16 %v34_v13, %v10662_v11  ;;  %v8317_v16 = vpack.i.bf16 %v10684_v15, %v34_v13  ;;  %vm1097_vm6 = vcmask 793600  }
   0x5   :  { %s10522_s21 = smov 63   ;;  %s10523_s22 = smov 64   ;;  %vm18590_vm7 = vcmask 1014784   ;;  %vm18651_vm8 = vcmask 760832   ;;  %vm630_vm9 = vcmask 752640   ;;  %vm697_vm10 = vcmask 523264  }
   0x6   :  { %s10524_s25 = smov 62   ;;  %s10525_s26 = smov 61   ;;  %vm18595_vm11 = vcmask 515072   ;;  %vm2085_vm12 = vcmask 588800   ;;  %vm18543_vm13 = vcmask 506880   ;;  %vm898_vm14 = vcmask 498688  }
   0x7   :  { %s10526_s27 = smov 60   ;;  %s10527_s28 = smov 32   ;;  %vm965_vm15 = vcmask 490496  }
   0x8   :  { %8108 = vrot.lane.b32.xlu1 %v8107_v5, %s10512_s9  ;;  %8098 = vrot.lane.b32.xlu0 %v8107_v5, %s10513_s10  ;;  %s10528_s8 = smov 31  }
   0xc   :  { %8118 = vrot.lane.b32.xlu1 %v8107_v5, %s10514_s11  ;;  %8113 = vrot.lane.b32.xlu0 %v8102_v3, %s10514_s11 }
  0x10   :  { %8128 = vrot.lane.b32.xlu1 %v8107_v5, %s10515_s14  ;;  %8123 = vrot.lane.b32.xlu0 %v8102_v3, %s10515_s14 }
  0x14   :  { %8138 = vrot.lane.b32.xlu1 %v8137_v7, %s10516_s15  ;;  %8133 = vrot.lane.b32.xlu0 %v8102_v3, %s10516_s15 }
  0x18   :  { %8148 = vrot.lane.b32.xlu1 %v8107_v5, %s10517_s16  ;;  %8143 = vrot.lane.b32.xlu0 %v8102_v3, %s10517_s16 }
  0x1c   :  { %8158 = vrot.lane.b32.xlu1 %v8107_v5, %s10518_s17  ;;  %8153 = vrot.lane.b32.xlu0 %v8102_v3, %s10518_s17 }
  0x20   :  { %8168 = vrot.lane.b32.xlu1 %v8107_v5, %s10519_s18  ;;  %8163 = vrot.lane.b32.xlu0 %v8102_v3, %s10519_s18 }
  0x24   :  { %8178 = vrot.lane.b32.xlu1 %v8177_v8, %s10520_s19  ;;  %8173 = vrot.lane.b32.xlu0 %v8102_v3, %s10520_s19 }
  0x28   :  { %8188 = vrot.lane.b32.xlu1 %v8177_v8, %s10521_s20  ;;  %8183 = vrot.lane.b32.xlu0 %v8102_v3, %s10521_s20 }
  0x2c   :  { %8198 = vrot.lane.b32.xlu1 %v8102_v3, %s10522_s21  ;;  %8193 = vrot.lane.b32.xlu0 %v8102_v3, %s10523_s22 }
  0x30   :  { %8208 = vrot.lane.b32.xlu1 %v8177_v8, %s10522_s21  ;;  %8203 = vrot.lane.b32.xlu0 %v8177_v8, %s10523_s22 }
  0x34   :  { %8218 = vrot.lane.b32.xlu1 %v8102_v3, %s10524_s25  ;;  %8213 = vrot.lane.b32.xlu0 %v10644_v10, %s10513_s10 }
  0x38   :  { %8228 = vrot.lane.b32.xlu1 %v8177_v8, %s10524_s25  ;;  %8223 = vrot.lane.b32.xlu0 %v8102_v3, %s10525_s26 }
  0x3c   :  { %8238 = vrot.lane.b32.xlu1 %v10644_v10, %s10512_s9  ;;  %8233 = vrot.lane.b32.xlu0 %v8177_v8, %s10525_s26 }
  0x40   :  { %8248 = vrot.lane.b32.xlu1 %v8102_v3, %s10526_s27  ;;  %8243 = vrot.lane.b32.xlu0 %v10644_v10, %s10514_s11 }
  0x44   :  { %8258 = vrot.lane.b32.xlu1 %v8177_v8, %s10526_s27  ;;  %8253 = vrot.lane.b32.xlu0 %v8102_v3, %s10527_s28 }
  0x48   :  { %8268 = vrot.lane.b32.xlu1 %v10644_v10, %s10515_s14  ;;  %8263 = vrot.lane.b32.xlu0 %v8177_v8, %s10527_s28 }
  0x4c   :  { %8278 = vrot.lane.b32.xlu1 %v8102_v3, %s10528_s8  ;;  %8273 = vrot.lane.b32.xlu0 %v8272_v12, %s10516_s15 }
  0x50   :  { %8288 = vrot.lane.b32.xlu1 %v10644_v10, %s10518_s17  ;;  %8283 = vrot.lane.b32.xlu0 %v10644_v10, %s10517_s16 }
  0x54   :  { %8293 = vrot.lane.b32.xlu0 %v10679_v14, %s10513_s10  ;;  %8303 = vrot.lane.b32.xlu1 %v10679_v14, %s10512_s9 }
  0x58   :  { %8298 = vrot.lane.b32.xlu0 %v10644_v10, %s10519_s18  ;;  %8318 = vrot.lane.b32.xlu1 %v8317_v16, %s10516_s15 }
  0x5c   :  { %8308 = vrot.lane.b32.xlu0 %v10679_v14, %s10514_s11  ;;  %8323 = vrot.lane.b32.xlu1 %v10679_v14, %s10517_s16 }
  0x60   :  { %8313 = vrot.lane.b32.xlu0 %v10679_v14, %s10515_s14 }
  0x76   :  { %v10700_v17 = vpop.permute.xlu1 %8103  ;;  %v8094_v18 = vpop.permute.xlu0 %8093 }
  0x77   :  { %v8096_v19 = vunpack.i.h.bf16 %v8094_v18  ;;  %v8095_v20 = vunpack.i.l.bf16 %v8094_v18  ;;  %v8106_v22 = vunpack.i.h.bf16 %v10700_v17  ;;  %v8105_v23 = vunpack.i.l.bf16 %v10700_v17 }
  0x79   :  { %v10703_v21 = vsel %vm94_vm0, %v8095_v20, %v8096_v19  ;;  %v10722_v33 = vsel %vm161_vm1, %v8105_v23, %v8106_v22 }
  0x7a   :  { %v10707_v24 = vpop.permute.xlu1 %8108  ;;  %v10709_v25 = vpop.permute.xlu0 %8098  ;;  %v1709_v26 = vpack.c.bf16 %v10703_v21, %v10583_v0 }
  0x7b   :  { %v8111_v27 = vunpack.i.h.bf16 %v10707_v24  ;;  %v8101_v28 = vunpack.i.h.bf16 %v10709_v25  ;;  %v8100_v52 = vunpack.i.l.bf16 %v10709_v25  ;;  %v8110_v57 = vunpack.i.l.bf16 %v10707_v24 }
  0x7c   :  { %2159 = vmatprep.subr.bf16.mxu0 %v1709_v26 }
  0x7d   :  { %v95_v29 = vsel %vm94_vm0, %v8101_v28, %v8095_v20  ;;  %v10726_v37 = vsel %vm161_vm1, %v8111_v27, %v8105_v23  ;;  %v10769_v3 = vsel %vm94_vm0, %v8096_v19, %v8100_v52  ;;  %v10801_v28 = vsel %vm161_vm1, %v8106_v22, %v8110_v57 }
  0x7e   :  { %v10716_v30 = vpop.permute.xlu1 %8118  ;;  %v8114_v31 = vpop.permute.xlu0 %8113  ;;  %v1708_v32 = vpack.c.bf16 %v95_v29, %v10593_v2  ;;  %v8342_v53 = vpack.i.bf16 %v95_v29, %v10593_v2  ;;  %v8337_v29 = vpack.i.bf16 %v10769_v3, %v10703_v21 }
  0x7f   :  { %v8121_v34 = vunpack.i.h.bf16 %v10716_v30  ;;  %v8116_v35 = vunpack.i.h.bf16 %v8114_v31  ;;  %v8115_v36 = vunpack.i.l.bf16 %v8114_v31  ;;  %v8120_v48 = vunpack.i.l.bf16 %v10716_v30 }
  0x80   :  { %2160 = vmatpush1.bf16.msra.mxu0 %v1708_v32 }
  0x81   :  { %v230_v38 = vsel %vm18582_vm2, %v8115_v36, %v8116_v35  ;;  %v10730_v39 = vsel %vm18582_vm2, %v8121_v34, %v8115_v36  ;;  %v10755_v56 = vsel %vm18582_vm2, %v8116_v35, %v8120_v48  ;;  %v8347_v34 = vpack.i.bf16 %v10801_v28, %v10722_v33 }
  0x82   :  { %v10732_v40 = vpop.permute.xlu1 %8128  ;;  %v10734_v41 = vpop.permute.xlu0 %8123  ;;  %v1725_v42 = vpack.c.bf16 %v230_v38, %v10722_v33  ;;  %v1724_v43 = vpack.c.bf16 %v10730_v39, %v10726_v37  ;;  %v8352_v7 = vpack.i.bf16 %v10755_v56, %v230_v38  ;;  %v8357_v32 = vpack.i.bf16 %v10730_v39, %v10726_v37 }
  0x83   :  { %v8125_v46 = vunpack.i.l.bf16 %v10734_v41  ;;  %v8131_v5 = vunpack.i.h.bf16 %v10732_v40  ;;  %v8126_v8 = vunpack.i.h.bf16 %v10734_v41  ;;  %v8130_v18 = vunpack.i.l.bf16 %v10732_v40 }
  0x84   :  { %2161 = vmatprep.subr.bf16.mxu0 %v1725_v42 }
  0x85   :  { %2162 = vmatpush1.bf16.msra.mxu0 %v1724_v43  ;;  %v364_v17 = vsel %vm18560_vm3, %v8125_v46, %v8126_v8  ;;  %v363_v22 = vsel %vm18560_vm3, %v8131_v5, %v8125_v46  ;;  %v10821_v37 = vsel %vm18560_vm3, %v8126_v8, %v8130_v18 }
  0x86   :  { %v10739_v44 = vpop.permute.xlu1 %8138  ;;  %v8134_v45 = vpop.permute.xlu0 %8133 }
  0x87   :  { %v8135_v47 = vunpack.i.l.bf16 %v8134_v45  ;;  %v8140_v58 = vunpack.i.l.bf16 %v10739_v44  ;;  %v8136_v59 = vunpack.i.h.bf16 %v8134_v45 }
  0x89   :  { %v8327_v49 = vpack.i.bf16 %v8125_v46, %v8135_v47  ;;  %v1098_v26 = vsel %vm1097_vm6, %v8135_v47, %v8136_v59  ;;  %v1099_v27 = vsel %vm1097_vm6, %v8136_v59, %v8140_v58 }
  0x8a   :  { %v10743_v50 = vpop.permute.xlu1 %8148  ;;  %v10745_v51 = vpop.permute.xlu0 %8143  ;;  %v8362_v43 = vpack.i.bf16 %v1099_v27, %v1098_v26 }
  0x8b   :  { %8328 = vrot.lane.b32.xlu1 %v8327_v49, %s10528_s8  ;;  %v8150_v54 = vunpack.i.l.bf16 %v10743_v50  ;;  %v8146_v55 = vunpack.i.h.bf16 %v10745_v51  ;;  %v10762_v62 = vunpack.i.l.bf16 %v10745_v51  ;;  %v8151_v38 = vunpack.i.h.bf16 %v10743_v50 }
  0x8d   :  { %v10783_v16 = vsel %vm429_vm4, %v8146_v55, %v8150_v54  ;;  %v431_v49 = vsel %vm429_vm4, %v10762_v62, %v8146_v55 }
  0x8e   :  { %v10759_v60 = vpop.permute.xlu1 %8158  ;;  %v8154_v61 = vpop.permute.xlu0 %8153 }
  0x8f   :  { %v8160_v63 = vunpack.i.l.bf16 %v10759_v60  ;;  %v8156_v0 = vunpack.i.h.bf16 %v8154_v61  ;;  %v8155_v2 = vunpack.i.l.bf16 %v8154_v61  ;;  %8343 = vrot.lane.b32.xlu1 %v8342_v53, %s10528_s8  ;;  %v8161_v31 = vunpack.i.h.bf16 %v10759_v60 }
  0x91   :  { %v8332_v12 = vpack.i.bf16 %v8155_v2, %v10762_v62  ;;  %v10778_v13 = vsel %vm496_vm5, %v8156_v0, %v8160_v63  ;;  %v498_v51 = vsel %vm496_vm5, %v8155_v2, %v8156_v0  ;;  %v497_v53 = vsel %vm496_vm5, %v8161_v31, %v8155_v2 }
  0x92   :  { %v10786_v19 = vpop.permute.xlu1 %8168  ;;  %v8164_v20 = vpop.permute.xlu0 %8163 }
  0x93   :  { %8333 = vrot.lane.b32.xlu0 %v8332_v12, %s10528_s8  ;;  %8353 = vrot.lane.b32.xlu1 %v8352_v7, %s10528_s8  ;;  %v8166_v35 = vunpack.i.h.bf16 %v8164_v20  ;;  %v10810_v36 = vunpack.i.l.bf16 %v8164_v20  ;;  %v8170_v41 = vunpack.i.l.bf16 %v10786_v19  ;;  %v8171_v47 = vunpack.i.h.bf16 %v10786_v19 }
  0x95   :  { %v565_v5 = vsel %vm18651_vm8, %v10810_v36, %v8166_v35  ;;  %v10846_v0 = vsel %vm18651_vm8, %v8166_v35, %v8170_v41  ;;  %v8367_v35 = vpack.i.bf16 %v10821_v37, %v364_v17 }
  0x96   :  { %v10816_v21 = vpop.permute.xlu1 %8178  ;;  %v8174_v42 = vpop.permute.xlu0 %8173 }
  0x97   :  { %v18552_v33 = vunpack.i.h.bf16 %v10816_v21  ;;  %v8180_v39 = vunpack.i.l.bf16 %v10816_v21  ;;  %v8176_v45 = vunpack.i.h.bf16 %v8174_v42  ;;  %v8175_v46 = vunpack.i.l.bf16 %v8174_v42  ;;  %8358 = vrot.lane.b32.xlu1 %v8357_v32, %s10528_s8  ;;  %8338 = vrot.lane.b32.xlu0 %v8337_v29, %s10528_s8 }
  0x98   :  { %v1757_v32 = vpack.c.bf16 %v498_v51, %v431_v49  ;;  %v430_v42 = vsel %vm429_vm4, %v8151_v38, %v10762_v62 }
  0x99   :  { %v297_v59 = vsel %vm18590_vm7, %v8175_v46, %v8176_v45  ;;  %v296_v61 = vsel %vm18590_vm7, %v8180_v39, %v8175_v46  ;;  %v10839_v7 = vsel %vm18590_vm7, %v8176_v45, %v18552_v33  ;;  %v1756_v39 = vpack.c.bf16 %v497_v53, %v430_v42 }
  0x9a   :  { %v10841_v8 = vpop.permute.xlu1 %8188  ;;  %v8184_v12 = vpop.permute.xlu0 %8183  ;;  %v1741_v55 = vpack.c.bf16 %v364_v17, %v297_v59  ;;  %v1740_v20 = vpack.c.bf16 %v363_v22, %v296_v61  ;;  %v8377_v22 = vpack.i.bf16 %v10778_v13, %v498_v51  ;;  %v564_v46 = vsel %vm18651_vm8, %v8171_v47, %v10810_v36 }
  0x9b   :  { %v18547_v26 = vunpack.i.h.bf16 %v10841_v8  ;;  %v8190_v27 = vunpack.i.l.bf16 %v10841_v8  ;;  %v8186_v29 = vunpack.i.h.bf16 %v8184_v12  ;;  %v8185_v31 = vunpack.i.l.bf16 %v8184_v12  ;;  %8363 = vrot.lane.b32.xlu1 %v8362_v43, %s10528_s8  ;;  %8348 = vrot.lane.b32.xlu0 %v8347_v34, %s10528_s8 }
  0x9c   :  { %2163 = vmatprep.subr.bf16.mxu0 %v1741_v55  ;;  %v8382_v17 = vpack.i.bf16 %v565_v5, %v10810_v36  ;;  %v8372_v55 = vpack.i.bf16 %v10783_v16, %v431_v49 }
  0x9d   :  { %2164 = vmatpush1.bf16.msra.mxu0 %v1740_v20  ;;  %v632_v45 = vsel %vm630_vm9, %v8185_v31, %v8186_v29  ;;  %v10864_v34 = vsel %vm630_vm9, %v8186_v29, %v18547_v26  ;;  %v631_v62 = vsel %vm630_vm9, %v8190_v27, %v8185_v31  ;;  %v8387_v31 = vpack.i.bf16 %v10600_v4, %v10846_v0 }
  0x9e   :  { %v8199_v43 = vpop.permute.xlu1 %8198  ;;  %v8194_v59 = vpop.permute.xlu0 %8193  ;;  %2165 = vmatprep.subr.bf16.mxu0 %v1757_v32  ;;  %v1773_v51 = vpack.c.bf16 %v632_v45, %v565_v5  ;;  %v1772_v20 = vpack.c.bf16 %v631_v62, %v564_v46 }
  0x9f   :  { %v8201_v53 = vunpack.i.h.bf16 %v8199_v43  ;;  %v8200_v61 = vunpack.i.l.bf16 %v8199_v43  ;;  %v8196_v12 = vunpack.i.h.bf16 %v8194_v59  ;;  %v8195_v47 = vunpack.i.l.bf16 %v8194_v59  ;;  %8378 = vrot.lane.b32.xlu1 %v8377_v22, %s10528_s8  ;;  %8368 = vrot.lane.b32.xlu0 %v8367_v35, %s10528_s8 }
  0xa1   :  { %2166 = vmatpush1.bf16.msra.mxu0 %v1756_v39  ;;  %v699_v36 = vsel %vm697_vm10, %v8195_v47, %v8196_v12  ;;  %v766_v5 = vsel %vm18595_vm11, %v8200_v61, %v8201_v53  ;;  %v10275_v39 = vld [vmem:[%s18535_s1 + $0x4] ss:$8 sps:$4 sm:$0xff]  }
  0xa2   :  { %v10875_v27 = vpop.permute.xlu1 %8208  ;;  %v10877_v29 = vpop.permute.xlu0 %8203  ;;  %2167 = vmatprep.subr.bf16.mxu0 %v1773_v51  ;;  %v1789_v32 = vpack.c.bf16 %v766_v5, %v699_v36  ;;  %7505 = vmatprep.mubr.msk.bf16.mxu0 %vm2085_vm12, %v10275_v39 }
  0xa3   :  { %v18545_v22 = vunpack.i.h.bf16 %v10875_v27  ;;  %v8210_v35 = vunpack.i.l.bf16 %v10875_v27  ;;  %v18546_v49 = vunpack.i.h.bf16 %v10877_v29  ;;  %v8205_v42 = vunpack.i.l.bf16 %v10877_v29  ;;  %8383 = vrot.lane.b32.xlu1 %v8382_v17, %s10528_s8  ;;  %8373 = vrot.lane.b32.xlu0 %v8372_v55, %s10528_s8 }
  0xa4   :  { %7514 = vmatprep.mubr.msk.bf16.mxu1 %vm2085_vm12, %v10275_v39 }
  0xa5   :  { %2168 = vmatpush1.bf16.msra.mxu0 %v1772_v20  ;;  %v698_v45 = vsel %vm697_vm10, %v8205_v42, %v8195_v47  ;;  %v765_v46 = vsel %vm18595_vm11, %v8210_v35, %v8200_v61  ;;  %v10895_v43 = vsel %vm697_vm10, %v8196_v12, %v18546_v49  ;;  %v10900_v59 = vsel %vm18595_vm11, %v8201_v53, %v18545_v22 }
  0xa6   :  { %v8219_v17 = vpop.permute.xlu1 %8218  ;;  %v10902_v51 = vpop.permute.xlu0 %8213  ;;  %2169 = vmatprep.subr.bf16.mxu0 %v1789_v32  ;;  %v1788_v62 = vpack.c.bf16 %v765_v46, %v698_v45 }
  0xa7   :  { %v8221_v47 = vunpack.i.h.bf16 %v8219_v17  ;;  %v8220_v55 = vunpack.i.l.bf16 %v8219_v17  ;;  %v8215_v12 = vunpack.i.l.bf16 %v10902_v51  ;;  %8398 = vrot.lane.b32.xlu1 %v10679_v14, %s10519_s18  ;;  %8388 = vrot.lane.b32.xlu0 %v8387_v31, %s10528_s8  ;;  %v1710_v31 = vpack.c.bf16 %v10769_v3, %v10588_v1 }
  0xa9   :  { %v10917_v53 = vsel %vm94_vm0, %v8100_v52, %v8215_v12  ;;  %2170 = vmatpush1.bf16.msra.mxu0 %v1788_v62  ;;  %v833_v32 = vsel %vm18543_vm13, %v8220_v55, %v8221_v47 }
  0xaa   :  { %v10919_v20 = vpop.permute.xlu1 %8228  ;;  %v8224_v36 = vpop.permute.xlu0 %8223  ;;  %v1711_v5 = vpack.c.bf16 %v10917_v53, %v10600_v4 }
  0xab   :  { %v18542_v35 = vunpack.i.h.bf16 %v10919_v20  ;;  %v8230_v25 = vunpack.i.l.bf16 %v10919_v20  ;;  %v8226_v42 = vunpack.i.h.bf16 %v8224_v36  ;;  %v8225_v52 = vunpack.i.l.bf16 %v8224_v36  ;;  %8408 = vrot.lane.b32.xlu1 %v10644_v10, %s10521_s20  ;;  %8393 = vrot.lane.b32.xlu0 %v10679_v14, %s10518_s17 }
  0xac   :  { %2242 = vmatprep.subr.bf16.mxu1 %v1711_v5 }
  0xad   :  { %2243 = vmatpush1.bf16.msra.mxu1 %v1710_v31  ;;  %v900_v4 = vsel %vm898_vm14, %v8225_v52, %v8226_v42  ;;  %v832_v17 = vsel %vm18543_vm13, %v8230_v25, %v8220_v55  ;;  %v10947_v62 = vsel %vm18543_vm13, %v8221_v47, %v18542_v35  ;;  %vm1032_vm13 = vcmask 261120  }
  0xae   :  { %v10933_v1 = vpop.permute.xlu1 %8238  ;;  %v10935_v3 = vpop.permute.xlu0 %8233  ;;  %v1805_v39 = vpack.c.bf16 %v900_v4, %v833_v32 }
  0xaf   :  { %v18544_v45 = vunpack.i.h.bf16 %v10935_v3  ;;  %v8235_v46 = vunpack.i.l.bf16 %v10935_v3  ;;  %8418 = vrot.lane.b32.xlu1 %v10644_v10, %s10522_s21  ;;  %8403 = vrot.lane.b32.xlu0 %v10644_v10, %s10520_s19  ;;  %v8241_v36 = vunpack.i.h.bf16 %v10933_v1  ;;  %v8240_v5 = vunpack.i.l.bf16 %v10933_v1 }
  0xb0   :  { %2171 = vmatprep.subr.bf16.mxu0 %v1805_v39 }
  0xb1   :  { %v899_v31 = vsel %vm898_vm14, %v8235_v46, %v8225_v52  ;;  %v10955_v32 = vsel %vm898_vm14, %v8226_v42, %v18544_v45  ;;  %v1726_v42 = vpack.c.bf16 %v10755_v56, %v10801_v28  ;;  %v165_v52 = vsel %vm161_vm1, %v8110_v57, %v8240_v5 }
  0xb2   :  { %v8249_v4 = vpop.permute.xlu1 %8248  ;;  %v10957_v61 = vpop.permute.xlu0 %8243  ;;  %v1804_v55 = vpack.c.bf16 %v899_v31, %v832_v17  ;;  %v10985_v56 = vsel %vm161_vm1, %v8240_v5, %v8241_v36  ;;  %v8216_v28 = vunpack.i.h.bf16 %v10902_v51 }
  0xb3   :  { %v8251_v25 = vunpack.i.h.bf16 %v8249_v4  ;;  %v8250_v39 = vunpack.i.l.bf16 %v8249_v4  ;;  %v18556_v35 = vunpack.i.h.bf16 %v10957_v61  ;;  %v8245_v38 = vunpack.i.l.bf16 %v10957_v61  ;;  %8428 = vrot.lane.b32.xlu1 %v10644_v10, %s10524_s25  ;;  %8413 = vrot.lane.b32.xlu0 %v10644_v10, %s10523_s22 }
  0xb4   :  { %2172 = vmatpush1.bf16.msra.mxu0 %v1804_v55 }
  0xb5   :  { %v10975_v46 = vsel %vm18582_vm2, %v8120_v48, %v8245_v38  ;;  %v10980_v17 = vsel %vm18582_vm2, %v8245_v38, %v18556_v35  ;;  %v967_v31 = vsel %vm965_vm15, %v8250_v39, %v8251_v25  ;;  %v8141_v48 = vunpack.i.h.bf16 %v10739_v44 }
  0xb6   :  { %v10988_v24 = vpop.permute.xlu1 %8258  ;;  %v8254_v57 = vpop.permute.xlu0 %8253  ;;  %v1727_v30 = vpack.c.bf16 %v10975_v46, %v165_v52 }
  0xb7   :  { %v18548_v38 = vunpack.i.h.bf16 %v10988_v24  ;;  %v8260_v4 = vunpack.i.l.bf16 %v10988_v24  ;;  %v8256_v55 = vunpack.i.h.bf16 %v8254_v57  ;;  %v8255_v47 = vunpack.i.l.bf16 %v8254_v57  ;;  %8438 = vrot.lane.b32.xlu1 %v10644_v10, %s10526_s27  ;;  %8423 = vrot.lane.b32.xlu0 %v10679_v14, %s10520_s19 }
  0xb8   :  { %2244 = vmatprep.subr.bf16.mxu1 %v1727_v30  ;;  %v11010_v57 = vsel %vm94_vm0, %v8215_v12, %v8216_v28 }
  0xb9   :  { %2245 = vmatpush1.bf16.msra.mxu1 %v1726_v42  ;;  %v1034_v5 = vsel %vm1032_vm13, %v8255_v47, %v8256_v55  ;;  %v966_v42 = vsel %vm965_vm15, %v8260_v4, %v8250_v39  ;;  %v11022_v30 = vsel %vm965_vm15, %v8251_v25, %v18548_v38  ;;  %v8457_v12 = vpack.i.bf16 %v165_v52, %v11010_v57 }
  0xba   :  { %v11001_v45 = vpop.permute.xlu1 %8268  ;;  %v11003_v22 = vpop.permute.xlu0 %8263  ;;  %v1821_v49 = vpack.c.bf16 %v1034_v5, %v967_v31  ;;  %18955 = vst [vmem:[#allocation2_spill] sm:$0xff] %v11022_v30  ;;  %v1100_v52 = vsel %vm1097_vm6, %v8140_v58, %v8141_v48 }
  0xbb   :  { %v18549_v23 = vunpack.i.h.bf16 %v11003_v22  ;;  %v8265_v26 = vunpack.i.l.bf16 %v11003_v22  ;;  %8448 = vrot.lane.b32.xlu1 %v10679_v14, %s10521_s20  ;;  %8433 = vrot.lane.b32.xlu0 %v10644_v10, %s10525_s26  ;;  %v8270_v60 = vunpack.i.l.bf16 %v11001_v45 }
  0xbc   :  { %2173 = vmatprep.subr.bf16.mxu0 %v1821_v49 }
  0xbd   :  { %v1033_v31 = vsel %vm1032_vm13, %v8265_v26, %v8255_v47  ;;  %v11029_v5 = vsel %vm1032_vm13, %v8256_v55, %v18549_v23  ;;  %v8452_v26 = vpack.i.bf16 %v10917_v53, %v10613_v6  ;;  %v8477_v6 = vpack.i.bf16 %v1100_v52, %v10980_v17 }
  0xbe   :  { %18956 = vst [vmem:[#allocation3_spill] sm:$0xff] %v11029_v5  ;;  %v11032_v2 = vpop.permute.xlu1 %8278  ;;  %v11034_v39 = vpop.permute.xlu0 %8273  ;;  %v1820_v4 = vpack.c.bf16 %v1033_v31, %v966_v42  ;;  %v8472_v52 = vpack.i.bf16 %v10975_v46, %v10985_v56  ;;  %v11111_v38 = vsel %vm18560_vm3, %v8130_v18, %v8270_v60 }
  0xbf   :  { %18957 = vst [vmem:[#allocation4_spill] sm:$0xff] %v11032_v2  ;;  %8458 = vrot.lane.b32.xlu1 %v8457_v12, %s10528_s8  ;;  %8443 = vrot.lane.b32.xlu0 %v10644_v10, %s10527_s28  ;;  %v8275_v50 = vunpack.i.l.bf16 %v11034_v39  ;;  %v8276_v35 = vunpack.i.h.bf16 %v11034_v39 }
  0xc0   :  { %2174 = vmatpush1.bf16.msra.mxu0 %v1820_v4 }
  0xc1   :  { %v1102_v1 = vsel %vm1097_vm6, %v8275_v50, %v8276_v35 }
  0xc2   :  { %v11043_v49 = vpop.permute.xlu1 %8288  ;;  %v11045_v47 = vpop.permute.xlu0 %8283 }
  0xc3   :  { %v18553_v55 = vunpack.i.h.bf16 %v11043_v49  ;;  %v8290_v42 = vunpack.i.l.bf16 %v11043_v49  ;;  %v18555_v12 = vunpack.i.h.bf16 %v11045_v47  ;;  %v8285_v10 = vunpack.i.l.bf16 %v11045_v47  ;;  %8468 = vrot.lane.b32.xlu1 %v10679_v14, %s10522_s21  ;;  %8453 = vrot.lane.b32.xlu0 %v8452_v26, %s10528_s8 }
  0xc5   :  { %v11061_v44 = vsel %vm429_vm4, %v8150_v54, %v8285_v10  ;;  %v11066_v58 = vsel %vm429_vm4, %v8285_v10, %v18555_v12  ;;  %v11071_v53 = vsel %vm496_vm5, %v8160_v63, %v8290_v42  ;;  %v11076_v31 = vsel %vm496_vm5, %v8290_v42, %v18553_v55  ;;  %v11090_v63 = vld [vmem:[%s18534_s0 + $0x48] sm:$0xff]  ;;  %v37_v55 = vld [vmem:[%s18534_s0 + $0x50] sm:$0xff] }
  0xc6   :  { %v11079_v4 = vpop.permute.xlu0 %8293  ;;  %v1101_v10 = vsel %vm1097_vm6, %v8141_v48, %v8275_v50  ;;  %v11106_v25 = vpack.i.bf16 %v11090_v63, %v10684_v15  ;;  %v18554_v54 = vunpack.i.h.bf16 %v11001_v45 }
  0xc7   :  { %18958 = vst [vmem:[#allocation5_spill] sm:$0xff] %v11079_v4  ;;  %8478 = vrot.lane.b32.xlu1 %v8477_v6, %s10528_s8  ;;  %8463 = vrot.lane.b32.xlu0 %v10679_v14, %s10523_s22  ;;  %v11099_v6 = vpop.permute.xlu1 %8303  ;;  %v8497_v46 = vpack.i.bf16 %v11111_v38, %v1101_v10 }
  0xc8   :  { %18959 = vst [vmem:[#allocation6_spill] sm:$0xff] %v11099_v6  ;;  %v18551_v48 = vunpack.i.h.bf16 %v11099_v6  ;;  %v8305_v23 = vunpack.i.l.bf16 %v11099_v6  ;;  %v11137_v10 = vsel %vm18560_vm3, %v8270_v60, %v18554_v54  ;;  %v8527_v60 = vpack.i.bf16 %v11071_v53, %v11066_v58 }
  0xca   :  { %v11096_v42 = vpop.permute.xlu0 %8298 }
  0xcb   :  { %8488 = vrot.lane.b32.xlu1 %v10679_v14, %s10524_s25  ;;  %8473 = vrot.lane.b32.xlu0 %v8472_v52, %s10528_s8  ;;  %v11132_v52 = vsel %vm161_vm1, %v8305_v23, %v18551_v48  ;;  %v8295_v48 = vunpack.i.l.bf16 %v11079_v4  ;;  %v11188_v12 = vpop.permute.xlu1 %8318 }
  0xcc   :  { %18962 = vst [vmem:[#allocation9_spill] sm:$0xff] %v11132_v52  ;;  %18963 = vst [vmem:[#allocation10_spill] sm:$0xff] %v11188_v12 }
  0xcd   :  { %v11160_v33 = vsel %vm94_vm0, %v8216_v28, %v8295_v48  ;;  %v18557_v28 = vunpack.i.h.bf16 %v11079_v4 }
  0xce   :  { %v11117_v26 = vpop.permute.xlu0 %8308  ;;  %v8547_v51 = vpack.i.bf16 %v11160_v33, %v10662_v11 }
  0xcf   :  { %18960 = vst [vmem:[#allocation7_spill] sm:$0xff] %v11117_v26  ;;  %8498 = vrot.lane.b32.xlu1 %v8497_v46, %s10528_s8  ;;  %8483 = vrot.lane.b32.xlu0 %v11106_v25, %s10513_s10  ;;  %v18550_v15 = vunpack.i.h.bf16 %v11117_v26  ;;  %v8310_v40 = vunpack.i.l.bf16 %v11117_v26  ;;  %v18561_v46 = vunpack.i.h.bf16 %v11096_v42 }
  0xd1   :  { %v11127_v18 = vsel %vm18582_vm2, %v8310_v40, %v18550_v15  ;;  %v8502_v15 = vpack.i.bf16 %v11061_v44, %v11137_v10 }
  0xd2   :  { %18961 = vst [vmem:[#allocation8_spill] sm:$0xff] %v11127_v18  ;;  %v11213_v19 = vpop.permute.xlu0 %8313 }
  0xd3   :  { %8508 = vrot.lane.b32.xlu1 %v11106_v25, %s10512_s9  ;;  %8493 = vrot.lane.b32.xlu0 %v10679_v14, %s10525_s26  ;;  %18966 = vst [vmem:[#allocation13_spill] sm:$0xff] %v11213_v19  ;;  %v18558_v39 = vunpack.i.h.bf16 %v11213_v19  ;;  %v8315_v50 = vunpack.i.l.bf16 %v11213_v19 }
  0xd7   :  { %8518 = vrot.lane.b32.xlu1 %v10679_v14, %s10526_s27  ;;  %8503 = vrot.lane.b32.xlu0 %v8502_v15, %s10528_s8  ;;  %v8532_v15 = vpack.i.bf16 %v10638_v9, %v11076_v31  ;;  %v8542_v9 = vpack.i.bf16 %v37_v55, %v11090_v63 }
  0xdb   :  { %8528 = vrot.lane.b32.xlu1 %v8527_v60, %s10528_s8  ;;  %8513 = vrot.lane.b32.xlu0 %v11106_v25, %s10514_s11  ;;  %v8300_v60 = vunpack.i.l.bf16 %v11096_v42 }
  0xdd   :  { %v11178_v54 = vsel %vm18651_vm8, %v8300_v60, %v18561_v46 }
  0xdf   :  { %8538 = vrot.lane.b32.xlu1 %v11106_v25, %s10515_s14  ;;  %8523 = vrot.lane.b32.xlu0 %v10679_v14, %s10527_s28  ;;  %v11186_v14 = vsel %vm161_vm1, %v8241_v36, %v8305_v23  ;;  %v11208_v36 = vpop.permute.xlu1 %8323 }
  0xe0   :  { %v8557_v11 = vpack.i.bf16 %v11186_v14, %v11178_v54  ;;  %18965 = vst [vmem:[#allocation12_spill] sm:$0xff] %v11208_v36 }
  0xe3   :  { %8548 = vrot.lane.b32.xlu1 %v8547_v51, %s10528_s8  ;;  %8533 = vrot.lane.b32.xlu0 %v8532_v15, %s10528_s8  ;;  %v11196_v51 = vsel %vm94_vm0, %v8295_v48, %v18557_v28  ;;  %v11201_v15 = vsel %vm18651_vm8, %v8170_v41, %v8300_v60  ;;  %v8577_v41 = vpack.i.bf16 %v1102_v1, %v11127_v18  ;;  %v18562_v48 = vunpack.i.l.bf16 %v11208_v36 }
  0xe4   :  { %18964 = vst [vmem:[#allocation11_spill] sm:$0xff] %v11196_v51  ;;  %v8552_v23 = vpack.i.bf16 %v11201_v15, %v11196_v51  ;;  %v18967_v60 = vunpack.i.h.bf16 %v10957_v61  ;;  %v18559_v61 = vunpack.i.l.bf16 %v11188_v12  ;;  %v18970_v1 = vunpack.i.h.bf16 %v11045_v47 }
  0xe5   :  { %v18971_v47 = vunpack.i.h.bf16 %v11001_v45 }
  0xe7   :  { %8558 = vrot.lane.b32.xlu1 %v8557_v11, %s10528_s8  ;;  %8543 = vrot.lane.b32.xlu0 %v8542_v9, %s10516_s15  ;;  %v11221_v9 = vsel %vm18582_vm2, %v18967_v60, %v8310_v40  ;;  %v11230_v11 = vld [vmem:[%s18534_s0 + $0x58] sm:$0xff]  ;;  %v11238_v40 = vsel %vm18560_vm3, %v8315_v50, %v18558_v39  ;;  %v1103_v39 = vsel %vm1097_vm6, %v8276_v35, %v18559_v61  ;;  %vm2110_vm2 = vcmask 1043456  }
  0xe8   :  { %18968 = vst [vmem:[#allocation14_spill] sm:$0xff] %v11230_v11  ;;  %18969 = vst [vmem:[#allocation15_spill] sm:$0xff] %v11238_v40  ;;  %v11251_v60 = vpack.i.bf16 %v11230_v11, %v37_v55 }
  0xeb   :  { %8568 = vrot.lane.b32.xlu1 %v11106_v25, %s10518_s17  ;;  %8553 = vrot.lane.b32.xlu0 %v8552_v23, %s10528_s8  ;;  %v8572_v23 = vpack.i.bf16 %v11221_v9, %v11132_v52 }
  0xef   :  { %8578 = vrot.lane.b32.xlu1 %v8577_v41, %s10528_s8  ;;  %8563 = vrot.lane.b32.xlu0 %v11106_v25, %s10517_s16  ;;  %v11245_v41 = vsel %vm429_vm4, %v18970_v1, %v18562_v48  ;;  %v11261_v1 = vsel %vm18560_vm3, %v18971_v47, %v8315_v50  ;;  %vm1419_vm3 = vcmask 252928  }
  0xf0   :  { %v8597_v28 = vpack.i.bf16 %v11245_v41, %v11238_v40 }
  0xf3   :  { %8588 = vrot.lane.b32.xlu1 %v11106_v25, %s10519_s18  ;;  %8573 = vrot.lane.b32.xlu0 %v8572_v23, %s10528_s8  ;;  %v8592_v25 = vpack.i.bf16 %v11261_v1, %v1103_v39  ;;  %v8280_v23 = vunpack.i.l.bf16 %v11032_v2 }
  0xf7   :  { %8598 = vrot.lane.b32.xlu1 %v8597_v28, %s10528_s8  ;;  %8583 = vrot.lane.b32.xlu0 %v11251_v60, %s10513_s10  ;;  %v18576_v28 = vunpack.i.h.bf16 %v11032_v2 }
  0xf9   :  { %v1421_v51 = vsel %vm1419_vm3, %v8280_v23, %v18576_v28 }
  0xfb   :  { %8608 = vrot.lane.b32.xlu1 %v11251_v60, %s10514_s11  ;;  %8593 = vrot.lane.b32.xlu0 %v8592_v25, %s10528_s8 }
  0xfd   :  { %v8329_v55 = vpop.permute.xlu1 %8328 }
  0xff   :  { %8603 = vrot.lane.b32.xlu0 %v11251_v60, %s10512_s9 }
 0x101   :  { %v8344_v35 = vpop.permute.xlu1 %8343 }
 0x102   :  { %v8345_v47 = vunpack.i.l.bf16 %v8344_v35  ;;  %v8346_v46 = vunpack.i.h.bf16 %v8344_v35 }
 0x104   :  { %v1420_v26 = vsel %vm1419_vm3, %v8345_v47, %v8280_v23 }
 0x105   :  { %v11272_v45 = vpop.permute.xlu0 %8333  ;;  %v11274_v50 = vpop.permute.xlu1 %8353 }
 0x106   :  { %18972 = vst [vmem:[#allocation16_spill] sm:$0xff] %v11274_v50  ;;  %v8355_v52 = vunpack.i.l.bf16 %v11274_v50  ;;  %v18974_v28 = vunpack.i.h.bf16 %v11274_v50 }
 0x109   :  { %v8359_v39 = vpop.permute.xlu1 %8358  ;;  %v11278_v61 = vpop.permute.xlu0 %8338 }
 0x10a   :  { %v18577_v25 = vunpack.i.h.bf16 %v11278_v61  ;;  %v8340_v48 = vunpack.i.l.bf16 %v11278_v61  ;;  %v8361_v18 = vunpack.i.h.bf16 %v8359_v39  ;;  %v8360_v30 = vunpack.i.l.bf16 %v8359_v39 }
 0x10c   :  { %v1437_v19 = vsel %vm1419_vm3, %v8340_v48, %v18577_v25  ;;  %v1436_v35 = vsel %vm1419_vm3, %v8346_v46, %v8340_v48  ;;  %v1469_v25 = vsel %vm1419_vm3, %v8355_v52, %v18974_v28  ;;  %v1468_v23 = vsel %vm1419_vm3, %v8361_v18, %v8355_v52 }
 0x10d   :  { %v11292_v12 = vpop.permute.xlu1 %8363  ;;  %v11294_v6 = vpop.permute.xlu0 %8348  ;;  %v1837_v40 = vpack.c.bf16 %v1437_v19, %v1421_v51  ;;  %v1836_v4 = vpack.c.bf16 %v1436_v35, %v1420_v26  ;;  %v8331_v28 = vunpack.i.h.bf16 %v8329_v55  ;;  %v8330_v35 = vunpack.i.l.bf16 %v8329_v55 }
 0x10e   :  { %18973 = vst [vmem:[#allocation17_spill] sm:$0xff] %v11292_v12  ;;  %v18578_v5 = vunpack.i.h.bf16 %v11294_v6  ;;  %v8350_v2 = vunpack.i.l.bf16 %v11294_v6  ;;  %v8365_v48 = vunpack.i.l.bf16 %v11292_v12 }
 0x10f   :  { %2175 = vmatprep.subr.bf16.mxu0 %v1837_v40 }
 0x110   :  { %2176 = vmatpush1.bf16.msra.mxu0 %v1836_v4  ;;  %v1453_v26 = vsel %vm1419_vm3, %v8350_v2, %v18578_v5  ;;  %v1452_v51 = vsel %vm1419_vm3, %v8360_v30, %v8350_v2  ;;  %v18976_v2 = vunpack.i.h.bf16 %v11292_v12  ;;  %v1484_v55 = vsel %vm1419_vm3, %v8330_v35, %v8365_v48 }
 0x111   :  { %v11308_v19 = vpop.permute.xlu1 %8378  ;;  %v11310_v40 = vpop.permute.xlu0 %8368  ;;  %v1853_v47 = vpack.c.bf16 %v1469_v25, %v1453_v26  ;;  %v1852_v39 = vpack.c.bf16 %v1468_v23, %v1452_v51  ;;  %v8336_v26 = vunpack.i.h.bf16 %v11272_v45  ;;  %v8335_v51 = vunpack.i.l.bf16 %v11272_v45 }
 0x112   :  { %18975 = vst [vmem:[#allocation18_spill] sm:$0xff] %v11310_v40  ;;  %v18587_v18 = vunpack.i.h.bf16 %v11310_v40  ;;  %v8370_v52 = vunpack.i.l.bf16 %v11310_v40  ;;  %v8380_v46 = vunpack.i.l.bf16 %v11308_v19  ;;  %v1485_v30 = vsel %vm1419_vm3, %v8365_v48, %v18976_v2 }
 0x113   :  { %2177 = vmatprep.subr.bf16.mxu0 %v1853_v47  ;;  %v18977_v48 = vunpack.i.h.bf16 %v11308_v19 }
 0x114   :  { %2178 = vmatpush1.bf16.msra.mxu0 %v1852_v39  ;;  %v1501_v25 = vsel %vm1419_vm3, %v8370_v52, %v18587_v18  ;;  %v1500_v23 = vsel %vm1419_vm3, %v8331_v28, %v8370_v52  ;;  %v1532_v52 = vsel %vm1419_vm3, %v8336_v26, %v8380_v46  ;;  %v1729_v18 = vpack.c.bf16 %v11221_v9, %v11186_v14 }
 0x115   :  { %v8384_v5 = vpop.permute.xlu1 %8383  ;;  %v11326_v4 = vpop.permute.xlu0 %8373  ;;  %v1869_v47 = vpack.c.bf16 %v1501_v25, %v1485_v30  ;;  %v1868_v39 = vpack.c.bf16 %v1500_v23, %v1484_v55  ;;  %v1533_v28 = vsel %vm1419_vm3, %v8380_v46, %v18977_v48 }
 0x116   :  { %v8386_v12 = vunpack.i.h.bf16 %v8384_v5  ;;  %v8385_v50 = vunpack.i.l.bf16 %v8384_v5  ;;  %v18583_v2 = vunpack.i.h.bf16 %v11326_v4  ;;  %v8375_v40 = vunpack.i.l.bf16 %v11326_v4 }
 0x117   :  { %2179 = vmatprep.subr.bf16.mxu0 %v1869_v47 }
 0x118   :  { %2180 = vmatpush1.bf16.msra.mxu0 %v1868_v39  ;;  %v1517_v45 = vsel %vm1419_vm3, %v8375_v40, %v18583_v2  ;;  %v1516_v35 = vsel %vm1419_vm3, %v8335_v51, %v8375_v40  ;;  %v1548_v5 = vsel %vm1419_vm3, %v8385_v50, %v8386_v12  ;;  %v18584_v39 = vunpack.i.h.bf16 %v11208_v36 }
 0x119   :  { %v11339_v30 = vpop.permute.xlu1 %8398  ;;  %v11341_v25 = vpop.permute.xlu0 %8388  ;;  %v1885_v55 = vpack.c.bf16 %v1533_v28, %v1517_v45  ;;  %v1884_v23 = vpack.c.bf16 %v1532_v52, %v1516_v35  ;;  %v1900_v47 = vpack.c.bf16 %v1548_v5, %v1548_v5  ;;  %v10387_v35 = vld [vmem:[%s18534_s0 + $0x28] sm:$0xff]  ;;  %v18978_v5 = vunpack.i.l.bf16 %v11208_v36 }
 0x11a   :  { %v18586_v48 = vunpack.i.l.bf16 %v11341_v25  ;;  %v8400_v2 = vunpack.i.l.bf16 %v11339_v30  ;;  %v1713_v52 = vpack.c.bf16 %v11160_v33, %v10387_v35  ;;  %v11391_v35 = vld [vmem:[%s18535_s1] ss:$8 sps:$4 sm:$0xff]  }
 0x11b   :  { %2181 = vmatprep.subr.bf16.mxu0 %v1885_v55  ;;  %v2112_v51 = vsel %vm2110_vm2, %v1900_v47, 0  ;;  %v11371_v55 = vsel %vm429_vm4, %v18978_v5, %v18584_v39 }
 0x11c   :  { %2182 = vmatpush1.bf16.msra.mxu0 %v1884_v23  ;;  %v1549_v50 = vsel %vm1419_vm3, %v8386_v12, %v18586_v48  ;;  %v11364_v12 = vld [vmem:[%s18534_s0 + $0x60] sm:$0xff]  ;;  %18979 = vst [vmem:[#allocation19_spill] sm:$0xff] %v11371_v55  ;;  %v18980_v23 = vunpack.i.h.bf16 %v11096_v42 }
 0x11d   :  { %v11349_v46 = vpop.permute.xlu1 %8408  ;;  %v11351_v40 = vpop.permute.xlu0 %8393  ;;  %v1901_v26 = vpack.c.bf16 %v1549_v50, %v1549_v50  ;;  %v18981_v50 = vunpack.i.h.bf16 %v11043_v49  ;;  %v8627_v39 = vpack.i.bf16 %v11364_v12, %v11230_v11 }
 0x11e   :  { %v18585_v28 = vunpack.i.h.bf16 %v11351_v40  ;;  %v8395_v45 = vunpack.i.l.bf16 %v11351_v40  ;;  %v11376_v47 = vsel %vm18651_vm8, %v18980_v23, %v8400_v2  ;;  %v8410_v36 = vunpack.i.l.bf16 %v11349_v46 }
 0x11f   :  { %7504 = vmatprep.subr.msk.bf16.mxu0 %vm2110_vm2, %v1901_v26 }
 0x120   :  { %v11381_v33 = vsel %vm496_vm5, %v18981_v50, %v8395_v45  ;;  %v11386_v26 = vsel %vm496_vm5, %v8395_v45, %v18585_v28  ;;  %2184 = vmatpush1.bf16.msra.mxu0 %v2112_v51  ;;  %v11402_v45 = vld [vmem:[%s18535_s1 + $0x14] ss:$8 sps:$4 sm:$0xff]   ;;  %v18983_v51 = vunpack.i.h.bf16 %v10816_v21 }
 0x121   :  { %18982 = vst [vmem:[#allocation20_spill] sm:$0xff] %v11386_v26  ;;  %v11393_v42 = vpop.permute.xlu1 %8418  ;;  %v8404_v5 = vpop.permute.xlu0 %8403  ;;  %2325 = vmatprep.subr.bf16.mxu0 %v1713_v52  ;;  %v8617_v49 = vpack.i.bf16 %v11376_v47, %v11386_v26  ;;  %v8612_v23 = vpack.i.bf16 %v11381_v33, %v11371_v55  ;;  %v10388_v52 = vld [vmem:[%s18534_s0 + $0x20] sm:$0xff] }
 0x122   :  { %v8405_v50 = vunpack.i.l.bf16 %v8404_v5  ;;  %v1712_v28 = vpack.c.bf16 %v11010_v57, %v10388_v52  ;;  %v18984_v52 = vunpack.i.h.bf16 %v11339_v30  ;;  %v8406_v21 = vunpack.i.h.bf16 %v8404_v5 }
 0x123   :  { %8618 = vrot.lane.b32.xlu1 %v8617_v49, %s10528_s8  ;;  %8613 = vrot.lane.b32.xlu0 %v8612_v23, %s10528_s8 }
 0x124   :  { %2192 = vmatmul.mubr.bf16.vlgmr.msra.gmra.mrb[0].mxu0 %v11391_v35  ;;  %v299_v11 = vsel %vm18590_vm7, %v18983_v51, %v8405_v50  ;;  %v11432_v14 = vsel %vm18651_vm8, %v8400_v2, %v18984_v52  ;;  %v18989_v51 = vpack.c.bf16 %v11071_v53, %v11061_v44  ;;  %v18990_v44 = vpack.c.bf16 %v10778_v13, %v10783_v16 }
 0x125   :  { %2326 = vmatpush1.bf16.msra.mxu0 %v1712_v28  ;;  %v11422_v57 = vpop.permute.xlu1 %8428  ;;  %v11424_v49 = vpop.permute.xlu0 %8413  ;;  %v1743_v23 = vpack.c.bf16 %v11111_v38, %v299_v11  ;;  %7506 = vmatprep.mubr.msk.bf16.mxu0 %vm2085_vm12, %v11402_v45  ;;  %18985 = vst [vmem:[#allocation21_spill] sm:$0xff] %v11432_v14  ;;  %v11440_v38 = vld [vmem:[%s18535_s1 + $0x10] ss:$8 sps:$4 sm:$0xff]   ;;  %v18986_v11 = vpack.c.bf16 %v10821_v37, %v10839_v7  ;;  %v18988_v37 = vunpack.i.h.bf16 %v10841_v8 }
 0x126   :  { %2327 = vmatprep.subr.bf16.mxu0 %v1729_v18  ;;  %v8415_v9 = vunpack.i.l.bf16 %v11424_v49  ;;  %v18987_v18 = vpack.c.bf16 %v10980_v17, %v10985_v56  ;;  %v11456_v28 = vld [vmem:[%s18534_s0 + $0x38] sm:$0xff]  ;;  %v11468_v17 = vld [vmem:[%s18535_s1 + $0x24] ss:$8 sps:$4 sm:$0xff]   ;;  %v300_v8 = vsel %vm18590_vm7, %v8405_v50, %v8406_v21 }
 0x127   :  { %8628 = vrot.lane.b32.xlu1 %v8627_v39, %s10516_s15  ;;  %8623 = vrot.lane.b32.xlu0 %v11251_v60, %s10515_s14  ;;  %v8632_v5 = vpack.i.bf16 %v11456_v28, %v11432_v14  ;;  %v634_v7 = vsel %vm630_vm9, %v18988_v37, %v8410_v36  ;;  %v8411_v37 = vunpack.i.h.bf16 %v11349_v46  ;;  %v19045_v14 = vunpack.i.h.bf16 %v11308_v19  ;;  %v11864_v19 = vld [vmem:[%s18535_s1 + $0x60] ss:$8 sps:$4 sm:$0xff]  }
 0x128   :  { %2246 = vmatprep.subr.bf16.mxu1 %v1743_v23  ;;  %v8420_v23 = vunpack.i.l.bf16 %v11393_v42  ;;  %v1775_v52 = vpack.c.bf16 %v634_v7, %v11201_v15  ;;  %v18992_v15 = vunpack.i.h.bf16 %v10877_v29  ;;  %v8430_v7 = vunpack.i.l.bf16 %v11422_v57 }
 0x129   :  { %2247 = vmatpush1.bf16.msra.mxu1 %v18986_v11  ;;  %2328 = vmatpush1.bf16.msra.mxu0 %v18987_v18  ;;  %v11449_v2 = vpop.permute.xlu1 %8438  ;;  %v11451_v39 = vpop.permute.xlu0 %8423 }
 0x12a   :  { %v18593_v56 = vunpack.i.l.bf16 %v11451_v39  ;;  %2248 = vmatprep.subr.bf16.mxu1 %v18989_v51  ;;  %v701_v50 = vsel %vm697_vm10, %v18992_v15, %v8415_v9  ;;  %v18993_v51 = vunpack.i.h.bf16 %v10875_v27  ;;  %v1761_v15 = vpack.c.bf16 %v11381_v33, %v11245_v41 }
 0x12b   :  { %8638 = vrot.lane.b32.xlu1 %v11251_v60, %s10517_s16  ;;  %8633 = vrot.lane.b32.xlu0 %v8632_v5, %s10528_s8  ;;  %v18995_v27 = vpack.c.bf16 %v10864_v34, %v10846_v0  ;;  %v18604_v0 = vunpack.i.l.bf16 %v11449_v2  ;;  %v18997_v34 = vunpack.i.h.bf16 %v10919_v20  ;;  %v11570_v20 = vld [vmem:[%s18535_s1 + $0x34] ss:$8 sps:$4 sm:$0xff]  }
 0x12c   :  { %v301_v11 = vsel %vm18590_vm7, %v8406_v21, %v18593_v56  ;;  %2200 = vmatmul.mubr.bf16.gmra.mrb[4].mxu0 %v11440_v38  ;;  %v11500_v21 = vld [vmem:[%s18534_s0 + $0x40] sm:$0xff]  ;;  %vm18998_vm7 = vcmask 506880  }
 0x12d   :  { %2249 = vmatpush1.bf16.msra.mxu1 %v18990_v44  ;;  %v11487_v53 = vpop.permute.xlu1 %8448  ;;  %v11489_v18 = vpop.permute.xlu0 %8433  ;;  %v1745_v5 = vpack.c.bf16 %v11261_v1, %v301_v11  ;;  %v11504_v13 = vpack.i.bf16 %v11090_v63, %v11500_v21  ;;  %7507 = vmatprep.mubr.msk.bf16.mxu0 %vm2085_vm12, %v11468_v17  ;;  %v1744_v63 = vpack.c.bf16 %v11137_v10, %v300_v8  ;;  %v11533_v10 = vld [vmem:[%s18535_s1 + $0x20] ss:$8 sps:$4 sm:$0xff]  }
 0x12e   :  { %18991 = vst [vmem:[#allocation22_spill] sm:$0xff] %v11487_v53  ;;  %v18592_v16 = vunpack.i.h.bf16 %v11487_v53  ;;  %v8450_v1 = vunpack.i.l.bf16 %v11487_v53  ;;  %v8435_v29 = vunpack.i.l.bf16 %v11489_v18  ;;  %2250 = vmatprep.subr.bf16.mxu1 %v1775_v52  ;;  %v768_v11 = vsel %vm18595_vm11, %v18993_v51, %v8420_v23 }
 0x12f   :  { %8648 = vrot.lane.b32.xlu1 %v11251_v60, %s10519_s18  ;;  %8643 = vrot.lane.b32.xlu0 %v11251_v60, %s10518_s17  ;;  %v1791_v44 = vpack.c.bf16 %v768_v11, %v701_v50  ;;  %v8421_v11 = vunpack.i.h.bf16 %v11393_v42 }
 0x130   :  { %v11526_v52 = vsel %vm630_vm9, %v8450_v1, %v18592_v16  ;;  %2329 = vmatprep.subr.bf16.mxu0 %v1745_v5  ;;  %v18996_v5 = vunpack.i.h.bf16 %v10935_v3  ;;  %v636_v33 = vsel %vm630_vm9, %v8411_v37, %v8450_v1  ;;  %v835_v3 = vsel %vm18998_vm7, %v18997_v34, %v8430_v7  ;;  %v19010_v1 = vld [vmem:[#allocation2_spill] sm:$0xff] }
 0x131   :  { %18994 = vst [vmem:[#allocation23_spill] sm:$0xff] %v11526_v52  ;;  %2251 = vmatpush1.bf16.msra.mxu1 %v18995_v27  ;;  %2330 = vmatpush1.bf16.msra.mxu0 %v1744_v63  ;;  %v11538_v8 = vpop.permute.xlu1 %8458  ;;  %v11540_v51 = vpop.permute.xlu0 %8443  ;;  %v635_v63 = vsel %vm630_vm9, %v8410_v36, %v8411_v37  ;;  %v8416_v27 = vunpack.i.h.bf16 %v11424_v49  ;;  %v19000_v36 = vpack.c.bf16 %v11076_v31, %v11066_v58  ;;  %v19002_v37 = vunpack.i.h.bf16 %v11003_v22  ;;  %v11633_v49 = vld [vmem:[%s18535_s1 + $0x44] ss:$8 sps:$4 sm:$0xff]  }
 0x132   :  { %v902_v41 = vsel %vm898_vm14, %v18996_v5, %v8435_v29  ;;  %v18603_v50 = vunpack.i.l.bf16 %v11540_v51  ;;  %2252 = vmatprep.subr.bf16.mxu1 %v1791_v44  ;;  %2331 = vmatprep.subr.bf16.mxu0 %v1761_v15  ;;  %v1777_v15 = vpack.c.bf16 %v636_v33, %v11376_v47  ;;  %v18999_v5 = vpack.c.bf16 %v10900_v59, %v10895_v43 }
 0x133   :  { %8658 = vrot.lane.b32.xlu1 %v11504_v13, %s10521_s20  ;;  %8653 = vrot.lane.b32.xlu0 %v11504_v13, %s10520_s19  ;;  %v1807_v44 = vpack.c.bf16 %v902_v41, %v835_v3  ;;  %v8391_v58 = vunpack.i.h.bf16 %v11341_v25  ;;  %v18601_v31 = vunpack.i.l.bf16 %v11538_v8  ;;  %v1776_v22 = vpack.c.bf16 %v635_v63, %v11178_v54 }
 0x134   :  { %2206 = vmatmul.mubr.bf16.gmra.mrb[8].mxu0 %v11533_v10  ;;  %v1036_v41 = vsel %vm1032_vm13, %v19002_v37, %v18603_v50  ;;  %v19003_v3 = vunpack.i.h.bf16 %v10988_v24  ;;  %v702_v54 = vsel %vm697_vm10, %v8415_v9, %v8416_v27  ;;  %v19004_v24 = vpack.c.bf16 %v10955_v32, %v10947_v62  ;;  %v19027_v50 = vld [vmem:[#allocation18_spill] sm:$0xff] }
 0x135   :  { %2253 = vmatpush1.bf16.msra.mxu1 %v18999_v5  ;;  %2332 = vmatpush1.bf16.msra.mxu0 %v19000_v36  ;;  %v11579_v46 = vpop.permute.xlu1 %8468  ;;  %v11581_v47 = vpop.permute.xlu0 %8453  ;;  %v11612_v36 = vld [vmem:[%s18535_s1 + $0x30] ss:$8 sps:$4 sm:$0xff]  }
 0x136   :  { %19001 = vst [vmem:[#allocation24_spill] sm:$0xff] %v11579_v46  ;;  %v18591_v33 = vunpack.i.h.bf16 %v11579_v46  ;;  %v8470_v34 = vunpack.i.l.bf16 %v11579_v46  ;;  %v8456_v43 = vunpack.i.h.bf16 %v11581_v47  ;;  %v18600_v59 = vunpack.i.l.bf16 %v11581_v47  ;;  %2254 = vmatprep.subr.bf16.mxu1 %v1807_v44  ;;  %2333 = vmatprep.subr.bf16.mxu0 %v1777_v15 }
 0x137   :  { %8668 = vrot.lane.b32.xlu1 %v11504_v13, %s10522_s21  ;;  %8663 = vrot.lane.b32.xlu0 %v11504_v13, %s10523_s22  ;;  %v969_v5 = vsel %vm965_vm15, %v19003_v3, %v18604_v0  ;;  %v769_v44 = vsel %vm18595_vm11, %v8420_v23, %v8421_v11  ;;  %v19028_v0 = vunpack.i.h.bf16 %v19027_v50 }
 0x138   :  { %v1823_v15 = vpack.c.bf16 %v1036_v41, %v969_v5  ;;  %7508 = vmatprep.mubr.msk.bf16.mxu0 %vm2085_vm12, %v11570_v20  ;;  %v1423_v63 = vsel %vm1419_vm3, %v8391_v58, %v18600_v59  ;;  %v1439_v37 = vsel %vm1419_vm3, %v8456_v43, %v18601_v31  ;;  %v11638_v62 = vsel %vm18595_vm11, %v8470_v34, %v18591_v33 }
 0x139   :  { %2255 = vmatpush1.bf16.msra.mxu1 %v19004_v24  ;;  %2334 = vmatpush1.bf16.msra.mxu0 %v1776_v22  ;;  %v11620_v42 = vpop.permute.xlu1 %8478  ;;  %v11622_v23 = vpop.permute.xlu0 %8463  ;;  %19006 = vst [vmem:[#allocation26_spill] sm:$0xff] %v11638_v62  ;;  %v770_v41 = vsel %vm18595_vm11, %v8421_v11, %v8470_v34  ;;  %v8461_v22 = vunpack.i.h.bf16 %v11538_v8  ;;  %v1839_v5 = vpack.c.bf16 %v1439_v37, %v1423_v63  ;;  %v19009_v34 = vld [vmem:[#allocation3_spill] sm:$0xff]  ;;  %vm19022_vm11 = vmmov %vm18998_vm7 }
 0x13a   :  { %19005 = vst [vmem:[#allocation25_spill] sm:$0xff] %v11622_v23  ;;  %v18594_v32 = vunpack.i.h.bf16 %v11622_v23  ;;  %v8465_v9 = vunpack.i.l.bf16 %v11622_v23  ;;  %2256 = vmatprep.subr.bf16.mxu1 %v1823_v15  ;;  %v19008_v15 = vunpack.i.h.bf16 %v11278_v61  ;;  %v19011_v33 = vpack.c.bf16 %v19009_v34, %v19010_v1  ;;  %v19013_v1 = vld [vmem:[#allocation4_spill] sm:$0xff] }
 0x13b   :  { %8678 = vrot.lane.b32.xlu1 %v11504_v13, %s10524_s25  ;;  %8673 = vrot.lane.b32.xlu0 %v11251_v60, %s10520_s19 }
 0x13c   :  { %v11651_v3 = vsel %vm697_vm10, %v8465_v9, %v18594_v32  ;;  %v703_v24 = vsel %vm697_vm10, %v8416_v27, %v8465_v9  ;;  %v1438_v11 = vsel %vm1419_vm3, %v19008_v15, %v8456_v43  ;;  %2212 = vmatmul.mubr.bf16.gmra.mrb[12].mxu0 %v11612_v36  ;;  %v1792_v32 = vpack.c.bf16 %v769_v44, %v702_v54 }
 0x13d   :  { %19007 = vst [vmem:[#allocation27_spill] sm:$0xff] %v11651_v3  ;;  %2257 = vmatpush1.bf16.msra.mxu1 %v19011_v33  ;;  %v11661_v48 = vpop.permute.xlu1 %8488  ;;  %v11663_v16 = vpop.permute.xlu0 %8473  ;;  %v1793_v56 = vpack.c.bf16 %v770_v41, %v703_v24  ;;  %7509 = vmatprep.mubr.msk.bf16.mxu0 %vm2085_vm12, %v11633_v49  ;;  %v18599_v27 = vunpack.i.l.bf16 %v11620_v42  ;;  %v19014_v33 = vunpack.i.h.bf16 %v19013_v1  ;;  %v19015_v41 = vunpack.i.h.bf16 %v11294_v6  ;;  %v11700_v6 = vld [vmem:[%s18535_s1 + $0x40] ss:$8 sps:$4 sm:$0xff]  }
 0x13e   :  { %19012 = vst [vmem:[#allocation3_spill] sm:$0xff] %v11661_v48  ;;  %v8476_v43 = vunpack.i.h.bf16 %v11663_v16  ;;  %v18597_v63 = vunpack.i.l.bf16 %v11663_v16  ;;  %2258 = vmatprep.subr.bf16.mxu1 %v1839_v5  ;;  %v19016_v5 = vld [vmem:[#allocation16_spill] sm:$0xff]  ;;  %v18596_v34 = vunpack.i.h.bf16 %v11661_v48 }
 0x13f   :  { %v1422_v37 = vsel %vm1419_vm3, %v19014_v33, %v8391_v58  ;;  %8688 = vrot.lane.b32.xlu1 %v11504_v13, %s10526_s27  ;;  %8683 = vrot.lane.b32.xlu0 %v11504_v13, %s10525_s26  ;;  %v1454_v58 = vsel %vm1419_vm3, %v19015_v41, %v8461_v22  ;;  %v19017_v24 = vunpack.i.h.bf16 %v19016_v5  ;;  %v8436_v41 = vunpack.i.h.bf16 %v11489_v18 }
 0x140   :  { %v1838_v44 = vpack.c.bf16 %v1438_v11, %v1422_v37  ;;  %2335 = vmatprep.subr.bf16.mxu0 %v1793_v56  ;;  %v1455_v54 = vsel %vm1419_vm3, %v8461_v22, %v18597_v63  ;;  %v1471_v9 = vsel %vm1419_vm3, %v8476_v43, %v18599_v27  ;;  %v8490_v56 = vunpack.i.l.bf16 %v11661_v48  ;;  %v19023_v27 = vld [vmem:[#allocation6_spill] sm:$0xff] }
 0x141   :  { %v1470_v15 = vsel %vm1419_vm3, %v19017_v24, %v8476_v43  ;;  %2336 = vmatpush1.bf16.msra.mxu0 %v1792_v32  ;;  %v11693_v11 = vpop.permute.xlu1 %8498  ;;  %v11695_v1 = vpop.permute.xlu0 %8483  ;;  %v1855_v33 = vpack.c.bf16 %v1471_v9, %v1455_v54  ;;  %v8431_v32 = vunpack.i.h.bf16 %v11422_v57  ;;  %v19018_v54 = vld [vmem:[#allocation5_spill] sm:$0xff]  ;;  %v903_v63 = vsel %vm898_vm14, %v8435_v29, %v8436_v41 }
 0x142   :  { %2259 = vmatpush1.bf16.msra.mxu1 %v1838_v44  ;;  %v1854_v37 = vpack.c.bf16 %v1470_v15, %v1454_v58  ;;  %v18598_v22 = vunpack.i.h.bf16 %v11695_v1  ;;  %v8485_v43 = vunpack.i.l.bf16 %v11695_v1  ;;  %v11707_v44 = vld [vmem:[%s18535_s1 + $0x54] ss:$8 sps:$4 sm:$0xff]   ;;  %v19019_v9 = vunpack.i.h.bf16 %v19018_v54 }
 0x143   :  { %8698 = vrot.lane.b32.xlu1 %v11251_v60, %s10521_s20  ;;  %8693 = vrot.lane.b32.xlu0 %v11504_v13, %s10527_s28  ;;  %v11723_v5 = vsel %vm18998_vm7, %v8490_v56, %v18596_v34  ;;  %v8501_v24 = vunpack.i.h.bf16 %v11693_v11  ;;  %v837_v54 = vsel %vm19022_vm11, %v8431_v32, %v8490_v56  ;;  %v836_v56 = vsel %vm18998_vm7, %v8430_v7, %v8431_v32 }
 0x144   :  { %v11718_v58 = vsel %vm94_vm0, %v19019_v9, %v8485_v43  ;;  %2260 = vmatprep.subr.bf16.mxu1 %v1855_v33  ;;  %19020 = vst [vmem:[#allocation2_spill] sm:$0xff] %v11723_v5  ;;  %2218 = vmatmul.mubr.bf16.gmra.mrb[16].mxu0 %v11700_v6  ;;  %v11737_v33 = vsel %vm94_vm0, %v8485_v43, %v18598_v22  ;;  %v8481_v43 = vunpack.i.h.bf16 %v11620_v42  ;;  %v19024_v59 = vunpack.i.h.bf16 %v19023_v27  ;;  %v11785_v22 = vld [vmem:[%s18535_s1 + $0x64] ss:$8 sps:$4 sm:$0xff]  }
 0x145   :  { %v11726_v15 = vpop.permute.xlu1 %8508  ;;  %v11728_v61 = vpop.permute.xlu0 %8493  ;;  %v8702_v13 = vpack.i.bf16 %v11718_v58, %v11500_v21  ;;  %7510 = vmatprep.mubr.msk.bf16.mxu0 %vm2085_vm12, %v11707_v44  ;;  %v1502_v29 = vsel %vm1419_vm3, %v19028_v0, %v8501_v24  ;;  %v19030_v50 = vunpack.i.l.bf16 %v11693_v11  ;;  %vm19039_vm11 = vcmask 1022976  }
 0x146   :  { %2261 = vmatpush1.bf16.msra.mxu1 %v1854_v37  ;;  %19021 = vst [vmem:[#allocation4_spill] sm:$0xff] %v11728_v61  ;;  %v8510_v9 = vunpack.i.l.bf16 %v11726_v15  ;;  %v18602_v37 = vunpack.i.h.bf16 %v11728_v61  ;;  %v8495_v34 = vunpack.i.l.bf16 %v11728_v61  ;;  %vm19041_vm7 = vmmov %vm19039_vm11 }
 0x147   :  { %8703 = vrot.lane.b32.xlu0 %v8702_v13, %s10528_s8  ;;  %v1487_v0 = vsel %vm1419_vm3, %v8481_v43, %v19030_v50 }
 0x148   :  { %v11756_v31 = vsel %vm161_vm1, %v19024_v59, %v8510_v9  ;;  %v11761_v57 = vsel %vm898_vm14, %v8495_v34, %v18602_v37  ;;  %v904_v18 = vsel %vm898_vm14, %v8436_v41, %v8495_v34  ;;  %v11774_v59 = vld [vmem:[%s18535_s1 + $0x50] ss:$8 sps:$4 sm:$0xff]   ;;  %v1808_v41 = vpack.c.bf16 %v903_v63, %v836_v56 }
 0x149   :  { %19025 = vst [vmem:[#allocation16_spill] sm:$0xff] %v11761_v57  ;;  %v11765_v7 = vpop.permute.xlu1 %8518  ;;  %v11767_v32 = vpop.permute.xlu0 %8503  ;;  %v8707_v13 = vpack.i.bf16 %v11756_v31, %v11737_v33  ;;  %v1809_v27 = vpack.c.bf16 %v904_v18, %v837_v54  ;;  %v19029_v54 = vld [vmem:[#allocation10_spill] sm:$0xff]  ;;  %v19031_v56 = vld [vmem:[#allocation17_spill] sm:$0xff] }
 0x14a   :  { %19026 = vst [vmem:[#allocation5_spill] sm:$0xff] %v11765_v7  ;;  %v18608_v34 = vunpack.i.l.bf16 %v11767_v32  ;;  %v19032_v37 = vunpack.i.h.bf16 %v19031_v56 }
 0x14b   :  { %8708 = vrot.lane.b32.xlu1 %v8707_v13, %s10528_s8  ;;  %2337 = vmatprep.subr.bf16.mxu0 %v1809_v27  ;;  %v19033_v13 = vunpack.i.h.bf16 %v11726_v15 }
 0x14c   :  { %2338 = vmatpush1.bf16.msra.mxu0 %v1808_v41  ;;  %8713 = vrot.lane.b32.xlu0 %v11251_v60, %s10523_s22  ;;  %v1503_v63 = vsel %vm1419_vm3, %v8501_v24, %v18608_v34  ;;  %v1486_v18 = vsel %vm1419_vm3, %v19032_v37, %v8481_v43  ;;  %v19035_v43 = vunpack.i.h.bf16 %v19029_v54  ;;  %v19037_v34 = vld [vmem:[#allocation7_spill] sm:$0xff] }
 0x14d   :  { %v11804_v27 = vsel %vm161_vm1, %v8510_v9, %v19033_v13  ;;  %v11806_v41 = vpop.permute.xlu1 %8528  ;;  %v11808_v3 = vpop.permute.xlu0 %8513  ;;  %v1871_v5 = vpack.c.bf16 %v1503_v63, %v1487_v0  ;;  %v1870_v57 = vpack.c.bf16 %v1502_v29, %v1486_v18  ;;  %2224 = vmatmul.mubr.bf16.gmra.mrb[20].mxu0 %v11774_v59  ;;  %v11818_v9 = vld [vmem:[%s18534_s0 + $0x68] sm:$0xff]  ;;  %v19036_v29 = vunpack.i.l.bf16 %v19029_v54 }
 0x14e   :  { %19034 = vst [vmem:[#allocation6_spill] sm:$0xff] %v11804_v27  ;;  %v8531_v24 = vunpack.i.h.bf16 %v11806_v41  ;;  %v8515_v37 = vunpack.i.l.bf16 %v11808_v3  ;;  %7511 = vmatprep.mubr.msk.bf16.mxu0 %vm2085_vm12, %v11785_v22  ;;  %v8441_v0 = vunpack.i.h.bf16 %v11449_v2  ;;  %v8446_v63 = vunpack.i.h.bf16 %v11540_v51 }
 0x14f   :  { %v1104_v18 = vsel %vm1097_vm6, %v19036_v29, %v19035_v43  ;;  %v8520_v13 = vunpack.i.l.bf16 %v11765_v7  ;;  %8718 = vrot.lane.b32.xlu1 %v11251_v60, %s10522_s21  ;;  %2262 = vmatprep.subr.bf16.mxu1 %v1871_v5  ;;  %v19038_v50 = vunpack.i.h.bf16 %v19037_v34  ;;  %v19040_v62 = vunpack.i.h.bf16 %v11808_v3 }
 0x150   :  { %2263 = vmatpush1.bf16.msra.mxu1 %v1870_v57  ;;  %v19043_v43 = vunpack.i.h.bf16 %v11767_v32  ;;  %v19044_v29 = vunpack.i.h.bf16 %v11326_v4  ;;  %v1534_v5 = vsel %vm1419_vm3, %v19045_v14, %v8531_v24  ;;  %v11859_v57 = vpack.i.bf16 %v11818_v9, %v11364_v12  ;;  %v11876_v12 = vld [vmem:[%s18535_s1 + $0x74] ss:$8 sps:$4 sm:$0xff]  }
 0x151   :  { %v11835_v56 = vsel %vm19039_vm11, %v19038_v50, %v8515_v37  ;;  %v11840_v48 = vsel %vm19041_vm7, %v8515_v37, %v19040_v62  ;;  %v11850_v34 = vpop.permute.xlu1 %8538  ;;  %v11852_v50 = vpop.permute.xlu0 %8523  ;;  %v19047_v14 = vunpack.i.h.bf16 %v11765_v7  ;;  %vm19058_vm11 = vcmask 785408  }
 0x152   :  { %19042 = vst [vmem:[#allocation18_spill] sm:$0xff] %v11840_v48  ;;  %v1518_v61 = vsel %vm1419_vm3, %v19044_v29, %v19043_v43  ;;  %19046 = vst [vmem:[#allocation10_spill] sm:$0xff] %v11852_v50  ;;  %v8727_v52 = vpack.i.bf16 %v1104_v18, %v11840_v48  ;;  %v8722_v62 = vpack.i.bf16 %v11835_v56, %v11804_v27  ;;  %v8525_v43 = vunpack.i.l.bf16 %v11852_v50 }
 0x153   :  { %v1886_v4 = vpack.c.bf16 %v1534_v5, %v1518_v61  ;;  %v11869_v37 = vsel %vm965_vm15, %v8520_v13, %v19047_v14  ;;  %v19049_v61 = vunpack.i.l.bf16 %v11449_v2  ;;  %v19050_v5 = vunpack.i.l.bf16 %v11540_v51  ;;  %vm19066_vm7 = vmmov %vm19058_vm11 }
 0x154   :  { %19048 = vst [vmem:[#allocation17_spill] sm:$0xff] %v11869_v37  ;;  %8728 = vrot.lane.b32.xlu1 %v8727_v52, %s10528_s8  ;;  %8723 = vrot.lane.b32.xlu0 %v8722_v62, %s10528_s8  ;;  %v19051_v46 = vunpack.i.h.bf16 %v11852_v50  ;;  %v971_v2 = vsel %vm965_vm15, %v8441_v0, %v8520_v13  ;;  %v1038_v51 = vsel %vm1032_vm13, %v8446_v63, %v8525_v43  ;;  %v19064_v27 = vunpack.i.l.bf16 %v11341_v25 }
 0x155   :  { %v970_v29 = vsel %vm965_vm15, %v19049_v61, %v8441_v0  ;;  %v1037_v7 = vsel %vm1032_vm13, %v19050_v5, %v8446_v63  ;;  %v11896_v61 = vpop.permute.xlu1 %8548  ;;  %v11898_v5 = vpop.permute.xlu0 %8533  ;;  %v1825_v52 = vpack.c.bf16 %v1038_v51, %v971_v2  ;;  %2230 = vmatmul.mubr.bf16.gmra.mrb[24].mxu0 %v11864_v19  ;;  %v19054_v0 = vunpack.i.l.bf16 %v11806_v41 }
 0x156   :  { %v11892_v55 = vsel %vm1032_vm13, %v8525_v43, %v19051_v46  ;;  %19053 = vst [vmem:[#allocation28_spill] sm:$0xff] %v11896_v61  ;;  %v18617_v14 = vunpack.i.l.bf16 %v11898_v5  ;;  %v1824_v18 = vpack.c.bf16 %v1037_v7, %v970_v29  ;;  %7512 = vmatprep.mubr.msk.bf16.mxu0 %vm2085_vm12, %v11876_v12  ;;  %v8540_v46 = vunpack.i.l.bf16 %v11850_v34 }
 0x157   :  { %19052 = vst [vmem:[#allocation7_spill] sm:$0xff] %v11892_v55  ;;  %2339 = vmatprep.subr.bf16.mxu0 %v1825_v52  ;;  %v19055_v63 = vunpack.i.h.bf16 %v11767_v32  ;;  %v8551_v52 = vunpack.i.h.bf16 %v11896_v61  ;;  %v19062_v26 = vunpack.i.l.bf16 %v11896_v61 }
 0x158   :  { %8733 = vrot.lane.b32.xlu0 %v11859_v57, %s10513_s10  ;;  %2340 = vmatpush1.bf16.msra.mxu0 %v1824_v18  ;;  %v1535_v7 = vsel %vm1419_vm3, %v8531_v24, %v18617_v14  ;;  %v11926_v18 = vld [vmem:[%s18535_s1 + $0x70] ss:$8 sps:$4 sm:$0xff]  }
 0x159   :  { %8738 = vrot.lane.b32.xlu1 %v11251_v60, %s10524_s25  ;;  %v1519_v13 = vsel %vm1419_vm3, %v19055_v63, %v19054_v0  ;;  %v11919_v43 = vpop.permute.xlu1 %8558  ;;  %v11921_v29 = vpop.permute.xlu0 %8543  ;;  %v8536_v0 = vunpack.i.h.bf16 %v11898_v5  ;;  %v19056_v24 = vld [vmem:[#allocation13_spill] sm:$0xff] }
 0x15a   :  { %v1887_v2 = vpack.c.bf16 %v1535_v7, %v1519_v13  ;;  %v18621_v51 = vunpack.i.l.bf16 %v11921_v29  ;;  %v19057_v63 = vunpack.i.h.bf16 %v19056_v24  ;;  %v19059_v7 = vunpack.i.h.bf16 %v19029_v54  ;;  %v11957_v54 = vld [vmem:[%s18535_s1 + $0x4] ss:$8 sps:$4 sm:$0xff]  }
 0x15b   :  { %v1425_v23 = vsel %vm1419_vm3, %v8536_v0, %v19062_v26 }
 0x15c   :  { %2264 = vmatprep.subr.bf16.mxu1 %v1887_v2  ;;  %8743 = vrot.lane.b32.xlu0 %v11251_v60, %s10525_s26  ;;  %v11936_v62 = vsel %vm19058_vm11, %v19057_v63, %v8540_v46  ;;  %v1105_v14 = vsel %vm1097_vm6, %v19059_v7, %v18621_v51  ;;  %v18627_v63 = vunpack.i.l.bf16 %v11919_v43  ;;  %v19061_v7 = vunpack.i.l.bf16 %v11581_v47 }
 0x15d   :  { %2265 = vmatpush1.bf16.msra.mxu1 %v1886_v4  ;;  %v11944_v37 = vpop.permute.xlu1 %8568  ;;  %v11946_v2 = vpop.permute.xlu0 %8553  ;;  %v8747_v55 = vpack.i.bf16 %v11936_v62, %v1105_v14  ;;  %2236 = vmatmul.mubr.bf16.gmra.mrb[28].mxu0 %v11926_v18  ;;  %v19060_v4 = vunpack.i.l.bf16 %v11538_v8  ;;  %vm19083_vm11 = vcmask 1022976  }
 0x15e   :  { %v8556_v13 = vunpack.i.h.bf16 %v11946_v2  ;;  %7523 = vmatprep.mubr.msk.bf16.mxu0 %vm2085_vm12, %v11957_v54  ;;  %v1424_v51 = vsel %vm1419_vm3, %v19061_v7, %v8536_v0  ;;  %v8570_v24 = vunpack.i.l.bf16 %v11944_v37  ;;  %v19063_v8 = vunpack.i.l.bf16 %v11946_v2 }
 0x15f   :  { %v1440_v14 = vsel %vm1419_vm3, %v19060_v4, %v8551_v52  ;;  %8748 = vrot.lane.b32.xlu1 %v8747_v55, %s10528_s8  ;;  %v18629_v26 = vunpack.i.h.bf16 %v11944_v37 }
 0x160   :  { %v1551_v50 = vsel %vm1419_vm3, %v8556_v13, %v18627_v63  ;;  %v1441_v4 = vsel %vm1419_vm3, %v8551_v52, %v19063_v8  ;;  %v1550_v48 = vsel %vm1419_vm3, %v19064_v27, %v8556_v13  ;;  %v19065_v63 = vunpack.i.h.bf16 %v11850_v34 }
 0x161   :  { %v11978_v53 = vpop.permute.xlu1 %8578  ;;  %v11980_v47 = vpop.permute.xlu0 %8563  ;;  %v1903_v7 = vpack.c.bf16 %v1551_v50, %v1551_v50  ;;  %v1841_v55 = vpack.c.bf16 %v1441_v4, %v1425_v23  ;;  %v1902_v23 = vpack.c.bf16 %v1550_v48, %v1550_v48  ;;  %v1840_v25 = vpack.c.bf16 %v1440_v14, %v1424_v51 }
 0x162   :  { %v11988_v61 = vsel %vm19066_vm7, %v8540_v46, %v19065_v63  ;;  %v18632_v0 = vunpack.i.h.bf16 %v11980_v47  ;;  %v8565_v52 = vunpack.i.l.bf16 %v11980_v47  ;;  %v19067_v27 = vunpack.i.h.bf16 %v11351_v40  ;;  %v19068_v46 = vld [vmem:[#allocation12_spill] sm:$0xff]  ;;  %vm19091_vm7 = vmmov %vm19083_vm11 }
 0x163   :  { %8758 = vrot.lane.b32.xlu1 %v11859_v57, %s10512_s9  ;;  %7513 = vmatprep.subr.msk.bf16.mxu1 %vm2110_vm2, %v1903_v7  ;;  %v19069_v13 = vunpack.i.h.bf16 %v19068_v46  ;;  %v1715_v8 = vpack.c.bf16 %v11718_v58, %v11456_v28  ;;  %v8561_v4 = vunpack.i.h.bf16 %v11919_v43  ;;  %v2118_v7 = vsel %vm2110_vm2, %v1902_v23, 0 }
 0x164   :  { %v11999_v50 = vsel %vm496_vm5, %v19067_v27, %v8570_v24  ;;  %2341 = vmatprep.subr.bf16.mxu0 %v1841_v55  ;;  %v12021_v55 = vsel %vm496_vm5, %v8570_v24, %v18629_v26  ;;  %v12026_v28 = vsel %vm429_vm4, %v8565_v52, %v18632_v0  ;;  %2267 = vmatpush1.bf16.msra.mxu1 %v2118_v7  ;;  %v10392_v27 = vld [vmem:[%s18534_s0 + $0x30] sm:$0xff] }
 0x165   :  { %v12004_v63 = vsel %vm429_vm4, %v19069_v13, %v8565_v52  ;;  %2342 = vmatpush1.bf16.msra.mxu0 %v1840_v25  ;;  %v12010_v48 = vpop.permute.xlu1 %8588  ;;  %v12012_v40 = vpop.permute.xlu0 %8573  ;;  %v18630_v25 = vunpack.i.l.bf16 %v11978_v53  ;;  %2408 = vmatprep.subr.bf16.mxu1 %v1715_v8  ;;  %v19070_v52 = vld [vmem:[#allocation11_spill] sm:$0xff]  ;;  %v19071_v13 = vunpack.i.l.bf16 %v11620_v42  ;;  %v1731_v42 = vpack.c.bf16 %v11835_v56, %v11756_v31  ;;  %v12071_v56 = vld [vmem:[%s18534_s0 + $0x50] sm:$0xff] }
 0x166   :  { %v8752_v51 = vpack.i.bf16 %v12004_v63, %v11988_v61  ;;  %v8576_v58 = vunpack.i.h.bf16 %v12012_v40  ;;  %v18631_v23 = vunpack.i.l.bf16 %v12012_v40  ;;  %v1714_v46 = vpack.c.bf16 %v19070_v52, %v10392_v27  ;;  %19073 = vst [vmem:[#allocation13_spill] sm:$0xff] %v12071_v56 }
 0x167   :  { %8768 = vrot.lane.b32.xlu1 %v11251_v60, %s10526_s27  ;;  %v19072_v60 = vunpack.i.l.bf16 %v11663_v16  ;;  %2275 = vmatmul.mubr.bf16.vlgmr.msra.gmra.mrb[0].mxu1 %v11391_v35  ;;  %v8581_v35 = vunpack.i.h.bf16 %v11978_v53 }
 0x168   :  { %v1472_v7 = vsel %vm1419_vm3, %v19071_v13, %v8576_v58  ;;  %8753 = vrot.lane.b32.xlu0 %v8752_v51, %s10528_s8  ;;  %v1457_v8 = vsel %vm1419_vm3, %v8561_v4, %v18631_v23  ;;  %v8777_v51 = vpack.i.bf16 %v11999_v50, %v12026_v28  ;;  %v1473_v27 = vsel %vm1419_vm3, %v8576_v58, %v18630_v25  ;;  %v19074_v58 = vld [vmem:[#allocation14_spill] sm:$0xff]  ;;  %v12116_v23 = vld [vmem:[%s18534_s0 + $0x70] sm:$0xff] }
 0x169   :  { %v1456_v24 = vsel %vm1419_vm3, %v19072_v60, %v8561_v4  ;;  %v12050_v14 = vpop.permute.xlu1 %8598  ;;  %v12052_v26 = vpop.permute.xlu0 %8583  ;;  %2409 = vmatpush1.bf16.msra.mxu1 %v1714_v46  ;;  %7515 = vmatprep.mubr.msk.bf16.mxu1 %vm2085_vm12, %v11402_v45  ;;  %v1857_v31 = vpack.c.bf16 %v1473_v27, %v1457_v8  ;;  %v18642_v46 = vunpack.i.h.bf16 %v12010_v48  ;;  %v19076_v13 = vunpack.i.h.bf16 %v11695_v1  ;;  %v19077_v8 = vld [vmem:[#allocation8_spill] sm:$0xff]  ;;  %v19078_v60 = vld [vmem:[#allocation9_spill] sm:$0xff] }
 0x16a   :  { %v8585_v16 = vunpack.i.l.bf16 %v12052_v26  ;;  %v1856_v4 = vpack.c.bf16 %v1472_v7, %v1456_v24  ;;  %2410 = vmatprep.subr.bf16.mxu1 %v1731_v42  ;;  %v8772_v24 = vpack.i.bf16 %v19074_v58, %v12071_v56  ;;  %v19079_v42 = vpack.c.bf16 %v19077_v8, %v19078_v60 }
 0x16b   :  { %8778 = vrot.lane.b32.xlu1 %v8777_v51, %s10528_s8  ;;  %2343 = vmatprep.subr.bf16.mxu0 %v1857_v31  ;;  %v19080_v31 = vunpack.i.l.bf16 %v11693_v11  ;;  %v8590_v25 = vunpack.i.l.bf16 %v12010_v48  ;;  %v18636_v1 = vunpack.i.l.bf16 %v12050_v14  ;;  %v19081_v60 = vunpack.i.l.bf16 %v11767_v32 }
 0x16c   :  { %8763 = vrot.lane.b32.xlu0 %v11859_v57, %s10514_s11  ;;  %v12083_v7 = vsel %vm94_vm0, %v19076_v13, %v8585_v16  ;;  %2344 = vmatpush1.bf16.msra.mxu0 %v1856_v4  ;;  %v12100_v4 = vld [vmem:[%s18534_s0 + $0x48] sm:$0xff] }
 0x16d   :  { %v12075_v52 = vpop.permute.xlu1 %8608  ;;  %v12077_v45 = vpop.permute.xlu0 %8593  ;;  %2411 = vmatpush1.bf16.msra.mxu1 %v19079_v42  ;;  %v1488_v58 = vsel %vm1419_vm3, %v19080_v31, %v8581_v35  ;;  %v8782_v13 = vpack.i.bf16 %v12100_v4, %v12021_v55  ;;  %v8797_v8 = vpack.i.bf16 %v12083_v7, %v12071_v56  ;;  %v18638_v56 = vunpack.i.h.bf16 %v12052_v26 }
 0x16e   :  { %19075 = vst [vmem:[#allocation12_spill] sm:$0xff] %v12077_v45  ;;  %v8596_v51 = vunpack.i.h.bf16 %v12077_v45  ;;  %v18633_v27 = vunpack.i.l.bf16 %v12077_v45  ;;  %v8610_v11 = vunpack.i.l.bf16 %v12075_v52 }
 0x16f   :  { %8788 = vrot.lane.b32.xlu1 %v11859_v57, %s10515_s14  ;;  %2283 = vmatmul.mubr.bf16.gmra.mrb[4].mxu1 %v11440_v38  ;;  %v8792_v38 = vpack.i.bf16 %v12116_v23, %v11818_v9 }
 0x170   :  { %v1504_v42 = vsel %vm1419_vm3, %v19081_v60, %v8596_v51  ;;  %8773 = vrot.lane.b32.xlu0 %v8772_v24, %s10527_s28  ;;  %v1489_v31 = vsel %vm1419_vm3, %v8581_v35, %v18633_v27  ;;  %v1505_v32 = vsel %vm1419_vm3, %v8596_v51, %v18636_v1  ;;  %v12129_v35 = vsel %vm18651_vm8, %v8590_v25, %v18642_v46 }
 0x171   :  { %v12118_v0 = vpop.permute.xlu0 %8603  ;;  %v1872_v60 = vpack.c.bf16 %v1504_v42, %v1488_v58  ;;  %v1873_v45 = vpack.c.bf16 %v1505_v32, %v1489_v31  ;;  %7516 = vmatprep.mubr.msk.bf16.mxu1 %vm2085_vm12, %v11468_v17  ;;  %v19082_v51 = vunpack.i.h.bf16 %v12075_v52  ;;  %v19085_v42 = vunpack.i.h.bf16 %v11726_v15 }
 0x172   :  { %v18637_v24 = vunpack.i.h.bf16 %v12118_v0  ;;  %v8605_v27 = vunpack.i.l.bf16 %v12118_v0  ;;  %v8546_v15 = vunpack.i.h.bf16 %v11921_v29  ;;  %v12163_v32 = vsel %vm94_vm0, %v8585_v16, %v18638_v56 }
 0x173   :  { %8798 = vrot.lane.b32.xlu1 %v8797_v8, %s10528_s8  ;;  %v12142_v58 = vsel %vm19083_vm11, %v8610_v11, %v19082_v51  ;;  %2345 = vmatprep.subr.bf16.mxu0 %v1873_v45  ;;  %19087 = vst [vmem:[#allocation8_spill] sm:$0xff] %v12163_v32  ;;  %v19088_v45 = vunpack.i.h.bf16 %v11339_v30  ;;  %vm19095_vm11 = vcmask 785408  }
 0x174   :  { %19084 = vst [vmem:[#allocation11_spill] sm:$0xff] %v12142_v58  ;;  %v12147_v1 = vsel %vm161_vm1, %v19085_v42, %v8605_v27  ;;  %v12152_v17 = vsel %vm161_vm1, %v8605_v27, %v18637_v24  ;;  %8783 = vrot.lane.b32.xlu0 %v8782_v13, %s10528_s8  ;;  %2346 = vmatpush1.bf16.msra.mxu0 %v1872_v60  ;;  %v19089_v13 = vunpack.i.l.bf16 %v11921_v29 }
 0x175   :  { %19086 = vst [vmem:[#allocation14_spill] sm:$0xff] %v12152_v17  ;;  %v8807_v8 = vpack.i.bf16 %v12147_v1, %v12129_v35  ;;  %v12170_v27 = vsel %vm18651_vm8, %v19088_v45, %v8590_v25  ;;  %v12195_v25 = vld [vmem:[%s18534_s0 + $0x78] sm:$0xff] }
 0x176   :  { %v1106_v60 = vsel %vm1097_vm6, %v19089_v13, %v8546_v15  ;;  %v8802_v51 = vpack.i.bf16 %v12170_v27, %v12163_v32  ;;  %v19092_v13 = vunpack.i.l.bf16 %v11806_v41 }
 0x177   :  { %8808 = vrot.lane.b32.xlu1 %v8807_v8, %s10528_s8  ;;  %2289 = vmatmul.mubr.bf16.gmra.mrb[8].mxu1 %v11533_v10  ;;  %v8827_v30 = vpack.i.bf16 %v1106_v60, %v12142_v58  ;;  %v19090_v10 = vunpack.i.h.bf16 %v11808_v3  ;;  %v12207_v3 = vpack.i.bf16 %v12195_v25, %v12116_v23 }
 0x178   :  { %8793 = vrot.lane.b32.xlu0 %v8792_v38, %s10516_s15  ;;  %7517 = vmatprep.mubr.msk.bf16.mxu1 %vm2085_vm12, %v11570_v20 }
 0x179   :  { %v12190_v29 = vsel %vm19091_vm7, %v19090_v10, %v8610_v11  ;;  %vm19097_vm7 = vmmov %vm19095_vm11 }
 0x17a   :  { %v8822_v16 = vpack.i.bf16 %v12190_v29, %v12152_v17 }
 0x17b   :  { %8818 = vrot.lane.b32.xlu1 %v11859_v57, %s10518_s17 }
 0x17c   :  { %8803 = vrot.lane.b32.xlu0 %v8802_v51, %s10528_s8  ;;  %v19093_v51 = vunpack.i.l.bf16 %v11898_v5 }
 0x17f   :  { %8828 = vrot.lane.b32.xlu1 %v8827_v30, %s10528_s8  ;;  %2295 = vmatmul.mubr.bf16.gmra.mrb[12].mxu1 %v11612_v36 }
 0x180   :  { %8813 = vrot.lane.b32.xlu0 %v11859_v57, %s10517_s16  ;;  %7518 = vmatprep.mubr.msk.bf16.mxu1 %vm2085_vm12, %v11633_v49 }
 0x183   :  { %8838 = vrot.lane.b32.xlu1 %v11859_v57, %s10519_s18  ;;  %v8601_v57 = vunpack.i.h.bf16 %v12050_v14 }
 0x184   :  { %8823 = vrot.lane.b32.xlu0 %v8822_v16, %s10528_s8 }
 0x185   :  { %v1520_v60 = vsel %vm1419_vm3, %v19092_v13, %v8601_v57 }
 0x187   :  { %2301 = vmatmul.mubr.bf16.gmra.mrb[16].mxu1 %v11700_v6 }
 0x188   :  { %8833 = vrot.lane.b32.xlu0 %v12207_v3, %s10513_s10  ;;  %7519 = vmatprep.mubr.msk.bf16.mxu1 %vm2085_vm12, %v11707_v44 }
 0x18f   :  { %2307 = vmatmul.mubr.bf16.gmra.mrb[20].mxu1 %v11774_v59 }
 0x190   :  { %7520 = vmatprep.mubr.msk.bf16.mxu1 %vm2085_vm12, %v11785_v22 }
 0x195   :  { %v12218_v11 = vpop.permute.xlu1 %8618  ;;  %v12220_v38 = vpop.permute.xlu0 %8613 }
 0x196   :  { %v18640_v42 = vunpack.i.l.bf16 %v12218_v11  ;;  %v8616_v8 = vunpack.i.h.bf16 %v12220_v38  ;;  %v18639_v45 = vunpack.i.l.bf16 %v12220_v38  ;;  %v8621_v31 = vunpack.i.h.bf16 %v12218_v11 }
 0x197   :  { %2313 = vmatmul.mubr.bf16.gmra.mrb[24].mxu1 %v11864_v19 }
 0x198   :  { %v1536_v30 = vsel %vm1419_vm3, %v19093_v51, %v8616_v8  ;;  %v1521_v10 = vsel %vm1419_vm3, %v8601_v57, %v18639_v45  ;;  %v1537_v16 = vsel %vm1419_vm3, %v8616_v8, %v18640_v42  ;;  %7521 = vmatprep.mubr.msk.bf16.mxu1 %vm2085_vm12, %v11876_v12  ;;  %v19094_v45 = vunpack.i.h.bf16 %v11850_v34 }
 0x199   :  { %v12238_v24 = vpop.permute.xlu1 %8628  ;;  %v12240_v56 = vpop.permute.xlu0 %8623  ;;  %v1889_v41 = vpack.c.bf16 %v1537_v16, %v1521_v10  ;;  %v1888_v13 = vpack.c.bf16 %v1536_v30, %v1520_v60 }
 0x19a   :  { %v18641_v5 = vunpack.i.l.bf16 %v12238_v24  ;;  %v8625_v51 = vunpack.i.l.bf16 %v12240_v56  ;;  %v18645_v8 = vunpack.i.h.bf16 %v12240_v56 }
 0x19b   :  { %2347 = vmatprep.subr.bf16.mxu0 %v1889_v41  ;;  %v19096_v41 = vunpack.i.l.bf16 %v11919_v43 }
 0x19c   :  { %v1107_v57 = vsel %vm1097_vm6, %v8546_v15, %v18641_v5  ;;  %v12254_v60 = vsel %vm19095_vm11, %v19094_v45, %v8625_v51  ;;  %2348 = vmatpush1.bf16.msra.mxu0 %v1888_v13  ;;  %v12271_v45 = vsel %vm19097_vm7, %v8625_v51, %v18645_v8  ;;  %v19099_v13 = vunpack.i.h.bf16 %v11980_v47 }
 0x19d   :  { %v12256_v30 = vpop.permute.xlu1 %8638  ;;  %v12258_v10 = vpop.permute.xlu0 %8633  ;;  %v8842_v16 = vpack.i.bf16 %v12254_v60, %v1107_v57  ;;  %v1552_v42 = vsel %vm1419_vm3, %v19096_v41, %v8621_v31  ;;  %19098 = vst [vmem:[#allocation9_spill] sm:$0xff] %v12271_v45  ;;  %vm19108_vm11 = vcmask 1014784  }
 0x19e   :  { %v8640_v5 = vunpack.i.l.bf16 %v12256_v30  ;;  %v18644_v34 = vunpack.i.l.bf16 %v12258_v10  ;;  %v1904_v41 = vpack.c.bf16 %v1552_v42, %v1552_v42  ;;  %v19101_v47 = vunpack.i.h.bf16 %v12256_v30  ;;  %vm19110_vm7 = vmmov %vm19108_vm11 }
 0x19f   :  { %8843 = vrot.lane.b32.xlu0 %v8842_v16, %s10528_s8  ;;  %2319 = vmatmul.mubr.bf16.gmra.mrb[28].mxu1 %v11926_v18 }
 0x1a0   :  { %v12276_v57 = vsel %vm429_vm4, %v19099_v13, %v8640_v5  ;;  %v1553_v43 = vsel %vm1419_vm3, %v8621_v31, %v18644_v34  ;;  %v12291_v51 = vsel %vm429_vm4, %v8640_v5, %v19101_v47  ;;  %7532 = vmatprep.mubr.msk.bf16.mxu1 %vm2085_vm12, %v11957_v54  ;;  %v8426_v34 = vunpack.i.h.bf16 %v11451_v39 }
 0x1a1   :  { %v12281_v46 = vpop.permute.xlu1 %8648  ;;  %v12283_v15 = vpop.permute.xlu0 %8643  ;;  %v8847_v16 = vpack.i.bf16 %v12276_v57, %v12271_v45  ;;  %v1905_v17 = vpack.c.bf16 %v1553_v43, %v1553_v43  ;;  %19102 = vst [vmem:[#allocation30_spill] sm:$0xff] %v12291_v51  ;;  %v19103_v5 = vunpack.i.h.bf16 %v11944_v37  ;;  %v2124_v8 = vsel %vm2110_vm2, %v1904_v41, 0 }
 0x1a2   :  { %19100 = vst [vmem:[#allocation29_spill] sm:$0xff] %v12281_v46  ;;  %v8650_v13 = vunpack.i.l.bf16 %v12281_v46  ;;  %v8645_v42 = vunpack.i.l.bf16 %v12283_v15  ;;  %v1717_v31 = vpack.c.bf16 %v12083_v7, %v12100_v4  ;;  %v19104_v43 = vunpack.i.h.bf16 %v12010_v48 }
 0x1a3   :  { %8848 = vrot.lane.b32.xlu1 %v8847_v16, %s10528_s8  ;;  %8853 = vrot.lane.b32.xlu0 %v12207_v3, %s10512_s9  ;;  %v1716_v7 = vpack.c.bf16 %v11737_v33, %v11500_v21  ;;  %v19107_v4 = vunpack.i.l.bf16 %v11451_v39  ;;  %v1733_v21 = vpack.c.bf16 %v12190_v29, %v12147_v1  ;;  %v19111_v29 = vld [vmem:[#allocation15_spill] sm:$0xff] }
 0x1a4   :  { %v12306_v47 = vsel %vm496_vm5, %v19103_v5, %v8645_v42  ;;  %7522 = vmatprep.subr.msk.bf16.mxu0 %vm2110_vm2, %v1905_v17  ;;  %v12319_v37 = vsel %vm18651_vm8, %v19104_v43, %v8650_v13  ;;  %v19105_v5 = vunpack.i.h.bf16 %v12283_v15 }
 0x1a5   :  { %2350 = vmatpush1.bf16.msra.mxu0 %v2124_v8  ;;  %v12312_v58 = vpop.permute.xlu1 %8658  ;;  %v8654_v16 = vpop.permute.xlu0 %8653  ;;  %v8862_v32 = vpack.i.bf16 %v12306_v47, %v12291_v51  ;;  %v302_v8 = vsel %vm19108_vm11, %v19107_v4, %v8426_v34  ;;  %v19116_v51 = vld [vmem:[#allocation22_spill] sm:$0xff]  ;;  %vm19119_vm11 = vmmov %vm19110_vm7 }
 0x1a6   :  { %v12324_v17 = vsel %vm496_vm5, %v8645_v42, %v19105_v5  ;;  %v8655_v41 = vunpack.i.l.bf16 %v8654_v16  ;;  %2491 = vmatprep.subr.bf16.mxu0 %v1717_v31  ;;  %v19109_v42 = vunpack.i.h.bf16 %v12281_v46  ;;  %v12344_v31 = vld [vmem:[%s18535_s1] ss:$8 sps:$4 sm:$0xff]   ;;  %v8656_v1 = vunpack.i.h.bf16 %v8654_v16 }
 0x1a7   :  { %19106 = vst [vmem:[#allocation31_spill] sm:$0xff] %v12324_v17  ;;  %8858 = vrot.lane.b32.xlu1 %v12207_v3, %s10514_s11  ;;  %8863 = vrot.lane.b32.xlu0 %v8862_v32, %s10528_s8 }
 0x1a8   :  { %v12339_v43 = vsel %vm18651_vm8, %v8650_v13, %v19109_v42  ;;  %2358 = vmatmul.mubr.bf16.vlgmr.msra.gmra.mrb[32].mxu0 %v12344_v31  ;;  %v303_v33 = vsel %vm19110_vm7, %v8426_v34, %v8655_v41  ;;  %v8867_v13 = vpack.i.bf16 %v12319_v37, %v12324_v17  ;;  %v12361_v42 = vld [vmem:[%s18535_s1 + $0x14] ss:$8 sps:$4 sm:$0xff]   ;;  %v1746_v34 = vpack.c.bf16 %v19111_v29, %v302_v8  ;;  %vm19121_vm8 = vmmov %vm19110_vm7 }
 0x1a9   :  { %2492 = vmatpush1.bf16.msra.mxu0 %v1716_v7  ;;  %v12351_v32 = vpop.permute.xlu1 %8668  ;;  %v12353_v5 = vpop.permute.xlu0 %8663  ;;  %v1747_v4 = vpack.c.bf16 %v11936_v62, %v303_v33  ;;  %7524 = vmatprep.mubr.msk.bf16.mxu0 %vm2085_vm12, %v12361_v42  ;;  %v12372_v62 = vld [vmem:[%s18534_s0 + $0x58] sm:$0xff]  ;;  %v19112_v33 = vld [vmem:[#allocation18_spill] sm:$0xff]  ;;  %v19115_v29 = vunpack.i.l.bf16 %v12312_v58  ;;  %v19117_v17 = vunpack.i.h.bf16 %v19116_v51 }
 0x1aa   :  { %2493 = vmatprep.subr.bf16.mxu0 %v1733_v21  ;;  %v8877_v7 = vpack.i.bf16 %v12372_v62, %v12339_v43  ;;  %v18653_v16 = vunpack.i.l.bf16 %v12351_v32 }
 0x1ab   :  { %8868 = vrot.lane.b32.xlu1 %v8867_v13, %s10528_s8  ;;  %8873 = vrot.lane.b32.xlu0 %v12207_v3, %s10515_s14  ;;  %v19113_v13 = vld [vmem:[#allocation6_spill] sm:$0xff]  ;;  %v638_v46 = vsel %vm630_vm9, %v19117_v17, %v19115_v29  ;;  %v19126_v29 = vld [vmem:[#allocation19_spill] sm:$0xff] }
 0x1ac   :  { %2412 = vmatprep.subr.bf16.mxu1 %v1747_v4  ;;  %v19114_v48 = vpack.c.bf16 %v19112_v33, %v19113_v13  ;;  %v1779_v17 = vpack.c.bf16 %v638_v46, %v12170_v27  ;;  %v19122_v13 = vunpack.i.l.bf16 %v12353_v5 }
 0x1ad   :  { %2413 = vmatpush1.bf16.msra.mxu1 %v1746_v34  ;;  %v12381_v39 = vpop.permute.xlu1 %8678  ;;  %v12383_v8 = vpop.permute.xlu0 %8673  ;;  %v19118_v34 = vpack.c.bf16 %v11999_v50, %v12004_v63  ;;  %v19123_v50 = vld [vmem:[#allocation25_spill] sm:$0xff] }
 0x1ae   :  { %2494 = vmatpush1.bf16.msra.mxu0 %v19114_v48  ;;  %v18652_v21 = vunpack.i.h.bf16 %v12383_v8  ;;  %v8675_v4 = vunpack.i.l.bf16 %v12383_v8  ;;  %v304_v48 = vsel %vm19119_vm11, %v8655_v41, %v8656_v1  ;;  %v19124_v63 = vunpack.i.h.bf16 %v19123_v50 }
 0x1af   :  { %2414 = vmatprep.subr.bf16.mxu1 %v19118_v34  ;;  %1093 = vrot.lane.b32.xlu1 %v12195_v25, %s10516_s15  ;;  %v12414_v25 = vld [vmem:[%s18535_s1 + $0x10] ss:$8 sps:$4 sm:$0xff]   ;;  %vm19139_vm11 = vcmask 506880  }
 0x1b0   :  { %8878 = vrot.lane.b32.xlu0 %v8877_v7, %s10528_s8  ;;  %v12402_v51 = vsel %vm19110_vm7, %v8675_v4, %v18652_v21  ;;  %v305_v33 = vsel %vm19121_vm8, %v8656_v1, %v8675_v4  ;;  %v705_v41 = vsel %vm697_vm10, %v19124_v63, %v19122_v13  ;;  %2366 = vmatmul.mubr.bf16.gmra.mrb[36].mxu0 %v12414_v25  ;;  %v19125_v7 = vld [vmem:[#allocation20_spill] sm:$0xff]  ;;  %vm19130_vm8 = vcmask 515072   ;;  %v12433_v63 = vld [vmem:[%s18535_s1 + $0x24] ss:$8 sps:$4 sm:$0xff]  }
 0x1b1   :  { %19120 = vst [vmem:[#allocation15_spill] sm:$0xff] %v12402_v51  ;;  %v19127_v34 = vpack.c.bf16 %v19125_v7, %v19126_v29  ;;  %v12420_v46 = vpop.permute.xlu1 %8688  ;;  %v12422_v27 = vpop.permute.xlu0 %8683  ;;  %v1749_v1 = vpack.c.bf16 %v12254_v60, %v305_v33  ;;  %v19128_v4 = vld [vmem:[#allocation24_spill] sm:$0xff]  ;;  %7525 = vmatprep.mubr.msk.bf16.mxu0 %vm2085_vm12, %v12433_v63  ;;  %v1748_v33 = vpack.c.bf16 %v11988_v61, %v304_v48  ;;  %v19131_v21 = vld [vmem:[#allocation23_spill] sm:$0xff]  ;;  %vm19156_vm7 = vmmov %vm19130_vm8 }
 0x1b2   :  { %v19129_v13 = vunpack.i.h.bf16 %v19128_v4  ;;  %v18661_v29 = vunpack.i.l.bf16 %v12422_v27  ;;  %v1765_v7 = vpack.c.bf16 %v12306_v47, %v12276_v57  ;;  %v18660_v47 = vunpack.i.l.bf16 %v12420_v46 }
 0x1b3   :  { %2415 = vmatpush1.bf16.msra.mxu1 %v19127_v34  ;;  %8883 = vrot.lane.b32.xlu1 %v12207_v3, %s10517_s16  ;;  %v12449_v34 = vld [vmem:[%s18534_s0 + $0x60] sm:$0xff] }
 0x1b4   :  { %v772_v50 = vsel %vm19130_vm8, %v19129_v13, %v18653_v16  ;;  %2416 = vmatprep.subr.bf16.mxu1 %v1779_v17  ;;  %8888 = vrot.lane.b32.xlu0 %v12207_v3, %s10518_s17  ;;  %v12453_v4 = vpack.i.bf16 %v11818_v9, %v12449_v34  ;;  %v8661_v17 = vunpack.i.h.bf16 %v12312_v58  ;;  %v19132_v16 = vld [vmem:[#allocation21_spill] sm:$0xff]  ;;  %v19134_v9 = vld [vmem:[#allocation4_spill] sm:$0xff]  ;;  %vm19162_vm8 = vmmov %vm19156_vm7 }
 0x1b5   :  { %2495 = vmatprep.subr.bf16.mxu0 %v1749_v1  ;;  %v1795_v13 = vpack.c.bf16 %v772_v50, %v705_v41  ;;  %v19133_v60 = vpack.c.bf16 %v19131_v21, %v19132_v16  ;;  %v12461_v61 = vpop.permute.xlu1 %8698  ;;  %v12463_v48 = vpop.permute.xlu0 %8693  ;;  %v19135_v51 = vunpack.i.h.bf16 %v19134_v9  ;;  %v19136_v21 = vunpack.i.l.bf16 %v12381_v39  ;;  %v19137_v16 = vld [vmem:[#allocation3_spill] sm:$0xff] }
 0x1b6   :  { %2496 = vmatpush1.bf16.msra.mxu0 %v1748_v33  ;;  %v18656_v41 = vunpack.i.h.bf16 %v12461_v61  ;;  %v8700_v1 = vunpack.i.l.bf16 %v12461_v61  ;;  %v18659_v57 = vunpack.i.l.bf16 %v12463_v48  ;;  %v12495_v9 = vld [vmem:[%s18535_s1 + $0x20] ss:$8 sps:$4 sm:$0xff]  }
 0x1b7   :  { %2417 = vmatpush1.bf16.msra.mxu1 %v19133_v60  ;;  %v906_v45 = vsel %vm898_vm14, %v19135_v51, %v18661_v29  ;;  %2497 = vmatprep.subr.bf16.mxu0 %v1765_v7  ;;  %v19138_v51 = vunpack.i.h.bf16 %v19137_v16  ;;  %v19140_v60 = vunpack.i.l.bf16 %v12312_v58  ;;  %v19142_v16 = vld [vmem:[#allocation27_spill] sm:$0xff] }
 0x1b8   :  { %2418 = vmatprep.subr.bf16.mxu1 %v1795_v13  ;;  %8893 = vrot.lane.b32.xlu1 %v12207_v3, %s10519_s18  ;;  %v12489_v7 = vsel %vm630_vm9, %v8700_v1, %v18656_v41  ;;  %v640_v3 = vsel %vm630_vm9, %v8661_v17, %v8700_v1 }
 0x1b9   :  { %8898 = vrot.lane.b32.xlu0 %v12453_v4, %s10520_s19  ;;  %v839_v50 = vsel %vm19139_vm11, %v19138_v51, %v19136_v21  ;;  %v639_v33 = vsel %vm630_vm9, %v19140_v60, %v8661_v17  ;;  %2372 = vmatmul.mubr.bf16.gmra.mrb[40].mxu0 %v12495_v9  ;;  %v19141_v21 = vld [vmem:[#allocation26_spill] sm:$0xff]  ;;  %v19144_v51 = vpack.c.bf16 %v12021_v55, %v12026_v28  ;;  %v12504_v60 = vpop.permute.xlu0 %8703  ;;  %v19147_v28 = vld [vmem:[#allocation5_spill] sm:$0xff]  ;;  %vm19163_vm11 = vmmov %vm19156_vm7 }
 0x1ba   :  { %v1811_v13 = vpack.c.bf16 %v906_v45, %v839_v50  ;;  %v19143_v58 = vpack.c.bf16 %v19141_v21, %v19142_v16  ;;  %v1781_v45 = vpack.c.bf16 %v640_v3, %v12319_v37  ;;  %v19145_v17 = vld [vmem:[#allocation10_spill] sm:$0xff]  ;;  %7526 = vmatprep.mubr.msk.bf16.mxu0 %vm2085_vm12, %v11570_v20  ;;  %v1780_v55 = vpack.c.bf16 %v639_v33, %v12129_v35  ;;  %v19149_v33 = vld [vmem:[#allocation16_spill] sm:$0xff] }
 0x1bb   :  { %2498 = vmatpush1.bf16.msra.mxu0 %v19144_v51  ;;  %v19146_v1 = vunpack.i.h.bf16 %v19145_v17  ;;  %v19148_v37 = vunpack.i.h.bf16 %v19147_v28  ;;  %v8636_v3 = vunpack.i.h.bf16 %v12258_v10  ;;  %v8706_v20 = vunpack.i.h.bf16 %v12504_v60 }
 0x1bc   :  { %2419 = vmatpush1.bf16.msra.mxu1 %v19143_v58  ;;  %8903 = vrot.lane.b32.xlu1 %v12453_v4, %s10521_s20  ;;  %v18668_v16 = vunpack.i.l.bf16 %v12504_v60  ;;  %v18657_v51 = vmov 0   ;;  %v8671_v17 = vunpack.i.h.bf16 %v12351_v32  ;;  %v8666_v35 = vunpack.i.h.bf16 %v12353_v5 }
 0x1bd   :  { %v1040_v50 = vsel %vm1032_vm13, %v19146_v1, %v18659_v57  ;;  %2420 = vmatprep.subr.bf16.mxu1 %v1811_v13  ;;  %8908 = vrot.lane.b32.xlu0 %v12453_v4, %s10523_s22  ;;  %v973_v13 = vsel %vm965_vm15, %v19148_v37, %v18660_v47  ;;  %v19150_v1 = vld [vmem:[#allocation2_spill] sm:$0xff]  ;;  %v12535_v37 = vpop.permute.xlu1 %8708  ;;  %v19155_v57 = vunpack.i.l.bf16 %v12351_v32  ;;  %v19158_v47 = vld [vmem:[#allocation7_spill] sm:$0xff] }
 0x1be   :  { %2499 = vmatprep.subr.bf16.mxu0 %v1781_v45  ;;  %v1827_v58 = vpack.c.bf16 %v1040_v50, %v973_v13  ;;  %9022 = vset.pattern.permute.xlu0 %v18657_v51  ;;  %v19151_v28 = vpack.c.bf16 %v19149_v33, %v19150_v1  ;;  %v18673_v21 = vunpack.i.l.bf16 %v12535_v37  ;;  %v12538_v41 = vpop.permute.xlu0 %8713  ;;  %v19152_v13 = vld [vmem:[#allocation28_spill] sm:$0xff]  ;;  %v19154_v1 = vunpack.i.l.bf16 %v11946_v2 }
 0x1bf   :  { %2500 = vmatpush1.bf16.msra.mxu0 %v1780_v55  ;;  %v8715_v50 = vunpack.i.l.bf16 %v12538_v41  ;;  %v19153_v33 = vunpack.i.l.bf16 %v19152_v13  ;;  %v773_v13 = vsel %vm19156_vm7, %v19155_v57, %v8671_v17  ;;  %v19161_v57 = vunpack.i.h.bf16 %v12538_v41 }
 0x1c0   :  { %2421 = vmatpush1.bf16.msra.mxu1 %v19151_v28  ;;  %8913 = vrot.lane.b32.xlu1 %v12453_v4, %s10522_s21  ;;  %v1427_v28 = vsel %vm1419_vm3, %v8636_v3, %v18668_v16  ;;  %v1443_v51 = vsel %vm1419_vm3, %v8706_v20, %v18673_v21  ;;  %vm19168_vm7 = vcmask 506880  }
 0x1c1   :  { %2422 = vmatprep.subr.bf16.mxu1 %v1827_v58  ;;  %289 = vrot.lane.b32.xlu0 %v12116_v23, %s10520_s19  ;;  %v1426_v55 = vsel %vm1419_vm3, %v19153_v33, %v8636_v3  ;;  %v1442_v58 = vsel %vm1419_vm3, %v19154_v1, %v8706_v20  ;;  %v19157_v33 = vunpack.i.l.bf16 %v12353_v5  ;;  %v19159_v1 = vld [vmem:[#allocation17_spill] sm:$0xff]  ;;  %v12568_v45 = vpop.permute.xlu1 %8718  ;;  %v1843_v3 = vpack.c.bf16 %v1443_v51, %v1427_v28 }
 0x1c2   :  { %2378 = vmatmul.mubr.bf16.gmra.mrb[44].mxu0 %v11612_v36  ;;  %v19160_v29 = vpack.c.bf16 %v19158_v47, %v19159_v1  ;;  %v18663_v36 = vunpack.i.h.bf16 %v12568_v45  ;;  %v8720_v32 = vunpack.i.l.bf16 %v12568_v45  ;;  %v12577_v5 = vsel %vm697_vm10, %v8715_v50, %v19161_v57 }
 0x1c3   :  { %v706_v2 = vsel %vm697_vm10, %v19157_v33, %v8666_v35  ;;  %7527 = vmatprep.mubr.msk.bf16.mxu0 %vm2085_vm12, %v11633_v49  ;;  %v707_v20 = vsel %vm697_vm10, %v8666_v35, %v8715_v50  ;;  %v8711_v49 = vunpack.i.h.bf16 %v12535_v37 }
 0x1c4   :  { %2423 = vmatpush1.bf16.msra.mxu1 %v19160_v29  ;;  %8918 = vrot.lane.b32.xlu1 %v12453_v4, %s10524_s25  ;;  %v1842_v29 = vpack.c.bf16 %v1442_v58, %v1426_v55  ;;  %v12588_v47 = vsel %vm19162_vm8, %v8720_v32, %v18663_v36  ;;  %v774_v51 = vsel %vm19163_vm11, %v8671_v17, %v8720_v32  ;;  %v19164_v17 = vunpack.i.l.bf16 %v12012_v40  ;;  %vm19170_vm8 = vmmov %vm19168_vm7 }
 0x1c5   :  { %8923 = vrot.lane.b32.xlu0 %v12453_v4, %s10525_s26  ;;  %2424 = vmatprep.subr.bf16.mxu1 %v1843_v3  ;;  %v1797_v50 = vpack.c.bf16 %v774_v51, %v707_v20  ;;  %v1796_v33 = vpack.c.bf16 %v773_v13, %v706_v2  ;;  %v19165_v13 = vunpack.i.l.bf16 %v11978_v53  ;;  %vm19172_vm11 = vmmov %vm19168_vm7 }
 0x1c6   :  { %v12591_v28 = vpop.permute.xlu1 %8728  ;;  %v12593_v35 = vpop.permute.xlu0 %8723  ;;  %v1458_v3 = vsel %vm1419_vm3, %v19164_v17, %v8711_v49 }
 0x1c7   :  { %v18666_v58 = vunpack.i.l.bf16 %v12591_v28  ;;  %v8726_v1 = vunpack.i.h.bf16 %v12593_v35  ;;  %v18667_v57 = vunpack.i.l.bf16 %v12593_v35  ;;  %2501 = vmatprep.subr.bf16.mxu0 %v1797_v50 }
 0x1c8   :  { %2425 = vmatpush1.bf16.msra.mxu1 %v1842_v29  ;;  %8928 = vrot.lane.b32.xlu1 %v12453_v4, %s10526_s27  ;;  %v8681_v29 = vunpack.i.h.bf16 %v12381_v39 }
 0x1c9   :  { %8933 = vrot.lane.b32.xlu0 %v12453_v4, %s10527_s28  ;;  %v1474_v2 = vsel %vm1419_vm3, %v19165_v13, %v8726_v1  ;;  %v1459_v32 = vsel %vm1419_vm3, %v8711_v49, %v18667_v57  ;;  %v1475_v20 = vsel %vm1419_vm3, %v8726_v1, %v18666_v58  ;;  %v8686_v4 = vunpack.i.h.bf16 %v12422_v27  ;;  %2502 = vmatpush1.bf16.msra.mxu0 %v1796_v33 }
 0x1ca   :  { %v12618_v40 = vpop.permute.xlu0 %8733  ;;  %v1859_v51 = vpack.c.bf16 %v1475_v20, %v1459_v32  ;;  %v1858_v17 = vpack.c.bf16 %v1474_v2, %v1458_v3  ;;  %2384 = vmatmul.mubr.bf16.gmra.mrb[48].mxu0 %v11700_v6  ;;  %v19166_v1 = vunpack.i.h.bf16 %v12052_v26  ;;  %v19167_v33 = vunpack.i.l.bf16 %v12381_v39 }
 0x1cb   :  { %v8735_v53 = vunpack.i.l.bf16 %v12618_v40  ;;  %v12621_v13 = vpop.permute.xlu1 %8738  ;;  %7528 = vmatprep.mubr.msk.bf16.mxu0 %vm2085_vm12, %v11707_v44  ;;  %v19169_v3 = vunpack.i.l.bf16 %v12422_v27  ;;  %v18665_v36 = vunpack.i.h.bf16 %v12618_v40 }
 0x1cc   :  { %624 = vrot.lane.b32.xlu1 %v12116_v23, %s10521_s20  ;;  %2426 = vmatprep.subr.bf16.mxu1 %v1859_v51  ;;  %v18662_v49 = vunpack.i.h.bf16 %v12621_v13  ;;  %v8740_v50 = vunpack.i.l.bf16 %v12621_v13  ;;  %v840_v6 = vsel %vm19168_vm7, %v19167_v33, %v8681_v29  ;;  %vm19180_vm7 = vcmask 1022976  }
 0x1cd   :  { %v12631_v32 = vsel %vm94_vm0, %v19166_v1, %v8735_v53  ;;  %2427 = vmatpush1.bf16.msra.mxu1 %v1858_v17  ;;  %v907_v2 = vsel %vm898_vm14, %v19169_v3, %v8686_v4 }
 0x1ce   :  { %v8937_v20 = vpack.i.bf16 %v12631_v32, %v12449_v34  ;;  %v12643_v51 = vpop.permute.xlu0 %8743  ;;  %v12648_v26 = vsel %vm19170_vm8, %v8740_v50, %v18662_v49  ;;  %v841_v17 = vsel %vm19172_vm11, %v8681_v29, %v8740_v50  ;;  %v1812_v33 = vpack.c.bf16 %v907_v2, %v840_v6  ;;  %v19176_v49 = vld [vmem:[#allocation12_spill] sm:$0xff]  ;;  %vm19181_vm8 = vmmov %vm19180_vm7 }
 0x1cf   :  { %19171 = vst [vmem:[#allocation18_spill] sm:$0xff] %v12648_v26  ;;  %v18664_v44 = vunpack.i.h.bf16 %v12643_v51  ;;  %v8745_v39 = vunpack.i.l.bf16 %v12643_v51  ;;  %v8731_v2 = vunpack.i.h.bf16 %v12591_v28  ;;  %vm19190_vm11 = vcmask 785408  }
 0x1d0   :  { %8938 = vrot.lane.b32.xlu0 %v8937_v20, %s10528_s8 }
 0x1d1   :  { %v12657_v27 = vsel %vm898_vm14, %v8745_v39, %v18664_v44  ;;  %v908_v1 = vsel %vm898_vm14, %v8686_v4, %v8745_v39  ;;  %v12660_v3 = vpop.permute.xlu1 %8748  ;;  %v12675_v4 = vsel %vm94_vm0, %v8735_v53, %v18665_v36  ;;  %v19177_v44 = vunpack.i.l.bf16 %v19176_v49 }
 0x1d2   :  { %19173 = vst [vmem:[#allocation6_spill] sm:$0xff] %v12657_v27  ;;  %v1813_v55 = vpack.c.bf16 %v908_v1, %v841_v17  ;;  %2390 = vmatmul.mubr.bf16.gmra.mrb[52].mxu0 %v11774_v59  ;;  %v8751_v6 = vunpack.i.h.bf16 %v12660_v3  ;;  %v19174_v59 = vunpack.i.h.bf16 %v12118_v0  ;;  %v19175_v17 = vunpack.i.l.bf16 %v12050_v14 }
 0x1d3   :  { %7529 = vmatprep.mubr.msk.bf16.mxu0 %vm2085_vm12, %v11785_v22  ;;  %v18669_v22 = vunpack.i.l.bf16 %v12660_v3  ;;  %v1490_v36 = vsel %vm1419_vm3, %v19177_v44, %v8731_v2 }
 0x1d4   :  { %2503 = vmatprep.subr.bf16.mxu0 %v1813_v55  ;;  %691 = vrot.lane.b32.xlu0 %v12116_v23, %s10523_s22  ;;  %v1506_v0 = vsel %vm1419_vm3, %v19175_v17, %v8751_v6 }
 0x1d5   :  { %2504 = vmatpush1.bf16.msra.mxu0 %v1812_v33  ;;  %v12670_v29 = vpop.permute.xlu1 %8758  ;;  %v1491_v14 = vsel %vm1419_vm3, %v8731_v2, %v18669_v22  ;;  %v8696_v2 = vunpack.i.h.bf16 %v12463_v48 }
 0x1d6   :  { %v8760_v50 = vunpack.i.l.bf16 %v12670_v29  ;;  %v18670_v1 = vunpack.i.h.bf16 %v12670_v29 }
 0x1d8   :  { %v12682_v55 = vsel %vm161_vm1, %v19174_v59, %v8760_v50  ;;  %v18675_v59 = vunpack.i.h.bf16 %v12238_v24  ;;  %v12718_v49 = vsel %vm161_vm1, %v8760_v50, %v18670_v1 }
 0x1d9   :  { %v12686_v20 = vpop.permute.xlu1 %8768  ;;  %v8942_v39 = vpack.i.bf16 %v12682_v55, %v12675_v4 }
 0x1da   :  { %v12690_v53 = vpop.permute.xlu0 %8753  ;;  %2396 = vmatmul.mubr.bf16.gmra.mrb[56].mxu0 %v11864_v19  ;;  %v18674_v44 = vunpack.i.h.bf16 %v12686_v20 }
 0x1db   :  { %v18671_v33 = vunpack.i.l.bf16 %v12690_v53  ;;  %8943 = vrot.lane.b32.xlu1 %v8942_v39, %s10528_s8  ;;  %7530 = vmatprep.mubr.msk.bf16.mxu0 %vm2085_vm12, %v11876_v12  ;;  %v1874_v12 = vpack.c.bf16 %v1506_v0, %v1490_v36  ;;  %v19178_v36 = vunpack.i.l.bf16 %v12238_v24  ;;  %v8770_v0 = vunpack.i.l.bf16 %v12686_v20 }
 0x1dd   :  { %v12705_v19 = vpop.permute.xlu1 %8778  ;;  %v1507_v17 = vsel %vm1419_vm3, %v8751_v6, %v18671_v33  ;;  %v8691_v6 = vunpack.i.h.bf16 %v12420_v46  ;;  %v1108_v50 = vsel %vm1097_vm6, %v19178_v36, %v18675_v59 }
 0x1de   :  { %v12713_v39 = vpop.permute.xlu0 %8763  ;;  %v1875_v58 = vpack.c.bf16 %v1507_v17, %v1491_v14  ;;  %v19179_v14 = vunpack.i.h.bf16 %v12075_v52  ;;  %v12754_v52 = vsel %vm965_vm15, %v8770_v0, %v18674_v44  ;;  %v8781_v44 = vunpack.i.h.bf16 %v12705_v19 }
 0x1df   :  { %v18672_v57 = vunpack.i.h.bf16 %v12713_v39  ;;  %v8765_v16 = vunpack.i.l.bf16 %v12713_v39  ;;  %758 = vrot.lane.b32.xlu1 %v12116_v23, %s10522_s21  ;;  %19182 = vst [vmem:[#allocation22_spill] sm:$0xff] %v12754_v52 }
 0x1e0   :  { %2428 = vmatprep.subr.bf16.mxu1 %v1875_v58 }
 0x1e1   :  { %v12736_v17 = vsel %vm19180_vm7, %v19179_v14, %v8765_v16  ;;  %v12741_v22 = vsel %vm19181_vm8, %v8765_v16, %v18672_v57  ;;  %2429 = vmatpush1.bf16.msra.mxu1 %v1874_v12  ;;  %v12743_v58 = vpop.permute.xlu1 %8788  ;;  %v19183_v14 = vunpack.i.l.bf16 %v12420_v46  ;;  %vm19197_vm7 = vmmov %vm19190_vm11  ;;  %vm19214_vm8 = vcmask 760832  }
 0x1e2   :  { %v12745_v1 = vpop.permute.xlu0 %8773  ;;  %v8952_v33 = vpack.i.bf16 %v1108_v50, %v12741_v22  ;;  %v8947_v36 = vpack.i.bf16 %v12736_v17, %v12718_v49  ;;  %2402 = vmatmul.mubr.bf16.gmra.mrb[60].mxu0 %v11926_v18  ;;  %v19184_v18 = vunpack.i.l.bf16 %v12463_v48 }
 0x1e3   :  { %v18677_v16 = vunpack.i.h.bf16 %v12745_v1  ;;  %v8775_v12 = vunpack.i.l.bf16 %v12745_v1  ;;  %7541 = vmatprep.mubr.msk.bf16.mxu0 %vm2085_vm12, %v11957_v54  ;;  %v974_v57 = vsel %vm965_vm15, %v19183_v14, %v8691_v6  ;;  %v975_v14 = vsel %vm965_vm15, %v8691_v6, %v8770_v0 }
 0x1e4   :  { %v1041_v21 = vsel %vm1032_vm13, %v19184_v18, %v8696_v2  ;;  %8953 = vrot.lane.b32.xlu1 %v8952_v33, %s10528_s8  ;;  %8948 = vrot.lane.b32.xlu0 %v8947_v36, %s10528_s8  ;;  %v8756_v18 = vunpack.i.h.bf16 %v12690_v53  ;;  %v8790_v6 = vunpack.i.l.bf16 %v12743_v58  ;;  %v19187_v0 = vunpack.i.l.bf16 %v12705_v19 }
 0x1e5   :  { %v12775_v54 = vsel %vm1032_vm13, %v8775_v12, %v18677_v16  ;;  %v12777_v46 = vpop.permute.xlu1 %8798  ;;  %v1042_v48 = vsel %vm1032_vm13, %v8696_v2, %v8775_v12  ;;  %v1828_v26 = vpack.c.bf16 %v1041_v21, %v974_v57  ;;  %v19186_v16 = vunpack.i.l.bf16 %v12218_v11 }
 0x1e6   :  { %19185 = vst [vmem:[#allocation25_spill] sm:$0xff] %v12777_v46  ;;  %v12782_v50 = vpop.permute.xlu0 %8783  ;;  %v1829_v33 = vpack.c.bf16 %v1042_v48, %v975_v14  ;;  %v1523_v12 = vsel %vm1419_vm3, %v8756_v18, %v19187_v0  ;;  %v19188_v11 = vunpack.i.l.bf16 %v12220_v38  ;;  %v18682_v0 = vunpack.i.l.bf16 %v12777_v46 }
 0x1e7   :  { %v18679_v59 = vunpack.i.l.bf16 %v12782_v50  ;;  %v1538_v27 = vsel %vm1419_vm3, %v19186_v16, %v8781_v44  ;;  %v8786_v36 = vunpack.i.h.bf16 %v12782_v50  ;;  %v19191_v38 = vunpack.i.h.bf16 %v12238_v24 }
 0x1e8   :  { %2505 = vmatprep.subr.bf16.mxu0 %v1829_v33  ;;  %825 = vrot.lane.b32.xlu0 %v12116_v23, %s10524_s25  ;;  %v1522_v57 = vsel %vm1419_vm3, %v19188_v11, %v8756_v18  ;;  %v8801_v33 = vunpack.i.h.bf16 %v12777_v46 }
 0x1e9   :  { %2506 = vmatpush1.bf16.msra.mxu0 %v1828_v26  ;;  %v12793_v2 = vpop.permute.xlu1 %8808  ;;  %v1539_v21 = vsel %vm1419_vm3, %v8781_v44, %v18679_v59  ;;  %892 = vrot.lane.b32.xlu1 %v12116_v23, %s10525_s26  ;;  %v1890_v48 = vpack.c.bf16 %v1538_v27, %v1522_v57  ;;  %v19189_v44 = vunpack.i.h.bf16 %v12240_v56 }
 0x1ea   :  { %v12806_v16 = vpop.permute.xlu0 %8793  ;;  %v1891_v26 = vpack.c.bf16 %v1539_v21, %v1523_v12  ;;  %v18684_v56 = vunpack.i.l.bf16 %v12793_v2 }
 0x1eb   :  { %v18680_v14 = vunpack.i.l.bf16 %v12806_v16  ;;  %v12815_v59 = vsel %vm19190_vm11, %v19189_v44, %v8790_v6  ;;  %v19193_v44 = vunpack.i.l.bf16 %v12535_v37  ;;  %vm19220_vm11 = vmmov %vm19214_vm8 }
 0x1ec   :  { %2430 = vmatprep.subr.bf16.mxu1 %v1891_v26 }
 0x1ed   :  { %v1109_v18 = vsel %vm1097_vm6, %v19191_v38, %v18680_v14  ;;  %2431 = vmatpush1.bf16.msra.mxu1 %v1890_v48  ;;  %v12822_v27 = vpop.permute.xlu1 %8818  ;;  %v1444_v24 = vsel %vm1419_vm3, %v19193_v44, %v8801_v33  ;;  %v19194_v48 = vunpack.i.l.bf16 %v12504_v60  ;;  %v19195_v60 = vunpack.i.l.bf16 %v12258_v10 }
 0x1ee   :  { %v12824_v12 = vpop.permute.xlu0 %8803  ;;  %v8957_v21 = vpack.i.bf16 %v12815_v59, %v1109_v18  ;;  %v1429_v18 = vsel %vm1419_vm3, %v8786_v36, %v18682_v0  ;;  %v8820_v14 = vunpack.i.l.bf16 %v12822_v27  ;;  %v18690_v10 = vunpack.i.h.bf16 %v12822_v27 }
 0x1ef   :  { %19192 = vst [vmem:[#allocation20_spill] sm:$0xff] %v12824_v12  ;;  %v8806_v57 = vunpack.i.h.bf16 %v12824_v12  ;;  %v18686_v26 = vunpack.i.l.bf16 %v12824_v12  ;;  %v1428_v38 = vsel %vm1419_vm3, %v19194_v48, %v8786_v36  ;;  %v19196_v36 = vunpack.i.h.bf16 %v12743_v58 }
 0x1f0   :  { %8958 = vrot.lane.b32.xlu0 %v8957_v21, %s10528_s8 }
 0x1f1   :  { %v1555_v11 = vsel %vm1419_vm3, %v8806_v57, %v18684_v56  ;;  %v1445_v37 = vsel %vm1419_vm3, %v8801_v33, %v18686_v26  ;;  %v1554_v44 = vsel %vm1419_vm3, %v19195_v60, %v8806_v57  ;;  %v12856_v0 = vsel %vm19197_vm7, %v8790_v6, %v19196_v36  ;;  %v12862_v26 = vpop.permute.xlu1 %8828  ;;  %v19204_v36 = vld [vmem:[#allocation8_spill] sm:$0xff] }
 0x1f2   :  { %v12851_v48 = vpop.permute.xlu0 %8813  ;;  %v1907_v21 = vpack.c.bf16 %v1555_v11, %v1555_v11  ;;  %v1845_v46 = vpack.c.bf16 %v1445_v37, %v1429_v18  ;;  %v1906_v12 = vpack.c.bf16 %v1554_v44, %v1554_v44  ;;  %v8811_v33 = vunpack.i.h.bf16 %v12793_v2  ;;  %19198 = vst [vmem:[#allocation19_spill] sm:$0xff] %v12862_v26 }
 0x1f3   :  { %v18691_v52 = vunpack.i.h.bf16 %v12851_v48  ;;  %v8815_v56 = vunpack.i.l.bf16 %v12851_v48  ;;  %v1844_v11 = vpack.c.bf16 %v1444_v24, %v1428_v38  ;;  %v1719_v6 = vpack.c.bf16 %v12631_v32, %v12372_v62 }
 0x1f4   :  { %959 = vrot.lane.b32.xlu0 %v12116_v23, %s10526_s27  ;;  %7531 = vmatprep.subr.msk.bf16.mxu1 %vm2110_vm2, %v1907_v21  ;;  %v19199_v57 = vunpack.i.h.bf16 %v12283_v15  ;;  %v19200_v37 = vunpack.i.h.bf16 %v12256_v30  ;;  %v2130_v24 = vsel %vm2110_vm2, %v1906_v12, 0  ;;  %v18688_v32 = vunpack.i.l.bf16 %v12862_v26  ;;  %v19203_v21 = vld [vmem:[#allocation13_spill] sm:$0xff] }
 0x1f5   :  { %v12882_v44 = vsel %vm429_vm4, %v8815_v56, %v18691_v52  ;;  %2507 = vmatprep.subr.bf16.mxu0 %v1845_v46  ;;  %2433 = vmatpush1.bf16.msra.mxu1 %v2130_v24  ;;  %v19202_v46 = vunpack.i.l.bf16 %v12593_v35  ;;  %v8796_v52 = vunpack.i.h.bf16 %v12806_v16  ;;  %vm19234_vm7 = vcmask 1022976  }
 0x1f6   :  { %v12872_v18 = vsel %vm496_vm5, %v19199_v57, %v8820_v14  ;;  %v12877_v60 = vsel %vm429_vm4, %v19200_v37, %v8815_v56  ;;  %2508 = vmatpush1.bf16.msra.mxu0 %v1844_v11  ;;  %v12885_v62 = vpop.permute.xlu0 %8823  ;;  %2574 = vmatprep.subr.bf16.mxu1 %v1719_v6  ;;  %v1718_v11 = vpack.c.bf16 %v19204_v36, %v19203_v21  ;;  %v19205_v6 = vunpack.i.l.bf16 %v12591_v28 }
 0x1f7   :  { %19201 = vst [vmem:[#allocation24_spill] sm:$0xff] %v12885_v62  ;;  %v8962_v15 = vpack.i.bf16 %v12877_v60, %v12856_v0  ;;  %v8967_v30 = vpack.i.bf16 %v12872_v18, %v12882_v44  ;;  %v8826_v38 = vunpack.i.h.bf16 %v12885_v62  ;;  %v18689_v56 = vunpack.i.l.bf16 %v12885_v62 }
 0x1f8   :  { %v1460_v12 = vsel %vm1419_vm3, %v19202_v46, %v8811_v33  ;;  %v1735_v57 = vpack.c.bf16 %v12736_v17, %v12682_v55  ;;  %v12906_v37 = vsel %vm496_vm5, %v8820_v14, %v18690_v10  ;;  %2441 = vmatmul.mubr.bf16.vlgmr.msra.gmra.mrb[32].mxu1 %v12344_v31  ;;  %v12918_v55 = vpop.permute.xlu1 %8838  ;;  %v19207_v21 = vunpack.i.h.bf16 %v12618_v40  ;;  %v19212_v40 = vld [vmem:[#allocation29_spill] sm:$0xff] }
 0x1f9   :  { %8963 = vrot.lane.b32.xlu1 %v8962_v15, %s10528_s8  ;;  %8968 = vrot.lane.b32.xlu0 %v8967_v30, %s10528_s8  ;;  %v1476_v35 = vsel %vm1419_vm3, %v19205_v6, %v8826_v38  ;;  %v1461_v24 = vsel %vm1419_vm3, %v8811_v33, %v18689_v56  ;;  %v1477_v15 = vsel %vm1419_vm3, %v8826_v38, %v18688_v32  ;;  %v12931_v33 = vld [vmem:[%s18534_s0 + $0x68] sm:$0xff] }
 0x1fa   :  { %2575 = vmatpush1.bf16.msra.mxu1 %v1718_v11  ;;  %v12920_v17 = vpop.permute.xlu0 %8833  ;;  %v1861_v14 = vpack.c.bf16 %v1477_v15, %v1461_v24  ;;  %v1860_v30 = vpack.c.bf16 %v1476_v35, %v1460_v12  ;;  %7533 = vmatprep.mubr.msk.bf16.mxu1 %vm2085_vm12, %v12361_v42  ;;  %v8972_v38 = vpack.i.bf16 %v12931_v33, %v12906_v37  ;;  %v8840_v12 = vunpack.i.l.bf16 %v12918_v55  ;;  %v19208_v11 = vld [vmem:[#allocation11_spill] sm:$0xff] }
 0x1fb   :  { %19206 = vst [vmem:[#allocation23_spill] sm:$0xff] %v12920_v17  ;;  %v18687_v28 = vunpack.i.h.bf16 %v12920_v17  ;;  %v8835_v46 = vunpack.i.l.bf16 %v12920_v17  ;;  %2576 = vmatprep.subr.bf16.mxu1 %v1735_v57  ;;  %v19209_v57 = vld [vmem:[#allocation14_spill] sm:$0xff]  ;;  %v19213_v15 = vunpack.i.h.bf16 %v19212_v40  ;;  %v8831_v40 = vunpack.i.h.bf16 %v12862_v26 }
 0x1fc   :  { %2509 = vmatprep.subr.bf16.mxu0 %v1861_v14  ;;  %v19210_v6 = vpack.c.bf16 %v19208_v11, %v19209_v57  ;;  %v12984_v11 = vld [vmem:[%s18535_s1 + $0x44] ss:$8 sps:$4 sm:$0xff]   ;;  %v19223_v26 = vunpack.i.h.bf16 %v12670_v29 }
 0x1fd   :  { %1026 = vrot.lane.b32.xlu1 %v12116_v23, %s10527_s28  ;;  %v12939_v36 = vsel %vm94_vm0, %v19207_v21, %v8835_v46  ;;  %2510 = vmatpush1.bf16.msra.mxu0 %v1860_v30  ;;  %v12949_v24 = vsel %vm94_vm0, %v8835_v46, %v18687_v28  ;;  %v12956_v14 = vsel %vm19214_vm8, %v19213_v15, %v8840_v12  ;;  %v18695_v21 = vunpack.i.h.bf16 %v12918_v55  ;;  %vm19236_vm8 = vmmov %vm19234_vm7 }
 0x1fe   :  { %2577 = vmatpush1.bf16.msra.mxu1 %v19210_v6  ;;  %v8977_v35 = vpack.i.bf16 %v12939_v36, %v12116_v23  ;;  %19211 = vst [vmem:[#allocation21_spill] sm:$0xff] %v12949_v24  ;;  %v8982_v30 = vpack.i.bf16 %v12956_v14, %v12949_v24  ;;  %v12968_v23 = vld [vmem:[%s18535_s1 + $0x34] ss:$8 sps:$4 sm:$0xff]   ;;  %19216 = vst [vmem:[#allocation3_spill] sm:$0xff] %v12984_v11  ;;  %v19222_v6 = vunpack.i.l.bf16 %v12690_v53  ;;  %v19226_v53 = vunpack.i.l.bf16 %v12660_v3 }
 0x1ff   :  { %v13000_v28 = vsel %vm19220_vm11, %v8840_v12, %v18695_v21  ;;  %vm19243_vm11 = vcmask 785408  }
 0x200   :  { %8978 = vrot.lane.b32.xlu0 %v8977_v35, %s10528_s8  ;;  %2449 = vmatmul.mubr.bf16.gmra.mrb[36].mxu1 %v12414_v25  ;;  %v12990_v35 = vpop.f32.mrb[0].mxu0 }
 0x201   :  { %8973 = vrot.lane.b32.xlu1 %v8972_v38, %s10528_s8  ;;  %7534 = vmatprep.mubr.msk.bf16.mxu1 %vm2085_vm12, %v12433_v63  ;;  %v12977_v38 = vld [vmem:[%s18535_s1 + $0x30] ss:$8 sps:$4 sm:$0xff]   ;;  %19217 = vst [vmem:[#allocation26_spill] sm:$0xff] %v12990_v35  ;;  %v13004_v10 = vpop.f32.mrb[1].mxu0 }
 0x202   :  { %19221 = vst [vmem:[#allocation5_spill] sm:$0xff] %v13004_v10  ;;  %v2197_v17 = vpop.f32.mrb[2].mxu0 }
 0x203   :  { %v1492_v17 = vsel %vm1419_vm3, %v19226_v53, %v8831_v40 }
 0x205   :  { %8983 = vrot.lane.b32.xlu1 %v8982_v30, %s10528_s8 }
 0x208   :  { %2455 = vmatmul.mubr.bf16.gmra.mrb[40].mxu1 %v12495_v9 }
 0x209   :  { %7535 = vmatprep.mubr.msk.bf16.mxu1 %vm2085_vm12, %v12968_v23 }
 0x210   :  { %2461 = vmatmul.mubr.bf16.gmra.mrb[44].mxu1 %v12977_v38 }
 0x211   :  { %v12972_v46 = vpop.permute.xlu0 %8843  ;;  %7536 = vmatprep.mubr.msk.bf16.mxu1 %vm2085_vm12, %v12984_v11  ;;  %v2198_v11 = vpop.f32.mrb[3].mxu0 }
 0x212   :  { %19215 = vst [vmem:[#allocation4_spill] sm:$0xff] %v12972_v46  ;;  %v8846_v57 = vunpack.i.h.bf16 %v12972_v46  ;;  %v19224_v21 = vunpack.i.l.bf16 %v12972_v46  ;;  %v19233_v46 = vunpack.i.h.bf16 %v12713_v39 }
 0x214   :  { %v1508_v24 = vsel %vm1419_vm3, %v19222_v6, %v8846_v57  ;;  %v1493_v32 = vsel %vm1419_vm3, %v8831_v40, %v19224_v21  ;;  %v13034_v21 = vld [vmem:[%s18535_s1 + $0x40] ss:$8 sps:$4 sm:$0xff]  }
 0x215   :  { %v12993_v15 = vpop.permute.xlu1 %8848  ;;  %v12995_v30 = vpop.permute.xlu0 %8853  ;;  %19228 = vst [vmem:[#allocation2_spill] sm:$0xff] %v13034_v21  ;;  %v1876_v11 = vpack.c.bf16 %v1508_v24, %v1492_v17 }
 0x216   :  { %19218 = vst [vmem:[#allocation27_spill] sm:$0xff] %v12993_v15  ;;  %19219 = vst [vmem:[#allocation10_spill] sm:$0xff] %v12995_v30  ;;  %v8855_v56 = vunpack.i.l.bf16 %v12995_v30  ;;  %v19225_v10 = vunpack.i.l.bf16 %v12993_v15  ;;  %v19231_v24 = vunpack.i.h.bf16 %v12995_v30 }
 0x218   :  { %v13014_v12 = vsel %vm161_vm1, %v19223_v26, %v8855_v56  ;;  %v1509_v62 = vsel %vm1419_vm3, %v8846_v57, %v19225_v10  ;;  %2467 = vmatmul.mubr.bf16.gmra.mrb[48].mxu1 %v13034_v21  ;;  %v13042_v57 = vld [vmem:[%s18535_s1 + $0x54] ss:$8 sps:$4 sm:$0xff]   ;;  %v13054_v17 = vsel %vm161_vm1, %v8855_v56, %v19231_v24 }
 0x219   :  { %v13025_v6 = vpop.permute.xlu1 %8858  ;;  %v13027_v35 = vpop.permute.xlu0 %8863  ;;  %v8987_v29 = vpack.i.bf16 %v13014_v12, %v13000_v28  ;;  %v1877_v26 = vpack.c.bf16 %v1509_v62, %v1493_v32  ;;  %19229 = vst [vmem:[#allocation28_spill] sm:$0xff] %v13042_v57  ;;  %7537 = vmatprep.mubr.msk.bf16.mxu1 %vm2085_vm12, %v13042_v57  ;;  %v19230_v32 = vunpack.i.l.bf16 %v12806_v16  ;;  %19232 = vst [vmem:[#allocation7_spill] sm:$0xff] %v13054_v17 }
 0x21a   :  { %19227 = vst [vmem:[#allocation16_spill] sm:$0xff] %v13025_v6  ;;  %v8860_v3 = vunpack.i.l.bf16 %v13025_v6  ;;  %v2201_v62 = vpop.f32.mrb[4].mxu0  ;;  %v8866_v53 = vunpack.i.h.bf16 %v13027_v35  ;;  %v19235_v16 = vunpack.i.h.bf16 %v13025_v6 }
 0x21b   :  { %v1110_v40 = vsel %vm1097_vm6, %v19230_v32, %v8796_v52  ;;  %8988 = vrot.lane.b32.xlu0 %v8987_v29, %s10528_s8  ;;  %2511 = vmatprep.subr.bf16.mxu0 %v1877_v26  ;;  %v2202_v10 = vpop.f32.mrb[5].mxu0  ;;  %v8851_v26 = vunpack.i.h.bf16 %v12993_v15 }
 0x21c   :  { %v13059_v57 = vsel %vm19234_vm7, %v19233_v46, %v8860_v3  ;;  %v13064_v62 = vsel %vm19236_vm8, %v8860_v3, %v19235_v16  ;;  %2512 = vmatpush1.bf16.msra.mxu0 %v1876_v11  ;;  %v2203_v29 = vpop.f32.mrb[6].mxu0  ;;  %v19238_v11 = vunpack.i.l.bf16 %v12782_v50  ;;  %v19240_v50 = vunpack.i.l.bf16 %v12793_v2  ;;  %vm19244_vm7 = vmmov %vm19243_vm11 }
 0x21d   :  { %19237 = vst [vmem:[#allocation17_spill] sm:$0xff] %v13064_v62  ;;  %v13068_v10 = vpop.permute.xlu1 %8868  ;;  %v13070_v56 = vpop.permute.xlu0 %8873  ;;  %v8992_v39 = vpack.i.bf16 %v13059_v57, %v13054_v17  ;;  %v8997_v46 = vpack.i.bf16 %v1110_v40, %v13064_v62  ;;  %v19239_v40 = vunpack.i.l.bf16 %v13027_v35  ;;  %v19242_v2 = vunpack.i.h.bf16 %v12743_v58 }
 0x21e   :  { %v8871_v24 = vunpack.i.h.bf16 %v13068_v10  ;;  %v18708_v3 = vunpack.i.l.bf16 %v13068_v10  ;;  %v8875_v16 = vunpack.i.l.bf16 %v13070_v56  ;;  %v2204_v32 = vpop.f32.mrb[7].mxu0  ;;  %v1540_v29 = vsel %vm1419_vm3, %v19238_v11, %v8866_v53 }
 0x21f   :  { %8993 = vrot.lane.b32.xlu1 %v8992_v39, %s10528_s8  ;;  %8998 = vrot.lane.b32.xlu0 %v8997_v46, %s10528_s8  ;;  %v2207_v30 = vpop.f32.mrb[8].mxu0  ;;  %v1525_v15 = vsel %vm1419_vm3, %v8851_v26, %v19239_v40  ;;  %v19241_v39 = vunpack.i.l.bf16 %v12705_v19  ;;  %v18710_v46 = vunpack.i.h.bf16 %v13070_v56  ;;  %vm19249_vm8 = vcmask 760832  }
 0x220   :  { %v1541_v32 = vsel %vm1419_vm3, %v8866_v53, %v18708_v3  ;;  %v1556_v11 = vsel %vm1419_vm3, %v19240_v50, %v8871_v24  ;;  %v2208_v21 = vpop.f32.mrb[9].mxu0  ;;  %v13105_v53 = vld [vmem:[%s18535_s1 + $0x50] ss:$8 sps:$4 sm:$0xff]   ;;  %v13111_v19 = vsel %vm19243_vm11, %v19242_v2, %v8875_v16  ;;  %vm19251_vm11 = vcmask 1014784  }
 0x221   :  { %v1524_v30 = vsel %vm1419_vm3, %v19241_v39, %v8851_v26  ;;  %v13098_v6 = vpop.permute.xlu1 %1093  ;;  %v1893_v40 = vpack.c.bf16 %v1541_v32, %v1525_v15  ;;  %2473 = vmatmul.mubr.bf16.gmra.mrb[52].mxu1 %v13105_v53  ;;  %v13119_v15 = vld [vmem:[%s18535_s1 + $0x64] ss:$8 sps:$4 sm:$0xff]   ;;  %v2209_v32 = vpop.f32.mrb[10].mxu0  ;;  %v1908_v39 = vpack.c.bf16 %v1556_v11, %v1556_v11 }
 0x222   :  { %v13100_v17 = vpop.permute.xlu0 %8878  ;;  %v1111_v21 = vsel %vm1097_vm6, %v8796_v52, %v13098_v6  ;;  %v1892_v50 = vpack.c.bf16 %v1540_v29, %v1524_v30  ;;  %7538 = vmatprep.mubr.msk.bf16.mxu1 %vm2085_vm12, %v13119_v15  ;;  %v2210_v2 = vpop.f32.mrb[11].mxu0  ;;  %v13130_v30 = vsel %vm19244_vm7, %v8875_v16, %v18710_v46  ;;  %vm19253_vm7 = vmmov %vm19249_vm8 }
 0x223   :  { %v18711_v26 = vunpack.i.l.bf16 %v13100_v17  ;;  %v9002_v58 = vpack.i.bf16 %v13111_v19, %v1111_v21  ;;  %2513 = vmatprep.subr.bf16.mxu0 %v1893_v40  ;;  %v2213_v29 = vpop.f32.mrb[12].mxu0  ;;  %19245 = vst [vmem:[#allocation12_spill] sm:$0xff] %v13130_v30  ;;  %v2136_v16 = vsel %vm2110_vm2, %v1908_v39, 0  ;;  %v1721_v2 = vpack.c.bf16 %v12939_v36, %v12931_v33 }
 0x224   :  { %2514 = vmatpush1.bf16.msra.mxu0 %v1892_v50  ;;  %v2214_v32 = vpop.f32.mrb[13].mxu0 }
 0x225   :  { %v1557_v52 = vsel %vm1419_vm3, %v8871_v24, %v18711_v26  ;;  %v13132_v3 = vpop.permute.xlu1 %8883  ;;  %9003 = vrot.lane.b32.xlu1 %v9002_v58, %s10528_s8  ;;  %v2215_v29 = vpop.f32.mrb[14].mxu0  ;;  %v19246_v58 = vunpack.i.h.bf16 %v12851_v48  ;;  %v19247_v32 = vunpack.i.h.bf16 %v12822_v27 }
 0x226   :  { %v13134_v62 = vpop.permute.xlu0 %8888  ;;  %v1909_v40 = vpack.c.bf16 %v1557_v52, %v1557_v52  ;;  %v18713_v11 = vunpack.i.h.bf16 %v13132_v3  ;;  %v8885_v21 = vunpack.i.l.bf16 %v13132_v3  ;;  %v2216_v39 = vpop.f32.mrb[15].mxu0 }
 0x227   :  { %v18712_v50 = vunpack.i.h.bf16 %v13134_v62  ;;  %v8890_v24 = vunpack.i.l.bf16 %v13134_v62 }
 0x228   :  { %7540 = vmatprep.subr.msk.bf16.mxu0 %vm2110_vm2, %v1909_v40  ;;  %v13148_v52 = vsel %vm429_vm4, %v19246_v58, %v8885_v21  ;;  %v13153_v46 = vsel %vm429_vm4, %v8885_v21, %v18713_v11  ;;  %v13169_v21 = vld [vmem:[%s18535_s1 + $0x60] ss:$8 sps:$4 sm:$0xff]   ;;  %v13182_v58 = vld [vmem:[%s18535_s1 + $0x74] ss:$8 sps:$4 sm:$0xff]   ;;  %v19248_v11 = vunpack.i.h.bf16 %v12918_v55 }
 0x229   :  { %v13158_v40 = vsel %vm496_vm5, %v19247_v32, %v8890_v24  ;;  %2516 = vmatpush1.bf16.msra.mxu0 %v2136_v16  ;;  %v9007_v36 = vpack.i.bf16 %v13148_v52, %v13130_v30  ;;  %2479 = vmatmul.mubr.bf16.gmra.mrb[56].mxu1 %v13169_v21  ;;  %v13175_v27 = vsel %vm496_vm5, %v8890_v24, %v18712_v50  ;;  %v2219_v32 = vpop.f32.mrb[16].mxu0 }
 0x22a   :  { %v13160_v26 = vpop.permute.xlu1 %8893  ;;  %2657 = vmatprep.subr.bf16.mxu0 %v1721_v2  ;;  %v9012_v48 = vpack.i.bf16 %v13158_v40, %v13153_v46  ;;  %7539 = vmatprep.mubr.msk.bf16.mxu1 %vm2085_vm12, %v13182_v58  ;;  %v1720_v24 = vpack.c.bf16 %v12675_v4, %v12449_v34  ;;  %v2220_v39 = vpop.f32.mrb[17].mxu0  ;;  %v1737_v32 = vpack.c.bf16 %v13059_v57, %v13014_v12 }
 0x22b   :  { %v8899_v33 = vpop.permute.xlu0 %8898  ;;  %v8895_v2 = vunpack.i.l.bf16 %v13160_v26  ;;  %9008 = vrot.lane.b32.xlu0 %v9007_v36, %s10528_s8  ;;  %v2221_v30 = vpop.f32.mrb[18].mxu0 }
 0x22c   :  { %v8900_v29 = vunpack.i.l.bf16 %v8899_v33  ;;  %9013 = vrot.lane.b32.xlu1 %v9012_v48, %s10528_s8  ;;  %2524 = vmatmul.mubr.bf16.vlgmr.msra.gmra.mrb[64].mxu0 %v12344_v31  ;;  %v19250_v48 = vunpack.i.h.bf16 %v12383_v8  ;;  %v8901_v34 = vunpack.i.h.bf16 %v8899_v33  ;;  %v19252_v31 = vunpack.i.h.bf16 %v13160_v26  ;;  %v2222_v57 = vpop.f32.mrb[19].mxu0 }
 0x22d   :  { %v13195_v16 = vsel %vm19249_vm8, %v19248_v11, %v8895_v2  ;;  %2658 = vmatpush1.bf16.msra.mxu0 %v1720_v24  ;;  %7542 = vmatprep.mubr.msk.bf16.mxu0 %vm2085_vm12, %v12361_v42  ;;  %v1767_v30 = vpack.c.bf16 %v12872_v18, %v12877_v60  ;;  %v2225_v33 = vpop.f32.mrb[20].mxu0  ;;  %v19255_v24 = vld [vmem:[#allocation15_spill] sm:$0xff]  ;;  %v1932_v42 = vld [vmem:[%s18536_s6] sm:$0xff]  ;;  %vm19258_vm8 = vmmov %vm19251_vm11  ;;  %v19259_v60 = vpack.c.bf16 %v12741_v22, %v12718_v49 }
 0x22e   :  { %v307_v36 = vsel %vm19251_vm11, %v19250_v48, %v8900_v29  ;;  %v13203_v4 = vpop.permute.xlu1 %8903  ;;  %v9017_v55 = vpack.i.bf16 %v13195_v16, %v13175_v27  ;;  %v13213_v12 = vsel %vm19253_vm7, %v8895_v2, %v19252_v31  ;;  %2659 = vmatprep.subr.bf16.mxu0 %v1737_v32  ;;  %v19257_v2 = vunpack.i.h.bf16 %v12461_v61  ;;  %vm19260_vm11 = vmmov %vm19258_vm8  ;;  %v13257_v33 = vld [vmem:[%s18535_s1 + $0x4] ss:$8 sps:$4 sm:$0xff]  }
 0x22f   :  { %v13205_v39 = vpop.permute.xlu0 %8908  ;;  %v1751_v11 = vpack.c.bf16 %v12815_v59, %v307_v36  ;;  %v8905_v8 = vunpack.i.l.bf16 %v13203_v4  ;;  %v19254_v59 = vld [vmem:[#allocation9_spill] sm:$0xff]  ;;  %v2226_v36 = vpop.f32.mrb[21].mxu0  ;;  %v308_v18 = vsel %vm19258_vm8, %v8900_v29, %v8901_v34  ;;  %vm19265_vm7 = vcmask 515072  }
 0x230   :  { %9018 = vrot.lane.b32.xlu0 %v9017_v55, %s10528_s8  ;;  %v19256_v48 = vpack.c.bf16 %v19254_v59, %v19255_v24  ;;  %1413 = vrot.lane.b32.xlu1 %v13213_v12, %s10528_s8  ;;  %v8910_v31 = vunpack.i.l.bf16 %v13205_v39  ;;  %v13249_v29 = vld [vmem:[%s18535_s1 + $0x70] ss:$8 sps:$4 sm:$0xff]   ;;  %v2227_v22 = vpop.f32.mrb[22].mxu0  ;;  %v19261_v59 = vld [vmem:[#allocation31_spill] sm:$0xff]  ;;  %v19262_v24 = vld [vmem:[#allocation30_spill] sm:$0xff]  ;;  %vm19269_vm8 = vcmask 506880  }
 0x231   :  { %2578 = vmatprep.subr.bf16.mxu1 %v1751_v11  ;;  %v642_v32 = vsel %vm630_vm9, %v19257_v2, %v8905_v8  ;;  %2660 = vmatpush1.bf16.msra.mxu0 %v19259_v60  ;;  %v1752_v2 = vpack.c.bf16 %v12856_v0, %v308_v18  ;;  %v1769_v60 = vpack.c.bf16 %v13158_v40, %v13148_v52 }
 0x232   :  { %2579 = vmatpush1.bf16.msra.mxu1 %v19256_v48  ;;  %v13238_v55 = vpop.permute.xlu1 %8913  ;;  %v1783_v49 = vpack.c.bf16 %v642_v32, %v12956_v14  ;;  %v19263_v48 = vpack.c.bf16 %v19261_v59, %v19262_v24  ;;  %v19264_v14 = vunpack.i.h.bf16 %v12568_v45  ;;  %v19266_v45 = vunpack.i.h.bf16 %v12538_v41 }
 0x233   :  { %v13240_v11 = vpop.permute.xlu0 %289  ;;  %2580 = vmatprep.subr.bf16.mxu1 %v1767_v30  ;;  %v8915_v57 = vunpack.i.l.bf16 %v13238_v55  ;;  %2485 = vmatmul.mubr.bf16.gmra.mrb[60].mxu1 %v13249_v29  ;;  %v19267_v52 = vpack.c.bf16 %v12489_v7, %v12339_v43  ;;  %v1768_v40 = vpack.c.bf16 %v12906_v37, %v12882_v44  ;;  %v19268_v41 = vunpack.i.h.bf16 %v12621_v13 }
 0x234   :  { %v309_v61 = vsel %vm19260_vm11, %v8901_v34, %v13240_v11  ;;  %1950 = vperm.xlu0 %9022, %v1932_v42   ;;  %7550 = vmatprep.mubr.msk.bf16.mxu1 %vm2085_vm12, %v13257_v33  ;;  %v2228_v34 = vpop.f32.mrb[23].mxu0  ;;  %v8906_v24 = vunpack.i.h.bf16 %v13203_v4  ;;  %vm19282_vm11 = vmmov %vm19265_vm7 }
 0x235   :  { %v1753_v30 = vpack.c.bf16 %v13111_v19, %v309_v61  ;;  %v776_v19 = vsel %vm19265_vm7, %v19264_v14, %v8915_v57  ;;  %2532 = vmatmul.mubr.bf16.gmra.mrb[68].mxu0 %v12414_v25  ;;  %v2231_v42 = vpop.f32.mrb[24].mxu0  ;;  %v709_v25 = vsel %vm697_vm10, %v19266_v45, %v8910_v31  ;;  %v19272_v14 = vunpack.i.h.bf16 %v12686_v20 }
 0x236   :  { %2581 = vmatpush1.bf16.msra.mxu1 %v19263_v48  ;;  %v13271_v32 = vpop.permute.xlu1 %8918  ;;  %7543 = vmatprep.mubr.msk.bf16.mxu0 %vm2085_vm12, %v12433_v63  ;;  %v2232_v61 = vpop.f32.mrb[25].mxu0  ;;  %v1799_v22 = vpack.c.bf16 %v776_v19, %v709_v25  ;;  %v19270_v63 = vunpack.i.h.bf16 %v12643_v51  ;;  %v19271_v51 = vpack.c.bf16 %v12588_v47, %v12577_v5  ;;  %v19273_v42 = vunpack.i.h.bf16 %v12745_v1 }
 0x237   :  { %v13273_v36 = vpop.permute.xlu0 %8923  ;;  %2582 = vmatprep.subr.bf16.mxu1 %v1783_v49  ;;  %2661 = vmatprep.subr.bf16.mxu0 %v1753_v30  ;;  %v8920_v0 = vunpack.i.l.bf16 %v13271_v32  ;;  %v2233_v49 = vpop.f32.mrb[26].mxu0  ;;  %v643_v5 = vsel %vm630_vm9, %v8905_v8, %v8906_v24  ;;  %v19274_v8 = vld [vmem:[#allocation6_spill] sm:$0xff] }
 0x238   :  { %v8925_v18 = vunpack.i.l.bf16 %v13273_v36  ;;  %2662 = vmatpush1.bf16.msra.mxu0 %v1752_v2  ;;  %v2234_v59 = vpop.f32.mrb[27].mxu0 }
 0x239   :  { %2663 = vmatprep.subr.bf16.mxu0 %v1769_v60  ;;  %v843_v30 = vsel %vm19269_vm8, %v19268_v41, %v8920_v0  ;;  %v2237_v37 = vpop.f32.mrb[28].mxu0 }
 0x23a   :  { %2583 = vmatpush1.bf16.msra.mxu1 %v19267_v52  ;;  %v910_v34 = vsel %vm898_vm14, %v19270_v63, %v8925_v18  ;;  %v13302_v43 = vpop.permute.xlu1 %8928  ;;  %v2238_v2 = vpop.f32.mrb[29].mxu0 }
 0x23b   :  { %v13304_v7 = vpop.permute.xlu0 %8933  ;;  %2584 = vmatprep.subr.bf16.mxu1 %v1799_v22  ;;  %v8930_v44 = vunpack.i.l.bf16 %v13302_v43  ;;  %v1815_v48 = vpack.c.bf16 %v910_v34, %v843_v30  ;;  %v13321_v45 = vpop.f32.mrb[0].mxu1  ;;  %v19277_v30 = vld [vmem:[#allocation22_spill] sm:$0xff]  ;;  %v8916_v2 = vunpack.i.h.bf16 %v13238_v55 }
 0x23c   :  { %v8935_v13 = vunpack.i.l.bf16 %v13304_v7  ;;  %2664 = vmatpush1.bf16.msra.mxu0 %v1768_v40  ;;  %v2239_v25 = vpop.f32.mrb[30].mxu0  ;;  %v13329_v20 = vpop.f32.mrb[1].mxu1  ;;  %v19275_v40 = vld [vmem:[#allocation18_spill] sm:$0xff]  ;;  %v19278_v63 = vpack.c.bf16 %v12775_v54, %v19277_v30 }
 0x23d   :  { %v977_v19 = vsel %vm965_vm15, %v19272_v14, %v8930_v44  ;;  %2538 = vmatmul.mubr.bf16.gmra.mrb[72].mxu0 %v12495_v9  ;;  %v2280_v1 = vpop.f32.mrb[2].mxu1  ;;  %v2240_v22 = vpop.f32.mrb[31].mxu0  ;;  %v19276_v41 = vpack.c.bf16 %v19274_v8, %v19275_v40  ;;  %v1784_v9 = vpack.c.bf16 %v643_v5, %v13000_v28  ;;  %v8911_v28 = vunpack.i.h.bf16 %v13205_v39 }
 0x23e   :  { %2585 = vmatpush1.bf16.msra.mxu1 %v19271_v51  ;;  %v1044_v60 = vsel %vm1032_vm13, %v19273_v42, %v8935_v13  ;;  %v13326_v47 = vpop.permute.xlu1 %624  ;;  %7544 = vmatprep.mubr.msk.bf16.mxu0 %vm2085_vm12, %v12968_v23  ;;  %v2281_v52 = vpop.f32.mrb[3].mxu1 }
 0x23f   :  { %2586 = vmatprep.subr.bf16.mxu1 %v1815_v48  ;;  %v644_v61 = vsel %vm630_vm9, %v8906_v24, %v13326_v47  ;;  %v1831_v49 = vpack.c.bf16 %v1044_v60, %v977_v19  ;;  %v19279_v24 = vld [vmem:[#allocation3_spill] sm:$0xff]  ;;  %v8881_v19 = vunpack.i.h.bf16 %v13100_v17  ;;  %v19280_v60 = vld [vmem:[#allocation2_spill] sm:$0xff]  ;;  %v710_v22 = vsel %vm697_vm10, %v8910_v31, %v8911_v28  ;;  %v19285_v31 = vld [vmem:[#allocation25_spill] sm:$0xff] }
 0x240   :  { %v1785_v4 = vpack.c.bf16 %v644_v61, %v13195_v16  ;;  %v19281_v61 = vld [vmem:[#allocation28_spill] sm:$0xff] }
 0x242   :  { %2587 = vmatpush1.bf16.msra.mxu1 %v19276_v41  ;;  %2665 = vmatprep.subr.bf16.mxu0 %v1785_v4  ;;  %v2284_v34 = vpop.f32.mrb[4].mxu1  ;;  %v13346_v48 = vpop.permute.xlu0 %8938  ;;  %v19283_v4 = vld [vmem:[#allocation20_spill] sm:$0xff] }
 0x243   :  { %2588 = vmatprep.subr.bf16.mxu1 %v1831_v49  ;;  %2666 = vmatpush1.bf16.msra.mxu0 %v1784_v9  ;;  %v2285_v59 = vpop.f32.mrb[5].mxu1  ;;  %v8941_v51 = vunpack.i.h.bf16 %v13346_v48  ;;  %v8940_v54 = vunpack.i.l.bf16 %v13346_v48  ;;  %v777_v49 = vsel %vm19282_vm11, %v8915_v57, %v8916_v2  ;;  %v19284_v52 = vunpack.i.l.bf16 %v19283_v4  ;;  %vm19291_vm11 = vmmov %vm19269_vm8 }
 0x244   :  { %v2286_v16 = vpop.f32.mrb[6].mxu1  ;;  %v19286_v57 = vunpack.i.l.bf16 %v19285_v31 }
 0x245   :  { %2544 = vmatmul.mubr.bf16.gmra.mrb[76].mxu0 %v12977_v38  ;;  %v2287_v37 = vpop.f32.mrb[7].mxu1  ;;  %v1446_v8 = vsel %vm1419_vm3, %v19284_v52, %v8941_v51  ;;  %v1431_v39 = vsel %vm1419_vm3, %v8881_v19, %v8940_v54 }
 0x246   :  { %2589 = vmatpush1.bf16.msra.mxu1 %v19278_v63  ;;  %7545 = vmatprep.mubr.msk.bf16.mxu0 %vm2085_vm12, %v19279_v24  ;;  %v13368_v40 = vpop.permute.xlu0 %691  ;;  %v1430_v30 = vsel %vm1419_vm3, %v19286_v57, %v8881_v19  ;;  %v1800_v37 = vpack.c.bf16 %v777_v49, %v710_v22 }
 0x247   :  { %v711_v9 = vsel %vm697_vm10, %v8911_v28, %v13368_v40  ;;  %v1846_v16 = vpack.c.bf16 %v1446_v8, %v1430_v30  ;;  %v19289_v30 = vld [vmem:[#allocation19_spill] sm:$0xff] }
 0x24a   :  { %v2290_v14 = vpop.f32.mrb[8].mxu1 }
 0x24b   :  { %v2291_v25 = vpop.f32.mrb[9].mxu1  ;;  %v8921_v14 = vunpack.i.h.bf16 %v13271_v32 }
 0x24c   :  { %v2292_v1 = vpop.f32.mrb[10].mxu1  ;;  %v8926_v25 = vunpack.i.h.bf16 %v13273_v36 }
 0x24d   :  { %v13353_v42 = vpop.permute.xlu1 %8943  ;;  %2550 = vmatmul.mubr.bf16.gmra.mrb[80].mxu0 %v19280_v60  ;;  %v2293_v41 = vpop.f32.mrb[11].mxu1 }
 0x24e   :  { %v8945_v5 = vunpack.i.l.bf16 %v13353_v42  ;;  %7546 = vmatprep.mubr.msk.bf16.mxu0 %vm2085_vm12, %v19281_v61  ;;  %v8946_v1 = vunpack.i.h.bf16 %v13353_v42  ;;  %v844_v41 = vsel %vm19269_vm8, %v8920_v0, %v8921_v14  ;;  %vm19332_vm8 = vcmask 1022976  }
 0x250   :  { %v1447_v55 = vsel %vm1419_vm3, %v8941_v51, %v8945_v5 }
 0x251   :  { %v13381_v63 = vpop.permute.xlu1 %758  ;;  %v1847_v34 = vpack.c.bf16 %v1447_v55, %v1431_v39  ;;  %v19287_v55 = vld [vmem:[#allocation24_spill] sm:$0xff] }
 0x252   :  { %v778_v59 = vsel %vm19265_vm7, %v8916_v2, %v13381_v63  ;;  %v2296_v51 = vpop.f32.mrb[12].mxu1  ;;  %v19288_v31 = vunpack.i.l.bf16 %v19287_v55  ;;  %vm19324_vm7 = vcmask 785408  }
 0x253   :  { %2590 = vmatprep.subr.bf16.mxu1 %v1847_v34  ;;  %v1801_v28 = vpack.c.bf16 %v778_v59, %v711_v9  ;;  %v2297_v19 = vpop.f32.mrb[13].mxu1  ;;  %v911_v9 = vsel %vm898_vm14, %v8925_v18, %v8926_v25  ;;  %v19290_v34 = vunpack.i.l.bf16 %v19289_v30 }
 0x254   :  { %2591 = vmatpush1.bf16.msra.mxu1 %v1846_v16  ;;  %v2298_v8 = vpop.f32.mrb[14].mxu1  ;;  %v1462_v57 = vsel %vm1419_vm3, %v19288_v31, %v8946_v1  ;;  %v1816_v19 = vpack.c.bf16 %v911_v9, %v844_v41 }
 0x255   :  { %2667 = vmatprep.subr.bf16.mxu0 %v1801_v28  ;;  %2556 = vmatmul.mubr.bf16.gmra.mrb[84].mxu0 %v13105_v53  ;;  %v2299_v39 = vpop.f32.mrb[15].mxu1 }
 0x256   :  { %v13389_v4 = vpop.permute.xlu1 %8953  ;;  %v13391_v52 = vpop.permute.xlu0 %8948  ;;  %2668 = vmatpush1.bf16.msra.mxu0 %v1800_v37  ;;  %7547 = vmatprep.mubr.msk.bf16.mxu0 %vm2085_vm12, %v13119_v15 }
 0x257   :  { %v8955_v2 = vunpack.i.l.bf16 %v13389_v4  ;;  %v8951_v22 = vunpack.i.h.bf16 %v13391_v52  ;;  %v8950_v49 = vunpack.i.l.bf16 %v13391_v52 }
 0x259   :  { %v1478_v59 = vsel %vm1419_vm3, %v19290_v34, %v8951_v22  ;;  %v1463_v16 = vsel %vm1419_vm3, %v8946_v1, %v8950_v49  ;;  %v1479_v32 = vsel %vm1419_vm3, %v8951_v22, %v8955_v2 }
 0x25a   :  { %v1863_v36 = vpack.c.bf16 %v1479_v32, %v1463_v16  ;;  %v1862_v0 = vpack.c.bf16 %v1478_v59, %v1462_v57  ;;  %v13416_v18 = vpop.permute.xlu0 %825  ;;  %v2302_v8 = vpop.f32.mrb[16].mxu1  ;;  %v8931_v59 = vunpack.i.h.bf16 %v13302_v43  ;;  %v8936_v16 = vunpack.i.h.bf16 %v13304_v7 }
 0x25b   :  { %v845_v37 = vsel %vm19291_vm11, %v8921_v14, %v13416_v18  ;;  %v13420_v28 = vpop.permute.xlu1 %892  ;;  %v2303_v22 = vpop.f32.mrb[17].mxu1  ;;  %v8956_v32 = vunpack.i.h.bf16 %v13389_v4  ;;  %v10414_v4 = vld [vmem:[%s18535_s1] ss:$8 sps:$4 sm:$0xff]   ;;  %vm19335_vm11 = vmmov %vm19324_vm7 }
 0x25c   :  { %2592 = vmatprep.subr.bf16.mxu1 %v1863_v36  ;;  %v912_v51 = vsel %vm898_vm14, %v8926_v25, %v13420_v28  ;;  %v2304_v39 = vpop.f32.mrb[18].mxu1 }
 0x25d   :  { %2593 = vmatpush1.bf16.msra.mxu1 %v1862_v0  ;;  %v1817_v1 = vpack.c.bf16 %v912_v51, %v845_v37  ;;  %2562 = vmatmul.mubr.bf16.gmra.mrb[88].mxu0 %v13169_v21  ;;  %v2305_v55 = vpop.f32.mrb[19].mxu1  ;;  %v19292_v37 = vld [vmem:[#allocation27_spill] sm:$0xff] }
 0x25e   :  { %7548 = vmatprep.mubr.msk.bf16.mxu0 %vm2085_vm12, %v13182_v58  ;;  %v19293_v51 = vunpack.i.l.bf16 %v19292_v37 }
 0x25f   :  { %2669 = vmatprep.subr.bf16.mxu0 %v1817_v1 }
 0x260   :  { %2670 = vmatpush1.bf16.msra.mxu0 %v1816_v19 }
 0x262   :  { %v13427_v14 = vpop.permute.xlu0 %8958  ;;  %v2308_v31 = vpop.f32.mrb[20].mxu1 }
 0x263   :  { %v2309_v25 = vpop.f32.mrb[21].mxu1  ;;  %v8961_v30 = vunpack.i.h.bf16 %v13427_v14  ;;  %v8960_v34 = vunpack.i.l.bf16 %v13427_v14  ;;  %v978_v31 = vsel %vm965_vm15, %v8930_v44, %v8931_v59 }
 0x264   :  { %v2310_v41 = vpop.f32.mrb[22].mxu1  ;;  %v1045_v25 = vsel %vm1032_vm13, %v8935_v13, %v8936_v16 }
 0x265   :  { %2568 = vmatmul.mubr.bf16.gmra.mrb[92].mxu0 %v13249_v29  ;;  %v2311_v57 = vpop.f32.mrb[23].mxu1  ;;  %v1510_v19 = vsel %vm1419_vm3, %v19293_v51, %v8961_v30  ;;  %v1495_v22 = vsel %vm1419_vm3, %v8956_v32, %v8960_v34  ;;  %v19294_v41 = vld [vmem:[#allocation4_spill] sm:$0xff] }
 0x266   :  { %7559 = vmatprep.mubr.msk.bf16.mxu0 %vm2085_vm12, %v13257_v33  ;;  %v13432_v9 = vpop.permute.xlu0 %959  ;;  %v19295_v57 = vunpack.i.l.bf16 %v19294_v41 }
 0x268   :  { %v1494_v37 = vsel %vm1419_vm3, %v19295_v57, %v8956_v32  ;;  %v1832_v57 = vpack.c.bf16 %v1045_v25, %v978_v31 }
 0x26a   :  { %v2314_v8 = vpop.f32.mrb[24].mxu1 }
 0x26b   :  { %v13439_v36 = vpop.permute.xlu1 %8963  ;;  %v13445_v1 = vpop.permute.xlu0 %8968 }
 0x26c   :  { %v8965_v0 = vunpack.i.l.bf16 %v13439_v36  ;;  %v2315_v55 = vpop.f32.mrb[25].mxu1  ;;  %v8966_v7 = vunpack.i.h.bf16 %v13439_v36  ;;  %v8971_v13 = vunpack.i.h.bf16 %v13445_v1  ;;  %v8970_v32 = vunpack.i.l.bf16 %v13445_v1 }
 0x26d   :  { %v2316_v50 = vpop.f32.mrb[26].mxu1  ;;  %v1878_v55 = vpack.c.bf16 %v1510_v19, %v1494_v37 }
 0x26e   :  { %v1511_v39 = vsel %vm1419_vm3, %v8961_v30, %v8965_v0  ;;  %v979_v30 = vsel %vm965_vm15, %v8931_v59, %v13432_v9  ;;  %v2317_v44 = vpop.f32.mrb[27].mxu1 }
 0x26f   :  { %v13462_v51 = vpop.permute.xlu1 %1026  ;;  %v1879_v8 = vpack.c.bf16 %v1511_v39, %v1495_v22  ;;  %v19297_v39 = vunpack.i.l.bf16 %v13068_v10 }
 0x270   :  { %v1046_v43 = vsel %vm1032_vm13, %v8936_v16, %v13462_v51  ;;  %v19296_v16 = vunpack.i.l.bf16 %v13027_v35 }
 0x271   :  { %2594 = vmatprep.subr.bf16.mxu1 %v1879_v8  ;;  %v1833_v41 = vpack.c.bf16 %v1046_v43, %v979_v30  ;;  %v1542_v37 = vsel %vm1419_vm3, %v19297_v39, %v8971_v13  ;;  %v1527_v43 = vsel %vm1419_vm3, %v8966_v7, %v8970_v32 }
 0x272   :  { %2595 = vmatpush1.bf16.msra.mxu1 %v1878_v55  ;;  %v13473_v50 = vpop.permute.xlu0 %8978  ;;  %v1526_v19 = vsel %vm1419_vm3, %v19296_v16, %v8966_v7  ;;  %v2320_v25 = vpop.f32.mrb[28].mxu1 }
 0x273   :  { %v13471_v22 = vpop.permute.xlu1 %8973  ;;  %2671 = vmatprep.subr.bf16.mxu0 %v1833_v41  ;;  %v8981_v31 = vunpack.i.h.bf16 %v13473_v50  ;;  %v18717_v30 = vunpack.i.l.bf16 %v13473_v50  ;;  %v2321_v55 = vpop.f32.mrb[29].mxu1  ;;  %v1894_v16 = vpack.c.bf16 %v1542_v37, %v1526_v19 }
 0x274   :  { %v8975_v59 = vunpack.i.l.bf16 %v13471_v22  ;;  %2672 = vmatpush1.bf16.msra.mxu0 %v1832_v57  ;;  %v8976_v8 = vunpack.i.h.bf16 %v13471_v22  ;;  %v2322_v41 = vpop.f32.mrb[30].mxu1 }
 0x275   :  { %v2323_v39 = vpop.f32.mrb[31].mxu1  ;;  %v1448_v7 = vsel %vm1419_vm3, %v8945_v5, %v8981_v31 }
 0x276   :  { %v1543_v35 = vsel %vm1419_vm3, %v8971_v13, %v8975_v59  ;;  %v1432_v25 = vsel %vm1419_vm3, %v8940_v54, %v8976_v8  ;;  %v1433_v13 = vsel %vm1419_vm3, %v8976_v8, %v18717_v30  ;;  %v19298_v39 = vunpack.i.l.bf16 %v13100_v17 }
 0x277   :  { %v13491_v44 = vpop.permute.xlu1 %8983  ;;  %v1895_v10 = vpack.c.bf16 %v1543_v35, %v1527_v43  ;;  %v1848_v37 = vpack.c.bf16 %v1448_v7, %v1432_v25 }
 0x278   :  { %v18718_v57 = vunpack.i.l.bf16 %v13491_v44  ;;  %v8986_v8 = vunpack.i.h.bf16 %v13491_v44 }
 0x279   :  { %2596 = vmatprep.subr.bf16.mxu1 %v1895_v10 }
 0x27a   :  { %2597 = vmatpush1.bf16.msra.mxu1 %v1894_v16  ;;  %v1449_v43 = vsel %vm1419_vm3, %v8981_v31, %v18718_v57  ;;  %v1558_v31 = vsel %vm1419_vm3, %v19298_v39, %v8986_v8 }
 0x27b   :  { %v1849_v19 = vpack.c.bf16 %v1449_v43, %v1433_v13  ;;  %v13506_v35 = vpop.f32.mrb[32].mxu0 }
 0x27c   :  { %v13508_v48 = vpop.f32.mrb[33].mxu0 }
 0x27d   :  { %2673 = vmatprep.subr.bf16.mxu0 %v1849_v19  ;;  %v2363_v54 = vpop.f32.mrb[34].mxu0 }
 0x27e   :  { %2674 = vmatpush1.bf16.msra.mxu0 %v1848_v37  ;;  %v2364_v42 = vpop.f32.mrb[35].mxu0  ;;  %v1910_v37 = vpack.c.bf16 %v1558_v31, %v1558_v31 }
 0x280   :  { %v2142_v39 = vsel %vm2110_vm2, %v1910_v37, 0 }
 0x283   :  { %v2367_v5 = vpop.f32.mrb[36].mxu0 }
 0x284   :  { %v2368_v55 = vpop.f32.mrb[37].mxu0 }
 0x285   :  { %v2369_v10 = vpop.f32.mrb[38].mxu0 }
 0x286   :  { %v2370_v41 = vpop.f32.mrb[39].mxu0 }
 0x28c   :  { %v2373_v16 = vpop.f32.mrb[40].mxu0 }
 0x28d   :  { %v2374_v25 = vpop.f32.mrb[41].mxu0  ;;  %v13514_v7 = vpop.permute.xlu0 %8988 }
 0x28e   :  { %v2375_v13 = vpop.f32.mrb[42].mxu0  ;;  %v18719_v43 = vunpack.i.l.bf16 %v13514_v7  ;;  %v8991_v54 = vunpack.i.h.bf16 %v13514_v7  ;;  %v19304_v22 = vunpack.i.l.bf16 %v13514_v7 }
 0x28f   :  { %v2376_v19 = vpop.f32.mrb[43].mxu0 }
 0x290   :  { %v1559_v42 = vsel %vm1419_vm3, %v8986_v8, %v18719_v43  ;;  %v1464_v8 = vsel %vm1419_vm3, %v8950_v49, %v8991_v54  ;;  %v10415_v49 = vld [vmem:[%s18535_s1 + $0x14] ss:$8 sps:$4 sm:$0xff]  }
 0x291   :  { %v13521_v5 = vpop.permute.xlu1 %8993  ;;  %v13523_v55 = vpop.permute.xlu0 %8998  ;;  %v1911_v17 = vpack.c.bf16 %v1559_v42, %v1559_v42 }
 0x292   :  { %v8996_v10 = vunpack.i.h.bf16 %v13521_v5  ;;  %v18715_v41 = vunpack.i.l.bf16 %v13521_v5  ;;  %v18716_v16 = vunpack.i.l.bf16 %v13523_v55 }
 0x293   :  { %7549 = vmatprep.subr.msk.bf16.mxu1 %vm2110_vm2, %v1911_v17 }
 0x294   :  { %v1480_v25 = vsel %vm1419_vm3, %v8955_v2, %v8996_v10  ;;  %2599 = vmatpush1.bf16.msra.mxu1 %v2142_v39  ;;  %v1465_v13 = vsel %vm1419_vm3, %v8991_v54, %v18715_v41  ;;  %v1481_v19 = vsel %vm1419_vm3, %v8996_v10, %v18716_v16  ;;  %v9001_v39 = vunpack.i.h.bf16 %v13523_v55 }
 0x295   :  { %v2379_v31 = vpop.f32.mrb[44].mxu0  ;;  %v1865_v37 = vpack.c.bf16 %v1481_v19, %v1465_v13  ;;  %v1864_v17 = vpack.c.bf16 %v1480_v25, %v1464_v8 }
 0x296   :  { %v2380_v42 = vpop.f32.mrb[45].mxu0  ;;  %v1496_v16 = vsel %vm1419_vm3, %v8960_v34, %v9001_v39 }
 0x297   :  { %v2381_v31 = vpop.f32.mrb[46].mxu0  ;;  %2607 = vmatmul.mubr.bf16.vlgmr.msra.gmra.mrb[64].mxu1 %v10414_v4  ;;  %2675 = vmatprep.subr.bf16.mxu0 %v1865_v37  ;;  %v13545_v2 = vpop.permute.xlu1 %9003 }
 0x298   :  { %v2382_v52 = vpop.f32.mrb[47].mxu0  ;;  %19299 = vst [vmem:[#allocation13_spill] sm:$0xff] %v13545_v2  ;;  %2676 = vmatpush1.bf16.msra.mxu0 %v1864_v17  ;;  %7551 = vmatprep.mubr.msk.bf16.mxu1 %vm2085_vm12, %v10415_v49  ;;  %v9006_v54 = vunpack.i.h.bf16 %v13545_v2  ;;  %v18720_v10 = vunpack.i.l.bf16 %v13545_v2 }
 0x299   :  { %v10416_v52 = vld [vmem:[%s18535_s1 + $0x10] ss:$8 sps:$4 sm:$0xff]  }
 0x29a   :  { %v1512_v42 = vsel %vm1419_vm3, %v8965_v0, %v9006_v54 }
 0x29d   :  { %v13556_v25 = vpop.permute.xlu0 %9008  ;;  %v2385_v19 = vpop.f32.mrb[48].mxu0 }
 0x29e   :  { %v13554_v8 = vpop.permute.xlu1 %9013  ;;  %v18721_v13 = vunpack.i.l.bf16 %v13556_v25  ;;  %v9011_v17 = vunpack.i.h.bf16 %v13556_v25  ;;  %v2386_v31 = vpop.f32.mrb[49].mxu0  ;;  %v1497_v19 = vsel %vm1419_vm3, %v9001_v39, %v18720_v10 }
 0x29f   :  { %19300 = vst [vmem:[#allocation8_spill] sm:$0xff] %v13554_v8  ;;  %v9016_v37 = vunpack.i.h.bf16 %v13554_v8  ;;  %2615 = vmatmul.mubr.bf16.gmra.mrb[68].mxu1 %v10416_v52  ;;  %v2387_v0 = vpop.f32.mrb[50].mxu0  ;;  %v10417_v31 = vld [vmem:[%s18535_s1 + $0x24] ss:$8 sps:$4 sm:$0xff]  }
 0x2a0   :  { %v1513_v36 = vsel %vm1419_vm3, %v9006_v54, %v18721_v13  ;;  %7552 = vmatprep.mubr.msk.bf16.mxu1 %vm2085_vm12, %v10417_v31  ;;  %v2388_v43 = vpop.f32.mrb[51].mxu0  ;;  %v1880_v0 = vpack.c.bf16 %v1512_v42, %v1496_v16  ;;  %v1528_v14 = vsel %vm1419_vm3, %v8970_v32, %v9011_v17 }
 0x2a1   :  { %v1881_v57 = vpack.c.bf16 %v1513_v36, %v1497_v19  ;;  %v1544_v13 = vsel %vm1419_vm3, %v8975_v59, %v9016_v37  ;;  %v19303_v43 = vunpack.i.l.bf16 %v13554_v8  ;;  %v19330_v8 = vld [vmem:[#allocation16_spill] sm:$0xff] }
 0x2a2   :  { %v13581_v30 = vpop.permute.xlu0 %9018  ;;  %v13585_v54 = vpop.permute.xlu1 %1413  ;;  %v1896_v32 = vpack.c.bf16 %v1544_v13, %v1528_v14 }
 0x2a3   :  { %19301 = vst [vmem:[#allocation11_spill] sm:$0xff] %v13581_v30  ;;  %v9021_v10 = vunpack.i.h.bf16 %v13581_v30  ;;  %v18722_v41 = vunpack.i.l.bf16 %v13581_v30  ;;  %19302 = vst [vmem:[#allocation14_spill] sm:$0xff] %v13585_v54  ;;  %2677 = vmatprep.subr.bf16.mxu0 %v1881_v57  ;;  %v1529_v39 = vsel %vm1419_vm3, %v9011_v17, %v19303_v43  ;;  %v10418_v17 = vld [vmem:[%s18535_s1 + $0x20] ss:$8 sps:$4 sm:$0xff]  }
 0x2a4   :  { %2678 = vmatpush1.bf16.msra.mxu0 %v1880_v0 }
 0x2a5   :  { %v1561_v34 = vsel %vm1419_vm3, %v9021_v10, %v13585_v54  ;;  %v1545_v16 = vsel %vm1419_vm3, %v9016_v37, %v18722_v41  ;;  %v1560_v59 = vsel %vm1419_vm3, %v19304_v22, %v9021_v10  ;;  %v2391_v42 = vpop.f32.mrb[52].mxu0 }
 0x2a6   :  { %v1897_v1 = vpack.c.bf16 %v1545_v16, %v1529_v39  ;;  %v2392_v57 = vpop.f32.mrb[53].mxu0  ;;  %v1913_v19 = vpack.c.bf16 %v1561_v34, %v1561_v34  ;;  %v1912_v36 = vpack.c.bf16 %v1560_v59, %v1560_v59 }
 0x2a7   :  { %v2393_v0 = vpop.f32.mrb[54].mxu0  ;;  %2621 = vmatmul.mubr.bf16.gmra.mrb[72].mxu1 %v10418_v17 }
 0x2a8   :  { %2679 = vmatprep.subr.bf16.mxu0 %v1897_v1  ;;  %v2394_v43 = vpop.f32.mrb[55].mxu0  ;;  %7553 = vmatprep.mubr.msk.bf16.mxu1 %vm2085_vm12, %v12968_v23  ;;  %v2148_v7 = vsel %vm2110_vm2, %v1912_v36, 0 }
 0x2a9   :  { %2680 = vmatpush1.bf16.msra.mxu0 %v1896_v32 }
 0x2aa   :  { %7558 = vmatprep.subr.msk.bf16.mxu0 %vm2110_vm2, %v1913_v19 }
 0x2ad   :  { %2682 = vmatpush1.bf16.msra.mxu0 %v2148_v7  ;;  %v2397_v10 = vpop.f32.mrb[56].mxu0 }
 0x2ae   :  { %v2398_v13 = vpop.f32.mrb[57].mxu0 }
 0x2af   :  { %v2399_v37 = vpop.f32.mrb[58].mxu0  ;;  %2627 = vmatmul.mubr.bf16.gmra.mrb[76].mxu1 %v12977_v38 }
 0x2b0   :  { %2690 = vmatmul.mubr.bf16.vlgmr.msra.gmra.mrb[96].mxu0 %v10414_v4  ;;  %v2400_v14 = vpop.f32.mrb[59].mxu0  ;;  %7554 = vmatprep.mubr.msk.bf16.mxu1 %vm2085_vm12, %v19279_v24 }
 0x2b1   :  { %7560 = vmatprep.mubr.msk.bf16.mxu0 %vm2085_vm12, %v10415_v49 }
 0x2b3   :  { %v13615_v34 = vpop.permute.xlu0 %1950 }
 0x2b4   :  { %19305 = vst [vmem:[#allocation29_spill] sm:$0xff] %v13615_v34  ;;  %v13619_v39 = vadd.f32 %v13506_v35, %v13615_v34  ;;  %v13623_v16 = vadd.f32 %v13508_v48, %v13615_v34  ;;  %v13627_v4 = vadd.f32 %v13321_v45, %v13615_v34  ;;  %v13631_v22 = vadd.f32 %v13329_v20, %v13615_v34 }
 0x2b5   :  { %v2403_v42 = vpop.f32.mrb[60].mxu0 }
 0x2b6   :  { %v2827_v49 = vmax.f32 %v13619_v39, 0.0  ;;  %v2828_v59 = vmax.f32 %v13623_v16, 0.0  ;;  %v18730_v1 = vmax.f32 %v13627_v4, 0.0  ;;  %v18731_v35 = vmax.f32 %v13631_v22, 0.0  ;;  %v2404_v32 = vpop.f32.mrb[61].mxu0  ;;  %v13698_v42 = vld [vmem:[%s18534_s0 + $0x78] sm:$0xff] }
 0x2b7   :  { %v2405_v48 = vpop.f32.mrb[62].mxu0  ;;  %2633 = vmatmul.mubr.bf16.gmra.mrb[80].mxu1 %v19280_v60 }
 0x2b8   :  { %v9023_v45 = vpack.i.bf16 %v18731_v35, %v18730_v1  ;;  %2698 = vmatmul.mubr.bf16.gmra.mrb[100].mxu0 %v10416_v52  ;;  %v2406_v20 = vpop.f32.mrb[63].mxu0  ;;  %7555 = vmatprep.mubr.msk.bf16.mxu1 %vm2085_vm12, %v19281_v61  ;;  %v9033_v57 = vpack.i.bf16 %v2828_v59, %v2827_v49  ;;  %v18725_v52 = vmov 0.0  }
 0x2b9   :  { %7561 = vmatprep.mubr.msk.bf16.mxu0 %vm2085_vm12, %v10417_v31  ;;  %v19306_v31 = vld [vmem:[#allocation5_spill] sm:$0xff] }
 0x2ba   :  { %9024 = vrot.lane.b32.xlu1 %v9023_v45, %s10513_s10  ;;  %v13666_v19 = vadd.f32 %v19306_v31, %v13615_v34 }
 0x2bc   :  { %v2824_v0 = vmax.f32 %v13666_v19, 0.0 }
 0x2be   :  { %9034 = vrot.lane.b32.xlu1 %v9033_v57, %s10513_s10 }
 0x2bf   :  { %2639 = vmatmul.mubr.bf16.gmra.mrb[84].mxu1 %v13105_v53 }
 0x2c0   :  { %2704 = vmatmul.mubr.bf16.gmra.mrb[104].mxu0 %v10418_v17  ;;  %7556 = vmatprep.mubr.msk.bf16.mxu1 %vm2085_vm12, %v13119_v15 }
 0x2c1   :  { %7562 = vmatprep.mubr.msk.bf16.mxu0 %vm2085_vm12, %v12968_v23 }
 0x2c2   :  { %1095 = vrot.lane.b32.xlu1 %v18725_v52, %s10516_s15 }
 0x2c7   :  { %2645 = vmatmul.mubr.bf16.gmra.mrb[88].mxu1 %v13169_v21 }
 0x2c8   :  { %2710 = vmatmul.mubr.bf16.gmra.mrb[108].mxu0 %v12977_v38  ;;  %7557 = vmatprep.mubr.msk.bf16.mxu1 %vm2085_vm12, %v13182_v58 }
 0x2c9   :  { %7563 = vmatprep.mubr.msk.bf16.mxu0 %vm2085_vm12, %v19279_v24 }
 0x2cb   :  { %v2442_v36 = vpop.f32.mrb[32].mxu1 }
 0x2cc   :  { %v13669_v23 = vadd.f32 %v2442_v36, %v13615_v34  ;;  %v13672_v17 = vpop.f32.mrb[33].mxu1 }
 0x2cd   :  { %v2446_v43 = vpop.f32.mrb[34].mxu1 }
 0x2ce   :  { %v18735_v38 = vmax.f32 %v13669_v23, 0.0  ;;  %v2447_v7 = vpop.f32.mrb[35].mxu1 }
 0x2cf   :  { %2651 = vmatmul.mubr.bf16.gmra.mrb[92].mxu1 %v13249_v29 }
 0x2d0   :  { %2716 = vmatmul.mubr.bf16.gmra.mrb[112].mxu0 %v19280_v60  ;;  %7568 = vmatprep.mubr.msk.bf16.mxu1 %vm2085_vm12, %v13257_v33  ;;  %v9028_v24 = vpack.i.bf16 %v2824_v0, %v18735_v38 }
 0x2d1   :  { %7564 = vmatprep.mubr.msk.bf16.mxu0 %vm2085_vm12, %v19281_v61 }
 0x2d2   :  { %9029 = vrot.lane.b32.xlu0 %v9028_v24, %s10513_s10 }
 0x2d3   :  { %v2450_v10 = vpop.f32.mrb[36].mxu1 }
 0x2d4   :  { %v2451_v13 = vpop.f32.mrb[37].mxu1 }
 0x2d5   :  { %v2452_v37 = vpop.f32.mrb[38].mxu1 }
 0x2d6   :  { %226 = vrot.lane.b32.xlu0 %v18725_v52, %s10514_s11  ;;  %v2453_v60 = vpop.f32.mrb[39].mxu1 }
 0x2d8   :  { %2722 = vmatmul.mubr.bf16.gmra.mrb[116].mxu0 %v13105_v53  ;;  %v13702_v53 = vpack.i.bf16 %v18725_v52, %v13698_v42 }
 0x2d9   :  { %7565 = vmatprep.mubr.msk.bf16.mxu0 %vm2085_vm12, %v13119_v15 }
 0x2da   :  { %494 = vrot.lane.b32.xlu0 %v18725_v52, %s10518_s17 }
 0x2db   :  { %v2456_v33 = vpop.f32.mrb[40].mxu1 }
 0x2dc   :  { %v2457_v61 = vpop.f32.mrb[41].mxu1 }
 0x2dd   :  { %v2458_v14 = vpop.f32.mrb[42].mxu1 }
 0x2de   :  { %561 = vrot.lane.b32.xlu0 %v18725_v52, %s10519_s18  ;;  %v2459_v32 = vpop.f32.mrb[43].mxu1  ;;  %s10532_s18 = smov 122  }
 0x2e0   :  { %2728 = vmatmul.mubr.bf16.gmra.mrb[120].mxu0 %v13169_v21 }
 0x2e1   :  { %7566 = vmatprep.mubr.msk.bf16.mxu0 %vm2085_vm12, %v13182_v58 }
 0x2e2   :  { %9049 = vrot.lane.b32.xlu0 %v13702_v53, %s10520_s19 }
 0x2e3   :  { %v2462_v15 = vpop.f32.mrb[44].mxu1 }
 0x2e4   :  { %v2463_v45 = vpop.f32.mrb[45].mxu1 }
 0x2e5   :  { %v2464_v48 = vpop.f32.mrb[46].mxu1 }
 0x2e6   :  { %v2465_v20 = vpop.f32.mrb[47].mxu1 }
 0x2e8   :  { %2734 = vmatmul.mubr.bf16.gmra.mrb[124].mxu0 %v13249_v29 }
 0x2eb   :  { %v2468_v57 = vpop.f32.mrb[48].mxu1 }
 0x2ec   :  { %v2469_v31 = vpop.f32.mrb[49].mxu1 }
 0x2ed   :  { %v2470_v36 = vpop.f32.mrb[50].mxu1 }
 0x2ee   :  { %v2471_v43 = vpop.f32.mrb[51].mxu1 }
 0x2f4   :  { %v2474_v7 = vpop.f32.mrb[52].mxu1 }
 0x2f5   :  { %v2475_v24 = vpop.f32.mrb[53].mxu1 }
 0x2f6   :  { %v2476_v10 = vpop.f32.mrb[54].mxu1 }
 0x2f7   :  { %v2477_v21 = vpop.f32.mrb[55].mxu1 }
 0x2fc   :  { %v2480_v13 = vpop.f32.mrb[56].mxu1 }
 0x2fd   :  { %v2481_v37 = vpop.f32.mrb[57].mxu1 }
 0x2fe   :  { %v2482_v58 = vpop.f32.mrb[58].mxu1 }
 0x2ff   :  { %v2525_v60 = vpop.f32.mrb[64].mxu0  ;;  %v2483_v33 = vpop.f32.mrb[59].mxu1 }
 0x300   :  { %v2527_v61 = vpop.f32.mrb[65].mxu0 }
 0x301   :  { %v2529_v14 = vpop.f32.mrb[66].mxu0 }
 0x302   :  { %v2530_v32 = vpop.f32.mrb[67].mxu0 }
 0x306   :  { %v2486_v15 = vpop.f32.mrb[60].mxu1 }
 0x307   :  { %v2487_v45 = vpop.f32.mrb[61].mxu1 }
 0x308   :  { %v2488_v48 = vpop.f32.mrb[62].mxu1  ;;  %v2533_v29 = vpop.f32.mrb[68].mxu0 }
 0x309   :  { %v2489_v20 = vpop.f32.mrb[63].mxu1  ;;  %v2534_v57 = vpop.f32.mrb[69].mxu0 }
 0x30a   :  { %v2535_v31 = vpop.f32.mrb[70].mxu0 }
 0x30b   :  { %v2536_v36 = vpop.f32.mrb[71].mxu0 }
 0x310   :  { %v2539_v43 = vpop.f32.mrb[72].mxu0 }
 0x311   :  { %v2540_v7 = vpop.f32.mrb[73].mxu0 }
 0x312   :  { %v2541_v24 = vpop.f32.mrb[74].mxu0 }
 0x313   :  { %v2542_v10 = vpop.f32.mrb[75].mxu0 }
 0x318   :  { %v2545_v21 = vpop.f32.mrb[76].mxu0 }
 0x319   :  { %v2546_v13 = vpop.f32.mrb[77].mxu0 }
 0x31a   :  { %v2547_v37 = vpop.f32.mrb[78].mxu0 }
 0x31b   :  { %v2548_v58 = vpop.f32.mrb[79].mxu0 }
 0x31c   :  { %v13718_v58 = vadd.f32 %v13672_v17, %v13615_v34 }
 0x320   :  { %v2551_v33 = vpop.f32.mrb[80].mxu0 }
 0x321   :  { %v2552_v41 = vpop.f32.mrb[81].mxu0  ;;  %v13721_v33 = vadd.f32 %v2525_v60, %v13615_v34 }
 0x322   :  { %v2553_v14 = vpop.f32.mrb[82].mxu0 }
 0x323   :  { %v2554_v32 = vpop.f32.mrb[83].mxu0 }
 0x328   :  { %v2557_v15 = vpop.f32.mrb[84].mxu0 }
 0x329   :  { %v2558_v45 = vpop.f32.mrb[85].mxu0  ;;  %v18734_v15 = vmax.f32 %v13718_v58, 0.0 }
 0x32a   :  { %v2559_v48 = vpop.f32.mrb[86].mxu0  ;;  %v18727_v45 = vmax.f32 %v13721_v33, 0.0 }
 0x32b   :  { %v2560_v29 = vpop.f32.mrb[87].mxu0 }
 0x32c   :  { %v13710_v21 = vpop.permute.xlu1 %9024  ;;  %v9043_v60 = vpack.i.bf16 %v18727_v45, %v18734_v15  ;;  %v13757_v29 = vadd.f32 %v2527_v61, %v13615_v34 }
 0x32d   :  { %v18732_v41 = vunpack.i.l.bf16 %v13710_v21 }
 0x330   :  { %v2563_v20 = vpop.f32.mrb[88].mxu0 }
 0x331   :  { %v2564_v57 = vpop.f32.mrb[89].mxu0 }
 0x332   :  { %v2565_v31 = vpop.f32.mrb[90].mxu0 }
 0x333   :  { %v2566_v36 = vpop.f32.mrb[91].mxu0 }
 0x338   :  { %v2569_v43 = vpop.f32.mrb[92].mxu0 }
 0x339   :  { %v2570_v7 = vpop.f32.mrb[93].mxu0 }
 0x33a   :  { %v2571_v24 = vpop.f32.mrb[94].mxu0 }
 0x33b   :  { %v2572_v10 = vpop.f32.mrb[95].mxu0  ;;  %v18724_v24 = vmax.f32 %v13757_v29, 0.0 }
 0x344   :  { %v13712_v13 = vpop.permute.xlu0 %9029 }
 0x345   :  { %v18729_v37 = vunpack.i.h.bf16 %v13712_v13 }
 0x347   :  { %v2888_v14 = vsel %vm94_vm0, %v18729_v37, %v18732_v41 }
 0x348   :  { %v13730_v32 = vmax.f32 %v2824_v0, %v2888_v14  ;;  %v19307_v0 = vld [vmem:[#allocation26_spill] sm:$0xff] }
 0x349   :  { %v13754_v48 = vadd.f32 %v19307_v0, %v13615_v34 }
 0x34a   :  { %v9038_v17 = vpack.i.bf16 %v18725_v52, %v13730_v32 }
 0x34b   :  { %v18728_v7 = vmax.f32 %v13754_v48, 0.0 }
 0x34c   :  { %9039 = vrot.lane.b32.xlu1 %v9038_v17, %s10515_s14 }
 0x34d   :  { %v9063_v14 = vpack.i.bf16 %v18724_v24, %v18728_v7 }
 0x350   :  { %9044 = vrot.lane.b32.xlu1 %v9043_v60, %s10513_s10 }
 0x354   :  { %427 = vrot.lane.b32.xlu1 %v18725_v52, %s10517_s16 }
 0x358   :  { %9054 = vrot.lane.b32.xlu1 %v13702_v53, %s10521_s20  ;;  %s10533_s20 = smov 66  }
 0x35c   :  { %9074 = vrot.lane.b32.xlu1 %v13702_v53, %s10522_s21  ;;  %s10534_s21 = smov 58  }
 0x360   :  { %9084 = vrot.lane.b32.xlu1 %v13702_v53, %s10525_s26  ;;  %s10535_s26 = smov 120  }
 0x364   :  { %9094 = vrot.lane.b32.xlu1 %v13702_v53, %s10527_s28 }
 0x36a   :  { %v2608_v19 = vpop.f32.mrb[64].mxu1 }
 0x36b   :  { %v13760_v20 = vadd.f32 %v2608_v19, %v13615_v34  ;;  %v13762_v57 = vpop.f32.mrb[65].mxu1 }
 0x36c   :  { %v2612_v31 = vpop.f32.mrb[66].mxu1 }
 0x36d   :  { %v18723_v36 = vmax.f32 %v13760_v20, 0.0  ;;  %v2613_v43 = vpop.f32.mrb[67].mxu1  ;;  %v13778_v31 = vpop.permute.xlu1 %9034 }
 0x36f   :  { %v9058_v10 = vpack.i.bf16 %v18725_v52, %v18723_v36 }
 0x371   :  { %9059 = vrot.lane.b32.xlu0 %v9058_v10, %s10513_s10  ;;  %v9037_v10 = vunpack.i.h.bf16 %v13778_v31 }
 0x372   :  { %v2616_v61 = vpop.f32.mrb[68].mxu1 }
 0x373   :  { %v2617_v17 = vpop.f32.mrb[69].mxu1  ;;  %v18736_v61 = vunpack.i.l.bf16 %v13712_v13 }
 0x374   :  { %v2618_v60 = vpop.f32.mrb[70].mxu1 }
 0x375   :  { %9064 = vrot.lane.b32.xlu0 %v9063_v14, %s10513_s10  ;;  %v2619_v19 = vpop.f32.mrb[71].mxu1  ;;  %v18733_v60 = vunpack.i.l.bf16 %v13778_v31 }
 0x376   :  { %v2892_v19 = vsel %vm94_vm0, %v9037_v10, %v18736_v61 }
 0x377   :  { %v2891_v14 = vsel %vm94_vm0, %v18733_v60, %v9037_v10 }
 0x379   :  { %9069 = vrot.lane.b32.xlu0 %v13702_v53, %s10523_s22 }
 0x37a   :  { %v2622_v0 = vpop.f32.mrb[72].mxu1 }
 0x37b   :  { %v2623_v43 = vpop.f32.mrb[73].mxu1 }
 0x37c   :  { %v2624_v36 = vpop.f32.mrb[74].mxu1  ;;  %v13797_v43 = vmax.f32 %v2827_v49, %v2891_v14 }
 0x37d   :  { %9079 = vrot.lane.b32.xlu0 %v13702_v53, %s10524_s25  ;;  %v2625_v17 = vpop.f32.mrb[75].mxu1 }
 0x37e   :  { %v13801_v17 = vmax.f32 %v2828_v59, %v2892_v19 }
 0x381   :  { %9089 = vrot.lane.b32.xlu0 %v13702_v53, %s10526_s27 }
 0x382   :  { %v2628_v36 = vpop.f32.mrb[76].mxu1 }
 0x383   :  { %v13793_v0 = vpop.f32.mrb[96].mxu0  ;;  %v2629_v52 = vpop.f32.mrb[77].mxu1  ;;  %v9113_v36 = vpack.i.bf16 %v13801_v17, %v13797_v43 }
 0x384   :  { %v13803_v24 = vpop.f32.mrb[97].mxu0  ;;  %v2630_v7 = vpop.f32.mrb[78].mxu1 }
 0x385   :  { %19308 = vst [vmem:[#allocation9_spill] sm:$0xff] %v13803_v24  ;;  %v2695_v45 = vpop.f32.mrb[98].mxu0  ;;  %9099 = vrot.lane.b32.xlu0 %v13702_v53, %s10528_s8  ;;  %v2631_v37 = vpop.f32.mrb[79].mxu1 }
 0x386   :  { %v2696_v10 = vpop.f32.mrb[99].mxu0 }
 0x389   :  { %9114 = vrot.lane.b32.xlu0 %v9113_v36, %s10515_s14 }
 0x38a   :  { %v2634_v39 = vpop.f32.mrb[80].mxu1 }
 0x38b   :  { %v2699_v49 = vpop.f32.mrb[100].mxu0  ;;  %v2635_v16 = vpop.f32.mrb[81].mxu1 }
 0x38c   :  { %v2700_v59 = vpop.f32.mrb[101].mxu0  ;;  %v2636_v14 = vpop.f32.mrb[82].mxu1 }
 0x38d   :  { %v2701_v19 = vpop.f32.mrb[102].mxu0  ;;  %v2637_v1 = vpop.f32.mrb[83].mxu1 }
 0x38e   :  { %v2702_v52 = vpop.f32.mrb[103].mxu0 }
 0x392   :  { %v2640_v45 = vpop.f32.mrb[84].mxu1 }
 0x393   :  { %v2705_v7 = vpop.f32.mrb[104].mxu0  ;;  %v2641_v35 = vpop.f32.mrb[85].mxu1 }
 0x394   :  { %v2706_v41 = vpop.f32.mrb[105].mxu0  ;;  %v2642_v53 = vpop.f32.mrb[86].mxu1 }
 0x395   :  { %v2707_v10 = vpop.f32.mrb[106].mxu0  ;;  %v2643_v37 = vpop.f32.mrb[87].mxu1 }
 0x396   :  { %v2708_v60 = vpop.f32.mrb[107].mxu0 }
 0x39a   :  { %v2646_v15 = vpop.f32.mrb[88].mxu1 }
 0x39b   :  { %v2711_v38 = vpop.f32.mrb[108].mxu0  ;;  %v2647_v61 = vpop.f32.mrb[89].mxu1 }
 0x39c   :  { %v2712_v36 = vpop.f32.mrb[109].mxu0  ;;  %v2648_v39 = vpop.f32.mrb[90].mxu1 }
 0x39d   :  { %v2713_v49 = vpop.f32.mrb[110].mxu0  ;;  %v2649_v16 = vpop.f32.mrb[91].mxu1 }
 0x39e   :  { %v2714_v59 = vpop.f32.mrb[111].mxu0  ;;  %v13810_v49 = vpop.permute.xlu1 %1095 }
 0x3a2   :  { %v2652_v14 = vpop.f32.mrb[92].mxu1 }
 0x3a3   :  { %v2717_v19 = vpop.f32.mrb[112].mxu0  ;;  %v2653_v1 = vpop.f32.mrb[93].mxu1 }
 0x3a4   :  { %v2718_v52 = vpop.f32.mrb[113].mxu0  ;;  %v2654_v45 = vpop.f32.mrb[94].mxu1 }
 0x3a5   :  { %v2719_v7 = vpop.f32.mrb[114].mxu0  ;;  %v2655_v35 = vpop.f32.mrb[95].mxu1 }
 0x3a6   :  { %v2720_v41 = vpop.f32.mrb[115].mxu0  ;;  %v19309_v7 = vunpack.i.l.bf16 %v13712_v13 }
 0x3ab   :  { %v2723_v53 = vpop.f32.mrb[116].mxu0 }
 0x3ac   :  { %v2724_v10 = vpop.f32.mrb[117].mxu0  ;;  %v19310_v53 = vmax.f32 %v13669_v23, 0.0  ;;  %v9027_v23 = vunpack.i.h.bf16 %v13710_v21 }
 0x3ad   :  { %v2725_v37 = vpop.f32.mrb[118].mxu0 }
 0x3ae   :  { %v2726_v60 = vpop.f32.mrb[119].mxu0  ;;  %v19311_v37 = vmax.f32 %v13718_v58, 0.0  ;;  %v19312_v58 = vunpack.i.l.bf16 %v13778_v31  ;;  %v13856_v31 = vadd.f32 %v13793_v0, %v13615_v34  ;;  %v13868_v0 = vadd.f32 %v13762_v57, %v13615_v34 }
 0x3af   :  { %v19326_v34 = vmov 0.0  }
 0x3b0   :  { %19318 = vst [vmem:[#allocation31_spill] sm:$0xff] %v13856_v31 }
 0x3b3   :  { %v2729_v15 = vpop.f32.mrb[120].mxu0 }
 0x3b4   :  { %v2730_v38 = vpop.f32.mrb[121].mxu0 }
 0x3b5   :  { %v2731_v61 = vpop.f32.mrb[122].mxu0  ;;  %v13829_v38 = vpop.permute.xlu0 %226 }
 0x3b6   :  { %v2732_v36 = vpop.f32.mrb[123].mxu0 }
 0x3b9   :  { %v13831_v61 = vpop.permute.xlu0 %494 }
 0x3bb   :  { %v2735_v39 = vpop.f32.mrb[124].mxu0 }
 0x3bc   :  { %v2736_v16 = vpop.f32.mrb[125].mxu0 }
 0x3bd   :  { %v2737_v59 = vpop.f32.mrb[126].mxu0  ;;  %v13833_v36 = vpop.permute.xlu0 %561 }
 0x3be   :  { %v2738_v14 = vpop.f32.mrb[127].mxu0  ;;  %v13812_v19 = vpop.permute.xlu1 %9039  ;;  %v2890_v59 = vsel %vm94_vm0, %v9027_v23, %v19312_v58 }
 0x3c1   :  { %v13835_v39 = vpop.permute.xlu0 %9049 }
 0x3c2   :  { %v9045_v1 = vpop.permute.xlu1 %9044 }
 0x3c3   :  { %v9047_v52 = vunpack.i.h.bf16 %v9045_v1  ;;  %v9046_v45 = vunpack.i.l.bf16 %v9045_v1  ;;  %v19314_v1 = vunpack.i.l.bf16 %v13710_v21 }
 0x3c5   :  { %v2893_v35 = vsel %vm94_vm0, %v19309_v7, %v9046_v45  ;;  %v2894_v41 = vsel %vm94_vm0, %v9046_v45, %v9047_v52  ;;  %v2889_v45 = vsel %vm94_vm0, %v19314_v1, %v9027_v23  ;;  %v19315_v7 = vld [vmem:[#allocation23_spill] sm:$0xff]  ;;  %v10420_v1 = vld [vmem:[%s18534_s0 + $0x70] sm:$0xff]  ;;  %s10531_s0 = smov 56  }
 0x3c6   :  { %v13820_v10 = vmax.f32 %v19310_v53, %v2893_v35  ;;  %v13824_v60 = vmax.f32 %v19311_v37, %v2894_v41  ;;  %v19316_v35 = vunpack.i.h.bf16 %v19315_v7  ;;  %v19317_v53 = vmax.f32 %v13631_v22, 0.0  ;;  %v19319_v7 = vld [vmem:[#allocation21_spill] sm:$0xff] }
 0x3c7   :  { %v19320_v22 = vmax.f32 %v13627_v4, 0.0  ;;  %v18738_v4 = vmax.f32 %v13868_v0, 0.0 }
 0x3c8   :  { %v9123_v15 = vpack.i.bf16 %v13824_v60, %v13820_v10  ;;  %v13852_v37 = vmax.f32 %v19317_v53, %v2890_v59  ;;  %v19321_v53 = vunpack.i.h.bf16 %v13712_v13 }
 0x3c9   :  { %v2921_v59 = vmax.f32 %v19320_v22, %v2889_v45  ;;  %v19322_v45 = vmax.f32 %v13754_v48, 0.0 }
 0x3ca   :  { %9124 = vrot.lane.b32.xlu0 %v9123_v15, %s10515_s14 }
 0x3e3   :  { %v9060_v16 = vpop.permute.xlu0 %9059 }
 0x3e4   :  { %v13841_v14 = vunpack.i.h.bf16 %v9060_v16 }
 0x3e6   :  { %19313 = vst [vmem:[#allocation15_spill] sm:$0xff] %v13841_v14  ;;  %v110_v41 = vsel %vm94_vm0, %v19316_v35, %v13841_v14  ;;  %v1722_v35 = vpack.c.bf16 %v19319_v7, %v10420_v1 }
 0x3e7   :  { %v9065_v15 = vpop.permute.xlu0 %9064  ;;  %v9103_v58 = vpack.i.bf16 %v13841_v14, %v110_v41  ;;  %v1723_v21 = vpack.c.bf16 %v110_v41, %v13698_v42  ;;  %v18737_v42 = vmax.f32 %v13856_v31, 0.0  ;;  %v9108_v41 = vpack.i.bf16 %v13852_v37, %v2921_v59 }
 0x3e8   :  { %v9067_v24 = vunpack.i.h.bf16 %v9065_v15  ;;  %v9066_v23 = vunpack.i.l.bf16 %v9065_v15 }
 0x3e9   :  { %2740 = vmatprep.subr.bf16.mxu1 %v1723_v21  ;;  %9104 = vrot.lane.b32.xlu1 %v9103_v58, %s10528_s8  ;;  %v9118_v57 = vpack.i.bf16 %v18737_v42, %v18738_v4  ;;  %v19323_v21 = vmax.f32 %v13721_v33, 0.0 }
 0x3ea   :  { %2741 = vmatpush1.bf16.msra.mxu1 %v1722_v35  ;;  %v2887_v15 = vsel %vm94_vm0, %v9066_v23, %v19321_v53  ;;  %v2895_v1 = vsel %vm94_vm0, %v9047_v52, %v9067_v24  ;;  %v428_v23 = vpop.permute.xlu1 %427 }
 0x3eb   :  { %v13885_v58 = vmax.f32 %v19322_v45, %v2887_v15  ;;  %v13889_v13 = vmax.f32 %v19323_v21, %v2895_v1  ;;  %v9061_v45 = vunpack.i.l.bf16 %v9060_v16  ;;  %v19327_v16 = vmax.f32 %v13757_v29, 0.0 }
 0x3ed   :  { %9109 = vrot.lane.b32.xlu1 %v9108_v41, %s10515_s14  ;;  %v9128_v52 = vpack.i.bf16 %v13889_v13, %v13885_v58  ;;  %v13903_v41 = vpop.permute.xlu0 %9069  ;;  %v2896_v4 = vsel %vm94_vm0, %v9067_v24, %v9061_v45 }
 0x3ee   :  { %v13895_v7 = vpop.permute.xlu1 %9054  ;;  %v13925_v30 = vmax.f32 %v19327_v16, %v2896_v4  ;;  %v19336_v16 = vunpack.i.h.bf16 %v13132_v3 }
 0x3f1   :  { %9119 = vrot.lane.b32.xlu1 %v9118_v57, %s10513_s10  ;;  %v13907_v53 = vpop.permute.xlu0 %9079 }
 0x3f2   :  { %v13897_v35 = vpop.permute.xlu1 %9074 }
 0x3f5   :  { %9129 = vrot.lane.b32.xlu1 %v9128_v52, %s10515_s14  ;;  %v13916_v31 = vpop.permute.xlu0 %9089 }
 0x3f6   :  { %v13899_v22 = vpop.permute.xlu1 %9084 }
 0x3f9   :  { %v13943_v29 = vpop.permute.xlu0 %9099 }
 0x3fa   :  { %v13901_v48 = vpop.permute.xlu1 %9094 }
 0x45b   :  { %v13905_v33 = vpop.permute.xlu1 %9104 }
 0x45f   :  { %v9110_v15 = vpop.permute.xlu1 %9109 }
 0x460   :  { %v9112_v1 = vunpack.i.h.bf16 %v9110_v15  ;;  %v9111_v57 = vunpack.i.l.bf16 %v9110_v15 }
 0x462   :  { %v2985_v21 = vsel %vm19324_vm7, %v9111_v57, %v9112_v1 }
 0x463   :  { %v13910_v52 = vmax.f32 %v2921_v59, %v2985_v21  ;;  %v13912_v42 = vpop.permute.xlu1 %9119  ;;  %v19328_v59 = vmax.f32 %v13760_v20, 0.0 }
 0x464   :  { %19325 = vst [vmem:[#allocation30_spill] sm:$0xff] %v13912_v42  ;;  %v9121_v14 = vunpack.i.l.bf16 %v13912_v42 }
 0x465   :  { %v9138_v54 = vpack.i.bf16 %v13910_v52, %v19326_v34  ;;  %v19331_v34 = vunpack.i.h.bf16 %v19330_v8  ;;  %v9041_v8 = vunpack.i.l.bf16 %v13812_v19 }
 0x466   :  { %v2897_v15 = vsel %vm94_vm0, %v9061_v45, %v9121_v14  ;;  %v13941_v45 = vunpack.i.h.bf16 %v13812_v19 }
 0x467   :  { %v13929_v21 = vmax.f32 %v19328_v59, %v2897_v15  ;;  %9139 = vrot.lane.b32.xlu1 %v9138_v54, %s10512_s9  ;;  %v13938_v2 = vsel %vm19332_vm8, %v19331_v34, %v13829_v38  ;;  %v19334_v54 = vunpack.i.h.bf16 %v13070_v56  ;;  %v9115_v34 = vpop.permute.xlu0 %9114  ;;  %v13961_v59 = vsel %vm429_vm4, %v19336_v16, %v428_v23  ;;  %vm19337_vm8 = vmmov %vm19324_vm7 }
 0x468   :  { %19333 = vst [vmem:[#allocation18_spill] sm:$0xff] %v13941_v45  ;;  %v9148_v20 = vpack.i.bf16 %v13829_v38, %v13938_v2  ;;  %v2984_v38 = vsel %vm19324_vm7, %v9041_v8, %v9111_v57  ;;  %v9117_v56 = vunpack.i.h.bf16 %v9115_v34  ;;  %vm19340_vm4 = vmmov %vm19324_vm7 }
 0x469   :  { %19329 = vst [vmem:[#allocation6_spill] sm:$0xff] %v13929_v21  ;;  %v9133_v24 = vpack.i.bf16 %v13929_v21, %v13925_v30  ;;  %v13952_v4 = vsel %vm19335_vm11, %v19334_v54, %v13941_v45  ;;  %v9163_v54 = vpack.i.bf16 %v428_v23, %v13961_v59  ;;  %vm19338_vm11 = vmmov %vm19324_vm7  ;;  %v19357_v21 = vld [vmem:[#allocation7_spill] sm:$0xff] }
 0x46a   :  { %v9158_v15 = vpack.i.bf16 %v13941_v45, %v13952_v4  ;;  %vm19342_vm7 = vmmov %vm19340_vm4 }
 0x46b   :  { %9134 = vrot.lane.b32.xlu0 %v9133_v24, %s10515_s14  ;;  %v9116_v24 = vunpack.i.l.bf16 %v9115_v34  ;;  %v9125_v23 = vpop.permute.xlu0 %9124 }
 0x46d   :  { %v2986_v19 = vsel %vm19337_vm8, %v9112_v1, %v9116_v24  ;;  %v2987_v3 = vsel %vm19338_vm11, %v9116_v24, %v9117_v56  ;;  %v9126_v1 = vunpack.i.l.bf16 %v9125_v23  ;;  %v9130_v24 = vpop.permute.xlu1 %9129  ;;  %vm19343_vm8 = vmmov %vm19340_vm4 }
 0x46e   :  { %v13973_v16 = vmax.f32 %v13852_v37, %v2986_v19  ;;  %v13980_v34 = vmax.f32 %v13797_v43, %v2987_v3  ;;  %v9127_v3 = vunpack.i.h.bf16 %v9125_v23  ;;  %v19345_v23 = vmax.f32 %v13868_v0, 0.0  ;;  %vm19347_vm11 = vmmov %vm19340_vm4 }
 0x46f   :  { %9149 = vrot.lane.b32.xlu0 %v9148_v20, %s10528_s8  ;;  %v13967_v20 = vmax.f32 %v13730_v32, %v2984_v38 }
 0x470   :  { %19339 = vst [vmem:[#allocation22_spill] sm:$0xff] %v13980_v34  ;;  %v9188_v32 = vpack.i.bf16 %v13980_v34, %v13973_v16 }
 0x471   :  { %v13977_v57 = vpack.i.bf16 %v13910_v52, %v13967_v20  ;;  %v9203_v37 = vpack.i.bf16 %v13967_v20, %v13980_v34 }
 0x473   :  { %9159 = vrot.lane.b32.xlu0 %v9158_v15, %s10528_s8  ;;  %v2988_v15 = vsel %vm19340_vm4, %v9117_v56, %v9126_v1  ;;  %v9131_v56 = vunpack.i.l.bf16 %v9130_v24  ;;  %vm19353_vm4 = vcmask 1014784  }
 0x474   :  { %v13992_v43 = vmax.f32 %v13801_v17, %v2988_v15 }
 0x475   :  { %v2983_v17 = vsel %vm19342_vm7, %v9131_v56, %v9041_v8  ;;  %v2989_v8 = vsel %vm19343_vm8, %v9126_v1, %v9127_v3  ;;  %vm19354_vm7 = vmmov %vm19353_vm4 }
 0x476   :  { %19341 = vst [vmem:[#allocation3_spill] sm:$0xff] %v13992_v43  ;;  %v13997_v38 = vpack.i.bf16 %v13992_v43, %v13980_v34 }
 0x477   :  { %9164 = vrot.lane.b32.xlu0 %v9163_v54, %s10528_s8  ;;  %v14009_v54 = vmax.f32 %v13885_v58, %v2983_v17 }
 0x479   :  { %v9268_v19 = vpack.i.bf16 %v13973_v16, %v14009_v54 }
 0x47b   :  { %9184 = vrot.lane.b32.xlu0 %v13977_v57, %s10531_s0 }
 0x47f   :  { %9189 = vrot.lane.b32.xlu0 %v9188_v32, %s10512_s9  ;;  %v18747_v32 = vunpack.i.h.bf16 %v13912_v42 }
 0x481   :  { %v2898_v58 = vsel %vm94_vm0, %v9121_v14, %v18747_v32 }
 0x482   :  { %v14031_v15 = vmax.f32 %v19345_v23, %v2898_v58 }
 0x483   :  { %9204 = vrot.lane.b32.xlu0 %v9203_v37, %s10520_s19 }
 0x484   :  { %19346 = vst [vmem:[#allocation28_spill] sm:$0xff] %v14031_v15 }
 0x487   :  { %9214 = vrot.lane.b32.xlu0 %v9203_v37, %s10532_s18  ;;  %v14027_v37 = vmax.f32 %v13820_v10, %v2989_v8  ;;  %v9132_v10 = vunpack.i.h.bf16 %v9130_v24  ;;  %v14062_v24 = vunpack.i.h.bf16 %v13835_v39  ;;  %v19351_v8 = vld [vmem:[#allocation10_spill] sm:$0xff] }
 0x488   :  { %v19352_v58 = vunpack.i.h.bf16 %v19351_v8 }
 0x489   :  { %19344 = vst [vmem:[#allocation2_spill] sm:$0xff] %v14027_v37  ;;  %v14037_v1 = vpack.i.bf16 %v14027_v37, %v13992_v43  ;;  %v14043_v14 = vpack.i.bf16 %v13967_v20, %v14027_v37  ;;  %v2990_v0 = vsel %vm19347_vm11, %v9127_v3, %v9132_v10  ;;  %19348 = vst [vmem:[#allocation20_spill] sm:$0xff] %v14062_v24  ;;  %v9051_v3 = vunpack.i.l.bf16 %v13835_v39 }
 0x48a   :  { %v14051_v56 = vmax.f32 %v13824_v60, %v2990_v0  ;;  %v1112_v39 = vsel %vm1097_vm6, %v13098_v6, %v13810_v49  ;;  %vm19355_vm6 = vmmov %vm19343_vm8  ;;  %vm19370_vm11 = vcmask 506880  }
 0x48b   :  { %9224 = vrot.lane.b32.xlu0 %v13997_v38, %s10523_s22  ;;  %v311_v0 = vsel %vm19353_vm4, %v9051_v3, %v14062_v24  ;;  %v310_v8 = vsel %vm19354_vm7, %v13240_v11, %v9051_v3  ;;  %v9057_v24 = vunpack.i.h.bf16 %v13895_v7  ;;  %v9153_v11 = vpack.i.bf16 %v13810_v49, %v1112_v39  ;;  %vm19372_vm7 = vmmov %vm19370_vm11 }
 0x48c   :  { %v14057_v17 = vpack.i.bf16 %v14051_v56, %v14009_v54 }
 0x48f   :  { %9234 = vrot.lane.b32.xlu0 %v13997_v38, %s10533_s20 }
 0x493   :  { %9244 = vrot.lane.b32.xlu0 %v13997_v38, %s10524_s25 }
 0x497   :  { %9254 = vrot.lane.b32.xlu0 %v13997_v38, %s10526_s27 }
 0x49b   :  { %9264 = vrot.lane.b32.xlu0 %v13997_v38, %s10534_s21 }
 0x49f   :  { %9269 = vrot.lane.b32.xlu0 %v9268_v19, %s10535_s26 }
 0x4a3   :  { %9274 = vrot.lane.b32.xlu0 %v9268_v19, %s10531_s0 }
 0x4a7   :  { %3576 = vrot.lane.b32.xlu0 %v13980_v34, %s10531_s0 }
 0x4ab   :  { %2973 = vrot.lane.b32.xlu0 %v14031_v15, %s10515_s14 }
 0x4af   :  { %9294 = vrot.lane.b32.xlu0 %v14037_v1, %s10532_s18 }
 0x4b3   :  { %9299 = vrot.lane.b32.xlu0 %v14043_v14, %s10523_s22 }
 0x4b7   :  { %9304 = vrot.lane.b32.xlu0 %v14043_v14, %s10524_s25 }
 0x4bb   :  { %9314 = vrot.lane.b32.xlu0 %v14043_v14, %s10534_s21 }
 0x4bf   :  { %9329 = vrot.lane.b32.xlu0 %v14057_v17, %s10532_s18 }
 0x4d9   :  { %v14064_v19 = vpop.permute.xlu1 %9139 }
 0x4da   :  { %19349 = vst [vmem:[#allocation25_spill] sm:$0xff] %v14064_v19  ;;  %v14068_v60 = vunpack.i.l.bf16 %v14064_v19 }
 0x4dc   :  { %19350 = vst [vmem:[#allocation24_spill] sm:$0xff] %v14068_v60  ;;  %v177_v23 = vsel %vm161_vm1, %v19352_v58, %v14068_v60  ;;  %v1755_v58 = vpack.c.bf16 %v13952_v4, %v311_v0  ;;  %v19360_v4 = vunpack.i.h.bf16 %v13134_v62  ;;  %v9071_v0 = vunpack.i.l.bf16 %v13903_v41 }
 0x4dd   :  { %v14076_v32 = vpop.permute.xlu0 %9134  ;;  %v9143_v45 = vpack.i.bf16 %v14068_v60, %v177_v23  ;;  %v1739_v15 = vpack.c.bf16 %v13938_v2, %v177_v23  ;;  %v9056_v2 = vunpack.i.l.bf16 %v13895_v7  ;;  %v19356_v60 = vld [vmem:[#allocation17_spill] sm:$0xff] }
 0x4de   :  { %v18765_v42 = vunpack.i.h.bf16 %v14076_v32  ;;  %v9136_v34 = vunpack.i.l.bf16 %v14076_v32  ;;  %v19358_v19 = vpack.c.bf16 %v19356_v60, %v19357_v21  ;;  %v512_v7 = vsel %vm496_vm5, %v19360_v4, %v13831_v61 }
 0x4df   :  { %9144 = vrot.lane.b32.xlu1 %v9143_v45, %s10528_s8  ;;  %2742 = vmatprep.subr.bf16.mxu1 %v1739_v15  ;;  %v19361_v15 = vld [vmem:[#allocation12_spill] sm:$0xff]  ;;  %v1771_v21 = vpack.c.bf16 %v512_v7, %v13961_v59  ;;  %v646_v62 = vsel %vm630_vm9, %v9056_v2, %v9057_v24  ;;  %vm19365_vm5 = vcmask 760832   ;;  %v9076_v60 = vunpack.i.l.bf16 %v13897_v35 }
 0x4e0   :  { %v2991_v23 = vsel %vm19343_vm8, %v9132_v10, %v9136_v34  ;;  %v2992_v6 = vsel %vm19355_vm6, %v9136_v34, %v18765_v42  ;;  %2743 = vmatpush1.bf16.msra.mxu1 %v19358_v19  ;;  %v1754_v10 = vpack.c.bf16 %v19361_v15, %v310_v8  ;;  %v14118_v34 = vunpack.i.h.bf16 %v13903_v41  ;;  %vm19392_vm6 = vmmov %vm19372_vm7 }
 0x4e1   :  { %v14100_v45 = vmax.f32 %v13889_v13, %v2991_v23  ;;  %2744 = vmatprep.subr.bf16.mxu1 %v1755_v58  ;;  %v14108_v3 = vmax.f32 %v13925_v30, %v2992_v6  ;;  %v9077_v13 = vunpack.i.h.bf16 %v13897_v35  ;;  %v9168_v19 = vpack.i.bf16 %v13831_v61, %v512_v7 }
 0x4e2   :  { %19363 = vst [vmem:[#allocation4_spill] sm:$0xff] %v14118_v34  ;;  %v19364_v30 = vunpack.i.h.bf16 %v13160_v26  ;;  %v645_v39 = vsel %vm630_vm9, %v13326_v47, %v9056_v2  ;;  %v9087_v8 = vunpack.i.h.bf16 %v13899_v22  ;;  %v14139_v26 = vunpack.i.h.bf16 %v13907_v53 }
 0x4e3   :  { %19359 = vst [vmem:[#allocation19_spill] sm:$0xff] %v14100_v45  ;;  %19362 = vst [vmem:[#allocation27_spill] sm:$0xff] %v14108_v3  ;;  %9154 = vrot.lane.b32.xlu1 %v9153_v11, %s10528_s8  ;;  %v14114_v49 = vpack.i.bf16 %v14100_v45, %v14051_v56  ;;  %v14135_v61 = vpack.i.bf16 %v14108_v3, %v14100_v45  ;;  %v19367_v35 = vpack.c.bf16 %v13175_v27, %v13153_v46  ;;  %vm19368_vm9 = vcmask 515072  }
 0x4e4   :  { %2745 = vmatpush1.bf16.msra.mxu1 %v1754_v10  ;;  %v579_v59 = vsel %vm19365_vm5, %v19364_v30, %v13833_v36  ;;  %19366 = vst [vmem:[#allocation5_spill] sm:$0xff] %v14139_v26  ;;  %v713_v41 = vsel %vm697_vm10, %v9071_v0, %v14118_v34  ;;  %v780_v47 = vsel %vm19368_vm9, %v9076_v60, %v9077_v13  ;;  %v9086_v2 = vunpack.i.l.bf16 %v13899_v22  ;;  %vm19371_vm4 = vmmov %vm19368_vm9 }
 0x4e5   :  { %2746 = vmatprep.subr.bf16.mxu1 %v1771_v21  ;;  %9349 = vrot.lane.b32.xlu0 %v14114_v49, %s10512_s9  ;;  %v1787_v24 = vpack.c.bf16 %v646_v62, %v579_v59  ;;  %v9173_v58 = vpack.i.bf16 %v13833_v36, %v579_v59  ;;  %v9081_v23 = vunpack.i.l.bf16 %v13907_v53  ;;  %v1786_v6 = vpack.c.bf16 %v645_v39, %v13213_v12  ;;  %vm19394_vm5 = vmmov %vm19392_vm6 }
 0x4e6   :  { %v9097_v46 = vunpack.i.h.bf16 %v13901_v48  ;;  %v712_v27 = vsel %vm697_vm10, %v13368_v40, %v9071_v0  ;;  %v1803_v11 = vpack.c.bf16 %v780_v47, %v713_v41  ;;  %v14158_v36 = vunpack.i.h.bf16 %v13916_v31 }
 0x4e7   :  { %9169 = vrot.lane.b32.xlu1 %v9168_v19, %s10528_s8  ;;  %v847_v4 = vsel %vm19370_vm11, %v9081_v23, %v14139_v26  ;;  %v914_v22 = vsel %vm898_vm14, %v9086_v2, %v9087_v8  ;;  %v779_v12 = vsel %vm19371_vm4, %v13381_v63, %v9076_v60  ;;  %v9096_v53 = vunpack.i.l.bf16 %v13901_v48 }
 0x4e8   :  { %2747 = vmatpush1.bf16.msra.mxu1 %v19367_v35  ;;  %19369 = vst [vmem:[#allocation26_spill] sm:$0xff] %v14158_v36  ;;  %v9091_v40 = vunpack.i.l.bf16 %v13916_v31  ;;  %v1802_v7 = vpack.c.bf16 %v779_v12, %v712_v27  ;;  %v846_v15 = vsel %vm19372_vm7, %v13416_v18, %v9081_v23  ;;  %v1819_v10 = vpack.c.bf16 %v914_v22, %v847_v4 }
 0x4e9   :  { %2748 = vmatprep.subr.bf16.mxu1 %v1787_v24  ;;  %9354 = vrot.lane.b32.xlu0 %v14135_v61, %s10520_s19  ;;  %v1048_v21 = vsel %vm1032_vm13, %v9096_v53, %v9097_v46  ;;  %v9102_v63 = vunpack.i.h.bf16 %v13943_v29  ;;  %v9107_v48 = vunpack.i.h.bf16 %v13905_v33  ;;  %v9106_v13 = vunpack.i.l.bf16 %v13905_v33 }
 0x4ea   :  { %v981_v31 = vsel %vm965_vm15, %v9091_v40, %v14158_v36  ;;  %v913_v62 = vsel %vm898_vm14, %v13420_v28, %v9086_v2  ;;  %v9193_v18 = vpack.i.bf16 %v13992_v43, %v13967_v20  ;;  %v980_v30 = vsel %vm965_vm15, %v13432_v9, %v9091_v40 }
 0x4eb   :  { %9174 = vrot.lane.b32.xlu1 %v9173_v58, %s10528_s8  ;;  %v1818_v19 = vpack.c.bf16 %v913_v62, %v846_v15  ;;  %v1835_v33 = vpack.c.bf16 %v1048_v21, %v981_v31  ;;  %v1451_v60 = vsel %vm1419_vm3, %v9106_v13, %v9107_v48  ;;  %v1047_v28 = vsel %vm1032_vm13, %v13462_v51, %v9096_v53  ;;  %v9150_v51 = vpop.permute.xlu0 %9149 }
 0x4ec   :  { %2749 = vmatpush1.bf16.msra.mxu1 %v1786_v6  ;;  %v9198_v0 = vpack.i.bf16 %v13973_v16, %v13910_v52  ;;  %v19373_v39 = vunpack.i.l.bf16 %v13491_v44  ;;  %v19374_v8 = vunpack.i.l.bf16 %v13473_v50  ;;  %v9283_v50 = vpack.i.bf16 %v14009_v54, %v14027_v37 }
 0x4ed   :  { %2750 = vmatprep.subr.bf16.mxu1 %v1803_v11  ;;  %9369 = vrot.lane.b32.xlu0 %v14135_v61, %s10533_s20  ;;  %v14219_v2 = vpack.i.bf16 %v14051_v56, %v14027_v37  ;;  %v9152_v4 = vunpack.i.h.bf16 %v9150_v51  ;;  %v9151_v22 = vunpack.i.l.bf16 %v9150_v51  ;;  %v19376_v48 = vunpack.i.l.bf16 %v13521_v5 }
 0x4ee   :  { %v1450_v9 = vsel %vm1419_vm3, %v19373_v39, %v9106_v13  ;;  %vm19388_vm13 = vcmask 1014784   ;;  %vm3602_vm9 = vcmask 457728   ;;  %vm3535_vm11 = vcmask 474112  }
 0x4ef   :  { %9179 = vrot.lane.b32.xlu1 %v13977_v57, %s10535_s26  ;;  %v9101_v57 = vunpack.i.l.bf16 %v13943_v29  ;;  %v1834_v29 = vpack.c.bf16 %v1047_v28, %v980_v30  ;;  %v9160_v44 = vpop.permute.xlu0 %9159  ;;  %vm19389_vm14 = vmmov %vm19388_vm13  ;;  %vm3276_vm4 = vcmask 982016   ;;  %vm3670_vm7 = vcmask 539648  }
 0x4f0   :  { %2751 = vmatpush1.bf16.msra.mxu1 %v1802_v7  ;;  %v19375_v7 = vunpack.i.l.bf16 %v13523_v55  ;;  %v9162_v21 = vunpack.i.h.bf16 %v9160_v44  ;;  %vm19390_vm8 = vmmov %vm19388_vm13 }
 0x4f1   :  { %2752 = vmatprep.subr.bf16.mxu1 %v1819_v10  ;;  %v1435_v59 = vsel %vm1419_vm3, %v9101_v57, %v9102_v63  ;;  %v1434_v35 = vsel %vm1419_vm3, %v19374_v8, %v9101_v57  ;;  %v1483_v10 = vsel %vm1419_vm3, %v9151_v22, %v9152_v4  ;;  %v9161_v63 = vunpack.i.l.bf16 %v9160_v44  ;;  %v19380_v44 = vld [vmem:[#allocation8_spill] sm:$0xff] }
 0x4f2   :  { %v1851_v24 = vpack.c.bf16 %v1451_v60, %v1435_v59  ;;  %v1850_v41 = vpack.c.bf16 %v1450_v9, %v1434_v35  ;;  %v1482_v15 = vsel %vm1419_vm3, %v19375_v7, %v9151_v22  ;;  %v19377_v60 = vunpack.i.l.bf16 %v13556_v25 }
 0x4f3   :  { %9194 = vrot.lane.b32.xlu1 %v9193_v18, %s10512_s9  ;;  %v9165_v47 = vpop.permute.xlu0 %9164  ;;  %v1515_v9 = vsel %vm1419_vm3, %v9161_v63, %v9162_v21 }
 0x4f4   :  { %2753 = vmatpush1.bf16.msra.mxu1 %v1818_v19  ;;  %v9167_v55 = vunpack.i.h.bf16 %v9165_v47  ;;  %v9166_v59 = vunpack.i.l.bf16 %v9165_v47  ;;  %v1514_v28 = vsel %vm1419_vm3, %v19377_v60, %v9161_v63 }
 0x4f5   :  { %2754 = vmatprep.subr.bf16.mxu1 %v1835_v33 }
 0x4f6   :  { %v1531_v4 = vsel %vm1419_vm3, %v9166_v59, %v9167_v55 }
 0x4f7   :  { %9199 = vrot.lane.b32.xlu1 %v9198_v0, %s10520_s19  ;;  %v14213_v58 = vpop.permute.xlu0 %9184 }
 0x4f8   :  { %2755 = vmatpush1.bf16.msra.mxu1 %v1834_v29 }
 0x4f9   :  { %2756 = vmatprep.subr.bf16.mxu1 %v1851_v24 }
 0x4fb   :  { %9209 = vrot.lane.b32.xlu1 %v9198_v0, %s10532_s18 }
 0x4fc   :  { %2757 = vmatpush1.bf16.msra.mxu1 %v1850_v41 }
 0x4ff   :  { %9219 = vrot.lane.b32.xlu1 %v9198_v0, %s10523_s22 }
 0x503   :  { %9229 = vrot.lane.b32.xlu1 %v9198_v0, %s10533_s20 }
 0x507   :  { %9239 = vrot.lane.b32.xlu1 %v9198_v0, %s10524_s25 }
 0x50b   :  { %9249 = vrot.lane.b32.xlu1 %v9198_v0, %s10526_s27 }
 0x50f   :  { %9259 = vrot.lane.b32.xlu1 %v9198_v0, %s10534_s21  ;;  %v19378_v0 = vld [vmem:[#allocation13_spill] sm:$0xff] }
 0x510   :  { %v19379_v5 = vunpack.i.l.bf16 %v19378_v0 }
 0x513   :  { %9279 = vrot.lane.b32.xlu1 %v13997_v38, %s10535_s26  ;;  %v14223_v38 = vpop.permute.xlu0 %9189 }
 0x514   :  { %v18763_v22 = vunpack.i.h.bf16 %v14223_v38 }
 0x517   :  { %9284 = vrot.lane.b32.xlu1 %v9283_v50, %s10512_s9  ;;  %v14227_v23 = vpop.permute.xlu0 %9204  ;;  %v19381_v50 = vunpack.i.l.bf16 %v19380_v44 }
 0x519   :  { %v1530_v25 = vsel %vm1419_vm3, %v19381_v50, %v9166_v59 }
 0x51b   :  { %9289 = vrot.lane.b32.xlu1 %v14037_v1, %s10520_s19 }
 0x51f   :  { %9309 = vrot.lane.b32.xlu1 %v14043_v14, %s10526_s27  ;;  %v14233_v14 = vpop.permute.xlu0 %9214 }
 0x523   :  { %9319 = vrot.lane.b32.xlu1 %v14219_v2, %s10533_s20  ;;  %v14237_v6 = vpop.permute.xlu0 %9224 }
 0x527   :  { %9324 = vrot.lane.b32.xlu1 %v14057_v17, %s10520_s19  ;;  %v14243_v46 = vpop.permute.xlu0 %9234 }
 0x52b   :  { %9334 = vrot.lane.b32.xlu1 %v14057_v17, %s10523_s22  ;;  %v14245_v27 = vpop.permute.xlu0 %9244 }
 0x52f   :  { %9339 = vrot.lane.b32.xlu1 %v14057_v17, %s10526_s27  ;;  %v14247_v11 = vpop.permute.xlu0 %9254 }
 0x533   :  { %9344 = vrot.lane.b32.xlu1 %v14057_v17, %s10534_s21  ;;  %v14249_v12 = vpop.permute.xlu0 %9264 }
 0x537   :  { %9359 = vrot.lane.b32.xlu1 %v14135_v61, %s10532_s18  ;;  %v14259_v62 = vpop.permute.xlu0 %9269 }
 0x53b   :  { %9364 = vrot.lane.b32.xlu1 %v14135_v61, %s10523_s22  ;;  %v14272_v47 = vpop.permute.xlu0 %9274 }
 0x53f   :  { %v14288_v55 = vpop.permute.xlu0 %3576 }
 0x540   :  { %19386 = vst [vmem:[#allocation23_spill] sm:$0xff] %v14288_v55 }
 0x551   :  { %v9145_v53 = vpop.permute.xlu1 %9144 }
 0x552   :  { %v9147_v17 = vunpack.i.h.bf16 %v9145_v53  ;;  %v9146_v40 = vunpack.i.l.bf16 %v9145_v53  ;;  %v9191_v53 = vunpack.i.l.bf16 %v14223_v38 }
 0x554   :  { %v1466_v13 = vsel %vm1419_vm3, %v19376_v48, %v9146_v40  ;;  %v1467_v31 = vsel %vm1419_vm3, %v9146_v40, %v9147_v17  ;;  %v19382_v17 = vld [vmem:[#allocation11_spill] sm:$0xff] }
 0x555   :  { %v9155_v18 = vpop.permute.xlu1 %9154  ;;  %v1867_v57 = vpack.c.bf16 %v1483_v10, %v1467_v31  ;;  %v1866_v19 = vpack.c.bf16 %v1482_v15, %v1466_v13  ;;  %v19383_v40 = vunpack.i.l.bf16 %v19382_v17 }
 0x556   :  { %v9157_v30 = vunpack.i.h.bf16 %v9155_v18  ;;  %v9156_v33 = vunpack.i.l.bf16 %v9155_v18  ;;  %v19384_v18 = vld [vmem:[#allocation14_spill] sm:$0xff] }
 0x557   :  { %2758 = vmatprep.subr.bf16.mxu1 %v1867_v57 }
 0x558   :  { %v1498_v29 = vsel %vm1419_vm3, %v19379_v5, %v9156_v33  ;;  %2759 = vmatpush1.bf16.msra.mxu1 %v1866_v19  ;;  %v1499_v39 = vsel %vm1419_vm3, %v9156_v33, %v9157_v30  ;;  %v3082_v19 = vsel %vm161_vm1, %v9191_v53, %v18763_v22  ;;  %v19385_v30 = vld [vmem:[#allocation25_spill] sm:$0xff] }
 0x559   :  { %v9170_v24 = vpop.permute.xlu1 %9169  ;;  %v1883_v8 = vpack.c.bf16 %v1515_v9, %v1499_v39  ;;  %v1882_v35 = vpack.c.bf16 %v1514_v28, %v1498_v29  ;;  %v9142_v33 = vunpack.i.h.bf16 %v19385_v30  ;;  %v14298_v29 = vpack.c.bf16 %v3082_v19, %v13973_v16 }
 0x55a   :  { %v9172_v41 = vunpack.i.h.bf16 %v9170_v24  ;;  %v9171_v51 = vunpack.i.l.bf16 %v9170_v24 }
 0x55b   :  { %2760 = vmatprep.subr.bf16.mxu1 %v1883_v8  ;;  %v14293_v0 = vsel %vm161_vm1, %v9142_v33, %v9191_v53  ;;  %v14308_v8 = vpop.permute.xlu0 %2973 }
 0x55c   :  { %v1546_v7 = vsel %vm1419_vm3, %v19383_v40, %v9171_v51  ;;  %2761 = vmatpush1.bf16.msra.mxu1 %v1882_v35  ;;  %v1547_v15 = vsel %vm1419_vm3, %v9171_v51, %v9172_v41  ;;  %v14306_v24 = vpack.c.bf16 %v14293_v0, %v13910_v52  ;;  %19387 = vst [vmem:[#allocation21_spill] sm:$0xff] %v14308_v8  ;;  %v10421_v35 = vld [vmem:[%s18535_s1] ss:$8 sps:$4 sm:$0xff]   ;;  %v10422_v41 = vld [vmem:[%s18535_s1 + $0x14] ss:$8 sps:$4 sm:$0xff]   ;;  %v18759_v40 = vunpack.i.h.bf16 %v14233_v14 }
 0x55d   :  { %v9175_v10 = vpop.permute.xlu1 %9174  ;;  %v1899_v21 = vpack.c.bf16 %v1547_v15, %v1531_v4  ;;  %v1898_v63 = vpack.c.bf16 %v1546_v7, %v1530_v25  ;;  %v18758_v25 = vunpack.i.h.bf16 %v14227_v23  ;;  %v18764_v4 = vunpack.i.l.bf16 %v14227_v23 }
 0x55e   :  { %v9177_v48 = vunpack.i.h.bf16 %v9175_v10  ;;  %v9176_v13 = vunpack.i.l.bf16 %v9175_v10  ;;  %v18762_v7 = vunpack.i.l.bf16 %v14233_v14 }
 0x55f   :  { %2762 = vmatprep.subr.bf16.mxu1 %v1899_v21  ;;  %v14327_v53 = vpop.permute.xlu0 %9294 }
 0x560   :  { %2763 = vmatpush1.bf16.msra.mxu1 %v1898_v63  ;;  %v1563_v31 = vsel %vm1419_vm3, %v9176_v13, %v9177_v48  ;;  %v1562_v57 = vsel %vm1419_vm3, %v19384_v18, %v9176_v13  ;;  %vm3209_vm3 = vcmask 998400   ;;  %v10423_v63 = vld [vmem:[%s18535_s1 + $0x10] ss:$8 sps:$4 sm:$0xff]  }
 0x561   :  { %v14290_v59 = vpop.permute.xlu1 %9179  ;;  %v1915_v60 = vpack.c.bf16 %v1563_v31, %v1563_v31  ;;  %v1914_v28 = vpack.c.bf16 %v1562_v57, %v1562_v57  ;;  %v10424_v57 = vld [vmem:[%s18535_s1 + $0x24] ss:$8 sps:$4 sm:$0xff]  }
 0x563   :  { %7567 = vmatprep.subr.msk.bf16.mxu1 %vm2110_vm2, %v1915_v60  ;;  %v2154_v5 = vsel %vm2110_vm2, %v1914_v28, 0 }
 0x564   :  { %2765 = vmatpush1.bf16.msra.mxu1 %v2154_v5  ;;  %v14368_v5 = vpop.permute.xlu0 %9299 }
 0x565   :  { %4652 = vmatprep.subr.bf16.mxu1 %v14298_v29  ;;  %v14301_v39 = vpop.permute.xlu1 %9194 }
 0x566   :  { %v18767_v9 = vunpack.i.l.bf16 %v14301_v39 }
 0x567   :  { %2773 = vmatmul.mubr.bf16.vlgmr.msra.gmra.mrb[96].mxu1 %v10421_v35 }
 0x568   :  { %4653 = vmatpush1.bf16.msra.mxu1 %v14306_v24  ;;  %v3080_v16 = vsel %vm161_vm1, %v18767_v9, %v9142_v33  ;;  %7569 = vmatprep.mubr.msk.bf16.mxu1 %vm2085_vm12, %v10422_v41 }
 0x569   :  { %v9200_v52 = vpop.permute.xlu1 %9199  ;;  %v14322_v51 = vpack.c.bf16 %v3080_v16, %v13967_v20  ;;  %v9403_v35 = vpack.i.bf16 %v3080_v16, %v3082_v19  ;;  %v10426_v16 = vld [vmem:[%s18535_s1 + $0x34] ss:$8 sps:$4 sm:$0xff]  }
 0x56a   :  { %v9202_v44 = vunpack.i.h.bf16 %v9200_v52  ;;  %v9201_v50 = vunpack.i.l.bf16 %v9200_v52 }
 0x56b   :  { %4567 = vmatprep.subr.bf16.mxu0 %v14322_v51 }
 0x56c   :  { %v14334_v20 = vsel %vm19388_vm13, %v18758_v25, %v9201_v50  ;;  %v14337_v21 = vsel %vm19389_vm14, %v9201_v50, %v9202_v44  ;;  %v14354_v18 = vsel %vm19390_vm8, %v9202_v44, %v18764_v4  ;;  %vm19401_vm13 = vcmask 785408   ;;  %vm19403_vm14 = vmmov %vm19390_vm8 }
 0x56d   :  { %v9210_v17 = vpop.permute.xlu1 %9209 }
 0x56e   :  { %v9212_v15 = vunpack.i.h.bf16 %v9210_v17  ;;  %v9211_v10 = vunpack.i.l.bf16 %v9210_v17  ;;  %v10425_v17 = vld [vmem:[%s18535_s1 + $0x20] ss:$8 sps:$4 sm:$0xff]  }
 0x56f   :  { %2781 = vmatmul.mubr.bf16.gmra.mrb[100].mxu1 %v10423_v63 }
 0x570   :  { %v14345_v48 = vsel %vm3209_vm3, %v18759_v40, %v9211_v10  ;;  %v3212_v13 = vsel %vm3209_vm3, %v9211_v10, %v9212_v15  ;;  %v3213_v31 = vsel %vm3209_vm3, %v9212_v15, %v18762_v7  ;;  %7570 = vmatprep.mubr.msk.bf16.mxu1 %vm2085_vm12, %v10424_v57  ;;  %v18761_v15 = vunpack.i.l.bf16 %v14237_v6  ;;  %v14390_v10 = vpop.permute.xlu0 %9304 }
 0x571   :  { %v9220_v30 = vpop.permute.xlu1 %9219  ;;  %v14361_v33 = vpack.c.bf16 %v3213_v31, %v14354_v18  ;;  %v9378_v60 = vpack.i.bf16 %v14345_v48, %v14334_v20  ;;  %v14366_v28 = vpack.c.bf16 %v3212_v13, %v14337_v21  ;;  %v9413_v63 = vpack.i.bf16 %v3213_v31, %v3212_v13 }
 0x572   :  { %v9222_v52 = vunpack.i.h.bf16 %v9220_v30  ;;  %v14375_v44 = vunpack.i.l.bf16 %v9220_v30  ;;  %v9383_v13 = vpack.i.bf16 %v14293_v0, %v14009_v54  ;;  %v10427_v0 = vld [vmem:[%s18535_s1 + $0x30] ss:$8 sps:$4 sm:$0xff]  }
 0x573   :  { %19391 = vst [vmem:[#allocation16_spill] sm:$0xff] %v14366_v28  ;;  %4654 = vmatprep.subr.bf16.mxu1 %v14361_v33  ;;  %9379 = vrot.lane.b32.xlu1 %v9378_v60, %s10524_s25 }
 0x574   :  { %4655 = vmatpush1.bf16.msra.mxu1 %v14366_v28  ;;  %v3344_v30 = vsel %vm697_vm10, %v9222_v52, %v18761_v15  ;;  %v3343_v60 = vsel %vm697_vm10, %v14375_v44, %v9222_v52 }
 0x575   :  { %v14373_v41 = vpop.permute.xlu1 %9229  ;;  %v9423_v25 = vpack.i.bf16 %v3344_v30, %v3343_v60 }
 0x576   :  { %v18766_v50 = vunpack.i.l.bf16 %v14373_v41 }
 0x577   :  { %9404 = vrot.lane.b32.xlu1 %v9403_v35, %s10524_s25  ;;  %2787 = vmatmul.mubr.bf16.gmra.mrb[104].mxu1 %v10425_v17 }
 0x578   :  { %v9373_v19 = vpack.i.bf16 %v14375_v44, %v18766_v50  ;;  %7571 = vmatprep.mubr.msk.bf16.mxu1 %vm2085_vm12, %v10426_v16  ;;  %v18760_v16 = vunpack.i.l.bf16 %v14245_v27  ;;  %v10430_v50 = vld [vmem:[%s18535_s1 + $0x54] ss:$8 sps:$4 sm:$0xff]  }
 0x579   :  { %v9240_v57 = vpop.permute.xlu1 %9239 }
 0x57a   :  { %v9242_v35 = vunpack.i.h.bf16 %v9240_v57  ;;  %v14397_v17 = vunpack.i.l.bf16 %v9240_v57  ;;  %9374 = vrot.lane.b32.xlu0 %v9373_v19, %s10524_s25  ;;  %v14416_v19 = vpop.permute.xlu0 %9314 }
 0x57b   :  { %9414 = vrot.lane.b32.xlu1 %v9413_v63, %s10524_s25 }
 0x57c   :  { %v14407_v40 = vsel %vm19392_vm6, %v9242_v35, %v18760_v16  ;;  %v14411_v52 = vsel %vm19394_vm5, %v14397_v17, %v9242_v35  ;;  %v10428_v35 = vld [vmem:[%s18535_s1 + $0x44] ss:$8 sps:$4 sm:$0xff]   ;;  %v18769_v16 = vunpack.i.l.bf16 %v14213_v58  ;;  %vm19418_vm6 = vmmov %vm19390_vm8 }
 0x57d   :  { %v9250_v31 = vpop.permute.xlu1 %9249  ;;  %19393 = vst [vmem:[#allocation10_spill] sm:$0xff] %v14407_v40 }
 0x57e   :  { %v14413_v57 = vunpack.i.l.bf16 %v9250_v31  ;;  %9384 = vrot.lane.b32.xlu0 %v9383_v13, %s10524_s25  ;;  %v18770_v13 = vunpack.i.h.bf16 %v14213_v58  ;;  %v9252_v4 = vunpack.i.h.bf16 %v9250_v31 }
 0x57f   :  { %9424 = vrot.lane.b32.xlu1 %v9423_v25, %s10524_s25  ;;  %2793 = vmatmul.mubr.bf16.gmra.mrb[108].mxu1 %v10427_v0  ;;  %v9428_v25 = vpack.i.bf16 %v14407_v40, %v14411_v52  ;;  %v18768_v0 = vunpack.i.h.bf16 %v14416_v19 }
 0x580   :  { %v9388_v63 = vpack.i.bf16 %v14413_v57, %v14397_v17  ;;  %7572 = vmatprep.mubr.msk.bf16.mxu1 %vm2085_vm12, %v10428_v35  ;;  %v14452_v31 = vsel %vm3602_vm9, %v18769_v16, %v18770_v13 }
 0x581   :  { %v9260_v15 = vpop.permute.xlu1 %9259 }
 0x582   :  { %v9262_v7 = vunpack.i.h.bf16 %v9260_v15  ;;  %v9261_v22 = vunpack.i.l.bf16 %v9260_v15  ;;  %9389 = vrot.lane.b32.xlu0 %v9388_v63, %s10524_s25  ;;  %v18776_v63 = vunpack.i.l.bf16 %v14247_v11 }
 0x583   :  { %9429 = vrot.lane.b32.xlu1 %v9428_v25, %s10524_s25  ;;  %v9272_v25 = vunpack.i.h.bf16 %v14259_v62 }
 0x584   :  { %v14436_v35 = vsel %vm3535_vm11, %v9261_v22, %v9262_v7  ;;  %v14441_v42 = vsel %vm3535_vm11, %v18768_v0, %v9261_v22  ;;  %v14471_v13 = vsel %vm965_vm15, %v9252_v4, %v18776_v63  ;;  %v9408_v63 = vpack.i.bf16 %v14354_v18, %v14337_v21 }
 0x585   :  { %v14444_v9 = vpop.permute.xlu1 %9279  ;;  %v9438_v15 = vpack.i.bf16 %v14436_v35, %v9261_v22  ;;  %v10429_v22 = vld [vmem:[%s18535_s1 + $0x40] ss:$8 sps:$4 sm:$0xff]   ;;  %v19399_v21 = vunpack.i.l.bf16 %v14373_v41 }
 0x586   :  { %v18775_v0 = vunpack.i.l.bf16 %v14444_v9  ;;  %9394 = vrot.lane.b32.xlu0 %v14135_v61, %s10526_s27 }
 0x587   :  { %9439 = vrot.lane.b32.xlu1 %v9438_v15, %s10524_s25  ;;  %2799 = vmatmul.mubr.bf16.gmra.mrb[112].mxu1 %v10429_v22  ;;  %v19395_v15 = vunpack.i.h.bf16 %v14290_v59  ;;  %v9232_v22 = vunpack.i.h.bf16 %v14373_v41 }
 0x588   :  { %v3280_v16 = vsel %vm3276_vm4, %v9272_v25, %v18775_v0  ;;  %7573 = vmatprep.mubr.msk.bf16.mxu1 %vm2085_vm12, %v10430_v50  ;;  %v19397_v50 = vunpack.i.l.bf16 %v14249_v12 }
 0x589   :  { %v3279_v36 = vsel %vm3276_vm4, %v19395_v15, %v9272_v25  ;;  %v14481_v34 = vpop.permute.xlu1 %9284  ;;  %v14483_v0 = vpack.c.bf16 %v3344_v30, %v3280_v16  ;;  %v9277_v25 = vunpack.i.h.bf16 %v14272_v47  ;;  %v3471_v30 = vsel %vm965_vm15, %v14413_v57, %v9252_v4 }
 0x58a   :  { %v9287_v26 = vunpack.i.h.bf16 %v14481_v34  ;;  %9399 = vrot.lane.b32.xlu0 %v14135_v61, %s10534_s21  ;;  %v14489_v37 = vpack.c.bf16 %v3343_v60, %v3279_v36  ;;  %v4245_v16 = vpack.c.bf16 %v14471_v13, %v14407_v40  ;;  %v19396_v36 = vunpack.i.l.bf16 %v14301_v39 }
 0x58b   :  { %4656 = vmatprep.subr.bf16.mxu1 %v14483_v0  ;;  %v14508_v43 = vsel %vm3535_vm11, %v9262_v7, %v19397_v50  ;;  %v3606_v4 = vsel %vm3602_vm9, %v9277_v25, %v14288_v55  ;;  %v19398_v40 = vunpack.i.l.bf16 %v14243_v46  ;;  %v3671_v18 = vsel %vm3670_vm7, %v19399_v21, %v9232_v22 }
 0x58c   :  { %v3079_v60 = vsel %vm161_vm1, %v9287_v26, %v19396_v36  ;;  %4657 = vmatpush1.bf16.msra.mxu1 %v14489_v37  ;;  %v19400_v7 = vunpack.i.h.bf16 %v14076_v32  ;;  %v4244_v41 = vpack.c.bf16 %v3471_v30, %v14411_v52  ;;  %v19402_v32 = vunpack.i.l.bf16 %v14227_v23 }
 0x58d   :  { %v3672_v15 = vsel %vm3670_vm7, %v9232_v22, %v19398_v40  ;;  %v14518_v28 = vpop.permute.xlu1 %9289  ;;  %4658 = vmatprep.subr.bf16.mxu1 %v4245_v16  ;;  %v4194_v26 = vpack.c.bf16 %v3079_v60, %v14009_v54  ;;  %v14529_v40 = vpack.c.bf16 %v14345_v48, %v14334_v20  ;;  %v4261_v22 = vpack.c.bf16 %v3606_v4, %v14508_v43  ;;  %v10431_v54 = vld [vmem:[%s18535_s1 + $0x50] ss:$8 sps:$4 sm:$0xff]  }
 0x58e   :  { %v2993_v50 = vsel %vm19401_vm13, %v19400_v7, %v14308_v8  ;;  %v18783_v36 = vunpack.i.l.bf16 %v14518_v28  ;;  %9409 = vrot.lane.b32.xlu0 %v9408_v63, %s10524_s25  ;;  %v9418_v20 = vpack.i.bf16 %v3672_v15, %v3671_v18  ;;  %v19404_v48 = vunpack.i.h.bf16 %v14301_v39  ;;  %v10432_v15 = vld [vmem:[%s18535_s1 + $0x64] ss:$8 sps:$4 sm:$0xff]   ;;  %vm19431_vm13 = vmmov %vm19418_vm6 }
 0x58f   :  { %4568 = vmatpush1.bf16.msra.mxu0 %v4194_v26  ;;  %2805 = vmatmul.mubr.bf16.gmra.mrb[116].mxu1 %v10431_v54  ;;  %v19405_v16 = vunpack.i.h.bf16 %v14223_v38  ;;  %v19406_v4 = vunpack.i.h.bf16 %v14213_v58  ;;  %v19407_v26 = vld [vmem:[#allocation6_spill] sm:$0xff]  ;;  %v9296_v38 = vunpack.i.l.bf16 %v14327_v53  ;;  %v18785_v18 = vunpack.i.h.bf16 %v14237_v6 }
 0x590   :  { %v3147_v63 = vsel %vm19403_vm14, %v19402_v32, %v18783_v36  ;;  %4569 = vmatprep.subr.bf16.mxu0 %v14529_v40  ;;  %4659 = vmatpush1.bf16.msra.mxu1 %v4244_v41  ;;  %v14553_v7 = vmax.f32 %v19407_v26, %v2993_v50  ;;  %v19409_v50 = vld [vmem:[#allocation22_spill] sm:$0xff]  ;;  %v18784_v32 = vunpack.i.h.bf16 %v14444_v9  ;;  %vm19433_vm14 = vmmov %vm19394_vm5 }
 0x591   :  { %v14547_v60 = vsel %vm161_vm1, %v19405_v16, %v19404_v48  ;;  %v3605_v21 = vsel %vm3602_vm9, %v19406_v4, %v9277_v25  ;;  %v14555_v54 = vpop.permute.xlu1 %9309  ;;  %4660 = vmatprep.subr.bf16.mxu1 %v4261_v22  ;;  %v9448_v41 = vpack.i.bf16 %v3147_v63, %v14100_v45  ;;  %7574 = vmatprep.mubr.msk.bf16.mxu1 %vm2085_vm12, %v10432_v15  ;;  %v9297_v16 = vunpack.i.h.bf16 %v14327_v53  ;;  %v14574_v4 = vpop.permute.xlu0 %9329 }
 0x592   :  { %19408 = vst [vmem:[#allocation17_spill] sm:$0xff] %v14553_v7  ;;  %9419 = vrot.lane.b32.xlu0 %v9418_v20, %s10524_s25  ;;  %v4260_v25 = vpack.c.bf16 %v3605_v21, %v14436_v35  ;;  %v14569_v22 = vpack.c.bf16 %v14547_v60, %v19409_v50  ;;  %v9433_v48 = vpack.i.bf16 %v14471_v13, %v3471_v30  ;;  %v19411_v21 = vunpack.i.l.bf16 %v14233_v14 }
 0x593   :  { %9449 = vrot.lane.b32.xlu1 %v9448_v41, %s10524_s25  ;;  %v14581_v35 = vpack.i.bf16 %v14553_v7, %v14108_v3  ;;  %v19412_v13 = vunpack.i.l.bf16 %v14237_v6  ;;  %v10433_v41 = vld [vmem:[%s18535_s1 + $0x60] ss:$8 sps:$4 sm:$0xff]   ;;  %v19413_v50 = vunpack.i.l.bf16 %v14444_v9  ;;  %v19415_v8 = vunpack.i.h.bf16 %v14574_v4 }
 0x594   :  { %4661 = vmatpush1.bf16.msra.mxu1 %v4260_v25  ;;  %v14587_v26 = vsel %vm3209_vm3, %v19411_v21, %v9296_v38  ;;  %v9331_v25 = vunpack.i.l.bf16 %v14574_v4  ;;  %v10434_v21 = vld [vmem:[%s18535_s1 + $0x74] ss:$8 sps:$4 sm:$0xff]  }
 0x595   :  { %v14576_v20 = vpop.permute.xlu1 %9319  ;;  %4662 = vmatprep.subr.bf16.mxu1 %v14569_v22  ;;  %19410 = vst [vmem:[#allocation7_spill] sm:$0xff] %v14581_v35  ;;  %v14592_v53 = vpack.c.bf16 %v14587_v26, %v3147_v63  ;;  %v14599_v30 = vsel %vm697_vm10, %v19412_v13, %v18785_v18  ;;  %v9443_v63 = vpack.i.bf16 %v14051_v56, %v14508_v43  ;;  %v9302_v43 = vunpack.i.h.bf16 %v14368_v5 }
 0x596   :  { %9434 = vrot.lane.b32.xlu0 %v9433_v48, %s10524_s25  ;;  %v3281_v48 = vsel %vm3276_vm4, %v19413_v50, %v18784_v32  ;;  %v9292_v32 = vunpack.i.h.bf16 %v14518_v28 }
 0x597   :  { %9454 = vrot.lane.b32.xlu1 %v14581_v35, %s10512_s9  ;;  %2811 = vmatmul.mubr.bf16.gmra.mrb[120].mxu1 %v10433_v41  ;;  %v14620_v41 = vsel %vm3209_vm3, %v9296_v38, %v9297_v16  ;;  %v14637_v15 = vpack.c.bf16 %v14599_v30, %v3281_v48  ;;  %v3342_v50 = vsel %vm697_vm10, %v9302_v43, %v14375_v44  ;;  %v19414_v35 = vunpack.i.h.bf16 %v14233_v14 }
 0x598   :  { %4663 = vmatpush1.bf16.msra.mxu1 %v14298_v29  ;;  %7575 = vmatprep.mubr.msk.bf16.mxu1 %vm2085_vm12, %v10434_v21  ;;  %v9181_v29 = vunpack.i.l.bf16 %v14290_v59  ;;  %v19416_v38 = vunpack.i.h.bf16 %v14227_v23  ;;  %v19419_v14 = vunpack.i.h.bf16 %v14243_v46  ;;  %v19420_v44 = vunpack.i.l.bf16 %v14243_v46 }
 0x599   :  { %v14624_v36 = vpop.permute.xlu1 %9324  ;;  %4664 = vmatprep.subr.bf16.mxu1 %v14592_v53  ;;  %v3210_v18 = vsel %vm3209_vm3, %v9331_v25, %v19414_v35 }
 0x59a   :  { %v9326_v21 = vunpack.i.l.bf16 %v14624_v36  ;;  %9444 = vrot.lane.b32.xlu0 %v9443_v63, %s10524_s25  ;;  %v14647_v63 = vsel %vm3209_vm3, %v9297_v16, %v19415_v8  ;;  %v19417_v45 = vunpack.i.h.bf16 %v14624_v36  ;;  %v3673_v35 = vsel %vm3670_vm7, %v19420_v44, %v19419_v14 }
 0x59b   :  { %3131 = vrot.lane.b32.xlu1 %v14553_v7, %s10520_s19  ;;  %v19421_v8 = vunpack.i.h.bf16 %v14290_v59 }
 0x59c   :  { %v3143_v13 = vsel %vm19390_vm8, %v9326_v21, %v19416_v38  ;;  %v14655_v48 = vsel %vm19418_vm6, %v9292_v32, %v19417_v45  ;;  %4665 = vmatpush1.bf16.msra.mxu1 %v14361_v33  ;;  %v9271_v33 = vunpack.i.l.bf16 %v14259_v62  ;;  %v19423_v21 = vunpack.i.l.bf16 %v14481_v34  ;;  %vm19437_vm8 = vmmov %vm19394_vm5 }
 0x59d   :  { %v14663_v25 = vpop.permute.xlu1 %9334  ;;  %4666 = vmatprep.subr.bf16.mxu1 %v14637_v15  ;;  %v4210_v23 = vpack.c.bf16 %v3210_v18, %v3143_v13  ;;  %v3278_v16 = vsel %vm3276_vm4, %v9181_v29, %v19421_v8  ;;  %v14671_v45 = vpack.c.bf16 %v14647_v63, %v14655_v48  ;;  %v19424_v38 = vunpack.i.h.bf16 %v14301_v39  ;;  %v14689_v18 = vld [vmem:[%s18537_s2 + $0x4] ss:$8 sps:$4 sm:$0xff]   ;;  %v14693_v39 = vpop.permute.xlu0 %9349 }
 0x59e   :  { %v9336_v44 = vunpack.i.l.bf16 %v14663_v25  ;;  %3195 = vrot.lane.b32.xlu0 %v14553_v7, %s10532_s18  ;;  %v14684_v59 = vpack.c.bf16 %v3342_v50, %v3278_v16  ;;  %19425 = vst [vmem:[#allocation13_spill] sm:$0xff] %v14689_v18  ;;  %v9247_v62 = vunpack.i.h.bf16 %v14245_v27  ;;  %v9468_v8 = vpack.i.bf16 %v3673_v35, %v14620_v41  ;;  %7593 = vmatprep.mubr.msk.bf16.mxu0 %vm2085_vm12, %v14689_v18 }
 0x59f   :  { %19422 = vst [vmem:[#allocation12_spill] sm:$0xff] %v14671_v45  ;;  %v14679_v14 = vsel %vm161_vm1, %v19424_v38, %v19423_v21  ;;  %3329 = vrot.lane.b32.xlu1 %v14553_v7, %s10523_s22  ;;  %4570 = vmatpush1.bf16.msra.mxu0 %v4210_v23  ;;  %v19426_v50 = vunpack.i.h.bf16 %v14555_v54  ;;  %v19427_v21 = vunpack.i.l.bf16 %v14368_v5  ;;  %v19428_v38 = vunpack.i.h.bf16 %v14237_v6 }
 0x5a0   :  { %v3277_v13 = vsel %vm3276_vm4, %v9271_v33, %v9181_v29  ;;  %v3341_v45 = vsel %vm697_vm10, %v9336_v44, %v9302_v43  ;;  %4571 = vmatprep.subr.bf16.mxu0 %v14684_v59  ;;  %4667 = vmatpush1.bf16.msra.mxu1 %v14483_v0  ;;  %v18791_v35 = vunpack.i.l.bf16 %v14555_v54  ;;  %v19429_v6 = vunpack.i.h.bf16 %v14390_v10  ;;  %v10435_v0 = vld [vmem:[%s18535_s1 + $0x70] ss:$8 sps:$4 sm:$0xff]  }
 0x5a1   :  { %v3470_v16 = vsel %vm965_vm15, %v19426_v50, %v14413_v57  ;;  %v14707_v55 = vsel %vm697_vm10, %v19428_v38, %v19427_v21  ;;  %v9458_v57 = vpack.i.bf16 %v14679_v14, %v14547_v60  ;;  %v14716_v23 = vpop.permute.xlu1 %9339  ;;  %v4226_v50 = vpack.c.bf16 %v3341_v45, %v3277_v13  ;;  %2817 = vmatmul.mubr.bf16.gmra.mrb[124].mxu1 %v10435_v0 }
 0x5a2   :  { %v14722_v21 = vsel %vm19394_vm5, %v19429_v6, %v14397_v17  ;;  %v9321_v43 = vunpack.i.l.bf16 %v14576_v20  ;;  %v19430_v60 = vunpack.i.l.bf16 %v14518_v28  ;;  %9469 = vrot.lane.b32.xlu0 %v9468_v8, %s10524_s25  ;;  %7602 = vmatprep.mubr.msk.bf16.mxu1 %vm2085_vm12, %v14689_v18  ;;  %v19432_v45 = vunpack.i.l.bf16 %v14245_v27  ;;  %vm19440_vm5 = vmmov %vm19418_vm6 }
 0x5a3   :  { %v4243_v17 = vpack.c.bf16 %v3470_v16, %v14722_v21  ;;  %v9257_v44 = vunpack.i.h.bf16 %v14247_v11  ;;  %v9267_v13 = vunpack.i.h.bf16 %v14249_v12  ;;  %9459 = vrot.lane.b32.xlu1 %v9458_v57, %s10524_s25  ;;  %4572 = vmatpush1.bf16.msra.mxu0 %v4226_v50  ;;  %v18792_v38 = vunpack.i.l.bf16 %v14390_v10 }
 0x5a4   :  { %v14733_v29 = vsel %vm19431_vm13, %v19430_v60, %v9292_v32  ;;  %v14742_v33 = vsel %vm19433_vm14, %v19432_v45, %v9247_v62  ;;  %v14749_v32 = vpop.permute.xlu0 %9354  ;;  %v19434_v57 = vunpack.i.h.bf16 %v14243_v46  ;;  %v19435_v6 = vunpack.i.l.bf16 %v14249_v12  ;;  %vm19449_vm13 = vmmov %vm19437_vm8 }
 0x5a5   :  { %4573 = vmatprep.subr.bf16.mxu0 %v4243_v17  ;;  %v9478_v28 = vpack.i.bf16 %v14742_v33, %v14707_v55  ;;  %v14754_v27 = vsel %vm965_vm15, %v9257_v44, %v18791_v35  ;;  %v9463_v8 = vpack.i.bf16 %v14587_v26, %v14733_v29  ;;  %v14758_v16 = vpop.permute.xlu1 %9344  ;;  %v18793_v26 = vunpack.i.h.bf16 %v14749_v32  ;;  %vm19454_vm14 = vmmov %vm19437_vm8 }
 0x5a6   :  { %v3674_v50 = vsel %vm3670_vm7, %v19434_v57, %v9321_v43  ;;  %v14770_v0 = vsel %vm3535_vm11, %v19435_v6, %v9267_v13  ;;  %v9356_v60 = vunpack.i.l.bf16 %v14749_v32  ;;  %v14783_v12 = vsel %vm19437_vm8, %v9247_v62, %v18792_v38 }
 0x5a7   :  { %9479 = vrot.lane.b32.xlu0 %v9478_v28, %s10524_s25  ;;  %19436 = vst [vmem:[#allocation8_spill] sm:$0xff] %v14770_v0  ;;  %9464 = vrot.lane.b32.xlu1 %v9463_v8, %s10524_s25  ;;  %v9488_v17 = vpack.i.bf16 %v14770_v0, %v14754_v27  ;;  %v9473_v46 = vpack.i.bf16 %v14599_v30, %v3674_v50  ;;  %v18795_v28 = vunpack.i.l.bf16 %v14416_v19  ;;  %v19438_v6 = vunpack.i.l.bf16 %v14247_v11 }
 0x5a8   :  { %v9351_v30 = vunpack.i.l.bf16 %v14693_v39  ;;  %v14799_v62 = vsel %vm19418_vm6, %v9356_v60, %v18793_v26  ;;  %v19439_v50 = vunpack.i.h.bf16 %v14624_v36  ;;  %vm19457_vm6 = vmmov %vm19437_vm8 }
 0x5a9   :  { %v14778_v45 = vpop.permute.xlu1 %9359  ;;  %v14792_v35 = vsel %vm965_vm15, %v19438_v6, %v9257_v44 }
 0x5aa   :  { %v18796_v8 = vunpack.i.h.bf16 %v14778_v45  ;;  %v9361_v57 = vunpack.i.l.bf16 %v14778_v45  ;;  %v3150_v38 = vsel %vm19440_vm5, %v19439_v50, %v9356_v60  ;;  %v9483_v26 = vpack.i.bf16 %v14792_v35, %v14783_v12  ;;  %v14849_v50 = vpop.permute.xlu0 %9369  ;;  %vm19461_vm5 = vmmov %vm19457_vm6 }
 0x5ab   :  { %9489 = vrot.lane.b32.xlu0 %v9488_v17, %s10524_s25  ;;  %9474 = vrot.lane.b32.xlu1 %v9473_v46, %s10524_s25  ;;  %v19441_v17 = vunpack.i.h.bf16 %v14574_v4  ;;  %v19442_v46 = vunpack.i.l.bf16 %v14481_v34  ;;  %v14828_v60 = vsel %vm3535_vm11, %v9267_v13, %v18795_v28  ;;  %v18797_v13 = vunpack.i.h.bf16 %v14693_v39 }
 0x5ac   :  { %v14810_v44 = vsel %vm3209_vm3, %v9361_v57, %v18796_v8  ;;  %19444 = vst [vmem:[#allocation14_spill] sm:$0xff] %v14828_v60 }
 0x5ad   :  { %v3217_v11 = vsel %vm3209_vm3, %v19441_v17, %v9361_v57  ;;  %v14815_v6 = vsel %vm161_vm1, %v19442_v46, %v9351_v30  ;;  %v14823_v4 = vpack.c.bf16 %v14810_v44, %v14799_v62  ;;  %v9493_v57 = vpack.i.bf16 %v14108_v3, %v14828_v60 }
 0x5ae   :  { %v14819_v36 = vpack.c.bf16 %v3217_v11, %v3150_v38  ;;  %v9498_v34 = vpack.i.bf16 %v14815_v6, %v14553_v7  ;;  %v9322_v17 = vunpack.i.h.bf16 %v14576_v20  ;;  %v18794_v46 = vunpack.i.l.bf16 %v14849_v50 }
 0x5af   :  { %19443 = vst [vmem:[#allocation11_spill] sm:$0xff] %v14823_v4  ;;  %3656 = vrot.lane.b32.xlu0 %v14553_v7, %s10533_s20  ;;  %9484 = vrot.lane.b32.xlu1 %v9483_v26, %s10524_s25  ;;  %v18798_v26 = vunpack.i.h.bf16 %v14663_v25 }
 0x5b3   :  { %9499 = vrot.lane.b32.xlu0 %v9498_v34, %s10524_s25  ;;  %9494 = vrot.lane.b32.xlu1 %v9493_v57, %s10524_s25  ;;  %v19445_v34 = vunpack.i.l.bf16 %v14368_v5 }
 0x5b7   :  { %3521 = vrot.lane.b32.xlu0 %v14553_v7, %s10534_s21  ;;  %3457 = vrot.lane.b32.xlu1 %v14553_v7, %s10526_s27 }
 0x5bb   :  { %9509 = vrot.lane.b32.xlu0 %v14037_v1, %s10531_s0  ;;  %9504 = vrot.lane.b32.xlu1 %v14219_v2, %s10535_s26  ;;  %v14859_v1 = vsel %vm161_vm1, %v9351_v30, %v18797_v13  ;;  %v9528_v2 = vpack.i.bf16 %v14647_v63, %v3150_v38  ;;  %v3675_v63 = vsel %vm3670_vm7, %v9321_v43, %v9322_v17  ;;  %v19450_v13 = vunpack.i.h.bf16 %v14416_v19 }
 0x5bc   :  { %v9523_v57 = vpack.i.bf16 %v14655_v48, %v14859_v1  ;;  %v9533_v38 = vpack.i.bf16 %v3675_v63, %v3217_v11  ;;  %v14883_v48 = vpop.permute.xlu1 %9364  ;;  %v19447_v63 = vunpack.i.h.bf16 %v14555_v54 }
 0x5bf   :  { %9519 = vrot.lane.b32.xlu0 %v14114_v49, %s10531_s0  ;;  %9514 = vrot.lane.b32.xlu1 %v14135_v61, %s10535_s26  ;;  %v14868_v49 = vsel %vm697_vm10, %v19445_v34, %v18798_v26  ;;  %v3676_v61 = vsel %vm3670_vm7, %v9322_v17, %v18794_v46  ;;  %v9346_v17 = vunpack.i.l.bf16 %v14758_v16 }
 0x5c0   :  { %19446 = vst [vmem:[#allocation25_spill] sm:$0xff] %v14868_v49  ;;  %v9538_v5 = vpack.i.bf16 %v14868_v49, %v3676_v61  ;;  %v9276_v61 = vunpack.i.l.bf16 %v14272_v47  ;;  %v19451_v47 = vunpack.i.l.bf16 %v14213_v58  ;;  %v19453_v58 = vld [vmem:[#allocation16_spill] sm:$0xff] }
 0x5c1   :  { %v3536_v26 = vsel %vm3535_vm11, %v9346_v17, %v19450_v13 }
 0x5c2   :  { %v3603_v3 = vsel %vm3602_vm9, %v9276_v61, %v19451_v47 }
 0x5c3   :  { %9529 = vrot.lane.b32.xlu0 %v9528_v2, %s10524_s25  ;;  %9524 = vrot.lane.b32.xlu1 %v9523_v57, %s10524_s25  ;;  %v9341_v57 = vunpack.i.l.bf16 %v14716_v23 }
 0x5c7   :  { %9539 = vrot.lane.b32.xlu0 %v9538_v5, %s10524_s25  ;;  %9534 = vrot.lane.b32.xlu1 %v9533_v38, %s10524_s25  ;;  %v3469_v5 = vsel %vm965_vm15, %v9341_v57, %v19447_v63  ;;  %v19448_v38 = vunpack.i.h.bf16 %v14390_v10  ;;  %v19452_v57 = vpack.c.bf16 %v14452_v31, %v14441_v42  ;;  %v18803_v42 = vunpack.i.h.bf16 %v14716_v23 }
 0x5e5   :  { %v14885_v30 = vpop.permute.xlu1 %9379 }
 0x5e9   :  { %v14887_v2 = vpop.permute.xlu1 %9404 }
 0x5ec   :  { %v14889_v34 = vpop.permute.xlu0 %9374 }
 0x5ed   :  { %v14892_v20 = vpop.permute.xlu1 %9414 }
 0x5f0   :  { %v9385_v43 = vpop.permute.xlu0 %9384 }
 0x5f1   :  { %v9386_v11 = vunpack.i.l.bf16 %v9385_v43  ;;  %v14907_v7 = vpop.permute.xlu1 %9424  ;;  %v9387_v17 = vunpack.i.h.bf16 %v9385_v43  ;;  %v9407_v43 = vunpack.i.h.bf16 %v14887_v2 }
 0x5f3   :  { %v3405_v46 = vsel %vm19449_vm13, %v9386_v11, %v19448_v38  ;;  %v4258_v11 = vpack.c.bf16 %v3603_v3, %v3536_v26  ;;  %v9416_v38 = vunpack.i.l.bf16 %v14892_v20  ;;  %vm19462_vm13 = vmmov %vm19461_vm5 }
 0x5f4   :  { %v14902_v28 = vpop.permute.xlu0 %9389  ;;  %v4242_v8 = vpack.c.bf16 %v3469_v5, %v3405_v46 }
 0x5f5   :  { %v14917_v46 = vpop.permute.xlu1 %9429 }
 0x5f6   :  { %4574 = vmatpush1.bf16.msra.mxu0 %v4242_v8  ;;  %v18802_v8 = vunpack.i.l.bf16 %v14887_v2  ;;  %v9431_v60 = vunpack.i.l.bf16 %v14917_v46 }
 0x5f7   :  { %4575 = vmatprep.subr.bf16.mxu0 %v19452_v57 }
 0x5f8   :  { %v14915_v63 = vpop.permute.xlu0 %9394 }
 0x5f9   :  { %v14928_v31 = vpop.permute.xlu1 %9439 }
 0x5fa   :  { %4576 = vmatpush1.bf16.msra.mxu0 %v4258_v11  ;;  %v3941_v11 = vsel %vm19437_vm8, %v9407_v43, %v9387_v17  ;;  %v19459_v43 = vunpack.i.h.bf16 %v14663_v25  ;;  %vm19464_vm8 = vmmov %vm19461_vm5 }
 0x5fb   :  { %4577 = vmatprep.subr.bf16.mxu0 %v14306_v24  ;;  %v3942_v24 = vsel %vm19454_vm14, %v9387_v17, %v18802_v8  ;;  %v19458_v17 = vunpack.i.l.bf16 %v14883_v48  ;;  %vm19463_vm14 = vmmov %vm19461_vm5 }
 0x5fc   :  { %v14920_v13 = vpop.permute.xlu0 %9399  ;;  %v4278_v8 = vpack.c.bf16 %v3942_v24, %v14411_v52  ;;  %v9382_v24 = vunpack.i.h.bf16 %v14885_v30 }
 0x5fd   :  { %v14967_v52 = vsel %vm697_vm10, %v19459_v43, %v19458_v17  ;;  %v9376_v17 = vunpack.i.l.bf16 %v14889_v34 }
 0x5fe   :  { %4578 = vmatpush1.bf16.msra.mxu0 %v14322_v51  ;;  %v3973_v43 = vsel %vm19462_vm13, %v9382_v24, %v9416_v38  ;;  %vm19468_vm13 = vmmov %vm19461_vm5 }
 0x5ff   :  { %4579 = vmatprep.subr.bf16.mxu0 %v19453_v58 }
 0x600   :  { %v14925_v61 = vpop.permute.xlu0 %9409 }
 0x601   :  { %v18805_v3 = vunpack.i.h.bf16 %v14925_v61  ;;  %v9411_v26 = vunpack.i.l.bf16 %v14925_v61 }
 0x602   :  { %4580 = vmatpush1.bf16.msra.mxu0 %v14529_v40  ;;  %v19455_v40 = vunpack.i.l.bf16 %v14555_v54 }
 0x603   :  { %4581 = vmatprep.subr.bf16.mxu0 %v14489_v37  ;;  %v9426_v37 = vunpack.i.l.bf16 %v14907_v7  ;;  %v3958_v54 = vsel %vm19457_vm6, %v9411_v26, %v18805_v3  ;;  %v4277_v3 = vpack.c.bf16 %v3941_v11, %v14722_v21  ;;  %vm19466_vm6 = vmmov %vm19461_vm5 }
 0x604   :  { %v14941_v47 = vpop.permute.xlu0 %9419  ;;  %v14948_v57 = vsel %vm965_vm15, %v19455_v40, %v18803_v42  ;;  %v9381_v42 = vunpack.i.l.bf16 %v14885_v30  ;;  %v19460_v40 = vunpack.i.h.bf16 %v14892_v20 }
 0x605   :  { %19456 = vst [vmem:[#allocation6_spill] sm:$0xff] %v14948_v57  ;;  %v14951_v58 = vpop.permute.xlu1 %9449  ;;  %v9421_v51 = vunpack.i.l.bf16 %v14941_v47  ;;  %v19465_v21 = vunpack.i.h.bf16 %v14941_v47 }
 0x606   :  { %4582 = vmatpush1.bf16.msra.mxu0 %v14684_v59  ;;  %v9377_v59 = vunpack.i.h.bf16 %v14889_v34  ;;  %v3974_v25 = vsel %vm19461_vm5, %v9416_v38, %v19460_v40  ;;  %v3957_v4 = vsel %vm19463_vm14, %v9381_v42, %v9411_v26  ;;  %v9392_v34 = vunpack.i.h.bf16 %v14902_v28  ;;  %vm19470_vm14 = vmmov %vm19461_vm5 }
 0x607   :  { %4583 = vmatprep.subr.bf16.mxu0 %v4278_v8  ;;  %v4294_v8 = vpack.c.bf16 %v3974_v25, %v3958_v54  ;;  %v3990_v11 = vsel %vm19466_vm6, %v9421_v51, %v19465_v21  ;;  %v9391_v38 = vunpack.i.l.bf16 %v14902_v28  ;;  %v3989_v54 = vsel %vm19461_vm5, %v9376_v17, %v9421_v51  ;;  %vm19474_vm6 = vmmov %vm19461_vm5 }
 0x608   :  { %v14973_v18 = vpop.permute.xlu0 %9434  ;;  %v4005_v0 = vsel %vm19464_vm8, %v9377_v59, %v9426_v37  ;;  %v19467_v59 = vunpack.i.h.bf16 %v14907_v7  ;;  %v9442_v17 = vunpack.i.h.bf16 %v14928_v31  ;;  %v9441_v40 = vunpack.i.l.bf16 %v14928_v31  ;;  %vm19472_vm8 = vmmov %vm19461_vm5 }
 0x609   :  { %v14982_v30 = vpop.permute.xlu1 %9454  ;;  %v9436_v26 = vunpack.i.l.bf16 %v14973_v18  ;;  %v19475_v31 = vunpack.i.h.bf16 %v14973_v18  ;;  %v4309_v49 = vpack.c.bf16 %v4005_v0, %v3989_v54 }
 0x60a   :  { %4584 = vmatpush1.bf16.msra.mxu0 %v4277_v3  ;;  %v4293_v3 = vpack.c.bf16 %v3973_v43, %v3957_v4  ;;  %v4006_v25 = vsel %vm19468_vm13, %v9426_v37, %v19467_v59  ;;  %v9456_v28 = vunpack.i.l.bf16 %v14982_v30  ;;  %v19469_v4 = vunpack.i.h.bf16 %v14917_v46 }
 0x60b   :  { %4585 = vmatprep.subr.bf16.mxu0 %v4294_v8  ;;  %v4310_v8 = vpack.c.bf16 %v4006_v25, %v3990_v11  ;;  %v19471_v43 = vunpack.i.l.bf16 %v14951_v58  ;;  %v19473_v11 = vunpack.i.l.bf16 %v14390_v10  ;;  %v19476_v10 = vunpack.i.h.bf16 %v14693_v39 }
 0x60c   :  { %v14996_v24 = vpop.permute.xlu0 %9444  ;;  %v4021_v37 = vsel %vm19470_vm14, %v9431_v60, %v19469_v4  ;;  %vm19479_vm13 = vcmask 1014784   ;;  %vm19482_vm14 = vmmov %vm19461_vm5 }
 0x60d   :  { %v9447_v42 = vunpack.i.h.bf16 %v14996_v24  ;;  %v15004_v5 = vpop.permute.xlu1 %3131  ;;  %v4035_v54 = vsel %vm19482_vm14, %v9392_v34, %v9436_v26  ;;  %vm19494_vm14 = vmmov %vm19461_vm5 }
 0x60e   :  { %4586 = vmatpush1.bf16.msra.mxu0 %v4293_v3  ;;  %v4036_v3 = vsel %vm19461_vm5, %v9436_v26, %v19475_v31  ;;  %v19478_v31 = vunpack.i.h.bf16 %v14749_v32  ;;  %v19483_v32 = vunpack.i.h.bf16 %v14758_v16  ;;  %v19487_v26 = vunpack.i.l.bf16 %v14996_v24 }
 0x60f   :  { %v15015_v59 = vsel %vm19472_vm8, %v9447_v42, %v19471_v43  ;;  %v15021_v25 = vsel %vm19474_vm6, %v19473_v11, %v9447_v42  ;;  %4587 = vmatprep.subr.bf16.mxu0 %v4310_v8  ;;  %v15036_v42 = vsel %vm161_vm1, %v19476_v10, %v9456_v28  ;;  %v19477_v8 = vunpack.i.h.bf16 %v14982_v30  ;;  %vm19488_vm8 = vmmov %vm19461_vm5 }
 0x610   :  { %v15027_v4 = vpop.permute.xlu0 %3195  ;;  %v9548_v43 = vpack.i.bf16 %v14948_v57, %v15015_v59  ;;  %v9543_v21 = vpack.i.bf16 %v15021_v25, %v14967_v52  ;;  %v3152_v51 = vsel %vm19479_vm13, %v19478_v31, %v15004_v5  ;;  %v19480_v57 = vunpack.i.h.bf16 %v14778_v45  ;;  %vm19489_vm6 = vmmov %vm19461_vm5 }
 0x611   :  { %v15041_v11 = vsel %vm161_vm1, %v9456_v28, %v19477_v8  ;;  %v15053_v39 = vpop.permute.xlu1 %3329  ;;  %v4326_v28 = vpack.c.bf16 %v4036_v3, %v4021_v37  ;;  %v19484_v8 = vunpack.i.l.bf16 %v14416_v19  ;;  %v19486_v31 = vunpack.i.h.bf16 %v14716_v23  ;;  %vm19493_vm13 = vmmov %vm19461_vm5 }
 0x612   :  { %v15051_v0 = vsel %vm3209_vm3, %v19480_v57, %v15027_v4  ;;  %19481 = vst [vmem:[#allocation22_spill] sm:$0xff] %v15053_v39  ;;  %9549 = vrot.lane.b32.xlu0 %v9548_v43, %s10524_s25  ;;  %9544 = vrot.lane.b32.xlu1 %v9543_v21, %s10524_s25  ;;  %v19485_v57 = vunpack.i.l.bf16 %v14915_v63  ;;  %v4051_v21 = vsel %vm19488_vm8, %v9442_v17, %v19487_v26  ;;  %v9452_v26 = vunpack.i.h.bf16 %v14951_v58  ;;  %vm19499_vm8 = vmmov %vm19461_vm5 }
 0x613   :  { %v15059_v10 = vpack.c.bf16 %v15051_v0, %v3152_v51  ;;  %v15066_v45 = vsel %vm3535_vm11, %v19484_v8, %v19483_v32  ;;  %4588 = vmatpush1.bf16.msra.mxu0 %v4309_v49  ;;  %v4050_v37 = vsel %vm19489_vm6, %v9441_v40, %v9442_v17  ;;  %v4020_v3 = vsel %vm19461_vm5, %v9391_v38, %v9431_v60  ;;  %vm19501_vm6 = vmmov %vm19461_vm5 }
 0x614   :  { %v15073_v34 = vsel %vm965_vm15, %v19486_v31, %v19485_v57  ;;  %4589 = vmatprep.subr.bf16.mxu0 %v4326_v28  ;;  %v15080_v19 = vpop.permute.xlu0 %9469  ;;  %v9563_v43 = vpack.i.bf16 %v15066_v45, %v15041_v11  ;;  %v9372_v32 = vunpack.i.h.bf16 %v14849_v50  ;;  %v19490_v49 = vunpack.i.l.bf16 %v14920_v13 }
 0x615   :  { %v9553_v23 = vpack.i.bf16 %v15036_v42, %v15073_v34  ;;  %v19491_v8 = vunpack.i.h.bf16 %v14758_v16  ;;  %v15094_v40 = vpop.permute.xlu1 %9459  ;;  %v4325_v60 = vpack.c.bf16 %v4035_v54, %v4020_v3  ;;  %v4342_v28 = vpack.c.bf16 %v4051_v21, %v4051_v21 }
 0x616   :  { %v18811_v38 = vunpack.i.h.bf16 %v15094_v40  ;;  %v9461_v17 = vunpack.i.l.bf16 %v15094_v40  ;;  %9564 = vrot.lane.b32.xlu0 %v9563_v43, %s10524_s25  ;;  %v4341_v31 = vpack.c.bf16 %v4050_v37, %v4050_v37  ;;  %v9568_v16 = vpack.i.bf16 %v14810_v44, %v3152_v51  ;;  %v19496_v43 = vld [vmem:[#allocation3_spill] sm:$0xff] }
 0x617   :  { %v15092_v57 = vsel %vm3535_vm11, %v19491_v8, %v19490_v49  ;;  %9554 = vrot.lane.b32.xlu1 %v9553_v23, %s10524_s25  ;;  %4590 = vmatpush1.bf16.msra.mxu0 %v4325_v60  ;;  %v19492_v49 = vunpack.i.l.bf16 %v14887_v2  ;;  %v19495_v37 = vunpack.i.l.bf16 %v14849_v50  ;;  %v15123_v23 = vpack.c.bf16 %v14679_v14, %v19496_v43  ;;  %v19497_v60 = vld [vmem:[#allocation10_spill] sm:$0xff]  ;;  %v15211_v50 = vld [vmem:[%s18537_s2 + $0x10] ss:$8 sps:$4 sm:$0xff]  }
 0x618   :  { %7592 = vmatprep.subr.msk.bf16.mxu0 %vm2110_vm2, %v4342_v28  ;;  %v9558_v3 = vpack.i.bf16 %v14799_v62, %v15092_v57  ;;  %v3944_v21 = vsel %vm19494_vm14, %v9461_v17, %v18811_v38  ;;  %v18813_v28 = vunpack.i.l.bf16 %v15080_v19  ;;  %v9367_v14 = vunpack.i.h.bf16 %v14883_v48  ;;  %vm19504_vm14 = vmmov %vm19461_vm5 }
 0x619   :  { %v3943_v8 = vsel %vm19493_vm13, %v19492_v49, %v9461_v17  ;;  %v15106_v54 = vpop.permute.xlu0 %9479  ;;  %v3677_v44 = vsel %vm3670_vm7, %v19495_v37, %v9372_v32  ;;  %v15118_v2 = vpop.permute.xlu1 %9464  ;;  %v4280_v51 = vpack.c.bf16 %v3944_v21, %v14742_v33  ;;  %v4520_v37 = vsel %vm2110_vm2, %v4341_v31, 0  ;;  %v15135_v21 = vld [vmem:[%s18537_s2] ss:$8 sps:$4 sm:$0xff]   ;;  %vm19502_vm13 = vmmov %vm19461_vm5 }
 0x61a   :  { %v4279_v62 = vpack.c.bf16 %v3943_v8, %v19497_v60  ;;  %v9467_v17 = vunpack.i.h.bf16 %v15118_v2  ;;  %v18812_v49 = vunpack.i.l.bf16 %v15118_v2  ;;  %9569 = vrot.lane.b32.xlu0 %v9568_v16, %s10524_s25  ;;  %v19498_v8 = vunpack.i.h.bf16 %v14925_v61 }
 0x61b   :  { %9559 = vrot.lane.b32.xlu1 %v9558_v3, %s10524_s25  ;;  %v9573_v60 = vpack.i.bf16 %v3677_v44, %v15051_v0  ;;  %v9472_v38 = vunpack.i.h.bf16 %v15080_v19  ;;  %4592 = vmatpush1.bf16.msra.mxu0 %v4520_v37  ;;  %v19500_v16 = vunpack.i.h.bf16 %v14892_v20  ;;  %v15160_v20 = vld [vmem:[%s18537_s2 + $0x14] ss:$8 sps:$4 sm:$0xff]  }
 0x61c   :  { %v3959_v43 = vsel %vm19499_vm8, %v19498_v8, %v9452_v26  ;;  %4668 = vmatprep.subr.bf16.mxu1 %v4280_v51  ;;  %4737 = vmatprep.subr.bf16.mxu0 %v15123_v23  ;;  %v3960_v61 = vsel %vm19461_vm5, %v9452_v26, %v18812_v49  ;;  %v3976_v0 = vsel %vm19502_vm13, %v9467_v17, %v18813_v28  ;;  %v18815_v8 = vunpack.i.l.bf16 %v15106_v54  ;;  %vm19507_vm8 = vmmov %vm19461_vm5 }
 0x61d   :  { %v3975_v31 = vsel %vm19501_vm6, %v19500_v16, %v9467_v17  ;;  %v15147_v3 = vpop.permute.xlu0 %9489  ;;  %4669 = vmatpush1.bf16.msra.mxu1 %v4279_v62  ;;  %v15155_v44 = vpop.permute.xlu1 %9474  ;;  %v4296_v51 = vpack.c.bf16 %v3976_v0, %v3960_v61  ;;  %v15169_v26 = vpack.c.bf16 %v14620_v41, %v14733_v29  ;;  %v19503_v17 = vunpack.i.h.bf16 %v14941_v47  ;;  %vm19509_vm6 = vmmov %vm19461_vm5 }
 0x61e   :  { %v4295_v37 = vpack.c.bf16 %v3975_v31, %v3959_v43  ;;  %v9477_v62 = vunpack.i.h.bf16 %v15155_v44  ;;  %v18814_v16 = vunpack.i.l.bf16 %v15155_v44  ;;  %4600 = vmatmul.mubr.bf16.vlgmr.msra.gmra.mrb[128].mxu0 %v15135_v21  ;;  %v9482_v31 = vunpack.i.h.bf16 %v15106_v54  ;;  %vm19511_vm13 = vmmov %vm19461_vm5 }
 0x61f   :  { %9574 = vrot.lane.b32.xlu1 %v9573_v60, %s10524_s25  ;;  %v3991_v43 = vsel %vm19504_vm14, %v19503_v17, %v9472_v38  ;;  %4738 = vmatpush1.bf16.msra.mxu0 %v14569_v22  ;;  %v19505_v61 = vunpack.i.l.bf16 %v14883_v48  ;;  %v19506_v0 = vunpack.i.h.bf16 %v14907_v7  ;;  %vm19513_vm14 = vmmov %vm19461_vm5 }
 0x620   :  { %4670 = vmatprep.subr.bf16.mxu1 %v4296_v51  ;;  %4739 = vmatprep.subr.bf16.mxu0 %v15169_v26  ;;  %v3992_v22 = vsel %vm19509_vm6, %v9472_v38, %v18814_v16  ;;  %v4008_v47 = vsel %vm19461_vm5, %v9477_v62, %v18815_v8  ;;  %v9492_v51 = vunpack.i.h.bf16 %v15147_v3  ;;  %v18819_v38 = vunpack.i.l.bf16 %v15147_v3  ;;  %vm19515_vm6 = vmmov %vm19461_vm5 }
 0x621   :  { %v15181_v60 = vsel %vm697_vm10, %v19505_v61, %v9367_v14  ;;  %v4007_v41 = vsel %vm19507_vm8, %v19506_v0, %v9477_v62  ;;  %v15187_v29 = vpop.permute.xlu0 %3656  ;;  %4671 = vmatpush1.bf16.msra.mxu1 %v4295_v37  ;;  %v15200_v17 = vpop.permute.xlu1 %9484  ;;  %v4312_v61 = vpack.c.bf16 %v4008_v47, %v3992_v22  ;;  %7594 = vmatprep.mubr.msk.bf16.mxu0 %vm2085_vm12, %v15160_v20  ;;  %v15221_v22 = vld [vmem:[%s18537_s2 + $0x24] ss:$8 sps:$4 sm:$0xff]   ;;  %v19512_v47 = vunpack.i.h.bf16 %v14973_v18  ;;  %vm19514_vm8 = vmmov %vm19461_vm5 }
 0x622   :  { %19508 = vst [vmem:[#allocation16_spill] sm:$0xff] %v15187_v29  ;;  %v3678_v7 = vsel %vm3670_vm7, %v9372_v32, %v15187_v29  ;;  %v4311_v0 = vpack.c.bf16 %v4007_v41, %v3991_v43  ;;  %v9487_v62 = vunpack.i.h.bf16 %v15200_v17  ;;  %v18816_v49 = vunpack.i.l.bf16 %v15200_v17 }
 0x623   :  { %v9578_v37 = vpack.i.bf16 %v15181_v60, %v3678_v7  ;;  %v9397_v32 = vunpack.i.h.bf16 %v14915_v63  ;;  %v19510_v43 = vunpack.i.h.bf16 %v14917_v46  ;;  %4740 = vmatpush1.bf16.msra.mxu0 %v14592_v53  ;;  %4672 = vmatprep.subr.bf16.mxu1 %v4312_v61 }
 0x624   :  { %v4037_v7 = vsel %vm19513_vm14, %v19512_v47, %v9487_v62  ;;  %v4023_v46 = vsel %vm19514_vm8, %v9482_v31, %v18816_v49  ;;  %v4038_v53 = vsel %vm19515_vm6, %v9487_v62, %v18819_v38  ;;  %v19516_v47 = vunpack.i.l.bf16 %v14996_v24  ;;  %vm19522_vm14 = vmmov %vm19461_vm5 }
 0x625   :  { %v4022_v41 = vsel %vm19511_vm13, %v19510_v43, %v9482_v31  ;;  %9579 = vrot.lane.b32.xlu0 %v9578_v37, %s10524_s25  ;;  %v15227_v28 = vpop.permute.xlu0 %9499  ;;  %4673 = vmatpush1.bf16.msra.mxu1 %v4311_v0  ;;  %v15236_v43 = vpop.permute.xlu1 %9494  ;;  %v4328_v18 = vpack.c.bf16 %v4038_v53, %v4023_v46  ;;  %v19517_v31 = vunpack.i.l.bf16 %v14915_v63  ;;  %v9402_v49 = vunpack.i.h.bf16 %v14920_v13  ;;  %vm19521_vm13 = vmmov %vm19461_vm5 }
 0x626   :  { %v18817_v61 = vunpack.i.l.bf16 %v15227_v28  ;;  %v4327_v16 = vpack.c.bf16 %v4037_v7, %v4022_v41  ;;  %v4052_v37 = vsel %vm19461_vm5, %v19516_v47, %v9492_v51  ;;  %v9497_v0 = vunpack.i.h.bf16 %v15236_v43  ;;  %4610 = vmatmul.mubr.bf16.gmra.mrb[132].mxu0 %v15211_v50  ;;  %vm19525_vm8 = vmmov %vm19461_vm5 }
 0x627   :  { %v18818_v8 = vunpack.i.l.bf16 %v15236_v43  ;;  %v15247_v62 = vsel %vm965_vm15, %v19517_v31, %v9397_v32  ;;  %v15254_v24 = vsel %vm697_vm10, %v9367_v14, %v15053_v39  ;;  %4674 = vmatprep.subr.bf16.mxu1 %v4328_v18  ;;  %7595 = vmatprep.mubr.msk.bf16.mxu0 %vm2085_vm12, %v15221_v22  ;;  %v19520_v41 = vunpack.i.l.bf16 %v14951_v58  ;;  %vm19543_vm6 = vmmov %vm19461_vm5 }
 0x628   :  { %19518 = vst [vmem:[#allocation3_spill] sm:$0xff] %v15247_v62  ;;  %19519 = vst [vmem:[#allocation10_spill] sm:$0xff] %v15254_v24  ;;  %v15266_v63 = vsel %vm19522_vm14, %v9497_v0, %v18817_v61  ;;  %v4343_v14 = vpack.c.bf16 %v4052_v37, %v4052_v37  ;;  %v10536_v61 = vmov 1  }
 0x629   :  { %v15261_v7 = vsel %vm19521_vm13, %v19520_v41, %v9497_v0  ;;  %19523 = vst [vmem:[#allocation32_spill] sm:$0xff] %v15266_v63  ;;  %v15268_v46 = vpop.permute.xlu0 %3521  ;;  %4675 = vmatpush1.bf16.msra.mxu1 %v4327_v16  ;;  %v4053_v48 = vsel %vm19525_vm8, %v9492_v51, %v18818_v8  ;;  %v15273_v53 = vpop.permute.xlu1 %3457  ;;  %v9588_v58 = vpack.i.bf16 %v15247_v62, %v15266_v63  ;;  %v15286_v16 = vld [vmem:[%s18537_s2 + $0x20] ss:$8 sps:$4 sm:$0xff]   ;;  %v19528_v51 = vunpack.i.l.bf16 %v14920_v13  ;;  %vm19548_vm13 = vmmov %vm19461_vm5 }
 0x62a   :  { %19524 = vst [vmem:[#allocation33_spill] sm:$0xff] %v15268_v46  ;;  %19526 = vst [vmem:[#allocation34_spill] sm:$0xff] %v15273_v53  ;;  %v9583_v18 = vpack.i.bf16 %v15261_v7, %v15254_v24  ;;  %v4344_v47 = vpack.c.bf16 %v4053_v48, %v4053_v48  ;;  %v15281_v0 = vsel %vm3535_vm11, %v9402_v49, %v15268_v46  ;;  %v4526_v41 = vsel %vm2110_vm2, %v4343_v14, 0  ;;  %v19537_v63 = vld [vmem:[#allocation14_spill] sm:$0xff] }
 0x62b   :  { %19527 = vst [vmem:[#allocation35_spill] sm:$0xff] %v15281_v0  ;;  %9589 = vrot.lane.b32.xlu0 %v9588_v58, %s10524_s25  ;;  %v15293_v37 = vsel %vm3535_vm11, %v19528_v51, %v9402_v49  ;;  %v15301_v48 = vpack.c.bf16 %v14859_v1, %v14051_v56  ;;  %9603 = vset.pattern.permute.xlu1 %v10536_v61  ;;  %v15308_v49 = vld [vmem:[%s18537_s2 + $0x34] ss:$8 sps:$4 sm:$0xff]   ;;  %v19531_v1 = vld [vmem:[#allocation2_spill] sm:$0xff]  ;;  %vm19552_vm14 = vmmov %vm19461_vm5 }
 0x62c   :  { %9584 = vrot.lane.b32.xlu1 %v9583_v18, %s10524_s25  ;;  %19529 = vst [vmem:[#allocation36_spill] sm:$0xff] %v15293_v37  ;;  %7601 = vmatprep.subr.msk.bf16.mxu1 %vm2110_vm2, %v4344_v47  ;;  %v9593_v58 = vpack.i.bf16 %v15281_v0, %v15293_v37  ;;  %v15313_v56 = vsel %vm965_vm15, %v9397_v32, %v15273_v53  ;;  %v19533_v32 = vunpack.i.h.bf16 %v14444_v9  ;;  %v15344_v9 = vld [vmem:[%s18537_s2 + $0x30] ss:$8 sps:$4 sm:$0xff]   ;;  %vm19553_vm8 = vmmov %vm19461_vm5 }
 0x62d   :  { %v15296_v31 = vpop.permute.xlu0 %9509  ;;  %4677 = vmatpush1.bf16.msra.mxu1 %v4526_v41  ;;  %v9505_v13 = vpop.permute.xlu1 %9504  ;;  %9604 = vset.pattern.permute.xlu0 %v10536_v61  ;;  %19530 = vst [vmem:[#allocation37_spill] sm:$0xff] %v15313_v56  ;;  %v15321_v14 = vpack.c.bf16 %v14815_v6, %v19531_v1  ;;  %v19534_v0 = vld [vmem:[#allocation12_spill] sm:$0xff]  ;;  %v19536_v37 = vld [vmem:[#allocation25_spill] sm:$0xff] }
 0x62e   :  { %v9506_v18 = vunpack.i.l.bf16 %v9505_v13  ;;  %4822 = vmatprep.subr.bf16.mxu1 %v15301_v48  ;;  %4616 = vmatmul.mubr.bf16.gmra.mrb[136].mxu0 %v15286_v16  ;;  %v9512_v61 = vunpack.i.h.bf16 %v15296_v31  ;;  %v9511_v47 = vunpack.i.l.bf16 %v15296_v31  ;;  %v9507_v51 = vunpack.i.h.bf16 %v9505_v13  ;;  %v15354_v13 = vld [vmem:[%s18537_s2 + $0x44] ss:$8 sps:$4 sm:$0xff]  }
 0x62f   :  { %9594 = vrot.lane.b32.xlu0 %v9593_v58, %s10524_s25  ;;  %7596 = vmatprep.mubr.msk.bf16.mxu0 %vm2085_vm12, %v15308_v49 }
 0x630   :  { %3893 = vrot.lane.b32.xlu1 %v15313_v56, %s10524_s25  ;;  %4685 = vmatmul.mubr.bf16.vlgmr.msra.gmra.mrb[128].mxu1 %v15135_v21  ;;  %v3282_v58 = vsel %vm3276_vm4, %v19533_v32, %v9506_v18  ;;  %v3283_v1 = vsel %vm3276_vm4, %v9506_v18, %v9507_v51  ;;  %v3608_v38 = vsel %vm3602_vm9, %v9511_v47, %v9512_v61 }
 0x631   :  { %v15325_v41 = vpop.permute.xlu0 %9519  ;;  %4823 = vmatpush1.bf16.msra.mxu1 %v15321_v14  ;;  %v15332_v8 = vpop.permute.xlu1 %9514  ;;  %v15335_v6 = vpack.c.bf16 %v14707_v55, %v3282_v58  ;;  %7603 = vmatprep.mubr.msk.bf16.mxu1 %vm2085_vm12, %v15160_v20  ;;  %v4247_v55 = vpack.c.bf16 %v14754_v27, %v14783_v12  ;;  %v15379_v56 = vpack.c.bf16 %v19536_v37, %v3283_v1 }
 0x632   :  { %19532 = vst [vmem:[#allocation2_spill] sm:$0xff] %v15325_v41  ;;  %v18823_v31 = vunpack.i.l.bf16 %v15332_v8  ;;  %4824 = vmatprep.subr.bf16.mxu1 %v14819_v36  ;;  %v9521_v27 = vunpack.i.l.bf16 %v15325_v41  ;;  %v4263_v24 = vpack.c.bf16 %v3608_v38, %v19537_v63  ;;  %v19540_v63 = vunpack.i.h.bf16 %v15325_v41  ;;  %v15424_v41 = vld [vmem:[%s18537_s2 + $0x54] ss:$8 sps:$4 sm:$0xff]  }
 0x633   :  { %4741 = vmatprep.subr.bf16.mxu0 %v15335_v6 }
 0x634   :  { %4742 = vmatpush1.bf16.msra.mxu0 %v14637_v15  ;;  %v3284_v58 = vsel %vm3276_vm4, %v9507_v51, %v18823_v31  ;;  %v4246_v15 = vpack.c.bf16 %v14792_v35, %v14742_v33  ;;  %v19535_v51 = vld [vmem:[#allocation23_spill] sm:$0xff]  ;;  %v4249_v35 = vpack.c.bf16 %v15073_v34, %v15015_v59  ;;  %v19538_v33 = vld [vmem:[#allocation29_spill] sm:$0xff]  ;;  %v3610_v1 = vsel %vm3602_vm9, %v9521_v27, %v19540_v63 }
 0x635   :  { %v15357_v32 = vpop.permute.xlu0 %9529  ;;  %4825 = vmatpush1.bf16.msra.mxu1 %v19534_v0  ;;  %v15367_v62 = vpop.permute.xlu1 %9524  ;;  %4743 = vmatprep.subr.bf16.mxu0 %v4247_v55  ;;  %v15370_v18 = vpack.c.bf16 %v14967_v52, %v3284_v58  ;;  %v3607_v31 = vsel %vm3602_vm9, %v19535_v51, %v9511_v47  ;;  %v19539_v47 = vld [vmem:[#allocation9_spill] sm:$0xff]  ;;  %v3609_v46 = vsel %vm3602_vm9, %v9512_v61, %v9521_v27 }
 0x636   :  { %4622 = vmatmul.mubr.bf16.gmra.mrb[140].mxu0 %v15344_v9  ;;  %v15391_v55 = vadd.f32 %v19539_v47, %v19538_v33  ;;  %v15405_v47 = vld [vmem:[%s18537_s2 + $0x40] ss:$8 sps:$4 sm:$0xff]   ;;  %v4264_v27 = vpack.c.bf16 %v3609_v46, %v15066_v45  ;;  %v9502_v45 = vunpack.i.h.bf16 %v15227_v28  ;;  %v15469_v46 = vld [vmem:[%s18537_s2 + $0x50] ss:$8 sps:$4 sm:$0xff]  }
 0x637   :  { %4826 = vmatprep.subr.bf16.mxu1 %v15370_v18  ;;  %7597 = vmatprep.mubr.msk.bf16.mxu0 %vm2085_vm12, %v15354_v13 }
 0x638   :  { %4744 = vmatpush1.bf16.msra.mxu0 %v4246_v15  ;;  %4695 = vmatmul.mubr.bf16.gmra.mrb[132].mxu1 %v15211_v50  ;;  %v19541_v15 = vld [vmem:[#allocation8_spill] sm:$0xff]  ;;  %v18837_v29 = vmax.f32 %v15391_v55, 0.0 }
 0x639   :  { %v15384_v52 = vpop.permute.xlu0 %9539  ;;  %4827 = vmatpush1.bf16.msra.mxu1 %v15379_v56  ;;  %v15395_v38 = vpop.permute.xlu1 %9534  ;;  %4745 = vmatprep.subr.bf16.mxu0 %v4263_v24  ;;  %v4262_v51 = vpack.c.bf16 %v3607_v31, %v19541_v15  ;;  %v19542_v24 = vunpack.i.l.bf16 %v15106_v54  ;;  %v19544_v31 = vld [vmem:[#allocation6_spill] sm:$0xff]  ;;  %v19546_v54 = vunpack.i.l.bf16 %v15155_v44 }
 0x63a   :  { %v18831_v37 = vunpack.i.h.bf16 %v15384_v52  ;;  %4828 = vmatprep.subr.bf16.mxu1 %v4249_v35  ;;  %v2774_v34 = vpop.f32.mrb[96].mxu1  ;;  %7604 = vmatprep.mubr.msk.bf16.mxu1 %vm2085_vm12, %v15221_v22  ;;  %v4248_v15 = vpack.c.bf16 %v19544_v31, %v15021_v25  ;;  %v19545_v53 = vunpack.i.h.bf16 %v15395_v38  ;;  %v4265_v31 = vpack.c.bf16 %v3610_v1, %v15092_v57 }
 0x63b   :  { %v15417_v35 = vadd.f32 %v2774_v34, %v19538_v33  ;;  %v2776_v58 = vpop.f32.mrb[97].mxu1  ;;  %v18834_v1 = vunpack.i.h.bf16 %v15332_v8 }
 0x63c   :  { %v15414_v63 = vsel %vm19543_vm6, %v19542_v24, %v18831_v37  ;;  %v15432_v24 = vsel %vm19461_vm5, %v19546_v54, %v19545_v53  ;;  %v15435_v34 = vadd.f32 %v2776_v58, %v19538_v33  ;;  %4746 = vmatpush1.bf16.msra.mxu0 %v4262_v51  ;;  %v2778_v37 = vpop.f32.mrb[98].mxu1  ;;  %v19547_v33 = vld [vmem:[#allocation19_spill] sm:$0xff]  ;;  %v9536_v51 = vunpack.i.l.bf16 %v15395_v38  ;;  %vm19554_vm6 = vmmov %vm19461_vm5 }
 0x63d   :  { %v18836_v39 = vmax.f32 %v15417_v35, 0.0  ;;  %4829 = vmatpush1.bf16.msra.mxu1 %v4248_v15  ;;  %4747 = vmatprep.subr.bf16.mxu0 %v15321_v14  ;;  %v2779_v61 = vpop.f32.mrb[99].mxu1  ;;  %v4313_v44 = vpack.c.bf16 %v15414_v63, %v15432_v24  ;;  %v9526_v14 = vunpack.i.l.bf16 %v15367_v62  ;;  %v15459_v37 = vpack.c.bf16 %v15036_v42, %v19547_v33  ;;  %v15475_v42 = vld [vmem:[%s18537_s2 + $0x64] ss:$8 sps:$4 sm:$0xff]  }
 0x63e   :  { %v18835_v53 = vmax.f32 %v15435_v34, 0.0  ;;  %4830 = vmatprep.subr.bf16.mxu1 %v4265_v31  ;;  %4628 = vmatmul.mubr.bf16.gmra.mrb[144].mxu0 %v15405_v47  ;;  %v1933_v15 = vld [vmem:[%s18536_s6 + $0x8] sm:$0xff]  ;;  %v9527_v33 = vunpack.i.h.bf16 %v15367_v62 }
 0x63f   :  { %v9598_v57 = vpack.i.bf16 %v18836_v39, %v18837_v29  ;;  %7598 = vmatprep.mubr.msk.bf16.mxu0 %vm2085_vm12, %v15424_v41  ;;  %v19565_v29 = vunpack.i.l.bf16 %v15200_v17  ;;  %v19570_v17 = vunpack.i.l.bf16 %v15236_v43 }
 0x640   :  { %2885 = vrot.lane.b32.xlu0 %v18835_v53, %s10513_s10  ;;  %4748 = vmatpush1.bf16.msra.mxu0 %v15123_v23 }
 0x641   :  { %4831 = vmatpush1.bf16.msra.mxu1 %v4264_v27  ;;  %9599 = vrot.lane.b32.xlu1 %v9598_v57, %s10513_s10  ;;  %v9532_v57 = vunpack.i.h.bf16 %v15357_v32  ;;  %v9531_v27 = vunpack.i.l.bf16 %v15357_v32 }
 0x642   :  { %4749 = vmatprep.subr.bf16.mxu0 %v19534_v0  ;;  %4832 = vmatprep.subr.bf16.mxu1 %v15459_v37  ;;  %v2782_v23 = vpop.f32.mrb[100].mxu1  ;;  %v3946_v0 = vsel %vm19548_vm13, %v9502_v45, %v9526_v14  ;;  %vm19557_vm13 = vmmov %vm19461_vm5 }
 0x643   :  { %4701 = vmatmul.mubr.bf16.gmra.mrb[136].mxu1 %v15286_v16  ;;  %v2783_v58 = vpop.f32.mrb[101].mxu1  ;;  %v19550_v23 = vld [vmem:[#allocation11_spill] sm:$0xff] }
 0x644   :  { %4750 = vmatpush1.bf16.msra.mxu0 %v15169_v26  ;;  %7605 = vmatprep.mubr.msk.bf16.mxu1 %vm2085_vm12, %v15308_v49  ;;  %v2784_v54 = vpop.f32.mrb[102].mxu1  ;;  %v19549_v26 = vunpack.i.l.bf16 %v15332_v8  ;;  %v4282_v58 = vpack.c.bf16 %v3946_v0, %v15021_v25  ;;  %v19555_v0 = vunpack.i.l.bf16 %v15080_v19 }
 0x645   :  { %4833 = vmatpush1.bf16.msra.mxu1 %v15301_v48  ;;  %4751 = vmatprep.subr.bf16.mxu0 %v15379_v56  ;;  %v2785_v61 = vpop.f32.mrb[103].mxu1  ;;  %v19551_v48 = vunpack.i.h.bf16 %v15094_v40  ;;  %v10436_v40 = vld [vmem:[%s18536_s6] sm:$0xff] }
 0x646   :  { %v3285_v31 = vsel %vm3276_vm4, %v19549_v26, %v18834_v1  ;;  %4834 = vmatprep.subr.bf16.mxu1 %v19550_v23  ;;  %4634 = vmatmul.mubr.bf16.gmra.mrb[148].mxu0 %v15469_v46  ;;  %v3978_v26 = vsel %vm19553_vm8, %v9532_v57, %v9536_v51  ;;  %vm19562_vm8 = vmmov %vm19461_vm5 }
 0x647   :  { %v3945_v56 = vsel %vm19552_vm14, %v19551_v48, %v9502_v45  ;;  %7599 = vmatprep.mubr.msk.bf16.mxu0 %vm2085_vm12, %v15475_v42  ;;  %4378 = vperm.xlu0 %9604, %v1933_v15   ;;  %v15507_v54 = vpack.c.bf16 %v15181_v60, %v3285_v31  ;;  %v3962_v60 = vsel %vm19554_vm6, %v9527_v33, %v9531_v27  ;;  %vm19560_vm14 = vmmov %vm19461_vm5 }
 0x648   :  { %4752 = vmatpush1.bf16.msra.mxu0 %v15335_v6  ;;  %4374 = vperm.xlu1 %9603, %v10436_v40   ;;  %v4281_v25 = vpack.c.bf16 %v3945_v56, %v14783_v12  ;;  %v15524_v6 = vld [vmem:[%s18537_s2 + $0x60] ss:$8 sps:$4 sm:$0xff]   ;;  %v3977_v15 = vsel %vm19461_vm5, %v19555_v0, %v9532_v57  ;;  %v4298_v61 = vpack.c.bf16 %v3978_v26, %v3962_v60  ;;  %v15536_v12 = vld [vmem:[%s18537_s2 + $0x74] ss:$8 sps:$4 sm:$0xff]   ;;  %vm19564_vm6 = vmmov %vm19461_vm5 }
 0x649   :  { %4835 = vmatpush1.bf16.msra.mxu1 %v14819_v36  ;;  %4753 = vmatprep.subr.bf16.mxu0 %v4282_v58  ;;  %v19556_v36 = vunpack.i.l.bf16 %v15118_v2  ;;  %v19558_v40 = vld [vmem:[#allocation13_spill] sm:$0xff] }
 0x64a   :  { %4836 = vmatprep.subr.bf16.mxu1 %v15507_v54  ;;  %v2788_v45 = vpop.f32.mrb[104].mxu1 }
 0x64b   :  { %v3961_v31 = vsel %vm19557_vm13, %v19556_v36, %v9527_v33  ;;  %4707 = vmatmul.mubr.bf16.gmra.mrb[140].mxu1 %v15344_v9  ;;  %v2789_v48 = vpop.f32.mrb[105].mxu1  ;;  %v15547_v33 = vld [vmem:[%s18537_s2 + $0x70] ss:$8 sps:$4 sm:$0xff]   ;;  %vm19566_vm13 = vmmov %vm19461_vm5 }
 0x64c   :  { %4754 = vmatpush1.bf16.msra.mxu0 %v4281_v25  ;;  %7606 = vmatprep.mubr.msk.bf16.mxu1 %vm2085_vm12, %v15354_v13  ;;  %v2790_v19 = vpop.f32.mrb[106].mxu1  ;;  %v4297_v57 = vpack.c.bf16 %v3977_v15, %v3961_v31 }
 0x64d   :  { %4837 = vmatpush1.bf16.msra.mxu1 %v15370_v18  ;;  %4755 = vmatprep.subr.bf16.mxu0 %v4298_v61  ;;  %v2791_v2 = vpop.f32.mrb[107].mxu1 }
 0x64e   :  { %4640 = vmatmul.mubr.bf16.gmra.mrb[152].mxu0 %v15524_v6  ;;  %v15565_v2 = vld [vmem:[%s18537_s2 + $0x4] ss:$8 sps:$4 sm:$0xff]  }
 0x64f   :  { %7600 = vmatprep.mubr.msk.bf16.mxu0 %vm2085_vm12, %v15536_v12 }
 0x650   :  { %4756 = vmatpush1.bf16.msra.mxu0 %v4297_v57 }
 0x652   :  { %v2794_v56 = vpop.f32.mrb[108].mxu1 }
 0x653   :  { %4713 = vmatmul.mubr.bf16.gmra.mrb[144].mxu1 %v15405_v47  ;;  %v2795_v58 = vpop.f32.mrb[109].mxu1 }
 0x654   :  { %7607 = vmatprep.mubr.msk.bf16.mxu1 %vm2085_vm12, %v15424_v41  ;;  %v2796_v18 = vpop.f32.mrb[110].mxu1 }
 0x655   :  { %v2797_v26 = vpop.f32.mrb[111].mxu1 }
 0x656   :  { %4646 = vmatmul.mubr.bf16.gmra.mrb[156].mxu0 %v15547_v33 }
 0x657   :  { %7611 = vmatprep.mubr.msk.bf16.mxu0 %vm2085_vm12, %v19558_v40 }
 0x65a   :  { %v2800_v25 = vpop.f32.mrb[112].mxu1 }
 0x65b   :  { %4719 = vmatmul.mubr.bf16.gmra.mrb[148].mxu1 %v15469_v46  ;;  %v2801_v60 = vpop.f32.mrb[113].mxu1  ;;  %v9541_v25 = vunpack.i.l.bf16 %v15384_v52 }
 0x65c   :  { %7608 = vmatprep.mubr.msk.bf16.mxu1 %vm2085_vm12, %v15475_v42  ;;  %v2802_v45 = vpop.f32.mrb[114].mxu1 }
 0x65d   :  { %v2803_v0 = vpop.f32.mrb[115].mxu1 }
 0x662   :  { %v2806_v15 = vpop.f32.mrb[116].mxu1 }
 0x663   :  { %4725 = vmatmul.mubr.bf16.gmra.mrb[152].mxu1 %v15524_v6  ;;  %v2807_v36 = vpop.f32.mrb[117].mxu1 }
 0x664   :  { %7609 = vmatprep.mubr.msk.bf16.mxu1 %vm2085_vm12, %v15536_v12  ;;  %v2808_v31 = vpop.f32.mrb[118].mxu1 }
 0x665   :  { %v2809_v61 = vpop.f32.mrb[119].mxu1 }
 0x666   :  { %v19559_v61 = vunpack.i.h.bf16 %v15395_v38 }
 0x66a   :  { %v2812_v48 = vpop.f32.mrb[120].mxu1 }
 0x66b   :  { %4731 = vmatmul.mubr.bf16.gmra.mrb[156].mxu1 %v15547_v33  ;;  %v2813_v19 = vpop.f32.mrb[121].mxu1  ;;  %v3994_v48 = vsel %vm19560_vm14, %v19559_v61, %v9541_v25  ;;  %v19563_v61 = vunpack.i.l.bf16 %v15147_v3  ;;  %vm19567_vm14 = vmmov %vm19461_vm5 }
 0x66c   :  { %7620 = vmatprep.mubr.msk.bf16.mxu1 %vm2085_vm12, %v15565_v2  ;;  %v2814_v57 = vpop.f32.mrb[122].mxu1  ;;  %v19561_v19 = vunpack.i.h.bf16 %v15384_v52 }
 0x66d   :  { %v2815_v56 = vpop.f32.mrb[123].mxu1 }
 0x674   :  { %v2818_v58 = vpop.f32.mrb[124].mxu1 }
 0x675   :  { %v2819_v18 = vpop.f32.mrb[125].mxu1 }
 0x676   :  { %v2820_v26 = vpop.f32.mrb[126].mxu1 }
 0x677   :  { %v2821_v40 = vpop.f32.mrb[127].mxu1 }
 0x684   :  { %v15570_v60 = vpop.permute.xlu0 %9549  ;;  %v15572_v45 = vpop.permute.xlu1 %9544 }
 0x685   :  { %v9546_v0 = vunpack.i.l.bf16 %v15572_v45  ;;  %v9552_v15 = vunpack.i.h.bf16 %v15570_v60  ;;  %v9551_v36 = vunpack.i.l.bf16 %v15570_v60  ;;  %v9547_v31 = vunpack.i.h.bf16 %v15572_v45 }
 0x687   :  { %v4010_v57 = vsel %vm19562_vm8, %v19561_v19, %v9546_v0  ;;  %v4039_v39 = vsel %vm19564_vm6, %v19563_v61, %v9552_v15  ;;  %v4024_v19 = vsel %vm19461_vm5, %v19565_v29, %v9547_v31  ;;  %vm19568_vm8 = vmmov %vm19461_vm5 }
 0x688   :  { %v15588_v56 = vpop.permute.xlu0 %9564  ;;  %v4314_v18 = vpack.c.bf16 %v4010_v57, %v3994_v48  ;;  %v4025_v48 = vsel %vm19566_vm13, %v9547_v31, %v9551_v36  ;;  %vm19569_vm6 = vmmov %vm19461_vm5 }
 0x689   :  { %v15590_v58 = vpop.permute.xlu1 %9554  ;;  %v9567_v26 = vunpack.i.h.bf16 %v15588_v56  ;;  %v18847_v40 = vunpack.i.l.bf16 %v15588_v56  ;;  %vm19571_vm13 = vmmov %vm19461_vm5 }
 0x68a   :  { %v9557_v1 = vunpack.i.h.bf16 %v15590_v58  ;;  %v9556_v53 = vunpack.i.l.bf16 %v15590_v58  ;;  %4757 = vmatprep.subr.bf16.mxu0 %v4314_v18 }
 0x68b   :  { %4758 = vmatpush1.bf16.msra.mxu0 %v4313_v44  ;;  %v4054_v31 = vsel %vm19461_vm5, %v19570_v17, %v9567_v26 }
 0x68c   :  { %v3947_v57 = vsel %vm19567_vm14, %v9526_v14, %v9557_v1  ;;  %v4040_v3 = vsel %vm19568_vm8, %v9552_v15, %v9556_v53  ;;  %v3948_v29 = vsel %vm19569_vm6, %v9557_v1, %v18847_v40  ;;  %v15620_v18 = vpop.permute.xlu0 %9569  ;;  %v4329_v15 = vpack.c.bf16 %v4039_v39, %v4024_v19  ;;  %vm19572_vm14 = vmmov %vm19461_vm5 }
 0x68d   :  { %v15622_v62 = vpop.permute.xlu1 %9559  ;;  %v4330_v14 = vpack.c.bf16 %v4040_v3, %v4025_v48  ;;  %v4284_v63 = vpack.c.bf16 %v3948_v29, %v15261_v7  ;;  %v4283_v24 = vpack.c.bf16 %v3947_v57, %v15015_v59  ;;  %v9572_v61 = vunpack.i.h.bf16 %v15620_v18  ;;  %vm19573_vm8 = vmmov %vm19461_vm5 }
 0x68e   :  { %v9561_v44 = vunpack.i.l.bf16 %v15622_v62  ;;  %v9562_v1 = vunpack.i.h.bf16 %v15622_v62  ;;  %v4345_v43 = vpack.c.bf16 %v4054_v31, %v4054_v31  ;;  %v18842_v17 = vunpack.i.l.bf16 %v15620_v18  ;;  %v19574_v31 = vld [vmem:[#allocation27_spill] sm:$0xff]  ;;  %vm19575_vm6 = vmmov %vm19461_vm5 }
 0x68f   :  { %4759 = vmatprep.subr.bf16.mxu0 %v4330_v14  ;;  %4838 = vmatprep.subr.bf16.mxu1 %v4284_v63  ;;  %v3979_v19 = vsel %vm19572_vm14, %v9536_v51, %v9572_v61  ;;  %vm19577_vm14 = vmmov %vm19461_vm5 }
 0x690   :  { %4760 = vmatpush1.bf16.msra.mxu0 %v4329_v15  ;;  %4839 = vmatpush1.bf16.msra.mxu1 %v4283_v24  ;;  %v4055_v48 = vsel %vm19571_vm13, %v9567_v26, %v9561_v44  ;;  %v3963_v57 = vsel %vm19573_vm8, %v9531_v27, %v9562_v1  ;;  %v4532_v29 = vsel %vm2110_vm2, %v4345_v43, 0  ;;  %v15646_v26 = vpack.c.bf16 %v15041_v11, %v19574_v31  ;;  %vm19576_vm13 = vmmov %vm19461_vm5 }
 0x691   :  { %v15633_v3 = vpop.permute.xlu1 %9574  ;;  %v4346_v59 = vpack.c.bf16 %v4055_v48, %v4055_v48  ;;  %v3964_v14 = vsel %vm19575_vm6, %v9562_v1, %v18842_v17  ;;  %v4299_v51 = vpack.c.bf16 %v3979_v19, %v3963_v57  ;;  %vm19578_vm8 = vmmov %vm19461_vm5 }
 0x692   :  { %v18843_v39 = vunpack.i.l.bf16 %v15633_v3  ;;  %v9577_v63 = vunpack.i.h.bf16 %v15633_v3  ;;  %vm19579_vm6 = vmmov %vm19461_vm5 }
 0x693   :  { %7610 = vmatprep.subr.msk.bf16.mxu0 %vm2110_vm2, %v4346_v59 }
 0x694   :  { %4762 = vmatpush1.bf16.msra.mxu0 %v4532_v29  ;;  %v3980_v38 = vsel %vm19461_vm5, %v9572_v61, %v18843_v39  ;;  %v3995_v59 = vsel %vm19577_vm14, %v9541_v25, %v9577_v63  ;;  %vm19582_vm14 = vmmov %vm19461_vm5 }
 0x695   :  { %4905 = vmatprep.subr.bf16.mxu0 %v15646_v26  ;;  %v4300_v32 = vpack.c.bf16 %v3980_v38, %v3964_v14 }
 0x697   :  { %4770 = vmatmul.mubr.bf16.vlgmr.msra.gmra.mrb[160].mxu0 %v15135_v21  ;;  %4840 = vmatprep.subr.bf16.mxu1 %v4300_v32  ;;  %v15656_v27 = vpop.permute.xlu0 %9579 }
 0x698   :  { %4841 = vmatpush1.bf16.msra.mxu1 %v4299_v51  ;;  %4906 = vmatpush1.bf16.msra.mxu0 %v15459_v37  ;;  %v9582_v11 = vunpack.i.h.bf16 %v15656_v27  ;;  %v18840_v24 = vunpack.i.l.bf16 %v15656_v27 }
 0x699   :  { %4907 = vmatprep.subr.bf16.mxu0 %v15059_v10  ;;  %7612 = vmatprep.mubr.msk.bf16.mxu0 %vm2085_vm12, %v15160_v20 }
 0x69a   :  { %v4011_v37 = vsel %vm19576_vm13, %v9546_v0, %v9582_v11  ;;  %v3996_v45 = vsel %vm19578_vm8, %v9577_v63, %v18840_v24  ;;  %vm19581_vm13 = vmmov %vm19461_vm5 }
 0x69b   :  { %v4315_v31 = vpack.c.bf16 %v4011_v37, %v3995_v59  ;;  %vm19583_vm8 = vmmov %vm19461_vm5 }
 0x69c   :  { %4908 = vmatpush1.bf16.msra.mxu0 %v19550_v23 }
 0x69d   :  { %v15666_v15 = vpop.permute.xlu0 %9589 }
 0x69e   :  { %v15668_v61 = vpop.permute.xlu1 %9584  ;;  %v18839_v1 = vunpack.i.l.bf16 %v15666_v15  ;;  %v9592_v23 = vunpack.i.h.bf16 %v15666_v15 }
 0x69f   :  { %v9587_v43 = vunpack.i.h.bf16 %v15668_v61  ;;  %v18841_v48 = vunpack.i.l.bf16 %v15668_v61  ;;  %4780 = vmatmul.mubr.bf16.gmra.mrb[164].mxu0 %v15211_v50 }
 0x6a0   :  { %7613 = vmatprep.mubr.msk.bf16.mxu0 %vm2085_vm12, %v15221_v22  ;;  %v4041_v32 = vsel %vm19582_vm14, %v9556_v53, %v9592_v23 }
 0x6a1   :  { %v4012_v0 = vsel %vm19579_vm6, %v9582_v11, %v18841_v48  ;;  %v15689_v19 = vpop.permute.xlu0 %9594  ;;  %v4027_v38 = vsel %vm19581_vm13, %v9587_v43, %v18839_v1  ;;  %v4026_v51 = vsel %vm19583_vm8, %v9551_v36, %v9587_v43  ;;  %vm19584_vm6 = vmmov %vm19461_vm5 }
 0x6a2   :  { %19580 = vst [vmem:[#allocation12_spill] sm:$0xff] %v15689_v19  ;;  %v15691_v57 = vpop.permute.xlu1 %3893  ;;  %v4316_v29 = vpack.c.bf16 %v4012_v0, %v3996_v45  ;;  %v18838_v14 = vunpack.i.h.bf16 %v15689_v19  ;;  %v9596_v52 = vunpack.i.l.bf16 %v15689_v19  ;;  %v4331_v59 = vpack.c.bf16 %v4041_v32, %v4026_v51  ;;  %v19585_v45 = vld [vmem:[#allocation30_spill] sm:$0xff]  ;;  %v19590_v32 = vld [vmem:[#allocation15_spill] sm:$0xff] }
 0x6a3   :  { %v4042_v25 = vsel %vm19461_vm5, %v9592_v23, %v15691_v57  ;;  %v19586_v0 = vunpack.i.h.bf16 %v19585_v45 }
 0x6a4   :  { %4842 = vmatprep.subr.bf16.mxu1 %v4316_v29  ;;  %v4332_v11 = vpack.c.bf16 %v4042_v25, %v4027_v38  ;;  %v4057_v63 = vsel %vm19584_vm6, %v9596_v52, %v18838_v14  ;;  %v4056_v37 = vsel %vm19461_vm5, %v9561_v44, %v9596_v52  ;;  %vm19612_vm6 = vcmask 1014784  }
 0x6a5   :  { %4843 = vmatpush1.bf16.msra.mxu1 %v4315_v31  ;;  %v4348_v53 = vpack.c.bf16 %v4057_v63, %v4057_v63  ;;  %v4347_v58 = vpack.c.bf16 %v4056_v37, %v4056_v37  ;;  %v19592_v37 = vmax.f32 %v15435_v34, 0.0  ;;  %vm19613_vm5 = vmmov %vm19612_vm6 }
 0x6a6   :  { %4844 = vmatprep.subr.bf16.mxu1 %v4332_v11  ;;  %v19591_v11 = vmax.f32 %v15417_v35, 0.0 }
 0x6a7   :  { %4786 = vmatmul.mubr.bf16.gmra.mrb[168].mxu0 %v15286_v16  ;;  %v4538_v60 = vsel %vm2110_vm2, %v4347_v58, 0 }
 0x6a8   :  { %7614 = vmatprep.mubr.msk.bf16.mxu0 %vm2085_vm12, %v15308_v49 }
 0x6a9   :  { %4845 = vmatpush1.bf16.msra.mxu1 %v4331_v59 }
 0x6aa   :  { %7619 = vmatprep.subr.msk.bf16.mxu1 %vm2110_vm2, %v4348_v53 }
 0x6ad   :  { %4847 = vmatpush1.bf16.msra.mxu1 %v4538_v60 }
 0x6af   :  { %4792 = vmatmul.mubr.bf16.gmra.mrb[172].mxu0 %v15344_v9 }
 0x6b0   :  { %4855 = vmatmul.mubr.bf16.vlgmr.msra.gmra.mrb[160].mxu1 %v15135_v21  ;;  %7615 = vmatprep.mubr.msk.bf16.mxu0 %vm2085_vm12, %v15354_v13  ;;  %v19587_v21 = vld [vmem:[#allocation31_spill] sm:$0xff] }
 0x6b1   :  { %7621 = vmatprep.mubr.msk.bf16.mxu1 %vm2085_vm12, %v15160_v20  ;;  %v19588_v52 = vmax.f32 %v19587_v21, 0.0  ;;  %v19589_v20 = vmax.f32 %v15391_v55, 0.0 }
 0x6b2   :  { %v2886_v43 = vpop.permute.xlu0 %2885 }
 0x6b3   :  { %v9600_v36 = vpop.permute.xlu1 %9599  ;;  %v2902_v51 = vsel %vm94_vm0, %v2886_v43, %v19590_v32 }
 0x6b4   :  { %v9602_v62 = vunpack.i.h.bf16 %v9600_v36  ;;  %v9601_v44 = vunpack.i.l.bf16 %v9600_v36  ;;  %v15752_v59 = vmax.f32 %v19592_v37, %v2902_v51 }
 0x6b6   :  { %v2901_v23 = vsel %vm94_vm0, %v9602_v62, %v2886_v43  ;;  %v2899_v29 = vsel %vm94_vm0, %v19586_v0, %v9601_v44  ;;  %v2900_v31 = vsel %vm94_vm0, %v9601_v44, %v9602_v62  ;;  %vm19595_vm0 = vcmask 785408  }
 0x6b7   :  { %4798 = vmatmul.mubr.bf16.gmra.mrb[176].mxu0 %v15405_v47  ;;  %v15731_v25 = vmax.f32 %v19588_v52, %v2899_v29  ;;  %v15735_v38 = vmax.f32 %v19589_v20, %v2900_v31  ;;  %v15746_v63 = vmax.f32 %v19591_v11, %v2901_v23  ;;  %vm19596_vm13 = vmmov %vm19595_vm0 }
 0x6b8   :  { %7616 = vmatprep.mubr.msk.bf16.mxu0 %vm2085_vm12, %v15424_v41  ;;  %4863 = vmatmul.mubr.bf16.gmra.mrb[164].mxu1 %v15211_v50  ;;  %vm19598_vm14 = vmmov %vm19595_vm0 }
 0x6b9   :  { %7622 = vmatprep.mubr.msk.bf16.mxu1 %vm2085_vm12, %v15221_v22  ;;  %v9605_v55 = vpack.i.bf16 %v15735_v38, %v15731_v25  ;;  %v9610_v50 = vpack.i.bf16 %v15752_v59, %v15746_v63  ;;  %vm19599_vm8 = vmmov %vm19595_vm0 }
 0x6bb   :  { %9606 = vrot.lane.b32.xlu1 %v9605_v55, %s10515_s14 }
 0x6bf   :  { %4804 = vmatmul.mubr.bf16.gmra.mrb[180].mxu0 %v15469_v46  ;;  %9611 = vrot.lane.b32.xlu1 %v9610_v50, %s10515_s14 }
 0x6c0   :  { %7617 = vmatprep.mubr.msk.bf16.mxu0 %vm2085_vm12, %v15475_v42  ;;  %4869 = vmatmul.mubr.bf16.gmra.mrb[168].mxu1 %v15286_v16 }
 0x6c1   :  { %7623 = vmatprep.mubr.msk.bf16.mxu1 %vm2085_vm12, %v15308_v49 }
 0x6c7   :  { %4810 = vmatmul.mubr.bf16.gmra.mrb[184].mxu0 %v15524_v6 }
 0x6c8   :  { %7618 = vmatprep.mubr.msk.bf16.mxu0 %vm2085_vm12, %v15536_v12  ;;  %4875 = vmatmul.mubr.bf16.gmra.mrb[172].mxu1 %v15344_v9 }
 0x6c9   :  { %7624 = vmatprep.mubr.msk.bf16.mxu1 %vm2085_vm12, %v15354_v13 }
 0x6cf   :  { %4816 = vmatmul.mubr.bf16.gmra.mrb[188].mxu0 %v15547_v33 }
 0x6d0   :  { %7629 = vmatprep.mubr.msk.bf16.mxu0 %vm2085_vm12, %v15565_v2  ;;  %4881 = vmatmul.mubr.bf16.gmra.mrb[176].mxu1 %v15405_v47 }
 0x6d1   :  { %7625 = vmatprep.mubr.msk.bf16.mxu1 %vm2085_vm12, %v15424_v41 }
 0x6d8   :  { %4887 = vmatmul.mubr.bf16.gmra.mrb[180].mxu1 %v15469_v46 }
 0x6d9   :  { %7626 = vmatprep.mubr.msk.bf16.mxu1 %vm2085_vm12, %v15475_v42 }
 0x6e0   :  { %4893 = vmatmul.mubr.bf16.gmra.mrb[184].mxu1 %v15524_v6 }
 0x6e1   :  { %7627 = vmatprep.mubr.msk.bf16.mxu1 %vm2085_vm12, %v15536_v12 }
 0x6e8   :  { %4899 = vmatmul.mubr.bf16.gmra.mrb[188].mxu1 %v15547_v33 }
 0x6e9   :  { %7638 = vmatprep.mubr.msk.bf16.mxu1 %vm2085_vm12, %v15565_v2 }
 0x6f1   :  { %v15785_v22 = vpop.f32.mrb[128].mxu0 }
 0x6f2   :  { %v15787_v16 = vpop.f32.mrb[129].mxu0 }
 0x6f3   :  { %v15789_v49 = vpop.f32.mrb[130].mxu0 }
 0x6f4   :  { %v15791_v41 = vpop.f32.mrb[131].mxu0 }
 0x6f9   :  { %v4611_v9 = vpop.f32.mrb[132].mxu0 }
 0x6fa   :  { %v4612_v13 = vpop.f32.mrb[133].mxu0 }
 0x6fb   :  { %v4613_v47 = vpop.f32.mrb[134].mxu0 }
 0x6fc   :  { %v4614_v35 = vpop.f32.mrb[135].mxu0 }
 0x701   :  { %v4617_v34 = vpop.f32.mrb[136].mxu0 }
 0x702   :  { %v4618_v46 = vpop.f32.mrb[137].mxu0 }
 0x703   :  { %v15793_v42 = vpop.f32.mrb[128].mxu1  ;;  %v4619_v6 = vpop.f32.mrb[138].mxu0 }
 0x704   :  { %v15795_v12 = vpop.f32.mrb[129].mxu1  ;;  %v4620_v33 = vpop.f32.mrb[139].mxu0 }
 0x705   :  { %v15797_v2 = vpop.f32.mrb[130].mxu1 }
 0x706   :  { %v15799_v53 = vpop.f32.mrb[131].mxu1 }
 0x709   :  { %v4623_v58 = vpop.f32.mrb[140].mxu0 }
 0x70a   :  { %v4624_v60 = vpop.f32.mrb[141].mxu0 }
 0x70b   :  { %v4625_v36 = vpop.f32.mrb[142].mxu0  ;;  %v4696_v62 = vpop.f32.mrb[132].mxu1 }
 0x70c   :  { %v4626_v44 = vpop.f32.mrb[143].mxu0  ;;  %v4697_v43 = vpop.f32.mrb[133].mxu1 }
 0x70d   :  { %v4698_v23 = vpop.f32.mrb[134].mxu1  ;;  %v15801_v60 = vpop.permute.xlu1 %4374 }
 0x70e   :  { %v4699_v45 = vpop.f32.mrb[135].mxu1  ;;  %19593 = vst [vmem:[#allocation23_spill] sm:$0xff] %v15801_v60 }
 0x711   :  { %v4629_v0 = vpop.f32.mrb[144].mxu0 }
 0x712   :  { %v4630_v29 = vpop.f32.mrb[145].mxu0 }
 0x713   :  { %v4631_v31 = vpop.f32.mrb[146].mxu0 }
 0x714   :  { %v4632_v21 = vpop.f32.mrb[147].mxu0 }
 0x716   :  { %v4702_v52 = vpop.f32.mrb[136].mxu1 }
 0x717   :  { %v4703_v20 = vpop.f32.mrb[137].mxu1 }
 0x718   :  { %v4704_v32 = vpop.f32.mrb[138].mxu1 }
 0x719   :  { %v4635_v51 = vpop.f32.mrb[148].mxu0  ;;  %v4705_v11 = vpop.f32.mrb[139].mxu1  ;;  %v19594_v32 = vld [vmem:[#allocation21_spill] sm:$0xff] }
 0x71a   :  { %v4636_v55 = vpop.f32.mrb[149].mxu0 }
 0x71b   :  { %v4637_v37 = vpop.f32.mrb[150].mxu0 }
 0x71c   :  { %v4638_v50 = vpop.f32.mrb[151].mxu0  ;;  %v19597_v37 = vld [vmem:[#allocation28_spill] sm:$0xff] }
 0x71e   :  { %v4708_v9 = vpop.f32.mrb[140].mxu1 }
 0x71f   :  { %v4709_v13 = vpop.f32.mrb[141].mxu1 }
 0x720   :  { %v4710_v47 = vpop.f32.mrb[142].mxu1 }
 0x721   :  { %v4641_v35 = vpop.f32.mrb[152].mxu0  ;;  %v4711_v34 = vpop.f32.mrb[143].mxu1 }
 0x722   :  { %v4642_v46 = vpop.f32.mrb[153].mxu0 }
 0x723   :  { %v4643_v6 = vpop.f32.mrb[154].mxu0 }
 0x724   :  { %v4644_v33 = vpop.f32.mrb[155].mxu0 }
 0x726   :  { %v4714_v58 = vpop.f32.mrb[144].mxu1 }
 0x727   :  { %v4715_v36 = vpop.f32.mrb[145].mxu1 }
 0x728   :  { %v4716_v62 = vpop.f32.mrb[146].mxu1 }
 0x729   :  { %v4647_v44 = vpop.f32.mrb[156].mxu0  ;;  %v4717_v43 = vpop.f32.mrb[147].mxu1 }
 0x72a   :  { %v4648_v23 = vpop.f32.mrb[157].mxu0 }
 0x72b   :  { %v4649_v45 = vpop.f32.mrb[158].mxu0 }
 0x72c   :  { %v4650_v0 = vpop.f32.mrb[159].mxu0 }
 0x72d   :  { %v9607_v29 = vpop.permute.xlu1 %9606 }
 0x72e   :  { %v9609_v31 = vunpack.i.h.bf16 %v9607_v29  ;;  %v9608_v21 = vunpack.i.l.bf16 %v9607_v29  ;;  %v4720_v52 = vpop.f32.mrb[148].mxu1  ;;  %v15856_v29 = vpop.permute.xlu0 %4378 }
 0x72f   :  { %v4721_v20 = vpop.f32.mrb[149].mxu1  ;;  %19603 = vst [vmem:[#allocation9_spill] sm:$0xff] %v15856_v29 }
 0x730   :  { %v2994_v51 = vsel %vm19595_vm0, %v19594_v32, %v9608_v21  ;;  %v2995_v11 = vsel %vm19596_vm13, %v9608_v21, %v9609_v31  ;;  %v4722_v55 = vpop.f32.mrb[150].mxu1  ;;  %v15864_v21 = vadd.f32 %v15799_v53, %v15856_v29  ;;  %vm19620_vm13 = vmmov %vm19613_vm5 }
 0x731   :  { %v15807_v50 = vmax.f32 %v19597_v37, %v2994_v51  ;;  %v15810_v9 = vmax.f32 %v15731_v25, %v2995_v11  ;;  %v15812_v13 = vpop.permute.xlu1 %9611  ;;  %v4723_v47 = vpop.f32.mrb[151].mxu1 }
 0x732   :  { %v9614_v35 = vunpack.i.h.bf16 %v15812_v13  ;;  %v9613_v34 = vunpack.i.l.bf16 %v15812_v13  ;;  %v18860_v53 = vmax.f32 %v15864_v21, 0.0  ;;  %v19617_v13 = vld [vmem:[#allocation22_spill] sm:$0xff] }
 0x733   :  { %v15818_v46 = vpack.i.bf16 %v15810_v9, %v15807_v50 }
 0x734   :  { %v2996_v6 = vsel %vm19598_vm14, %v9609_v31, %v9613_v34  ;;  %v2997_v33 = vsel %vm19599_vm8, %v9613_v34, %v9614_v35  ;;  %v15860_v31 = vadd.f32 %v15795_v12, %v15801_v60  ;;  %vm19621_vm14 = vmmov %vm19613_vm5  ;;  %vm19625_vm8 = vcmask 506880  }
 0x735   :  { %9626 = vrot.lane.b32.xlu1 %v15818_v46, %s10532_s18  ;;  %9616 = vrot.lane.b32.xlu0 %v15818_v46, %s10512_s9  ;;  %v15829_v58 = vmax.f32 %v15735_v38, %v2996_v6  ;;  %v15832_v36 = vmax.f32 %v15746_v63, %v2997_v33 }
 0x736   :  { %v4726_v25 = vpop.f32.mrb[152].mxu1  ;;  %v18856_v55 = vmax.f32 %v15860_v31, 0.0 }
 0x737   :  { %19600 = vst [vmem:[#allocation25_spill] sm:$0xff] %v15829_v58  ;;  %19601 = vst [vmem:[#allocation14_spill] sm:$0xff] %v15832_v36  ;;  %v4727_v62 = vpop.f32.mrb[153].mxu1  ;;  %v15840_v23 = vpack.i.bf16 %v15832_v36, %v15829_v58 }
 0x738   :  { %v4728_v44 = vpop.f32.mrb[154].mxu1 }
 0x739   :  { %9636 = vrot.lane.b32.xlu1 %v15818_v46, %s10523_s22  ;;  %9621 = vrot.lane.b32.xlu0 %v15818_v46, %s10520_s19  ;;  %v4729_v43 = vpop.f32.mrb[155].mxu1  ;;  %19602 = vst [vmem:[#allocation29_spill] sm:$0xff] %v15840_v23 }
 0x73d   :  { %9646 = vrot.lane.b32.xlu1 %v15840_v23, %s10520_s19  ;;  %9631 = vrot.lane.b32.xlu0 %v15840_v23, %s10512_s9 }
 0x73e   :  { %v4732_v38 = vpop.f32.mrb[156].mxu1 }
 0x73f   :  { %v4733_v63 = vpop.f32.mrb[157].mxu1 }
 0x740   :  { %v4734_v45 = vpop.f32.mrb[158].mxu1 }
 0x741   :  { %9656 = vrot.lane.b32.xlu1 %v15818_v46, %s10524_s25  ;;  %9641 = vrot.lane.b32.xlu0 %v15818_v46, %s10533_s20  ;;  %v4735_v0 = vpop.f32.mrb[159].mxu1 }
 0x745   :  { %9666 = vrot.lane.b32.xlu1 %v15840_v23, %s10523_s22  ;;  %9651 = vrot.lane.b32.xlu0 %v15840_v23, %s10532_s18 }
 0x749   :  { %9661 = vrot.lane.b32.xlu0 %v15818_v46, %s10526_s27 }
 0x76a   :  { %v4771_v52 = vpop.f32.mrb[160].mxu0 }
 0x76b   :  { %v15867_v20 = vadd.f32 %v4771_v52, %v15801_v60  ;;  %v4773_v32 = vpop.f32.mrb[161].mxu0 }
 0x76c   :  { %v15870_v51 = vadd.f32 %v4773_v32, %v15801_v60  ;;  %v4775_v11 = vpop.f32.mrb[162].mxu0 }
 0x76d   :  { %v18855_v37 = vmax.f32 %v15867_v20, 0.0  ;;  %v15875_v12 = vadd.f32 %v4775_v11, %v15856_v29  ;;  %v4777_v47 = vpop.f32.mrb[163].mxu0 }
 0x76e   :  { %v18849_v34 = vmax.f32 %v15870_v51, 0.0  ;;  %v15880_v6 = vadd.f32 %v4777_v47, %v15856_v29 }
 0x76f   :  { %v9670_v33 = vpack.i.bf16 %v18855_v37, %v18856_v55  ;;  %v18857_v25 = vmax.f32 %v15875_v12, 0.0 }
 0x770   :  { %v9675_v62 = vpack.i.bf16 %v18860_v53, %v18849_v34  ;;  %v18848_v44 = vmax.f32 %v15880_v6, 0.0 }
 0x771   :  { %9671 = vrot.lane.b32.xlu1 %v9670_v33, %s10512_s9  ;;  %v19604_v33 = vld [vmem:[#allocation17_spill] sm:$0xff] }
 0x772   :  { %v9690_v43 = vpack.i.bf16 %v18848_v44, %v18857_v25  ;;  %9676 = vrot.lane.b32.xlu0 %v9675_v62, %s10512_s9  ;;  %v4781_v38 = vpop.f32.mrb[164].mxu0  ;;  %v9710_v62 = vpack.i.bf16 %v15807_v50, %v19604_v33 }
 0x773   :  { %v4782_v63 = vpop.f32.mrb[165].mxu0  ;;  %v15917_v38 = vadd.f32 %v15793_v42, %v15801_v60  ;;  %v19606_v42 = vld [vmem:[#allocation7_spill] sm:$0xff] }
 0x774   :  { %v4783_v45 = vpop.f32.mrb[166].mxu0 }
 0x775   :  { %9691 = vrot.lane.b32.xlu1 %v9690_v43, %s10512_s9  ;;  %v4784_v0 = vpop.f32.mrb[167].mxu0  ;;  %v15913_v43 = vadd.f32 %v15787_v16, %v15801_v60  ;;  %19605 = vst [vmem:[#allocation8_spill] sm:$0xff] %v15917_v38 }
 0x776   :  { %9681 = vrot.lane.b32.xlu0 %v15840_v23, %s10533_s20 }
 0x779   :  { %9696 = vrot.lane.b32.xlu1 %v15840_v23, %s10524_s25 }
 0x77a   :  { %9686 = vrot.lane.b32.xlu0 %v15818_v46, %s10534_s21  ;;  %v4787_v52 = vpop.f32.mrb[168].mxu0 }
 0x77b   :  { %v4788_v32 = vpop.f32.mrb[169].mxu0 }
 0x77c   :  { %v4789_v11 = vpop.f32.mrb[170].mxu0 }
 0x77d   :  { %9706 = vrot.lane.b32.xlu1 %v15840_v23, %s10534_s21  ;;  %v4790_v47 = vpop.f32.mrb[171].mxu0  ;;  %v18850_v11 = vmax.f32 %v15913_v43, 0.0 }
 0x77e   :  { %9701 = vrot.lane.b32.xlu0 %v15840_v23, %s10526_s27  ;;  %v18844_v47 = vmax.f32 %v15917_v38, 0.0 }
 0x782   :  { %9711 = vrot.lane.b32.xlu0 %v9710_v62, %s10535_s26  ;;  %v4793_v63 = vpop.f32.mrb[172].mxu0 }
 0x783   :  { %v4856_v45 = vpop.f32.mrb[160].mxu1  ;;  %v4794_v0 = vpop.f32.mrb[173].mxu0 }
 0x784   :  { %v4857_v52 = vadd.f32 %v4856_v45, %v15801_v60  ;;  %v4858_v32 = vpop.f32.mrb[161].mxu1  ;;  %v4795_v14 = vpop.f32.mrb[174].mxu0  ;;  %v9735_v45 = vpack.i.bf16 %v18844_v47, %v18850_v11 }
 0x785   :  { %v4859_v1 = vpop.f32.mrb[162].mxu1  ;;  %v4796_v16 = vpop.f32.mrb[175].mxu0 }
 0x786   :  { %v4860_v24 = vadd.f32 %v4859_v1, %v15856_v29  ;;  %9726 = vrot.lane.b32.xlu0 %v19606_v42, %s10531_s0  ;;  %v4861_v48 = vpop.f32.mrb[163].mxu1  ;;  %v5249_v62 = vmax.f32 %v4857_v52, 0.0  ;;  %v9720_v52 = vpack.i.bf16 %v15829_v58, %v15810_v9 }
 0x787   :  { %v15938_v48 = vadd.f32 %v15797_v2, %v15856_v29 }
 0x788   :  { %v5263_v63 = vmax.f32 %v4860_v24, 0.0  ;;  %v15934_v24 = vadd.f32 %v15791_v41, %v15856_v29  ;;  %v15951_v41 = vadd.f32 %v15789_v49, %v15856_v29 }
 0x789   :  { %19608 = vst [vmem:[#allocation19_spill] sm:$0xff] %v15938_v48 }
 0x78a   :  { %v9715_v0 = vpack.i.bf16 %v5263_v63, %v5249_v62  ;;  %9736 = vrot.lane.b32.xlu0 %v9735_v45, %s10512_s9  ;;  %v4799_v32 = vpop.f32.mrb[176].mxu0  ;;  %19607 = vst [vmem:[#allocation6_spill] sm:$0xff] %v15934_v24  ;;  %v18846_v63 = vmax.f32 %v15938_v48, 0.0  ;;  %19610 = vst [vmem:[#allocation13_spill] sm:$0xff] %v15951_v41  ;;  %v19639_v48 = vmax.f32 %v15860_v31, 0.0 }
 0x78b   :  { %v4800_v14 = vpop.f32.mrb[177].mxu0  ;;  %v4864_v17 = vpop.f32.mrb[164].mxu1 }
 0x78c   :  { %9716 = vrot.lane.b32.xlu1 %v9715_v0, %s10512_s9  ;;  %v4801_v1 = vpop.f32.mrb[178].mxu0  ;;  %v4865_v16 = vpop.f32.mrb[165].mxu1  ;;  %v15945_v17 = vadd.f32 %v15785_v22, %v15801_v60 }
 0x78d   :  { %v4802_v39 = vpop.f32.mrb[179].mxu0  ;;  %v4866_v42 = vpop.f32.mrb[166].mxu1 }
 0x78e   :  { %v4867_v62 = vpop.f32.mrb[167].mxu1  ;;  %19609 = vst [vmem:[#allocation11_spill] sm:$0xff] %v15945_v17  ;;  %v18845_v39 = vmax.f32 %v15934_v24, 0.0  ;;  %v18852_v16 = vmax.f32 %v15945_v17, 0.0  ;;  %v18851_v42 = vmax.f32 %v15951_v41, 0.0 }
 0x790   :  { %9721 = vrot.lane.b32.xlu1 %v9720_v52, %s10535_s26  ;;  %v9740_v22 = vpack.i.bf16 %v18846_v63, %v18845_v39 }
 0x792   :  { %v4805_v2 = vpop.f32.mrb[180].mxu0 }
 0x793   :  { %v4806_v45 = vpop.f32.mrb[181].mxu0  ;;  %v4870_v32 = vpop.f32.mrb[168].mxu1 }
 0x794   :  { %9731 = vrot.lane.b32.xlu1 %v15818_v46, %s10531_s0  ;;  %v4807_v0 = vpop.f32.mrb[182].mxu0  ;;  %v4871_v1 = vpop.f32.mrb[169].mxu1  ;;  %v9750_v46 = vpack.i.bf16 %v18851_v42, %v18852_v16 }
 0x795   :  { %v4808_v14 = vpop.f32.mrb[183].mxu0  ;;  %v4872_v49 = vpop.f32.mrb[170].mxu1 }
 0x796   :  { %v4873_v52 = vpop.f32.mrb[171].mxu1 }
 0x798   :  { %9741 = vrot.lane.b32.xlu1 %v9740_v22, %s10512_s9 }
 0x79a   :  { %v4811_v62 = vpop.f32.mrb[184].mxu0 }
 0x79b   :  { %v4812_v2 = vpop.f32.mrb[185].mxu0  ;;  %v4876_v0 = vpop.f32.mrb[172].mxu1 }
 0x79c   :  { %9751 = vrot.lane.b32.xlu1 %v9750_v46, %s10512_s9  ;;  %v4813_v45 = vpop.f32.mrb[186].mxu0  ;;  %v4877_v14 = vpop.f32.mrb[173].mxu1 }
 0x79d   :  { %v4814_v32 = vpop.f32.mrb[187].mxu0  ;;  %v4878_v1 = vpop.f32.mrb[174].mxu1 }
 0x79e   :  { %v4879_v47 = vpop.f32.mrb[175].mxu1 }
 0x7a2   :  { %v4817_v39 = vpop.f32.mrb[188].mxu0 }
 0x7a3   :  { %v4818_v49 = vpop.f32.mrb[189].mxu0  ;;  %v4882_v63 = vpop.f32.mrb[176].mxu1 }
 0x7a4   :  { %v4819_v52 = vpop.f32.mrb[190].mxu0  ;;  %v4883_v40 = vpop.f32.mrb[177].mxu1 }
 0x7a5   :  { %v4820_v22 = vpop.f32.mrb[191].mxu0  ;;  %v4884_v44 = vpop.f32.mrb[178].mxu1  ;;  %v19611_v40 = vunpack.i.h.bf16 %v14982_v30 }
 0x7a6   :  { %v4885_v34 = vpop.f32.mrb[179].mxu1 }
 0x7a7   :  { %v15967_v11 = vpop.permute.xlu1 %9626  ;;  %v9617_v62 = vpop.permute.xlu0 %9616 }
 0x7a8   :  { %v9629_v2 = vunpack.i.h.bf16 %v15967_v11  ;;  %v9628_v46 = vunpack.i.l.bf16 %v15967_v11  ;;  %v9619_v45 = vunpack.i.h.bf16 %v9617_v62  ;;  %v9618_v0 = vunpack.i.l.bf16 %v9617_v62 }
 0x7aa   :  { %v3220_v47 = vsel %vm3209_vm3, %v15027_v4, %v9628_v46  ;;  %v3221_v39 = vsel %vm3209_vm3, %v9628_v46, %v9629_v2  ;;  %v3089_v34 = vsel %vm161_vm1, %v19611_v40, %v9618_v0  ;;  %v3090_v44 = vsel %vm161_vm1, %v9618_v0, %v9619_v45 }
 0x7ab   :  { %v15980_v63 = vpop.permute.xlu1 %9636  ;;  %v9622_v32 = vpop.permute.xlu0 %9621  ;;  %v15983_v14 = vpack.c.bf16 %v3090_v44, %v15807_v50  ;;  %v9745_v1 = vpack.i.bf16 %v3090_v44, %v3089_v34  ;;  %v9760_v49 = vpack.i.bf16 %v3221_v39, %v3220_v47  ;;  %v15986_v4 = vpack.c.bf16 %v3089_v34, %v19604_v33 }
 0x7ac   :  { %v9624_v52 = vunpack.i.h.bf16 %v9622_v32  ;;  %v9623_v22 = vunpack.i.l.bf16 %v9622_v32  ;;  %v4888_v62 = vpop.f32.mrb[180].mxu1  ;;  %v18854_v0 = vunpack.i.h.bf16 %v15980_v63  ;;  %v9638_v34 = vunpack.i.l.bf16 %v15980_v63 }
 0x7ad   :  { %4990 = vmatprep.subr.bf16.mxu1 %v15983_v14  ;;  %9746 = vrot.lane.b32.xlu0 %v9745_v1, %s10524_s25  ;;  %v4889_v30 = vpop.f32.mrb[181].mxu1 }
 0x7ae   :  { %9761 = vrot.lane.b32.xlu1 %v9760_v49, %s10524_s25  ;;  %4991 = vmatpush1.bf16.msra.mxu1 %v15986_v4  ;;  %v3153_v50 = vsel %vm19612_vm6, %v15004_v5, %v9623_v22  ;;  %v4890_v46 = vpop.f32.mrb[182].mxu1  ;;  %v3154_v40 = vsel %vm19613_vm5, %v9623_v22, %v9624_v52  ;;  %vm19627_vm6 = vmmov %vm19625_vm8 }
 0x7af   :  { %v15995_v33 = vpop.permute.xlu0 %9631  ;;  %v16001_v1 = vpack.c.bf16 %v3220_v47, %v3153_v50  ;;  %v4891_v49 = vpop.f32.mrb[183].mxu1  ;;  %v16005_v30 = vpack.c.bf16 %v3221_v39, %v3154_v40  ;;  %v9755_v5 = vpack.i.bf16 %v3154_v40, %v3153_v50  ;;  %v19615_v46 = vld [vmem:[#allocation18_spill] sm:$0xff]  ;;  %vm19650_vm5 = vmmov %vm19627_vm6 }
 0x7b0   :  { %v18853_v44 = vunpack.i.h.bf16 %v15995_v33  ;;  %v9633_v32 = vunpack.i.l.bf16 %v15995_v33  ;;  %v16003_v62 = vpop.permute.xlu1 %9646  ;;  %v2998_v42 = vsel %vm19595_vm0, %v9614_v35, %v19615_v46  ;;  %v16027_v35 = vsel %vm697_vm10, %v19617_v13, %v9638_v34  ;;  %vm19669_vm0 = vmmov %vm19650_vm5 }
 0x7b1   :  { %19614 = vst [vmem:[#allocation27_spill] sm:$0xff] %v16003_v62  ;;  %4992 = vmatprep.subr.bf16.mxu1 %v16005_v30  ;;  %9756 = vrot.lane.b32.xlu0 %v9755_v5, %s10524_s25  ;;  %v16038_v49 = vmax.f32 %v15752_v59, %v2998_v42  ;;  %v18858_v5 = vunpack.i.h.bf16 %v16003_v62  ;;  %v9648_v46 = vunpack.i.l.bf16 %v16003_v62 }
 0x7b2   :  { %v16012_v22 = vsel %vm161_vm1, %v9619_v45, %v9633_v32  ;;  %v16017_v16 = vsel %vm161_vm1, %v9633_v32, %v18853_v44  ;;  %v16032_v45 = vsel %vm697_vm10, %v9638_v34, %v18854_v0  ;;  %4993 = vmatpush1.bf16.msra.mxu1 %v16001_v1  ;;  %v19618_v44 = vld [vmem:[#allocation16_spill] sm:$0xff] }
 0x7b3   :  { %19616 = vst [vmem:[#allocation30_spill] sm:$0xff] %v16017_v16  ;;  %v16021_v47 = vpop.permute.xlu0 %9641  ;;  %v9765_v39 = vpack.i.bf16 %v16017_v16, %v16012_v22  ;;  %v4894_v32 = vpop.f32.mrb[184].mxu1  ;;  %v3155_v25 = vsel %vm19620_vm13, %v9624_v52, %v9648_v46  ;;  %vm19670_vm13 = vmmov %vm19669_vm0 }
 0x7b4   :  { %v18859_v50 = vunpack.i.h.bf16 %v16021_v47  ;;  %v9643_v40 = vunpack.i.l.bf16 %v16021_v47  ;;  %v4895_v13 = vpop.f32.mrb[185].mxu1  ;;  %v16048_v55 = vpop.permute.xlu1 %9656 }
 0x7b5   :  { %9766 = vrot.lane.b32.xlu1 %v9765_v39, %s10524_s25  ;;  %v4896_v37 = vpop.f32.mrb[186].mxu1  ;;  %3077 = vrot.lane.b32.xlu0 %v16038_v49, %s10512_s9  ;;  %v9775_v39 = vpack.i.bf16 %v16032_v45, %v16027_v35  ;;  %v19626_v60 = vunpack.i.h.bf16 %v16048_v55 }
 0x7b6   :  { %v3679_v34 = vsel %vm3670_vm7, %v19618_v44, %v9643_v40  ;;  %v3680_v0 = vsel %vm3670_vm7, %v9643_v40, %v18859_v50  ;;  %v4897_v13 = vpop.f32.mrb[187].mxu1  ;;  %v3156_v37 = vsel %vm19621_vm14, %v9648_v46, %v18858_v5  ;;  %v19622_v46 = vmov 0.0   ;;  %vm19672_vm14 = vmmov %vm19669_vm0 }
 0x7b7   :  { %v16052_v59 = vpop.permute.xlu0 %9651  ;;  %v9770_v42 = vpack.i.bf16 %v3680_v0, %v3679_v34  ;;  %v9658_v0 = vunpack.i.l.bf16 %v16048_v55  ;;  %v16076_v5 = vpack.i.bf16 %v19622_v46, %v16038_v49  ;;  %v9785_v29 = vpack.i.bf16 %v3156_v37, %v3155_v25 }
 0x7b8   :  { %19619 = vst [vmem:[#allocation31_spill] sm:$0xff] %v16052_v59  ;;  %v18863_v32 = vunpack.i.h.bf16 %v16052_v59  ;;  %v9653_v44 = vunpack.i.l.bf16 %v16052_v59 }
 0x7b9   :  { %9776 = vrot.lane.b32.xlu1 %v9775_v39, %s10524_s25  ;;  %9771 = vrot.lane.b32.xlu0 %v9770_v42, %s10524_s25  ;;  %v16094_v59 = vsel %vm19627_vm6, %v9658_v0, %v19626_v60  ;;  %vm19676_vm6 = vmmov %vm19669_vm0 }
 0x7ba   :  { %v3222_v34 = vsel %vm3209_vm3, %v9629_v2, %v9653_v44  ;;  %v3223_v13 = vsel %vm3209_vm3, %v9653_v44, %v18863_v32  ;;  %v19624_v44 = vunpack.i.l.bf16 %v15227_v28 }
 0x7bb   :  { %v16072_v52 = vpop.permute.xlu0 %9661  ;;  %v16078_v39 = vpack.c.bf16 %v3222_v34, %v3155_v25  ;;  %v16080_v50 = vpack.c.bf16 %v3223_v13, %v3156_v37  ;;  %v4900_v53 = vpop.f32.mrb[188].mxu1  ;;  %v9790_v11 = vpack.i.bf16 %v3223_v13, %v3222_v34 }
 0x7bc   :  { %v9663_v2 = vunpack.i.l.bf16 %v16072_v52  ;;  %v4901_v40 = vpop.f32.mrb[189].mxu1  ;;  %v16089_v32 = vsel %vm19625_vm8, %v19624_v44, %v9658_v0  ;;  %v19629_v37 = vunpack.i.h.bf16 %v16072_v52  ;;  %vm19674_vm8 = vmmov %vm19669_vm0 }
 0x7bd   :  { %19623 = vst [vmem:[#allocation15_spill] sm:$0xff] %v16080_v50  ;;  %9781 = vrot.lane.b32.xlu1 %v16076_v5, %s10532_s18  ;;  %v4902_v42 = vpop.f32.mrb[190].mxu1  ;;  %9786 = vrot.lane.b32.xlu0 %v9785_v29, %s10524_s25  ;;  %v19628_v40 = vld [vmem:[#allocation34_spill] sm:$0xff]  ;;  %v16115_v29 = vpop.permute.xlu1 %9666  ;;  %v19634_v50 = vmax.f32 %v15864_v21, 0.0 }
 0x7be   :  { %v4903_v53 = vpop.f32.mrb[191].mxu1  ;;  %v16099_v25 = vsel %vm965_vm15, %v19628_v40, %v9663_v2  ;;  %v16104_v28 = vsel %vm965_vm15, %v9663_v2, %v19629_v37  ;;  %v9795_v42 = vpack.i.bf16 %v16094_v59, %v16089_v32  ;;  %19630 = vst [vmem:[#allocation21_spill] sm:$0xff] %v16115_v29  ;;  %v9668_v40 = vunpack.i.l.bf16 %v16115_v29 }
 0x7bf   :  { %v9800_v60 = vpack.i.bf16 %v16104_v28, %v16099_v25  ;;  %v19637_v53 = vunpack.i.h.bf16 %v16021_v47 }
 0x7c1   :  { %9791 = vrot.lane.b32.xlu1 %v9790_v11, %s10524_s25  ;;  %9796 = vrot.lane.b32.xlu0 %v9795_v42, %s10524_s25 }
 0x7c5   :  { %9801 = vrot.lane.b32.xlu1 %v9800_v60, %s10524_s25 }
 0x7c9   :  { %9806 = vrot.lane.b32.xlu1 %v16076_v5, %s10533_s20 }
 0x7e3   :  { %v16117_v0 = vpop.permute.xlu1 %9671 }
 0x7e4   :  { %v16119_v34 = vpop.permute.xlu0 %9676  ;;  %v9674_v13 = vunpack.i.h.bf16 %v16117_v0  ;;  %v18874_v11 = vunpack.i.l.bf16 %v16117_v0 }
 0x7e5   :  { %v18877_v2 = vunpack.i.l.bf16 %v16119_v34  ;;  %v19632_v38 = vunpack.i.h.bf16 %v16119_v34 }
 0x7e6   :  { %v5358_v60 = vsel %vm161_vm1, %v18874_v11, %v9674_v13 }
 0x7e7   :  { %v16124_v44 = vpop.permute.xlu1 %9691  ;;  %v5359_v62 = vsel %vm161_vm1, %v9674_v13, %v18877_v2  ;;  %v19635_v13 = vmax.f32 %v15875_v12, 0.0  ;;  %v16163_v19 = vmax.f32 %v19639_v48, %v5358_v60 }
 0x7e8   :  { %v9693_v37 = vunpack.i.l.bf16 %v16124_v44  ;;  %v16129_v42 = vpop.permute.xlu0 %9681  ;;  %v19633_v36 = vunpack.i.h.bf16 %v16124_v44 }
 0x7e9   :  { %19631 = vst [vmem:[#allocation28_spill] sm:$0xff] %v16129_v42  ;;  %v9683_v23 = vunpack.i.l.bf16 %v16129_v42  ;;  %v19638_v58 = vunpack.i.h.bf16 %v16129_v42 }
 0x7ea   :  { %v5370_v24 = vsel %vm161_vm1, %v19632_v38, %v9693_v37  ;;  %v5371_v11 = vsel %vm161_vm1, %v9693_v37, %v19633_v36  ;;  %v19640_v36 = vmax.f32 %v15867_v20, 0.0  ;;  %v19644_v20 = vunpack.i.h.bf16 %v16115_v29  ;;  %v19656_v29 = vld [vmem:[#allocation2_spill] sm:$0xff] }
 0x7eb   :  { %v16149_v16 = vmax.f32 %v19634_v50, %v5370_v24  ;;  %v16153_v2 = vmax.f32 %v19635_v13, %v5371_v11  ;;  %v3681_v41 = vsel %vm3670_vm7, %v19637_v53, %v9683_v23  ;;  %v3682_v38 = vsel %vm3670_vm7, %v9683_v23, %v19638_v58  ;;  %v16169_v24 = vpop.permute.xlu1 %9696 }
 0x7ec   :  { %v16167_v21 = vmax.f32 %v19640_v36, %v5359_v62  ;;  %19642 = vst [vmem:[#allocation18_spill] sm:$0xff] %v16169_v24  ;;  %v16171_v12 = vpop.permute.xlu0 %9686  ;;  %v9810_v50 = vpack.i.bf16 %v3682_v38, %v3681_v41  ;;  %v19643_v23 = vunpack.i.h.bf16 %v15980_v63  ;;  %v16185_v48 = vsel %vm697_vm10, %v9668_v40, %v19644_v20  ;;  %v19646_v63 = vld [vmem:[#allocation33_spill] sm:$0xff] }
 0x7ed   :  { %19636 = vst [vmem:[#allocation17_spill] sm:$0xff] %v16153_v2  ;;  %v18883_v47 = vunpack.i.h.bf16 %v16171_v12  ;;  %v9688_v11 = vunpack.i.l.bf16 %v16171_v12  ;;  %v9820_v58 = vpack.i.bf16 %v16153_v2, %v16149_v16  ;;  %19645 = vst [vmem:[#allocation22_spill] sm:$0xff] %v16185_v48  ;;  %v18881_v41 = vunpack.i.l.bf16 %v16169_v24 }
 0x7ee   :  { %19641 = vst [vmem:[#allocation7_spill] sm:$0xff] %v16167_v21  ;;  %v16180_v31 = vsel %vm697_vm10, %v19643_v23, %v9668_v40  ;;  %9811 = vrot.lane.b32.xlu0 %v9810_v50, %s10524_s25  ;;  %v9815_v53 = vpack.i.bf16 %v16167_v21, %v16163_v19  ;;  %v19647_v38 = vunpack.i.h.bf16 %v16072_v52  ;;  %v19649_v50 = vunpack.i.h.bf16 %v16048_v55 }
 0x7ef   :  { %9821 = vrot.lane.b32.xlu1 %v9820_v58, %s10523_s22  ;;  %v16196_v37 = vsel %vm3535_vm11, %v19646_v63, %v9688_v11  ;;  %v16201_v40 = vsel %vm3535_vm11, %v9688_v11, %v18883_v47  ;;  %v9825_v13 = vpack.i.bf16 %v16185_v48, %v16180_v31  ;;  %v19653_v47 = vld [vmem:[#allocation32_spill] sm:$0xff]  ;;  %v19654_v48 = vld [vmem:[#allocation37_spill] sm:$0xff]  ;;  %v19657_v42 = vunpack.i.h.bf16 %v19656_v29 }
 0x7f0   :  { %v16190_v62 = vpop.permute.xlu0 %9701  ;;  %v16220_v11 = vsel %vm19650_vm5, %v19649_v50, %v18881_v41  ;;  %v9830_v23 = vpack.i.bf16 %v16201_v40, %v16196_v37  ;;  %v4251_v20 = vpack.c.bf16 %v19654_v48, %v19653_v47  ;;  %v19658_v48 = vld [vmem:[#allocation35_spill] sm:$0xff]  ;;  %v19660_v29 = vunpack.i.l.bf16 %v16119_v34  ;;  %vm19677_vm5 = vmmov %vm19669_vm0 }
 0x7f1   :  { %v18882_v60 = vunpack.i.l.bf16 %v16190_v62 }
 0x7f2   :  { %9816 = vrot.lane.b32.xlu0 %v9815_v53, %s10523_s22  ;;  %v19651_v53 = vunpack.i.h.bf16 %v15332_v8 }
 0x7f3   :  { %v16212_v36 = vsel %vm965_vm15, %v19647_v38, %v18882_v60  ;;  %9826 = vrot.lane.b32.xlu1 %v9825_v13, %s10524_s25  ;;  %v19652_v38 = vld [vmem:[#allocation10_spill] sm:$0xff]  ;;  %v16233_v60 = vpop.permute.xlu1 %9706 }
 0x7f4   :  { %19648 = vst [vmem:[#allocation16_spill] sm:$0xff] %v16212_v36  ;;  %v9712_v58 = vpop.permute.xlu0 %9711 }
 0x7f5   :  { %v9713_v52 = vunpack.i.l.bf16 %v9712_v58 }
 0x7f6   :  { %9831 = vrot.lane.b32.xlu0 %v9830_v23, %s10524_s25 }
 0x7f7   :  { %v3286_v63 = vsel %vm3276_vm4, %v19651_v53, %v9713_v52 }
 0x7f8   :  { %v9727_v13 = vpop.permute.xlu0 %9726  ;;  %v16231_v55 = vpack.c.bf16 %v19652_v38, %v3286_v63 }
 0x7f9   :  { %v9729_v50 = vunpack.i.h.bf16 %v9727_v13  ;;  %v9728_v41 = vunpack.i.l.bf16 %v9727_v13  ;;  %v19655_v13 = vld [vmem:[#allocation3_spill] sm:$0xff] }
 0x7fa   :  { %4909 = vmatprep.subr.bf16.mxu0 %v16231_v55  ;;  %v4250_v38 = vpack.c.bf16 %v19655_v13, %v15261_v7  ;;  %v9714_v7 = vunpack.i.h.bf16 %v9712_v58  ;;  %v19665_v58 = vmax.f32 %v15880_v6, 0.0 }
 0x7fb   :  { %4910 = vmatpush1.bf16.msra.mxu0 %v15507_v54  ;;  %v3612_v23 = vsel %vm3602_vm9, %v9728_v41, %v9729_v50  ;;  %v3611_v2 = vsel %vm3602_vm9, %v19657_v42, %v9728_v41  ;;  %v19659_v54 = vunpack.i.l.bf16 %v16117_v0  ;;  %v19661_v41 = vunpack.i.h.bf16 %v16124_v44 }
 0x7fc   :  { %4911 = vmatprep.subr.bf16.mxu0 %v4251_v20  ;;  %v16240_v8 = vpop.permute.xlu0 %9736  ;;  %v4267_v36 = vpack.c.bf16 %v3612_v23, %v19658_v48  ;;  %v19662_v23 = vld [vmem:[#allocation36_spill] sm:$0xff]  ;;  %v19663_v48 = vmax.f32 %v15913_v43, 0.0  ;;  %v3287_v44 = vsel %vm3276_vm4, %v9713_v52, %v9714_v7 }
 0x7fd   :  { %v9739_v53 = vunpack.i.h.bf16 %v16240_v8  ;;  %v9738_v63 = vunpack.i.l.bf16 %v16240_v8  ;;  %v4266_v13 = vpack.c.bf16 %v3611_v2, %v19662_v23  ;;  %v9708_v2 = vunpack.i.l.bf16 %v16233_v60 }
 0x7fe   :  { %v9717_v21 = vpop.permute.xlu1 %9716 }
 0x7ff   :  { %v16253_v20 = vsel %vm161_vm1, %v9739_v53, %v19659_v54  ;;  %v5356_v24 = vsel %vm161_vm1, %v9738_v63, %v9739_v53  ;;  %v9719_v17 = vunpack.i.h.bf16 %v9717_v21  ;;  %v9718_v46 = vunpack.i.l.bf16 %v9717_v21  ;;  %4912 = vmatpush1.bf16.msra.mxu0 %v4250_v38 }
 0x800   :  { %4913 = vmatprep.subr.bf16.mxu0 %v4267_v36  ;;  %v16267_v54 = vmax.f32 %v19663_v48, %v5356_v24  ;;  %v19664_v53 = vmax.f32 %v15870_v51, 0.0  ;;  %v18902_v51 = vunpack.i.h.bf16 %v16190_v62 }
 0x801   :  { %v5360_v42 = vsel %vm161_vm1, %v19660_v29, %v9718_v46  ;;  %v5372_v0 = vsel %vm161_vm1, %v19661_v41, %v9719_v17  ;;  %v19666_v41 = vunpack.i.h.bf16 %v16171_v12 }
 0x802   :  { %v5408_v21 = vmax.f32 %v19664_v53, %v5360_v42  ;;  %v5420_v36 = vmax.f32 %v19665_v58, %v5372_v0  ;;  %v16273_v38 = vpop.permute.xlu1 %9721  ;;  %v4236_v42 = vpack.c.bf16 %v16027_v35, %v3287_v44  ;;  %v19667_v0 = vunpack.i.l.bf16 %v16190_v62 }
 0x803   :  { %v9723_v46 = vunpack.i.l.bf16 %v16273_v38  ;;  %4914 = vmatpush1.bf16.msra.mxu0 %v4266_v13  ;;  %v4252_v35 = vpack.c.bf16 %v16099_v25, %v16089_v32  ;;  %v18903_v25 = vunpack.i.h.bf16 %v16273_v38  ;;  %v19668_v53 = vunpack.i.l.bf16 %v15588_v56 }
 0x804   :  { %4915 = vmatprep.subr.bf16.mxu0 %v15986_v4  ;;  %v9835_v17 = vpack.i.bf16 %v5408_v21, %v16038_v49  ;;  %v9840_v43 = vpack.i.bf16 %v16267_v54, %v5420_v36  ;;  %v19671_v56 = vunpack.i.l.bf16 %v15633_v3 }
 0x805   :  { %v3288_v6 = vsel %vm3276_vm4, %v9714_v7, %v9723_v46  ;;  %v4253_v7 = vpack.c.bf16 %v16104_v28, %v16094_v59 }
 0x806   :  { %v16283_v24 = vpop.permute.xlu1 %9731  ;;  %9836 = vrot.lane.b32.xlu0 %v9835_v17, %s10523_s22  ;;  %9841 = vrot.lane.b32.xlu1 %v9840_v43, %s10523_s22  ;;  %v4237_v52 = vpack.c.bf16 %v16032_v45, %v3288_v6  ;;  %v16300_v45 = vsel %vm3535_vm11, %v19666_v41, %v9708_v2  ;;  %v18904_v17 = vunpack.i.h.bf16 %v16233_v60 }
 0x807   :  { %v18900_v4 = vunpack.i.h.bf16 %v16283_v24  ;;  %v9733_v29 = vunpack.i.l.bf16 %v16283_v24  ;;  %4916 = vmatpush1.bf16.msra.mxu0 %v15646_v26  ;;  %v16307_v26 = vsel %vm965_vm15, %v19667_v0, %v18902_v51 }
 0x808   :  { %4917 = vmatprep.subr.bf16.mxu0 %v16001_v1  ;;  %4994 = vmatprep.subr.bf16.mxu1 %v4237_v52  ;;  %v9860_v23 = vpack.i.bf16 %v16300_v45, %v16307_v26 }
 0x809   :  { %4995 = vmatpush1.bf16.msra.mxu1 %v4236_v42  ;;  %v3614_v1 = vsel %vm3602_vm9, %v9733_v29, %v18900_v4  ;;  %v3613_v28 = vsel %vm3602_vm9, %v9729_v50, %v9733_v29 }
 0x80a   :  { %4996 = vmatprep.subr.bf16.mxu1 %v4253_v7  ;;  %3467 = vrot.lane.b32.xlu1 %v16038_v49, %s10526_s27  ;;  %v4269_v12 = vpack.c.bf16 %v3614_v1, %v16201_v40  ;;  %v4268_v13 = vpack.c.bf16 %v3613_v28, %v16196_v37  ;;  %v3289_v40 = vsel %vm3276_vm4, %v9723_v46, %v18903_v25  ;;  %v19675_v7 = vunpack.i.l.bf16 %v15620_v18  ;;  %s10537_s27 = smov 116  }
 0x80b   :  { %4918 = vmatpush1.bf16.msra.mxu0 %v15059_v10  ;;  %v16326_v10 = vpack.c.bf16 %v16012_v22, %v15810_v9  ;;  %v16338_v37 = vpack.c.bf16 %v16180_v31, %v3289_v40  ;;  %v16374_v28 = vsel %vm3535_vm11, %v9708_v2, %v18904_v17  ;;  %v19678_v18 = vunpack.i.h.bf16 %v15995_v33  ;;  %v19727_v17 = vld [vmem:[#allocation8_spill] sm:$0xff] }
 0x80c   :  { %4919 = vmatprep.subr.bf16.mxu0 %v4236_v42 }
 0x80d   :  { %4997 = vmatpush1.bf16.msra.mxu1 %v4252_v35 }
 0x80e   :  { %4998 = vmatprep.subr.bf16.mxu1 %v4269_v12  ;;  %9861 = vrot.lane.b32.xlu1 %v9860_v23, %s10524_s25 }
 0x80f   :  { %4920 = vmatpush1.bf16.msra.mxu0 %v16231_v55  ;;  %v16335_v55 = vpop.permute.xlu1 %9741 }
 0x811   :  { %4999 = vmatpush1.bf16.msra.mxu1 %v4268_v13 }
 0x812   :  { %5000 = vmatprep.subr.bf16.mxu1 %v16326_v10 }
 0x813   :  { %v16342_v9 = vpop.permute.xlu1 %9751 }
 0x814   :  { %v9754_v25 = vunpack.i.h.bf16 %v16342_v9 }
 0x815   :  { %5001 = vmatpush1.bf16.msra.mxu1 %v15983_v14 }
 0x816   :  { %5002 = vmatprep.subr.bf16.mxu1 %v16078_v39 }
 0x819   :  { %5003 = vmatpush1.bf16.msra.mxu1 %v16005_v30 }
 0x81a   :  { %5004 = vmatprep.subr.bf16.mxu1 %v16338_v37 }
 0x81d   :  { %5005 = vmatpush1.bf16.msra.mxu1 %v4237_v52 }
 0x81f   :  { %v9747_v22 = vpop.permute.xlu0 %9746 }
 0x820   :  { %v9749_v14 = vunpack.i.h.bf16 %v9747_v22  ;;  %v9748_v50 = vunpack.i.l.bf16 %v9747_v22  ;;  %v16344_v48 = vpop.permute.xlu1 %9761 }
 0x821   :  { %v9764_v31 = vunpack.i.h.bf16 %v16344_v48  ;;  %v9763_v30 = vunpack.i.l.bf16 %v16344_v48 }
 0x822   :  { %v3949_v21 = vsel %vm19669_vm0, %v19668_v53, %v9748_v50  ;;  %v3950_v58 = vsel %vm19670_vm13, %v9748_v50, %v9749_v14  ;;  %vm19679_vm13 = vmmov %vm19669_vm0 }
 0x823   :  { %v4286_v36 = vpack.c.bf16 %v3950_v58, %v16089_v32  ;;  %v4285_v46 = vpack.c.bf16 %v3949_v21, %v19653_v47  ;;  %v9757_v44 = vpop.permute.xlu0 %9756  ;;  %v3981_v52 = vsel %vm19672_vm14, %v19671_v56, %v9763_v30  ;;  %v3982_v42 = vsel %vm19674_vm8, %v9763_v30, %v9764_v31  ;;  %vm19681_vm14 = vmmov %vm19669_vm0 }
 0x824   :  { %v9759_v43 = vunpack.i.h.bf16 %v9757_v44  ;;  %v9758_v6 = vunpack.i.l.bf16 %v9757_v44  ;;  %v19680_v58 = vunpack.i.l.bf16 %v15668_v61  ;;  %vm19682_vm8 = vmmov %vm19669_vm0 }
 0x825   :  { %4921 = vmatprep.subr.bf16.mxu0 %v4286_v36 }
 0x826   :  { %4922 = vmatpush1.bf16.msra.mxu0 %v4285_v46  ;;  %v3965_v32 = vsel %vm19676_vm6, %v19675_v7, %v9758_v6  ;;  %v3966_v0 = vsel %vm19677_vm5, %v9758_v6, %v9759_v43  ;;  %v19683_v46 = vunpack.i.l.bf16 %v15656_v27  ;;  %vm19684_vm6 = vmmov %vm19669_vm0 }
 0x827   :  { %v16358_v29 = vpop.permute.xlu1 %9766  ;;  %v16367_v1 = vpop.permute.xlu0 %3077  ;;  %v4302_v35 = vpack.c.bf16 %v3982_v42, %v3966_v0  ;;  %v4301_v3 = vpack.c.bf16 %v3981_v52, %v3965_v32  ;;  %vm19685_vm5 = vmmov %vm19669_vm0 }
 0x828   :  { %19673 = vst [vmem:[#allocation34_spill] sm:$0xff] %v16358_v29  ;;  %v18898_v47 = vunpack.i.h.bf16 %v16358_v29  ;;  %v9768_v41 = vunpack.i.l.bf16 %v16358_v29  ;;  %v16380_v12 = vsel %vm161_vm1, %v19678_v18, %v16367_v1 }
 0x829   :  { %v9870_v40 = vpack.i.bf16 %v16380_v12, %v16374_v28  ;;  %4923 = vmatprep.subr.bf16.mxu0 %v4302_v35 }
 0x82a   :  { %v3951_v23 = vsel %vm19669_vm0, %v9749_v14, %v9768_v41  ;;  %v3952_v13 = vsel %vm19679_vm13, %v9768_v41, %v18898_v47  ;;  %4924 = vmatpush1.bf16.msra.mxu0 %v4301_v3  ;;  %vm19688_vm13 = vmmov %vm19669_vm0 }
 0x82b   :  { %v16388_v22 = vpop.permute.xlu1 %9776  ;;  %v4288_v2 = vpack.c.bf16 %v3952_v13, %v16220_v11  ;;  %v4287_v50 = vpack.c.bf16 %v3951_v23, %v16094_v59  ;;  %v16394_v14 = vpop.permute.xlu0 %9771  ;;  %9871 = vrot.lane.b32.xlu1 %v9870_v40, %s10524_s25 }
 0x82c   :  { %v9779_v33 = vunpack.i.h.bf16 %v16388_v22  ;;  %v9778_v48 = vunpack.i.l.bf16 %v16388_v22  ;;  %v9774_v53 = vunpack.i.h.bf16 %v16394_v14  ;;  %v9773_v21 = vunpack.i.l.bf16 %v16394_v14 }
 0x82d   :  { %5006 = vmatprep.subr.bf16.mxu1 %v4288_v2 }
 0x82e   :  { %v4013_v30 = vsel %vm19681_vm14, %v19680_v58, %v9778_v48  ;;  %5007 = vmatpush1.bf16.msra.mxu1 %v4287_v50  ;;  %v4014_v59 = vsel %vm19682_vm8, %v9778_v48, %v9779_v33  ;;  %v3997_v44 = vsel %vm19684_vm6, %v19683_v46, %v9773_v21  ;;  %v3998_v6 = vsel %vm19685_vm5, %v9773_v21, %v9774_v53  ;;  %vm19689_vm14 = vmmov %vm19669_vm0 }
 0x82f   :  { %v16405_v36 = vpop.permute.xlu1 %9781  ;;  %v16411_v56 = vpop.permute.xlu0 %9786  ;;  %9886 = vrot.lane.b32.xlu1 %v16076_v5, %s10531_s0  ;;  %v4318_v61 = vpack.c.bf16 %v4014_v59, %v3998_v6  ;;  %v4317_v52 = vpack.c.bf16 %v4013_v30, %v3997_v44  ;;  %vm19690_vm8 = vmmov %vm19669_vm0  ;;  %v19691_v21 = vunpack.i.l.bf16 %v15666_v15 }
 0x830   :  { %19686 = vst [vmem:[#allocation33_spill] sm:$0xff] %v16411_v56  ;;  %v18897_v42 = vunpack.i.h.bf16 %v16411_v56  ;;  %v9788_v7 = vunpack.i.l.bf16 %v16411_v56  ;;  %vm19692_vm6 = vmmov %vm19669_vm0  ;;  %v19749_v56 = vld [vmem:[#allocation27_spill] sm:$0xff] }
 0x831   :  { %4925 = vmatprep.subr.bf16.mxu0 %v4318_v61  ;;  %vm19693_vm5 = vmmov %vm19669_vm0  ;;  %v19750_v29 = vunpack.i.h.bf16 %v19749_v56 }
 0x832   :  { %4926 = vmatpush1.bf16.msra.mxu0 %v4317_v52  ;;  %v3967_v0 = vsel %vm19669_vm0, %v9759_v43, %v9788_v7  ;;  %v3968_v3 = vsel %vm19688_vm13, %v9788_v7, %v18897_v42  ;;  %vm19694_vm13 = vmmov %vm19669_vm0  ;;  %v9753_v7 = vunpack.i.l.bf16 %v16342_v9  ;;  %v16630_v9 = vunpack.i.h.bf16 %v16405_v36 }
 0x833   :  { %v16417_v32 = vpop.permute.xlu1 %9791  ;;  %v16422_v35 = vpop.permute.xlu0 %9796 }
 0x834   :  { %19687 = vst [vmem:[#allocation10_spill] sm:$0xff] %v16417_v32  ;;  %v18895_v27 = vunpack.i.h.bf16 %v16417_v32  ;;  %v9793_v41 = vunpack.i.l.bf16 %v16417_v32  ;;  %v18906_v18 = vunpack.i.h.bf16 %v16422_v35  ;;  %v9798_v23 = vunpack.i.l.bf16 %v16422_v35 }
 0x836   :  { %v3983_v13 = vsel %vm19689_vm14, %v9764_v31, %v9793_v41  ;;  %v3984_v40 = vsel %vm19690_vm8, %v9793_v41, %v18895_v27  ;;  %v4028_v58 = vsel %vm19692_vm6, %v19691_v21, %v9798_v23  ;;  %v4029_v30 = vsel %vm19669_vm0, %v9798_v23, %v18906_v18  ;;  %vm19697_vm14 = vmmov %vm19669_vm0  ;;  %v19711_v27 = vld [vmem:[#allocation18_spill] sm:$0xff] }
 0x837   :  { %v16433_v2 = vpop.permute.xlu1 %9801  ;;  %v4304_v50 = vpack.c.bf16 %v3984_v40, %v3968_v3  ;;  %v4303_v43 = vpack.c.bf16 %v3983_v13, %v3967_v0  ;;  %vm19698_vm8 = vmmov %vm19669_vm0  ;;  %v18909_v47 = vunpack.i.h.bf16 %v19711_v27  ;;  %v16670_v18 = vld [vmem:[%s18537_s2 + $0x44] ss:$8 sps:$4 sm:$0xff]  }
 0x838   :  { %v18905_v48 = vunpack.i.h.bf16 %v16433_v2  ;;  %v9803_v14 = vunpack.i.l.bf16 %v16433_v2  ;;  %vm19701_vm6 = vmmov %vm19669_vm0 }
 0x839   :  { %5008 = vmatprep.subr.bf16.mxu1 %v4304_v50 }
 0x83a   :  { %v4043_v31 = vsel %vm19693_vm5, %v15691_v57, %v9803_v14  ;;  %5009 = vmatpush1.bf16.msra.mxu1 %v4303_v43  ;;  %v4044_v59 = vsel %vm19694_vm13, %v9803_v14, %v18905_v48  ;;  %v9744_v43 = vunpack.i.h.bf16 %v16335_v55  ;;  %vm19702_vm5 = vmmov %vm19669_vm0 }
 0x83b   :  { %v4334_v46 = vpack.c.bf16 %v4044_v59, %v4029_v30  ;;  %v4333_v44 = vpack.c.bf16 %v4043_v31, %v4028_v58  ;;  %v16448_v6 = vpop.permute.xlu1 %9806  ;;  %v5355_v58 = vsel %vm161_vm1, %v9753_v7, %v9738_v63  ;;  %vm19710_vm13 = vmmov %vm19669_vm0 }
 0x83d   :  { %4927 = vmatprep.subr.bf16.mxu0 %v4334_v46 }
 0x83e   :  { %4928 = vmatpush1.bf16.msra.mxu0 %v4333_v44 }
 0x860   :  { %v16450_v15 = vpop.permute.xlu0 %9811 }
 0x861   :  { %19695 = vst [vmem:[#allocation32_spill] sm:$0xff] %v16450_v15  ;;  %v16452_v61 = vpop.permute.xlu1 %9821  ;;  %v18894_v41 = vunpack.i.h.bf16 %v16450_v15  ;;  %v9813_v0 = vunpack.i.l.bf16 %v16450_v15 }
 0x862   :  { %v9824_v57 = vunpack.i.h.bf16 %v16452_v61  ;;  %v18901_v52 = vunpack.i.l.bf16 %v16452_v61 }
 0x863   :  { %v3999_v31 = vsel %vm19697_vm14, %v9774_v53, %v9813_v0  ;;  %v4000_v59 = vsel %vm19698_vm8, %v9813_v0, %v18894_v41  ;;  %vm19718_vm14 = vmmov %vm19669_vm0 }
 0x864   :  { %v16459_v3 = vpop.permute.xlu0 %9816  ;;  %v5512_v23 = vsel %vm697_vm10, %v18901_v52, %v9824_v57  ;;  %v19724_v52 = vld [vmem:[#allocation17_spill] sm:$0xff] }
 0x865   :  { %v9819_v13 = vunpack.i.h.bf16 %v16459_v3  ;;  %v18899_v40 = vunpack.i.l.bf16 %v16459_v3  ;;  %v16468_v50 = vpop.permute.xlu1 %9826  ;;  %v16486_v46 = vmax.f32 %v16149_v16, %v5512_v23  ;;  %v19703_v23 = vunpack.i.h.bf16 %v16119_v34 }
 0x866   :  { %19696 = vst [vmem:[#allocation37_spill] sm:$0xff] %v16468_v50  ;;  %v18896_v14 = vunpack.i.h.bf16 %v16468_v50  ;;  %v9828_v21 = vunpack.i.l.bf16 %v16468_v50 }
 0x867   :  { %v5502_v30 = vsel %vm697_vm10, %v18899_v40, %v9819_v13  ;;  %19699 = vst [vmem:[#allocation3_spill] sm:$0xff] %v16486_v46  ;;  %v19723_v40 = vld [vmem:[#allocation7_spill] sm:$0xff] }
 0x868   :  { %v16489_v44 = vmax.f32 %v16163_v19, %v5502_v30  ;;  %v4015_v8 = vsel %vm19701_vm6, %v9779_v33, %v9828_v21  ;;  %v16494_v63 = vpop.permute.xlu0 %9831  ;;  %v4016_v53 = vsel %vm19702_vm5, %v9828_v21, %v18896_v14  ;;  %v5369_v19 = vsel %vm161_vm1, %v9744_v43, %v19703_v23  ;;  %v19705_v21 = vld [vmem:[#allocation11_spill] sm:$0xff]  ;;  %vm19757_vm6 = vmmov %vm19669_vm0 }
 0x869   :  { %v18907_v7 = vunpack.i.h.bf16 %v16494_v63  ;;  %v9833_v0 = vunpack.i.l.bf16 %v16494_v63  ;;  %v4320_v41 = vpack.c.bf16 %v4016_v53, %v4000_v59  ;;  %v4319_v16 = vpack.c.bf16 %v4015_v8, %v3999_v31  ;;  %v19708_v31 = vld [vmem:[#allocation12_spill] sm:$0xff]  ;;  %vm19760_vm5 = vmmov %vm19669_vm0 }
 0x86a   :  { %19700 = vst [vmem:[#allocation2_spill] sm:$0xff] %v16489_v44  ;;  %v9845_v22 = vpack.i.bf16 %v16489_v44, %v16038_v49  ;;  %v19704_v33 = vmov 0.0   ;;  %v19706_v14 = vmax.f32 %v19705_v21, 0.0  ;;  %v19709_v59 = vunpack.i.h.bf16 %v19708_v31  ;;  %v19712_v21 = vld [vmem:[#allocation19_spill] sm:$0xff]  ;;  %v19714_v31 = vld [vmem:[#allocation25_spill] sm:$0xff] }
 0x86b   :  { %v9895_v30 = vpack.i.bf16 %v16489_v44, %v19704_v33  ;;  %5010 = vmatprep.subr.bf16.mxu1 %v4320_v41  ;;  %v4059_v34 = vsel %vm19669_vm0, %v9833_v0, %v18907_v7  ;;  %19738 = vst [vmem:[#allocation25_spill] sm:$0xff] %v16670_v18 }
 0x86c   :  { %v16512_v42 = vmax.f32 %v19706_v14, %v5355_v58  ;;  %v4058_v8 = vsel %vm19710_vm13, %v19709_v59, %v9833_v0  ;;  %9846 = vrot.lane.b32.xlu0 %v9845_v22, %s10520_s19  ;;  %v4350_v53 = vpack.c.bf16 %v4059_v34, %v4059_v34  ;;  %v19713_v14 = vmax.f32 %v19712_v21, 0.0  ;;  %5011 = vmatpush1.bf16.msra.mxu1 %v4319_v16  ;;  %v19715_v22 = vld [vmem:[#allocation30_spill] sm:$0xff]  ;;  %v19720_v21 = vld [vmem:[#allocation15_spill] sm:$0xff]  ;;  %vm19768_vm13 = vmmov %vm19669_vm0 }
 0x86d   :  { %9896 = vrot.lane.b32.xlu1 %v9895_v30, %s10535_s26  ;;  %v4349_v23 = vpack.c.bf16 %v4058_v8, %v4058_v8  ;;  %v9850_v0 = vpack.i.bf16 %v16220_v11, %v16038_v49  ;;  %v16533_v59 = vpack.c.bf16 %v19715_v22, %v19714_v31  ;;  %v19717_v16 = vunpack.i.l.bf16 %v19711_v27  ;;  %v16550_v34 = vld [vmem:[%s18537_s2] ss:$8 sps:$4 sm:$0xff]   ;;  %v19719_v8 = vld [vmem:[#allocation16_spill] sm:$0xff] }
 0x86e   :  { %19707 = vst [vmem:[#allocation35_spill] sm:$0xff] %v16512_v42  ;;  %v16525_v58 = vmax.f32 %v19713_v14, %v5369_v19  ;;  %7628 = vmatprep.subr.msk.bf16.mxu0 %vm2110_vm2, %v4350_v53  ;;  %v9743_v14 = vunpack.i.l.bf16 %v16335_v55  ;;  %v19721_v22 = vld [vmem:[#allocation14_spill] sm:$0xff]  ;;  %v16580_v55 = vld [vmem:[%s18537_s2 + $0x10] ss:$8 sps:$4 sm:$0xff]  }
 0x86f   :  { %v4544_v41 = vsel %vm2110_vm2, %v4349_v23, 0  ;;  %19716 = vst [vmem:[#allocation36_spill] sm:$0xff] %v16533_v59  ;;  %v16544_v19 = vsel %vm19718_vm14, %v19717_v16, %v18909_v47  ;;  %v16559_v23 = vld [vmem:[%s18537_s2 + $0x14] ss:$8 sps:$4 sm:$0xff]   ;;  %vm19770_vm14 = vmmov %vm19669_vm0 }
 0x870   :  { %4930 = vmatpush1.bf16.msra.mxu0 %v4544_v41  ;;  %v9900_v30 = vpack.i.bf16 %v16512_v42, %v16525_v58  ;;  %9851 = vrot.lane.b32.xlu0 %v9850_v0, %s10524_s25  ;;  %v9855_v53 = vpack.i.bf16 %v19719_v8, %v16544_v19 }
 0x871   :  { %5075 = vmatprep.subr.bf16.mxu0 %v16533_v59 }
 0x872   :  { %9901 = vrot.lane.b32.xlu1 %v9900_v30, %s10523_s22  ;;  %v9875_v30 = vpack.i.bf16 %v16038_v49, %v19721_v22 }
 0x873   :  { %4938 = vmatmul.mubr.bf16.vlgmr.msra.gmra.mrb[192].mxu0 %v16550_v34 }
 0x874   :  { %5076 = vmatpush1.bf16.msra.mxu0 %v16326_v10  ;;  %7630 = vmatprep.mubr.msk.bf16.mxu0 %vm2085_vm12, %v16559_v23 }
 0x875   :  { %9856 = vrot.lane.b32.xlu0 %v9855_v53, %s10524_s25  ;;  %5077 = vmatprep.subr.bf16.mxu0 %v19720_v21  ;;  %v16593_v53 = vld [vmem:[%s18537_s2 + $0x24] ss:$8 sps:$4 sm:$0xff]  }
 0x876   :  { %19722 = vst [vmem:[#allocation11_spill] sm:$0xff] %v16593_v53 }
 0x878   :  { %5078 = vmatpush1.bf16.msra.mxu0 %v16078_v39  ;;  %v16567_v41 = vpop.permute.xlu0 %9836  ;;  %v16571_v10 = vpop.permute.xlu1 %9841  ;;  %v5368_v39 = vsel %vm161_vm1, %v9743_v14, %v9744_v43 }
 0x879   :  { %9866 = vrot.lane.b32.xlu0 %v16076_v5, %s10534_s21  ;;  %v9839_v0 = vunpack.i.h.bf16 %v16567_v41  ;;  %v9843_v31 = vunpack.i.l.bf16 %v16571_v10 }
 0x87b   :  { %4948 = vmatmul.mubr.bf16.gmra.mrb[196].mxu0 %v16580_v55  ;;  %v5503_v5 = vsel %vm697_vm10, %v9819_v13, %v9839_v0  ;;  %v5513_v16 = vsel %vm697_vm10, %v9824_v57, %v9843_v31  ;;  %v19725_v13 = vld [vmem:[#allocation6_spill] sm:$0xff] }
 0x87c   :  { %7631 = vmatprep.mubr.msk.bf16.mxu0 %vm2085_vm12, %v16593_v53  ;;  %v5543_v4 = vmax.f32 %v19723_v40, %v5503_v5  ;;  %v16599_v43 = vmax.f32 %v19724_v52, %v5513_v16  ;;  %v19726_v0 = vmax.f32 %v19725_v13, 0.0  ;;  %v19728_v40 = vmax.f32 %v19727_v17, 0.0  ;;  %v19729_v52 = vld [vmem:[#allocation29_spill] sm:$0xff]  ;;  %v16733_v47 = vpop.permute.xlu1 %3467 }
 0x87d   :  { %9876 = vrot.lane.b32.xlu0 %v9875_v30, %s10535_s26  ;;  %v16636_v17 = vld [vmem:[%s18537_s2 + $0x34] ss:$8 sps:$4 sm:$0xff]  }
 0x87e   :  { %v16604_v51 = vmax.f32 %v19726_v0, %v5368_v39  ;;  %v16607_v57 = vpack.i.bf16 %v16599_v43, %v5543_v4  ;;  %v16610_v31 = vpack.i.bf16 %v5543_v4, %v16486_v46  ;;  %v16616_v5 = vmax.f32 %v19728_v40, %v16253_v20  ;;  %v16625_v39 = vld [vmem:[%s18537_s2 + $0x20] ss:$8 sps:$4 sm:$0xff]   ;;  %19731 = vst [vmem:[#allocation18_spill] sm:$0xff] %v16636_v17  ;;  %v19732_v16 = vld [vmem:[#allocation13_spill] sm:$0xff]  ;;  %v19734_v40 = vld [vmem:[#allocation24_spill] sm:$0xff] }
 0x87f   :  { %19730 = vst [vmem:[#allocation12_spill] sm:$0xff] %v16625_v39  ;;  %v5367_v4 = vsel %vm161_vm1, %v9754_v25, %v9743_v14  ;;  %v9783_v20 = vunpack.i.l.bf16 %v16405_v36  ;;  %v19733_v13 = vmax.f32 %v19732_v16, 0.0  ;;  %v18908_v36 = vunpack.i.h.bf16 %v16448_v6 }
 0x880   :  { %v9890_v30 = vpack.i.bf16 %v16604_v51, %v16616_v5  ;;  %v9808_v14 = vunpack.i.l.bf16 %v16448_v6  ;;  %v3094_v32 = vsel %vm161_vm1, %v16367_v1, %v19734_v40 }
 0x881   :  { %9881 = vrot.lane.b32.xlu0 %v19729_v52, %s10531_s0  ;;  %v16643_v0 = vmax.f32 %v19733_v13, %v5367_v4  ;;  %v16647_v25 = vsel %vm3209_vm3, %v9783_v20, %v16630_v9  ;;  %v19736_v4 = vld [vmem:[#allocation28_spill] sm:$0xff] }
 0x882   :  { %v9915_v52 = vpack.i.bf16 %v19734_v40, %v16647_v25  ;;  %v19737_v16 = vunpack.i.h.bf16 %v19736_v4  ;;  %v3684_v48 = vsel %vm3670_vm7, %v9808_v14, %v18908_v36  ;;  %v16679_v4 = vld [vmem:[%s18537_s2 + $0x40] ss:$8 sps:$4 sm:$0xff]   ;;  %v16729_v36 = vld [vmem:[%s18537_s2 + $0x4] ss:$8 sps:$4 sm:$0xff]  }
 0x883   :  { %4954 = vmatmul.mubr.bf16.gmra.mrb[200].mxu0 %v16625_v39  ;;  %19739 = vst [vmem:[#allocation30_spill] sm:$0xff] %v16679_v4  ;;  %19746 = vst [vmem:[#allocation29_spill] sm:$0xff] %v16729_v36  ;;  %v19763_v39 = vld [vmem:[#allocation4_spill] sm:$0xff] }
 0x884   :  { %7632 = vmatprep.mubr.msk.bf16.mxu0 %vm2085_vm12, %v16636_v17  ;;  %v3683_v13 = vsel %vm3670_vm7, %v19737_v16, %v9808_v14  ;;  %v16685_v14 = vld [vmem:[%s18537_s2 + $0x54] ss:$8 sps:$4 sm:$0xff]   ;;  %v16710_v16 = vld [vmem:[%s18537_s2 + $0x60] ss:$8 sps:$4 sm:$0xff]   ;;  %vm19751_vm7 = vcmask 1014784  }
 0x885   :  { %9891 = vrot.lane.b32.xlu0 %v9890_v30, %s10523_s22  ;;  %v16658_v30 = vld [vmem:[%s18537_s2 + $0x30] ss:$8 sps:$4 sm:$0xff]   ;;  %v9920_v7 = vpack.i.bf16 %v3684_v48, %v3683_v13  ;;  %19740 = vst [vmem:[#allocation16_spill] sm:$0xff] %v16685_v14  ;;  %v9935_v48 = vpack.i.bf16 %v16486_v46, %v16489_v44  ;;  %19743 = vst [vmem:[#allocation17_spill] sm:$0xff] %v16710_v16  ;;  %v16716_v13 = vld [vmem:[%s18537_s2 + $0x74] ss:$8 sps:$4 sm:$0xff]   ;;  %v16735_v44 = vpop.permute.xlu1 %9861 }
 0x886   :  { %19735 = vst [vmem:[#allocation19_spill] sm:$0xff] %v16658_v30  ;;  %19744 = vst [vmem:[#allocation6_spill] sm:$0xff] %v16716_v13 }
 0x887   :  { %vm19753_vm8 = vmmov %vm19751_vm7 }
 0x889   :  { %5475 = vrot.lane.b32.xlu0 %v16643_v0, %s10523_s22 }
 0x88b   :  { %4960 = vmatmul.mubr.bf16.gmra.mrb[204].mxu0 %v16658_v30 }
 0x88c   :  { %7633 = vmatprep.mubr.msk.bf16.mxu0 %vm2085_vm12, %v16670_v18  ;;  %v9864_v18 = vunpack.i.h.bf16 %v16735_v44 }
 0x88d   :  { %9916 = vrot.lane.b32.xlu0 %v9915_v52, %s10524_s25  ;;  %v16703_v52 = vld [vmem:[%s18537_s2 + $0x64] ss:$8 sps:$4 sm:$0xff]  }
 0x88e   :  { %19742 = vst [vmem:[#allocation7_spill] sm:$0xff] %v16703_v52 }
 0x891   :  { %9921 = vrot.lane.b32.xlu0 %v9920_v7, %s10524_s25  ;;  %v16697_v7 = vld [vmem:[%s18537_s2 + $0x50] ss:$8 sps:$4 sm:$0xff]  }
 0x892   :  { %19741 = vst [vmem:[#allocation14_spill] sm:$0xff] %v16697_v7 }
 0x893   :  { %4966 = vmatmul.mubr.bf16.gmra.mrb[208].mxu0 %v16679_v4 }
 0x894   :  { %7634 = vmatprep.mubr.msk.bf16.mxu0 %vm2085_vm12, %v16685_v14 }
 0x895   :  { %9931 = vrot.lane.b32.xlu0 %v16610_v31, %s10520_s19 }
 0x899   :  { %9936 = vrot.lane.b32.xlu0 %v9935_v48, %s10537_s27  ;;  %v16723_v48 = vld [vmem:[%s18537_s2 + $0x70] ss:$8 sps:$4 sm:$0xff]   ;;  %s10538_s2 = smov 4  }
 0x89a   :  { %19745 = vst [vmem:[#allocation8_spill] sm:$0xff] %v16723_v48 }
 0x89b   :  { %4972 = vmatmul.mubr.bf16.gmra.mrb[212].mxu0 %v16697_v7  ;;  %v19752_v7 = vld [vmem:[#allocation20_spill] sm:$0xff] }
 0x89c   :  { %7635 = vmatprep.mubr.msk.bf16.mxu0 %vm2085_vm12, %v16703_v52 }
 0x89d   :  { %v16737_v46 = vpop.permute.xlu1 %9871 }
 0x89e   :  { %19747 = vst [vmem:[#allocation13_spill] sm:$0xff] %v16737_v46 }
 0x8a1   :  { %v16752_v52 = vpop.permute.xlu1 %9886 }
 0x8a3   :  { %4978 = vmatmul.mubr.bf16.gmra.mrb[216].mxu0 %v16710_v16  ;;  %v9838_v16 = vunpack.i.l.bf16 %v16567_v41  ;;  %v19756_v41 = vunpack.i.h.bf16 %v19711_v27  ;;  %v19766_v27 = vunpack.i.h.bf16 %v16494_v63 }
 0x8a4   :  { %7636 = vmatprep.mubr.msk.bf16.mxu0 %vm2085_vm12, %v16716_v13 }
 0x8a5   :  { %v4060_v59 = vsel %vm19669_vm0, %v19766_v27, %v9864_v18 }
 0x8ab   :  { %4984 = vmatmul.mubr.bf16.gmra.mrb[220].mxu0 %v16723_v48 }
 0x8ac   :  { %7647 = vmatprep.mubr.msk.bf16.mxu0 %vm2085_vm12, %v16729_v36 }
 0x8de   :  { %v16739_v50 = vpop.permute.xlu0 %9846 }
 0x8df   :  { %19748 = vst [vmem:[#allocation28_spill] sm:$0xff] %v16739_v50  ;;  %v9848_v15 = vunpack.i.l.bf16 %v16739_v50  ;;  %v16793_v50 = vsel %vm697_vm10, %v9838_v16, %v19763_v39 }
 0x8e1   :  { %v16748_v48 = vsel %vm19751_vm7, %v19750_v29, %v9848_v15  ;;  %v16756_v14 = vsel %vm19753_vm8, %v9848_v15, %v19752_v7  ;;  %v19754_v29 = vld [vmem:[#allocation31_spill] sm:$0xff]  ;;  %v19759_v15 = vld [vmem:[#allocation5_spill] sm:$0xff]  ;;  %vm19772_vm7 = vmmov %vm19669_vm0 }
 0x8e2   :  { %v9852_v36 = vpop.permute.xlu0 %9851  ;;  %v9905_v13 = vpack.i.bf16 %v16748_v48, %v3094_v32  ;;  %v19755_v56 = vunpack.i.h.bf16 %v19754_v29  ;;  %vm19774_vm8 = vmmov %vm19669_vm0 }
 0x8e3   :  { %v9853_v4 = vunpack.i.l.bf16 %v9852_v36  ;;  %v9854_v21 = vunpack.i.h.bf16 %v9852_v36 }
 0x8e4   :  { %9906 = vrot.lane.b32.xlu1 %v9905_v13, %s10524_s25  ;;  %v16764_v30 = vsel %vm3209_vm3, %v19755_v56, %v9783_v20  ;;  %v19761_v20 = vld [vmem:[#allocation21_spill] sm:$0xff]  ;;  %vm19765_vm3 = vmmov %vm19669_vm0 }
 0x8e5   :  { %v16769_v17 = vsel %vm19757_vm6, %v19756_v41, %v9853_v4  ;;  %v16773_v40 = vsel %vm19760_vm5, %v9853_v4, %v19759_v15  ;;  %v9910_v29 = vpack.i.bf16 %v16764_v30, %v16756_v14  ;;  %v19762_v56 = vunpack.i.h.bf16 %v19761_v20  ;;  %v16787_v41 = vpop.permute.xlu1 %9896  ;;  %vm19817_vm6 = vmmov %vm19669_vm0 }
 0x8e6   :  { %19758 = vst [vmem:[#allocation27_spill] sm:$0xff] %v16769_v17  ;;  %v9945_v13 = vpack.i.bf16 %v16773_v40, %v16769_v17  ;;  %v19764_v20 = vunpack.i.l.bf16 %v16737_v46  ;;  %v19767_v17 = vunpack.i.h.bf16 %v16422_v35  ;;  %v19769_v15 = vunpack.i.h.bf16 %v16433_v2  ;;  %vm19818_vm5 = vmmov %vm19669_vm0 }
 0x8e7   :  { %v16775_v33 = vpop.permute.xlu0 %9856  ;;  %v16784_v36 = vsel %vm697_vm10, %v19762_v56, %v9838_v16  ;;  %v19773_v46 = vunpack.i.l.bf16 %v16735_v44 }
 0x8e8   :  { %v9859_v4 = vunpack.i.h.bf16 %v16775_v33  ;;  %9946 = vrot.lane.b32.xlu0 %v9945_v13, %s10524_s25  ;;  %9911 = vrot.lane.b32.xlu1 %v9910_v29, %s10524_s25  ;;  %v4061_v56 = vsel %vm19765_vm3, %v9864_v18, %v19764_v20  ;;  %v4030_v1 = vsel %vm19768_vm13, %v19767_v17, %v9854_v21  ;;  %v19771_v13 = vunpack.i.l.bf16 %v16775_v33  ;;  %vm19819_vm3 = vmmov %vm19669_vm0 }
 0x8e9   :  { %v9925_v35 = vpack.i.bf16 %v16793_v50, %v16784_v36  ;;  %v4352_v2 = vpack.c.bf16 %v4061_v56, %v4061_v56  ;;  %v4351_v17 = vpack.c.bf16 %v4060_v59, %v4060_v59  ;;  %v9940_v59 = vpack.i.bf16 %v16630_v9, %v19752_v7  ;;  %vm19824_vm13 = vmmov %vm19669_vm0 }
 0x8ea   :  { %v4045_v16 = vsel %vm19770_vm14, %v19769_v15, %v9859_v4  ;;  %v4031_v29 = vsel %vm19772_vm7, %v9854_v21, %v19771_v13  ;;  %v4046_v20 = vsel %vm19774_vm8, %v9859_v4, %v19773_v46  ;;  %v9902_v21 = vpop.permute.xlu1 %9901  ;;  %v19775_v15 = vunpack.i.h.bf16 %v16233_v60  ;;  %vm19825_vm14 = vmmov %vm19669_vm0 }
 0x8eb   :  { %v9867_v53 = vpop.permute.xlu0 %9866  ;;  %v4336_v63 = vpack.c.bf16 %v4046_v20, %v4031_v29  ;;  %v4335_v42 = vpack.c.bf16 %v4045_v16, %v4030_v1  ;;  %v9903_v60 = vunpack.i.l.bf16 %v9902_v21  ;;  %v4550_v16 = vsel %vm2110_vm2, %v4351_v17, 0  ;;  %vm19826_vm7 = vmmov %vm19669_vm0 }
 0x8ec   :  { %v9869_v18 = vunpack.i.h.bf16 %v9867_v53  ;;  %v9868_v27 = vunpack.i.l.bf16 %v9867_v53  ;;  %9966 = vrot.lane.b32.xlu0 %v16607_v57, %s10538_s2  ;;  %9926 = vrot.lane.b32.xlu1 %v9925_v35, %s10524_s25  ;;  %v16836_v13 = vpack.c.bf16 %v3094_v32, %v16038_v49  ;;  %v19778_v35 = vld [vmem:[#allocation26_spill] sm:$0xff]  ;;  %vm19827_vm8 = vmmov %vm19669_vm0 }
 0x8ed   :  { %5012 = vmatprep.subr.bf16.mxu1 %v4336_v63  ;;  %v19777_v63 = vunpack.i.h.bf16 %v16190_v62  ;;  %v19779_v32 = vld [vmem:[#allocation22_spill] sm:$0xff] }
 0x8ee   :  { %v16822_v46 = vsel %vm3535_vm11, %v19775_v15, %v9868_v27  ;;  %v16825_v1 = vsel %vm3535_vm11, %v9868_v27, %v9869_v18  ;;  %5013 = vmatpush1.bf16.msra.mxu1 %v4335_v42  ;;  %v19776_v42 = vunpack.i.h.bf16 %v16273_v38  ;;  %v9898_v38 = vunpack.i.l.bf16 %v16787_v41  ;;  %vm19811_vm11 = vmmov %vm19669_vm0 }
 0x8ef   :  { %v9877_v53 = vpop.permute.xlu0 %9876  ;;  %7637 = vmatprep.subr.msk.bf16.mxu1 %vm2110_vm2, %v4352_v2  ;;  %v9970_v4 = vpack.i.bf16 %v16825_v1, %v16822_v46  ;;  %v16846_v27 = vsel %vm965_vm15, %v19777_v63, %v16733_v47  ;;  %v16851_v2 = vsel %vm965_vm15, %v16733_v47, %v19778_v35  ;;  %v9904_v15 = vunpack.i.h.bf16 %v9902_v21  ;;  %vm19809_vm15 = vmmov %vm19669_vm0 }
 0x8f0   :  { %v9878_v56 = vunpack.i.l.bf16 %v9877_v53  ;;  %v9879_v29 = vunpack.i.h.bf16 %v9877_v53  ;;  %9941 = vrot.lane.b32.xlu1 %v9940_v59, %s10524_s25  ;;  %v19780_v47 = vunpack.i.l.bf16 %v16452_v61  ;;  %v9844_v21 = vunpack.i.h.bf16 %v16571_v10 }
 0x8f1   :  { %9971 = vrot.lane.b32.xlu0 %v9970_v4, %s10524_s25  ;;  %v4208_v4 = vpack.c.bf16 %v16380_v12, %v19721_v22  ;;  %v16877_v12 = vpack.c.bf16 %v16647_v25, %v16756_v14  ;;  %v4224_v25 = vpack.c.bf16 %v16764_v30, %v16748_v48  ;;  %v19783_v48 = vunpack.i.l.bf16 %v16459_v3 }
 0x8f2   :  { %5015 = vmatpush1.bf16.msra.mxu1 %v4550_v16  ;;  %v3290_v20 = vsel %vm3276_vm4, %v19776_v42, %v9878_v56  ;;  %v5511_v59 = vsel %vm697_vm10, %v9903_v60, %v19780_v47  ;;  %v4255_v16 = vpack.c.bf16 %v16307_v26, %v16544_v19  ;;  %v3292_v22 = vsel %vm3276_vm4, %v9879_v29, %v9898_v38 }
 0x8f3   :  { %v16853_v49 = vpop.permute.xlu0 %9881  ;;  %5160 = vmatprep.subr.bf16.mxu1 %v16836_v13  ;;  %v16857_v17 = vpack.c.bf16 %v19779_v32, %v3290_v20  ;;  %v19781_v26 = vunpack.i.h.bf16 %v16448_v6  ;;  %v5499_v14 = vsel %vm697_vm10, %v9904_v15, %v9844_v21  ;;  %v16895_v42 = vmax.f32 %v16525_v58, %v5511_v59 }
 0x8f4   :  { %v9884_v62 = vunpack.i.h.bf16 %v16853_v49  ;;  %v9883_v53 = vunpack.i.l.bf16 %v16853_v49  ;;  %9951 = vrot.lane.b32.xlu1 %v16610_v31, %s10535_s26  ;;  %v3291_v6 = vsel %vm3276_vm4, %v9878_v56, %v9879_v29  ;;  %v19782_v32 = vunpack.i.h.bf16 %v16283_v24  ;;  %vm19814_vm4 = vmmov %vm19669_vm0 }
 0x8f5   :  { %5023 = vmatmul.mubr.bf16.vlgmr.msra.gmra.mrb[192].mxu1 %v16550_v34  ;;  %5079 = vmatprep.subr.bf16.mxu0 %v16857_v17  ;;  %v9960_v10 = vpack.i.bf16 %v19763_v39, %v19781_v26  ;;  %v16904_v30 = vpack.c.bf16 %v16793_v50, %v3292_v22  ;;  %v9889_v24 = vunpack.i.h.bf16 %v16752_v52  ;;  %v19784_v3 = vpack.c.bf16 %v19719_v8, %v16220_v11  ;;  %v19788_v26 = vld [vmem:[#allocation27_spill] sm:$0xff] }
 0x8f6   :  { %3939 = vrot.lane.b32.xlu0 %v9869_v18, %s10524_s25  ;;  %v3616_v61 = vsel %vm3602_vm9, %v9883_v53, %v9884_v62  ;;  %v9955_v18 = vpack.i.bf16 %v16851_v2, %v16846_v27  ;;  %5080 = vmatpush1.bf16.msra.mxu0 %v16338_v37  ;;  %v3615_v37 = vsel %vm3602_vm9, %v19782_v32, %v9883_v53  ;;  %v9888_v53 = vunpack.i.l.bf16 %v16752_v52  ;;  %v19793_v32 = vld [vmem:[#allocation24_spill] sm:$0xff] }
 0x8f7   :  { %5161 = vmatpush1.bf16.msra.mxu1 %v4208_v4  ;;  %v9892_v31 = vpop.permute.xlu0 %9891  ;;  %5081 = vmatprep.subr.bf16.mxu0 %v4255_v16  ;;  %v4271_v47 = vpack.c.bf16 %v3616_v61, %v16374_v28  ;;  %v4240_v59 = vpack.c.bf16 %v16784_v36, %v3291_v6  ;;  %v4270_v11 = vpack.c.bf16 %v3615_v37, %v16300_v45  ;;  %v19785_v16 = vld [vmem:[#allocation35_spill] sm:$0xff] }
 0x8f8   :  { %v9894_v20 = vunpack.i.h.bf16 %v9892_v31  ;;  %v9893_v63 = vunpack.i.l.bf16 %v9892_v31  ;;  %5162 = vmatprep.subr.bf16.mxu1 %v16877_v12  ;;  %7639 = vmatprep.mubr.msk.bf16.mxu1 %vm2085_vm12, %v16559_v23  ;;  %v16949_v36 = vmax.f32 %v19785_v16, %v5499_v14  ;;  %v19789_v14 = vld [vmem:[#allocation36_spill] sm:$0xff] }
 0x8f9   :  { %9956 = vrot.lane.b32.xlu1 %v9955_v18, %s10524_s25  ;;  %v3618_v18 = vsel %vm3602_vm9, %v9888_v53, %v9889_v24 }
 0x8fa   :  { %v5500_v58 = vsel %vm697_vm10, %v9844_v21, %v9893_v63  ;;  %v5501_v15 = vsel %vm697_vm10, %v9893_v63, %v19783_v48  ;;  %v5510_v56 = vsel %vm697_vm10, %v9894_v20, %v9903_v60  ;;  %5727 = vrot.lane.b32.xlu0 %v16599_v43, %s10535_s26  ;;  %5082 = vmatpush1.bf16.msra.mxu0 %v19784_v3  ;;  %v19790_v63 = vld [vmem:[#allocation28_spill] sm:$0xff]  ;;  %v19796_v3 = vld [vmem:[#allocation19_spill] sm:$0xff] }
 0x8fb   :  { %v16918_v28 = vmax.f32 %v16267_v54, %v5500_v58  ;;  %v16921_v50 = vmax.f32 %v16616_v5, %v5501_v15  ;;  %v16924_v29 = vmax.f32 %v16604_v51, %v5510_v56  ;;  %5163 = vmatpush1.bf16.msra.mxu1 %v4224_v25  ;;  %v5476_v60 = vpop.permute.xlu0 %5475  ;;  %5083 = vmatprep.subr.bf16.mxu0 %v4271_v47  ;;  %v9849_v6 = vunpack.i.h.bf16 %v19790_v63  ;;  %v19794_v47 = vld [vmem:[#allocation18_spill] sm:$0xff] }
 0x8fc   :  { %5164 = vmatprep.subr.bf16.mxu1 %v16904_v30  ;;  %v5509_v54 = vsel %vm697_vm10, %v5476_v60, %v9894_v20  ;;  %v4257_v5 = vpack.c.bf16 %v16851_v2, %v16773_v40  ;;  %v19786_v2 = vld [vmem:[#allocation11_spill] sm:$0xff]  ;;  %v4273_v31 = vpack.c.bf16 %v3618_v18, %v16825_v1  ;;  %v19792_v1 = vmov 0.0  }
 0x8fd   :  { %v16936_v51 = vmax.f32 %v16643_v0, %v5509_v54  ;;  %v16941_v8 = vpack.i.bf16 %v16924_v29, %v16918_v28  ;;  %5033 = vmatmul.mubr.bf16.gmra.mrb[196].mxu1 %v16580_v55  ;;  %v16946_v52 = vpack.i.bf16 %v16895_v42, %v16921_v50  ;;  %9961 = vrot.lane.b32.xlu1 %v9960_v10, %s10524_s25  ;;  %v19787_v0 = vld [vmem:[#allocation5_spill] sm:$0xff]  ;;  %v19801_v54 = vld [vmem:[#allocation7_spill] sm:$0xff] }
 0x8fe   :  { %7640 = vmatprep.mubr.msk.bf16.mxu1 %vm2085_vm12, %v19786_v2  ;;  %5084 = vmatpush1.bf16.msra.mxu0 %v4270_v11  ;;  %v9975_v21 = vpack.i.bf16 %v19778_v35, %v19787_v0  ;;  %v4256_v10 = vpack.c.bf16 %v16846_v27, %v19788_v26  ;;  %v3617_v35 = vsel %vm3602_vm9, %v9884_v62, %v9888_v53  ;;  %v19791_v62 = vld [vmem:[#allocation12_spill] sm:$0xff]  ;;  %vm19810_vm9 = vmmov %vm19669_vm0 }
 0x8ff   :  { %5165 = vmatpush1.bf16.msra.mxu1 %v4240_v59  ;;  %v16954_v45 = vpop.permute.xlu0 %9916  ;;  %5085 = vmatprep.subr.bf16.mxu0 %v4208_v4  ;;  %v16960_v61 = vpack.i.bf16 %v16936_v51, %v16949_v36  ;;  %v5779_v22 = vpack.c.bf16 %v16936_v51, %v16949_v36  ;;  %v5789_v4 = vpack.c.bf16 %v16895_v42, %v16921_v50 }
 0x900   :  { %5166 = vmatprep.subr.bf16.mxu1 %v4257_v5  ;;  %9991 = vrot.lane.b32.xlu0 %v16941_v8, %s10537_s27  ;;  %v9980_v27 = vpack.i.bf16 %v16949_v36, %v16599_v43  ;;  %v4272_v49 = vpack.c.bf16 %v3617_v35, %v16822_v46  ;;  %v4274_v37 = vpack.c.bf16 %v19793_v32, %v19792_v1  ;;  %v9919_v60 = vunpack.i.h.bf16 %v16954_v45  ;;  %v19805_v5 = vld [vmem:[#allocation29_spill] sm:$0xff] }
 0x901   :  { %9976 = vrot.lane.b32.xlu1 %v9975_v21, %s10524_s25  ;;  %v10010_v58 = vpack.i.bf16 %v9849_v6, %v16936_v51  ;;  %v4275_v15 = vpack.c.bf16 %v16630_v9, %v19752_v7  ;;  %s10539_s25 = smov 112   ;;  %v19797_v9 = vld [vmem:[#allocation25_spill] sm:$0xff]  ;;  %v9899_v7 = vunpack.i.h.bf16 %v16787_v41 }
 0x902   :  { %5086 = vmatpush1.bf16.msra.mxu0 %v19789_v14  ;;  %v19802_v41 = vld [vmem:[#allocation17_spill] sm:$0xff] }
 0x903   :  { %5167 = vmatpush1.bf16.msra.mxu1 %v4256_v10  ;;  %v16977_v20 = vpop.permute.xlu0 %9921  ;;  %5087 = vmatprep.subr.bf16.mxu0 %v4224_v25  ;;  %v19795_v25 = vld [vmem:[#allocation15_spill] sm:$0xff]  ;;  %v19806_v14 = vld [vmem:[#allocation13_spill] sm:$0xff] }
 0x904   :  { %5168 = vmatprep.subr.bf16.mxu1 %v4273_v31  ;;  %10001 = vrot.lane.b32.xlu0 %v16960_v61, %s10535_s26 }
 0x905   :  { %5039 = vmatmul.mubr.bf16.gmra.mrb[200].mxu1 %v19791_v62  ;;  %9981 = vrot.lane.b32.xlu1 %v9980_v27, %s10520_s19  ;;  %v9874_v27 = vunpack.i.h.bf16 %v19806_v14 }
 0x906   :  { %7641 = vmatprep.mubr.msk.bf16.mxu1 %vm2085_vm12, %v19794_v47  ;;  %5088 = vmatpush1.bf16.msra.mxu0 %v19795_v25 }
 0x907   :  { %5169 = vmatpush1.bf16.msra.mxu1 %v4272_v49  ;;  %v16992_v43 = vpop.permute.xlu0 %9931  ;;  %5089 = vmatprep.subr.bf16.mxu0 %v4240_v59  ;;  %v19803_v59 = vld [vmem:[#allocation6_spill] sm:$0xff] }
 0x908   :  { %5170 = vmatprep.subr.bf16.mxu1 %v4274_v37  ;;  %v9933_v46 = vunpack.i.l.bf16 %v16992_v43  ;;  %10011 = vrot.lane.b32.xlu0 %v10010_v58, %s10520_s19  ;;  %v19807_v37 = vld [vmem:[#allocation34_spill] sm:$0xff] }
 0x909   :  { %9986 = vrot.lane.b32.xlu1 %v16607_v57, %s10537_s27  ;;  %v4276_v57 = vpack.c.bf16 %v19763_v39, %v9898_v38  ;;  %v19798_v39 = vld [vmem:[#allocation30_spill] sm:$0xff]  ;;  %v19799_v38 = vld [vmem:[#allocation16_spill] sm:$0xff]  ;;  %v19808_v25 = vunpack.i.h.bf16 %v19807_v37 }
 0x90a   :  { %v16997_v48 = vpack.c.bf16 %v9933_v46, %v9849_v6  ;;  %5090 = vmatpush1.bf16.msra.mxu0 %v16857_v17  ;;  %v10020_v17 = vpack.i.bf16 %v9899_v7, %v9933_v46 }
 0x90b   :  { %5171 = vmatpush1.bf16.msra.mxu1 %v16836_v13  ;;  %v17005_v56 = vpop.permute.xlu0 %9936  ;;  %v4292_v13 = vpack.c.bf16 %v9919_v60, %v19787_v0  ;;  %v3953_v58 = vsel %vm19809_vm15, %v19808_v25, %v9874_v27  ;;  %vm19828_vm15 = vmmov %vm19669_vm0 }
 0x90c   :  { %5172 = vmatprep.subr.bf16.mxu1 %v4275_v15  ;;  %v9938_v24 = vunpack.i.l.bf16 %v17005_v56 }
 0x90d   :  { %5045 = vmatmul.mubr.bf16.gmra.mrb[204].mxu1 %v19796_v3  ;;  %9996 = vrot.lane.b32.xlu1 %v16941_v8, %s10539_s25 }
 0x90e   :  { %v10015_v53 = vpack.i.bf16 %v9938_v24, %v16895_v42  ;;  %7642 = vmatprep.mubr.msk.bf16.mxu1 %vm2085_vm12, %v19797_v9  ;;  %v10328_v42 = vld [vmem:[%s18538_s3 + $0xc] ss:$16 sps:$4 sm:$0xff]  }
 0x90f   :  { %5173 = vmatpush1.bf16.msra.mxu1 %v16877_v12  ;;  %v19800_v12 = vld [vmem:[#allocation14_spill] sm:$0xff] }
 0x910   :  { %5174 = vmatprep.subr.bf16.mxu1 %v4276_v57  ;;  %10016 = vrot.lane.b32.xlu0 %v10015_v53, %s10520_s19 }
 0x911   :  { %10006 = vrot.lane.b32.xlu1 %v16960_v61, %s10537_s27 }
 0x913   :  { %5175 = vmatpush1.bf16.msra.mxu1 %v16904_v30  ;;  %v19804_v30 = vld [vmem:[#allocation8_spill] sm:$0xff] }
 0x914   :  { %5176 = vmatprep.subr.bf16.mxu1 %v4292_v13 }
 0x915   :  { %5051 = vmatmul.mubr.bf16.gmra.mrb[208].mxu1 %v19798_v39  ;;  %10021 = vrot.lane.b32.xlu1 %v10020_v17, %s10520_s19 }
 0x916   :  { %7643 = vmatprep.mubr.msk.bf16.mxu1 %vm2085_vm12, %v19799_v38 }
 0x91d   :  { %5057 = vmatmul.mubr.bf16.gmra.mrb[212].mxu1 %v19800_v12 }
 0x91e   :  { %7644 = vmatprep.mubr.msk.bf16.mxu1 %vm2085_vm12, %v19801_v54 }
 0x925   :  { %5063 = vmatmul.mubr.bf16.gmra.mrb[216].mxu1 %v19802_v41 }
 0x926   :  { %7645 = vmatprep.mubr.msk.bf16.mxu1 %vm2085_vm12, %v19803_v59 }
 0x92d   :  { %5069 = vmatmul.mubr.bf16.gmra.mrb[220].mxu1 %v19804_v30 }
 0x92e   :  { %7656 = vmatprep.mubr.msk.bf16.mxu1 %vm2085_vm12, %v19805_v5  ;;  %v9918_v5 = vunpack.i.l.bf16 %v16954_v45 }
 0x946   :  { %v17038_v11 = vpop.f32.mrb[192].mxu0 }
 0x947   :  { %v17040_v16 = vpop.f32.mrb[193].mxu0 }
 0x948   :  { %v17042_v0 = vpop.f32.mrb[194].mxu0 }
 0x949   :  { %v17044_v21 = vpop.f32.mrb[195].mxu0 }
 0x94e   :  { %v4949_v10 = vpop.f32.mrb[196].mxu0 }
 0x94f   :  { %v4950_v18 = vpop.f32.mrb[197].mxu0 }
 0x950   :  { %v4951_v35 = vpop.f32.mrb[198].mxu0 }
 0x951   :  { %v4952_v31 = vpop.f32.mrb[199].mxu0  ;;  %v4289_v35 = vpack.c.bf16 %v3953_v58, %v16544_v19  ;;  %v9923_v19 = vunpack.i.l.bf16 %v16977_v20 }
 0x952   :  { %v19812_v31 = vld [vmem:[#allocation33_spill] sm:$0xff] }
 0x956   :  { %v4955_v63 = vpop.f32.mrb[200].mxu0  ;;  %v9907_v6 = vpop.permute.xlu1 %9906 }
 0x957   :  { %v4956_v49 = vpop.f32.mrb[201].mxu0  ;;  %v9908_v1 = vunpack.i.l.bf16 %v9907_v6  ;;  %v9909_v15 = vunpack.i.h.bf16 %v9907_v6  ;;  %v19813_v63 = vunpack.i.h.bf16 %v19812_v31 }
 0x958   :  { %v4957_v32 = vpop.f32.mrb[202].mxu0 }
 0x959   :  { %v4958_v46 = vpop.f32.mrb[203].mxu0  ;;  %v3955_v24 = vsel %vm19810_vm9, %v9908_v1, %v9919_v60  ;;  %v3954_v53 = vsel %vm19811_vm11, %v9874_v27, %v9908_v1  ;;  %v3969_v60 = vsel %vm19814_vm4, %v19813_v63, %v9909_v15  ;;  %v19815_v27 = vld [vmem:[#allocation10_spill] sm:$0xff]  ;;  %v9924_v1 = vunpack.i.h.bf16 %v16977_v20  ;;  %vm19830_vm9 = vmmov %vm19669_vm0 }
 0x95a   :  { %v17052_v57 = vpop.permute.xlu0 %9946  ;;  %v9912_v7 = vpop.permute.xlu1 %9911  ;;  %v4290_v13 = vpack.c.bf16 %v3954_v53, %v19788_v26  ;;  %v4291_v17 = vpack.c.bf16 %v3955_v24, %v16773_v40  ;;  %v19816_v6 = vunpack.i.h.bf16 %v19815_v27  ;;  %v9939_v46 = vunpack.i.h.bf16 %v17005_v56  ;;  %vm19831_vm11 = vmmov %vm19669_vm0 }
 0x95b   :  { %v9914_v10 = vunpack.i.h.bf16 %v9912_v7  ;;  %v9913_v18 = vunpack.i.l.bf16 %v9912_v7  ;;  %vm19833_vm4 = vmmov %vm19669_vm0 }
 0x95c   :  { %5091 = vmatprep.subr.bf16.mxu0 %v4290_v13  ;;  %5177 = vmatpush1.bf16.msra.mxu1 %v4291_v17 }
 0x95d   :  { %v3985_v49 = vsel %vm19817_vm6, %v19816_v6, %v9914_v10  ;;  %5092 = vmatpush1.bf16.msra.mxu0 %v4289_v35  ;;  %v3970_v26 = vsel %vm19818_vm5, %v9909_v15, %v9913_v18  ;;  %v3986_v40 = vsel %vm19819_vm3, %v9914_v10, %v9918_v5  ;;  %v19820_v35 = vld [vmem:[#allocation32_spill] sm:$0xff]  ;;  %vm19834_vm6 = vmmov %vm19669_vm0 }
 0x95e   :  { %v4961_v45 = vpop.f32.mrb[204].mxu0  ;;  %v17068_v32 = vpop.permute.xlu0 %9966  ;;  %v4306_v37 = vpack.c.bf16 %v3986_v40, %v3970_v26  ;;  %v4305_v25 = vpack.c.bf16 %v3985_v49, %v3969_v60  ;;  %v19821_v31 = vunpack.i.h.bf16 %v19820_v35  ;;  %v19822_v60 = vld [vmem:[#allocation37_spill] sm:$0xff]  ;;  %v4002_v49 = vsel %vm19825_vm14, %v9923_v19, %v9924_v1  ;;  %vm19835_vm5 = vmmov %vm19669_vm0 }
 0x95f   :  { %v4962_v58 = vpop.f32.mrb[205].mxu0  ;;  %v9968_v24 = vunpack.i.l.bf16 %v17068_v32  ;;  %v17072_v53 = vpop.permute.xlu1 %9926  ;;  %v19823_v27 = vunpack.i.h.bf16 %v19822_v60  ;;  %v9934_v60 = vunpack.i.h.bf16 %v16992_v43  ;;  %vm19837_vm3 = vmmov %vm19669_vm0 }
 0x960   :  { %v4963_v7 = vpop.f32.mrb[206].mxu0  ;;  %v9929_v15 = vunpack.i.h.bf16 %v17072_v53  ;;  %v9928_v13 = vunpack.i.l.bf16 %v17072_v53  ;;  %5093 = vmatprep.subr.bf16.mxu0 %v4306_v37  ;;  %v4001_v63 = vsel %vm19669_vm0, %v19821_v31, %v9923_v19  ;;  %vm19839_vm14 = vmmov %vm19669_vm0 }
 0x961   :  { %v4964_v17 = vpop.f32.mrb[207].mxu0  ;;  %v10035_v10 = vpack.i.bf16 %v9968_v24, %v9939_v46  ;;  %5094 = vmatpush1.bf16.msra.mxu0 %v4305_v25 }
 0x962   :  { %v4017_v56 = vsel %vm19824_vm13, %v19823_v27, %v9928_v13  ;;  %v4018_v26 = vsel %vm19826_vm7, %v9928_v13, %v9929_v15  ;;  %vm19838_vm13 = vmmov %vm19669_vm0 }
 0x963   :  { %v17082_v6 = vpop.permute.xlu0 %9971  ;;  %v9942_v40 = vpop.permute.xlu1 %9941  ;;  %10036 = vrot.lane.b32.xlu0 %v10035_v10, %s10520_s19  ;;  %v4322_v45 = vpack.c.bf16 %v4018_v26, %v4002_v49  ;;  %v4321_v37 = vpack.c.bf16 %v4017_v56, %v4001_v63  ;;  %vm19840_vm7 = vmmov %vm19669_vm0 }
 0x964   :  { %v9944_v25 = vunpack.i.h.bf16 %v9942_v40  ;;  %v9943_v58 = vunpack.i.l.bf16 %v9942_v40  ;;  %v9974_v56 = vunpack.i.h.bf16 %v17082_v6  ;;  %v9973_v49 = vunpack.i.l.bf16 %v17082_v6 }
 0x965   :  { %5095 = vmatprep.subr.bf16.mxu0 %v4322_v45  ;;  %v9969_v6 = vunpack.i.h.bf16 %v17068_v32 }
 0x966   :  { %v4967_v46 = vpop.f32.mrb[208].mxu0  ;;  %v3987_v24 = vsel %vm19827_vm8, %v9918_v5, %v9944_v25  ;;  %v3971_v7 = vsel %vm19828_vm15, %v9913_v18, %v9943_v58  ;;  %5096 = vmatpush1.bf16.msra.mxu0 %v4321_v37  ;;  %v4308_v17 = vpack.c.bf16 %v9944_v25, %v9943_v58  ;;  %v9949_v5 = vunpack.i.h.bf16 %v17052_v57  ;;  %vm19841_vm8 = vmmov %vm19669_vm0 }
 0x967   :  { %v4968_v19 = vpop.f32.mrb[209].mxu0  ;;  %v17093_v35 = vpop.permute.xlu1 %9951  ;;  %10041 = vrot.lane.b32.xlu0 %v16960_v61, %s10539_s25  ;;  %v4307_v13 = vpack.c.bf16 %v3987_v24, %v3971_v7  ;;  %v9948_v18 = vunpack.i.l.bf16 %v17052_v57  ;;  %v10060_v57 = vpack.i.bf16 %v9934_v60, %v16924_v29  ;;  %v19829_v37 = vunpack.i.l.bf16 %v16775_v33 }
 0x968   :  { %v17097_v10 = vpop.permute.xlu0 %3939  ;;  %v9953_v31 = vunpack.i.l.bf16 %v17093_v35  ;;  %5178 = vmatprep.subr.bf16.mxu1 %v4308_v17  ;;  %v4969_v63 = vpop.f32.mrb[210].mxu0  ;;  %v19832_v7 = vunpack.i.l.bf16 %v16735_v44 }
 0x969   :  { %5179 = vmatpush1.bf16.msra.mxu1 %v4307_v13  ;;  %v4970_v27 = vpop.f32.mrb[211].mxu0  ;;  %v4032_v25 = vsel %vm19830_vm9, %v19829_v37, %v9948_v18  ;;  %v4033_v58 = vsel %vm19831_vm11, %v9948_v18, %v9949_v5  ;;  %v4063_v13 = vsel %vm19835_vm5, %v9973_v49, %v9974_v56 }
 0x96a   :  { %v10025_v61 = vpack.i.bf16 %v16921_v50, %v9953_v31  ;;  %v19836_v31 = vunpack.i.l.bf16 %v19806_v14  ;;  %v10050_v14 = vpack.i.bf16 %v16918_v28, %v9969_v6  ;;  %v1934_v50 = vld [vmem:[%s18536_s6 + $0x10] sm:$0xff] }
 0x96b   :  { %v9957_v26 = vpop.permute.xlu1 %9956  ;;  %10046 = vrot.lane.b32.xlu0 %v16946_v52, %s10537_s27 }
 0x96c   :  { %v9959_v40 = vunpack.i.h.bf16 %v9957_v26  ;;  %v9958_v45 = vunpack.i.l.bf16 %v9957_v26  ;;  %10026 = vrot.lane.b32.xlu1 %v10025_v61, %s10520_s19  ;;  %v17117_v24 = vpop.permute.xlu0 %5727  ;;  %v4062_v33 = vsel %vm19837_vm3, %v19836_v31, %v9973_v49 }
 0x96e   :  { %v4973_v46 = vpop.f32.mrb[212].mxu0  ;;  %v4047_v17 = vsel %vm19833_vm4, %v19832_v7, %v9958_v45  ;;  %v4048_v19 = vsel %vm19834_vm6, %v9958_v45, %v9959_v40  ;;  %v4354_v45 = vpack.c.bf16 %v4063_v13, %v4063_v13 }
 0x96f   :  { %v4974_v63 = vpop.f32.mrb[213].mxu0  ;;  %v9962_v27 = vpop.permute.xlu1 %9961  ;;  %10061 = vrot.lane.b32.xlu0 %v10060_v57, %s10520_s19  ;;  %v4338_v32 = vpack.c.bf16 %v4048_v19, %v4033_v58  ;;  %v4337_v18 = vpack.c.bf16 %v4047_v17, %v4032_v25  ;;  %v4353_v46 = vpack.c.bf16 %v4062_v33, %v4062_v33 }
 0x970   :  { %v4975_v61 = vpop.f32.mrb[214].mxu0  ;;  %v9964_v26 = vunpack.i.h.bf16 %v9962_v27  ;;  %v9963_v37 = vunpack.i.l.bf16 %v9962_v27  ;;  %10031 = vrot.lane.b32.xlu1 %v16946_v52, %s10535_s26 }
 0x971   :  { %v4976_v44 = vpop.f32.mrb[215].mxu0  ;;  %5097 = vmatprep.subr.bf16.mxu0 %v4338_v32  ;;  %v4556_v53 = vsel %vm2110_vm2, %v4353_v46, 0 }
 0x972   :  { %v4003_v49 = vsel %vm19669_vm0, %v9924_v1, %v9963_v37  ;;  %v4019_v57 = vsel %vm19838_vm13, %v9929_v15, %v9964_v26  ;;  %v9992_v25 = vpop.permute.xlu0 %9991  ;;  %5098 = vmatpush1.bf16.msra.mxu0 %v4337_v18  ;;  %v4324_v58 = vpack.c.bf16 %v9964_v26, %v9963_v37  ;;  %v4064_v1 = vsel %vm19839_vm14, %v9974_v56, %v17097_v10 }
 0x973   :  { %v9994_v7 = vunpack.i.h.bf16 %v9992_v25  ;;  %v9993_v17 = vunpack.i.l.bf16 %v9992_v25  ;;  %v9977_v19 = vpop.permute.xlu1 %9976  ;;  %7646 = vmatprep.subr.msk.bf16.mxu0 %vm2110_vm2, %v4354_v45  ;;  %10066 = vrot.lane.b32.xlu0 %v16941_v8, %s10535_s26  ;;  %v4323_v6 = vpack.c.bf16 %v4019_v57, %v4003_v49  ;;  %v4355_v37 = vpack.c.bf16 %v4064_v1, %v4064_v1 }
 0x974   :  { %v9979_v13 = vunpack.i.h.bf16 %v9977_v19  ;;  %v9978_v20 = vunpack.i.l.bf16 %v9977_v19  ;;  %5180 = vmatprep.subr.bf16.mxu1 %v4324_v58  ;;  %10051 = vrot.lane.b32.xlu1 %v10050_v14, %s10520_s19  ;;  %v4356_v56 = vpack.c.bf16 %v17097_v10, %v17097_v10  ;;  %v9954_v10 = vunpack.i.h.bf16 %v17093_v35 }
 0x975   :  { %5181 = vmatpush1.bf16.msra.mxu1 %v4323_v6  ;;  %v5787_v15 = vpack.c.bf16 %v9994_v7, %v9993_v17  ;;  %v19842_v49 = vmov 0  }
 0x976   :  { %v4979_v31 = vpop.f32.mrb[216].mxu0  ;;  %v4034_v33 = vsel %vm19840_vm7, %v9949_v5, %v9978_v20  ;;  %v4049_v63 = vsel %vm19841_vm8, %v9959_v40, %v9979_v13  ;;  %v10002_v27 = vpop.permute.xlu0 %10001  ;;  %5100 = vmatpush1.bf16.msra.mxu0 %v4556_v53  ;;  %v4340_v8 = vpack.c.bf16 %v9979_v13, %v9978_v20  ;;  %v10070_v14 = vpack.i.bf16 %v17117_v24, %v9954_v10 }
 0x977   :  { %v4980_v32 = vpop.f32.mrb[217].mxu0  ;;  %v17146_v18 = vpop.permute.xlu1 %9981  ;;  %7744 = vmatprep.subr.bf16.mxu0 %v5787_v15  ;;  %v4339_v61 = vpack.c.bf16 %v4049_v63, %v4034_v33  ;;  %v10004_v17 = vunpack.i.h.bf16 %v10002_v27  ;;  %v10003_v19 = vunpack.i.l.bf16 %v10002_v27 }
 0x978   :  { %v4981_v26 = vpop.f32.mrb[218].mxu0  ;;  %5182 = vmatprep.subr.bf16.mxu1 %v4340_v8  ;;  %10056 = vrot.lane.b32.xlu1 %v16946_v52, %s10539_s25  ;;  %v9983_v40 = vunpack.i.l.bf16 %v17146_v18  ;;  %v4562_v52 = vsel %vm2110_vm2, %v4355_v37, 0  ;;  %v9984_v58 = vunpack.i.h.bf16 %v17146_v18  ;;  %v1945_v32 = vld [vmem:[%s18536_s6 + $0x68] sm:$0xff]  ;;  %v1947_v37 = vld [vmem:[%s18536_s6 + $0x78] sm:$0xff] }
 0x979   :  { %v4982_v5 = vpop.f32.mrb[219].mxu0  ;;  %5108 = vmatmul.mubr.bf16.vlgmr.msra.gmra.mrb[224].mxu0 %v16550_v34  ;;  %5183 = vmatpush1.bf16.msra.mxu1 %v4339_v61  ;;  %v1946_v26 = vld [vmem:[%s18536_s6 + $0x70] sm:$0xff] }
 0x97a   :  { %7655 = vmatprep.subr.msk.bf16.mxu1 %vm2110_vm2, %v4356_v56  ;;  %7745 = vmatpush3.bf16.msra.mxu0 %v5779_v22  ;;  %v10012_v45 = vpop.permute.xlu0 %10011  ;;  %vm6004_vm2 = vcmask 130048  }
 0x97b   :  { %v9987_v44 = vpop.permute.xlu1 %9986  ;;  %7648 = vmatprep.mubr.msk.bf16.mxu0 %vm2085_vm12, %v16559_v23  ;;  %v10013_v36 = vunpack.i.l.bf16 %v10012_v45  ;;  %v10014_v1 = vunpack.i.h.bf16 %v10012_v45 }
 0x97c   :  { %5751 = vrot.lane.b32.xlu1 %v9983_v40, %s10520_s19  ;;  %10076 = vrot.lane.b32.xlu0 %v9987_v44, %s10520_s19 }
 0x97d   :  { %5185 = vmatpush1.bf16.msra.mxu1 %v4562_v52  ;;  %v5780_v6 = vpack.c.bf16 %v10013_v36, %v9984_v58 }
 0x97e   :  { %v4985_v46 = vpop.f32.mrb[220].mxu0  ;;  %6126 = vmatprep.subr.bf16.mxu1 %v19842_v49 }
 0x97f   :  { %v4986_v51 = vpop.f32.mrb[221].mxu0  ;;  %v9997_v22 = vpop.permute.xlu1 %9996 }
 0x980   :  { %v9999_v57 = vunpack.i.h.bf16 %v9997_v22  ;;  %v9998_v25 = vunpack.i.l.bf16 %v9997_v22  ;;  %5193 = vmatmul.mubr.bf16.vlgmr.msra.gmra.mrb[224].mxu1 %v16550_v34  ;;  %10071 = vrot.lane.b32.xlu1 %v10070_v14, %s10520_s19  ;;  %v4987_v35 = vpop.f32.mrb[222].mxu0  ;;  %v10454_v34 = vld [vmem:[%s18536_s6] sm:$0xff] }
 0x981   :  { %6127 = vmatpush1.bf16.msra.mxu1 %v16997_v48  ;;  %v4988_v7 = vpop.f32.mrb[223].mxu0  ;;  %5118 = vmatmul.mubr.bf16.gmra.mrb[228].mxu0 %v16580_v55  ;;  %v10455_v48 = vld [vmem:[%s18536_s6 + $0x8] sm:$0xff] }
 0x982   :  { %v5788_v24 = vpack.c.bf16 %v9999_v57, %v9998_v25  ;;  %6128 = vmatprep.subr.bf16.mxu1 %v19842_v49  ;;  %7657 = vmatprep.mubr.msk.bf16.mxu1 %vm2085_vm12, %v16559_v23  ;;  %v5781_v23 = vpack.c.bf16 %v10004_v17, %v10003_v19  ;;  %v10017_v27 = vpop.permute.xlu0 %10016 }
 0x983   :  { %v17174_v13 = vpop.permute.xlu1 %10006  ;;  %7649 = vmatprep.mubr.msk.bf16.mxu0 %vm2085_vm12, %v19786_v2  ;;  %5958 = vrot.lane.b32.xlu0 %v10455_v48, %s10512_s9  ;;  %v10018_v36 = vunpack.i.l.bf16 %v10017_v27 }
 0x984   :  { %7746 = vmatprep.subr.bf16.mxu0 %v5788_v24  ;;  %5956 = vrot.lane.b32.xlu1 %v10454_v34, %s10512_s9  ;;  %v10009_v46 = vunpack.i.h.bf16 %v17174_v13  ;;  %v10008_v14 = vunpack.i.l.bf16 %v17174_v13  ;;  %v10019_v34 = vunpack.i.h.bf16 %v10017_v27 }
 0x985   :  { %7747 = vmatpush3.bf16.msra.mxu0 %v5780_v6 }
 0x986   :  { %7748 = vmatprep.subr.bf16.mxu0 %v5789_v4  ;;  %v1936_v4 = vld [vmem:[%s18536_s6 + $0x20] sm:$0xff]  ;;  %v5782_v48 = vpack.c.bf16 %v10009_v46, %v10008_v14 }
 0x987   :  { %v17191_v20 = vpop.permute.xlu1 %10021 }
 0x988   :  { %v10023_v53 = vunpack.i.l.bf16 %v17191_v20  ;;  %5201 = vmatmul.mubr.bf16.gmra.mrb[228].mxu1 %v16580_v55  ;;  %v10325_v55 = vld [vmem:[%s18538_s3 + $0x4] ss:$16 sps:$4 sm:$0xff]   ;;  %5960 = vrot.lane.b32.xlu1 %v1934_v50, %s10512_s9  ;;  %v10024_v22 = vunpack.i.h.bf16 %v17191_v20 }
 0x989   :  { %7749 = vmatpush3.bf16.msra.mxu0 %v5781_v23  ;;  %7658 = vmatprep.mubr.msk.bf16.mxu1 %vm2085_vm12, %v19786_v2  ;;  %v1935_v2 = vld [vmem:[%s18536_s6 + $0x18] sm:$0xff] }
 0x98a   :  { %v5796_v15 = vpack.c.bf16 %v10023_v53, %v10014_v1  ;;  %5124 = vmatmul.mubr.bf16.gmra.mrb[232].mxu0 %v19791_v62  ;;  %5962 = vrot.lane.b32.xlu0 %v1935_v2, %s10512_s9 }
 0x98b   :  { %7650 = vmatprep.mubr.msk.bf16.mxu0 %vm2085_vm12, %v19794_v47 }
 0x98c   :  { %6129 = vmatpush1.bf16.msra.mxu1 %v5796_v15  ;;  %5964 = vrot.lane.b32.xlu1 %v1936_v4, %s10512_s9 }
 0x98d   :  { %6130 = vmatprep.subr.bf16.mxu1 %v19842_v49 }
 0x990   :  { %5207 = vmatmul.mubr.bf16.gmra.mrb[232].mxu1 %v19791_v62  ;;  %v1937_v62 = vld [vmem:[%s18536_s6 + $0x28] sm:$0xff] }
 0x991   :  { %7659 = vmatprep.mubr.msk.bf16.mxu1 %vm2085_vm12, %v19794_v47  ;;  %5966 = vrot.lane.b32.xlu0 %v1937_v62, %s10512_s9  ;;  %v1938_v47 = vld [vmem:[%s18536_s6 + $0x30] sm:$0xff] }
 0x992   :  { %5130 = vmatmul.mubr.bf16.gmra.mrb[236].mxu0 %v19796_v3  ;;  %5968 = vrot.lane.b32.xlu1 %v1938_v47, %s10512_s9 }
 0x993   :  { %7651 = vmatprep.mubr.msk.bf16.mxu0 %vm2085_vm12, %v19797_v9 }
 0x998   :  { %5213 = vmatmul.mubr.bf16.gmra.mrb[236].mxu1 %v19796_v3  ;;  %v1939_v3 = vld [vmem:[%s18536_s6 + $0x38] sm:$0xff] }
 0x999   :  { %7660 = vmatprep.mubr.msk.bf16.mxu1 %vm2085_vm12, %v19797_v9  ;;  %5970 = vrot.lane.b32.xlu0 %v1939_v3, %s10512_s9  ;;  %v1940_v9 = vld [vmem:[%s18536_s6 + $0x40] sm:$0xff] }
 0x99a   :  { %5136 = vmatmul.mubr.bf16.gmra.mrb[240].mxu0 %v19798_v39  ;;  %5972 = vrot.lane.b32.xlu1 %v1940_v9, %s10512_s9 }
 0x99b   :  { %7652 = vmatprep.mubr.msk.bf16.mxu0 %vm2085_vm12, %v19799_v38 }
 0x9a0   :  { %5219 = vmatmul.mubr.bf16.gmra.mrb[240].mxu1 %v19798_v39  ;;  %v1941_v39 = vld [vmem:[%s18536_s6 + $0x48] sm:$0xff] }
 0x9a1   :  { %7661 = vmatprep.mubr.msk.bf16.mxu1 %vm2085_vm12, %v19799_v38  ;;  %5974 = vrot.lane.b32.xlu0 %v1941_v39, %s10512_s9  ;;  %v1942_v38 = vld [vmem:[%s18536_s6 + $0x50] sm:$0xff] }
 0x9a2   :  { %5142 = vmatmul.mubr.bf16.gmra.mrb[244].mxu0 %v19800_v12  ;;  %5976 = vrot.lane.b32.xlu1 %v1942_v38, %s10512_s9 }
 0x9a3   :  { %7653 = vmatprep.mubr.msk.bf16.mxu0 %vm2085_vm12, %v19801_v54 }
 0x9a8   :  { %5225 = vmatmul.mubr.bf16.gmra.mrb[244].mxu1 %v19800_v12  ;;  %v1943_v12 = vld [vmem:[%s18536_s6 + $0x58] sm:$0xff] }
 0x9a9   :  { %7662 = vmatprep.mubr.msk.bf16.mxu1 %vm2085_vm12, %v19801_v54  ;;  %5978 = vrot.lane.b32.xlu0 %v1943_v12, %s10512_s9 }
 0x9aa   :  { %5148 = vmatmul.mubr.bf16.gmra.mrb[248].mxu0 %v19802_v41 }
 0x9ab   :  { %7654 = vmatprep.mubr.msk.bf16.mxu0 %vm2085_vm12, %v19803_v59 }
 0x9ad   :  { %5982 = vrot.lane.b32.xlu0 %v1945_v32, %s10512_s9 }
 0x9b0   :  { %5231 = vmatmul.mubr.bf16.gmra.mrb[248].mxu1 %v19802_v41 }
 0x9b1   :  { %7663 = vmatprep.mubr.msk.bf16.mxu1 %vm2085_vm12, %v19803_v59  ;;  %v1944_v59 = vld [vmem:[%s18536_s6 + $0x60] sm:$0xff]  ;;  %5986 = vrot.lane.b32.xlu0 %v1947_v37, %s10512_s9 }
 0x9b2   :  { %5154 = vmatmul.mubr.bf16.gmra.mrb[252].mxu0 %v19804_v30  ;;  %5980 = vrot.lane.b32.xlu1 %v1944_v59, %s10512_s9 }
 0x9b3   :  { %6061 = vmatprep.mubr.bf16.mxu0 %v10325_v55 }
 0x9b6   :  { %5984 = vrot.lane.b32.xlu1 %v1946_v26, %s10512_s9 }
 0x9b8   :  { %5237 = vmatmul.mubr.bf16.gmra.mrb[252].mxu1 %v19804_v30 }
 0x9b9   :  { %7696 = vmatprep.mubr.msk.bf16.mxu1 %vm6004_vm2, %v10328_v42 }
 0x9c8   :  { %v17275_v54 = vpop.f32.mrb[192].mxu1 }
 0x9c9   :  { %v17279_v41 = vpop.f32.mrb[193].mxu1 }
 0x9ca   :  { %v17284_v30 = vpop.f32.mrb[194].mxu1 }
 0x9cb   :  { %v17286_v31 = vpop.f32.mrb[195].mxu1 }
 0x9d0   :  { %v5034_v33 = vpop.f32.mrb[196].mxu1 }
 0x9d1   :  { %v5035_v63 = vpop.f32.mrb[197].mxu1 }
 0x9d2   :  { %v5036_v8 = vpop.f32.mrb[198].mxu1 }
 0x9d3   :  { %v5037_v61 = vpop.f32.mrb[199].mxu1  ;;  %v5784_v8 = vpack.c.bf16 %v16924_v29, %v16918_v28 }
 0x9d5   :  { %v10037_v56 = vpop.permute.xlu0 %10036 }
 0x9d6   :  { %v10038_v24 = vunpack.i.l.bf16 %v10037_v56  ;;  %v10039_v3 = vunpack.i.h.bf16 %v10037_v56 }
 0x9d8   :  { %v5040_v5 = vpop.f32.mrb[200].mxu1  ;;  %v5798_v20 = vpack.c.bf16 %v10038_v24, %v10019_v34  ;;  %v10331_v24 = vld [vmem:[%s18538_s3 + $0x24] ss:$16 sps:$4 sm:$0xff]  }
 0x9d9   :  { %v5041_v44 = vpop.f32.mrb[201].mxu1  ;;  %v10042_v10 = vpop.permute.xlu0 %10041  ;;  %v5800_v5 = vpack.c.bf16 %v9983_v40, %v9934_v60 }
 0x9da   :  { %v5042_v45 = vpop.f32.mrb[202].mxu1  ;;  %v10044_v23 = vunpack.i.h.bf16 %v10042_v10  ;;  %v10043_v1 = vunpack.i.l.bf16 %v10042_v10 }
 0x9db   :  { %v5043_v52 = vpop.f32.mrb[203].mxu1 }
 0x9dc   :  { %v5783_v62 = vpack.c.bf16 %v10044_v23, %v10043_v1 }
 0x9dd   :  { %v10047_v35 = vpop.permute.xlu0 %10046 }
 0x9de   :  { %v10027_v51 = vpop.permute.xlu1 %10026  ;;  %v10049_v13 = vunpack.i.h.bf16 %v10047_v35  ;;  %v10048_v55 = vunpack.i.l.bf16 %v10047_v35 }
 0x9df   :  { %v10029_v57 = vunpack.i.h.bf16 %v10027_v51  ;;  %v10028_v25 = vunpack.i.l.bf16 %v10027_v51 }
 0x9e0   :  { %v5046_v58 = vpop.f32.mrb[204].mxu1  ;;  %v5792_v39 = vpack.c.bf16 %v10049_v13, %v10048_v55  ;;  %v10329_v13 = vld [vmem:[%s18538_s3 + $0x20] ss:$16 sps:$4 sm:$0xff]   ;;  %v10334_v55 = vld [vmem:[%s18538_s3 + $0x2c] ss:$16 sps:$4 sm:$0xff]  }
 0x9e1   :  { %v5047_v7 = vpop.f32.mrb[205].mxu1  ;;  %v5797_v17 = vpack.c.bf16 %v10028_v25, %v10024_v22  ;;  %v5790_v19 = vpack.c.bf16 %v10018_v36, %v10029_v57  ;;  %v10062_v2 = vpop.permute.xlu0 %10061  ;;  %v19843_v36 = vld [vmem:[#allocation3_spill] sm:$0xff]  ;;  %v19844_v22 = vld [vmem:[#allocation2_spill] sm:$0xff] }
 0x9e2   :  { %v5048_v6 = vpop.f32.mrb[206].mxu1  ;;  %v10032_v53 = vpop.permute.xlu1 %10031  ;;  %v10063_v56 = vunpack.i.l.bf16 %v10062_v2  ;;  %v10064_v28 = vunpack.i.h.bf16 %v10062_v2  ;;  %v19845_v43 = vpack.c.bf16 %v19843_v36, %v19844_v22  ;;  %v10323_v7 = vld [vmem:[%s18538_s3] ss:$16 sps:$4 sm:$0xff]  }
 0x9e3   :  { %v5049_v15 = vpop.f32.mrb[207].mxu1  ;;  %v10034_v42 = vunpack.i.h.bf16 %v10032_v53  ;;  %v10033_v50 = vunpack.i.l.bf16 %v10032_v53  ;;  %7750 = vmatprep.subr.bf16.mxu0 %v5790_v19  ;;  %6131 = vmatpush1.bf16.msra.mxu1 %v5797_v17  ;;  %v10326_v53 = vld [vmem:[%s18538_s3 + $0x8] ss:$16 sps:$4 sm:$0xff]  }
 0x9e4   :  { %7751 = vmatpush3.bf16.msra.mxu0 %v5782_v48  ;;  %6132 = vmatprep.subr.bf16.mxu1 %v19842_v49 }
 0x9e5   :  { %v5791_v4 = vpack.c.bf16 %v10034_v42, %v10033_v50  ;;  %v10067_v61 = vpop.permute.xlu0 %10066  ;;  %v10337_v42 = vld [vmem:[%s18538_s3 + $0x44] ss:$16 sps:$4 sm:$0xff]  }
 0x9e6   :  { %v10052_v47 = vpop.permute.xlu1 %10051  ;;  %v10069_v45 = vunpack.i.h.bf16 %v10067_v61  ;;  %v10068_v52 = vunpack.i.l.bf16 %v10067_v61  ;;  %v10353_v61 = vld [vmem:[%s18538_s3 + $0xa0] ss:$16 sps:$4 sm:$0xff]  }
 0x9e7   :  { %v10053_v9 = vunpack.i.l.bf16 %v10052_v47  ;;  %7752 = vmatprep.subr.bf16.mxu0 %v5791_v4  ;;  %6133 = vmatpush1.bf16.msra.mxu1 %v5798_v20  ;;  %v10054_v63 = vunpack.i.h.bf16 %v10052_v47  ;;  %v10332_v4 = vld [vmem:[%s18538_s3 + $0x28] ss:$16 sps:$4 sm:$0xff]   ;;  %v10335_v47 = vld [vmem:[%s18538_s3 + $0x40] ss:$16 sps:$4 sm:$0xff]  }
 0x9e8   :  { %v5052_v38 = vpop.f32.mrb[208].mxu1  ;;  %7753 = vmatpush3.bf16.msra.mxu0 %v5783_v62  ;;  %6134 = vmatprep.subr.bf16.mxu1 %v19842_v49  ;;  %v5786_v60 = vpack.c.bf16 %v10069_v45, %v10068_v52  ;;  %v10362_v45 = vld [vmem:[%s18538_s3 + $0xc8] ss:$16 sps:$4 sm:$0xff]   ;;  %v10365_v52 = vld [vmem:[%s18538_s3 + $0xe0] ss:$16 sps:$4 sm:$0xff]  }
 0x9e9   :  { %v5053_v12 = vpop.f32.mrb[209].mxu1  ;;  %v5799_v59 = vpack.c.bf16 %v10053_v9, %v10039_v3  ;;  %7754 = vmatprep.subr.bf16.mxu0 %v5792_v39  ;;  %v5785_v10 = vpack.c.bf16 %v10063_v56, %v10054_v63  ;;  %v10340_v3 = vld [vmem:[%s18538_s3 + $0x4c] ss:$16 sps:$4 sm:$0xff]   ;;  %v10343_v9 = vld [vmem:[%s18538_s3 + $0x64] ss:$16 sps:$4 sm:$0xff]  }
 0x9ea   :  { %v5054_v33 = vpop.f32.mrb[210].mxu1  ;;  %v10057_v27 = vpop.permute.xlu1 %10056  ;;  %v10338_v39 = vld [vmem:[%s18538_s3 + $0x48] ss:$16 sps:$4 sm:$0xff]   ;;  %v10341_v38 = vld [vmem:[%s18538_s3 + $0x60] ss:$16 sps:$4 sm:$0xff]  }
 0x9eb   :  { %v5055_v32 = vpop.f32.mrb[211].mxu1  ;;  %v10059_v26 = vunpack.i.h.bf16 %v10057_v27  ;;  %v10058_v37 = vunpack.i.l.bf16 %v10057_v27  ;;  %6135 = vmatpush1.bf16.msra.mxu1 %v5799_v59  ;;  %v10346_v12 = vld [vmem:[%s18538_s3 + $0x6c] ss:$16 sps:$4 sm:$0xff]   ;;  %v10349_v59 = vld [vmem:[%s18538_s3 + $0x84] ss:$16 sps:$4 sm:$0xff]  }
 0x9ec   :  { %7755 = vmatpush3.bf16.msra.mxu0 %v5784_v8  ;;  %6136 = vmatprep.subr.bf16.mxu1 %v19842_v49  ;;  %v10344_v33 = vld [vmem:[%s18538_s3 + $0x68] ss:$16 sps:$4 sm:$0xff]   ;;  %v10347_v63 = vld [vmem:[%s18538_s3 + $0x80] ss:$16 sps:$4 sm:$0xff]   ;;  %v10352_v27 = vld [vmem:[%s18538_s3 + $0x8c] ss:$16 sps:$4 sm:$0xff]  }
 0x9ed   :  { %v5793_v44 = vpack.c.bf16 %v10059_v26, %v10058_v37  ;;  %v10355_v8 = vld [vmem:[%s18538_s3 + $0xa4] ss:$16 sps:$4 sm:$0xff]   ;;  %v10350_v32 = vld [vmem:[%s18538_s3 + $0x88] ss:$16 sps:$4 sm:$0xff]   ;;  %v10358_v26 = vld [vmem:[%s18538_s3 + $0xac] ss:$16 sps:$4 sm:$0xff]  }
 0x9ee   :  { %v5752_v46 = vpop.permute.xlu1 %5751  ;;  %v10077_v58 = vpop.permute.xlu0 %10076  ;;  %v10361_v37 = vld [vmem:[%s18538_s3 + $0xc4] ss:$16 sps:$4 sm:$0xff]   ;;  %v10356_v56 = vld [vmem:[%s18538_s3 + $0xa8] ss:$16 sps:$4 sm:$0xff]  }
 0x9ef   :  { %7756 = vmatprep.subr.bf16.mxu0 %v5793_v44  ;;  %6137 = vmatpush1.bf16.msra.mxu1 %v5800_v5  ;;  %v5801_v51 = vpack.c.bf16 %v5752_v46, %v10064_v28  ;;  %v10079_v19 = vunpack.i.h.bf16 %v10077_v58  ;;  %v10078_v6 = vunpack.i.l.bf16 %v10077_v58  ;;  %v10359_v5 = vld [vmem:[%s18538_s3 + $0xc0] ss:$16 sps:$4 sm:$0xff]   ;;  %v10364_v44 = vld [vmem:[%s18538_s3 + $0xcc] ss:$16 sps:$4 sm:$0xff]   ;;  %v10368_v28 = vld [vmem:[%s18538_s3 + $0xe8] ss:$16 sps:$4 sm:$0xff]  }
 0x9f0   :  { %v5058_v29 = vpop.f32.mrb[212].mxu1  ;;  %7757 = vmatpush3.bf16.msra.mxu0 %v5785_v10  ;;  %6138 = vmatprep.subr.bf16.mxu1 %v19842_v49  ;;  %v10367_v10 = vld [vmem:[%s18538_s3 + $0xe4] ss:$16 sps:$4 sm:$0xff]   ;;  %v10370_v46 = vld [vmem:[%s18538_s3 + $0xec] ss:$16 sps:$4 sm:$0xff]  }
 0x9f1   :  { %v5059_v14 = vpop.f32.mrb[213].mxu1  ;;  %7758 = vmatprep.subr.bf16.mxu0 %v19845_v43  ;;  %v5803_v23 = vpack.c.bf16 %v10079_v19, %v10078_v6  ;;  %v19846_v29 = vld [vmem:[#allocation23_spill] sm:$0xff] }
 0x9f2   :  { %v5060_v18 = vpop.f32.mrb[214].mxu1  ;;  %v10072_v40 = vpop.permute.xlu1 %10071  ;;  %v17418_v14 = vadd.f32 %v17279_v41, %v19846_v29 }
 0x9f3   :  { %v5061_v57 = vpop.f32.mrb[215].mxu1  ;;  %v10074_v25 = vunpack.i.h.bf16 %v10072_v40  ;;  %v10073_v35 = vunpack.i.l.bf16 %v10072_v40  ;;  %6139 = vmatpush1.bf16.msra.mxu1 %v5801_v51  ;;  %v19847_v51 = vld [vmem:[#allocation9_spill] sm:$0xff] }
 0x9f4   :  { %7759 = vmatpush3.bf16.msra.mxu0 %v5786_v60  ;;  %6140 = vmatprep.subr.bf16.mxu1 %v19842_v49  ;;  %v17422_v36 = vadd.f32 %v17286_v31, %v19847_v51  ;;  %v5253_v57 = vmax.f32 %v17418_v14, 0.0 }
 0x9f5   :  { %v5802_v17 = vpack.c.bf16 %v10074_v25, %v10073_v35 }
 0x9f6   :  { %v5267_v31 = vmax.f32 %v17422_v36, 0.0 }
 0x9f7   :  { %6062 = vmatmul.mubr.bf16.vlgmr.msra.gmra.mrb[0].mxu0 %v10323_v7  ;;  %6141 = vmatpush1.bf16.msra.mxu1 %v5802_v17 }
 0x9f8   :  { %v5064_v34 = vpop.f32.mrb[216].mxu1  ;;  %6142 = vmatprep.subr.bf16.mxu1 %v19842_v49  ;;  %6069 = vmatprep.mubr.bf16.mxu0 %v10331_v24  ;;  %v17442_v24 = vadd.f32 %v17275_v54, %v19846_v29 }
 0x9f9   :  { %v5065_v48 = vpop.f32.mrb[217].mxu1 }
 0x9fa   :  { %v5066_v1 = vpop.f32.mrb[218].mxu1  ;;  %v17456_v48 = vadd.f32 %v17040_v16, %v19846_v29  ;;  %v5252_v16 = vmax.f32 %v17442_v24, 0.0 }
 0x9fb   :  { %v5067_v15 = vpop.f32.mrb[219].mxu1  ;;  %6143 = vmatpush1.bf16.msra.mxu1 %v5803_v23 }
 0x9fc   :  { %v17467_v15 = vadd.f32 %v17042_v0, %v19847_v51 }
 0x9fe   :  { %6159 = vmatmul.mubr.bf16.vlgmr.msra.gmra.mrb[0].mxu1 %v10326_v53 }
 0x9ff   :  { %6070 = vmatmul.mubr.bf16.gmra.mrb[4].mxu0 %v10329_v13  ;;  %7697 = vmatprep.mubr.msk.bf16.mxu1 %vm6004_vm2, %v10334_v55 }
 0xa00   :  { %v5070_v50 = vpop.f32.mrb[220].mxu1  ;;  %6077 = vmatprep.mubr.bf16.mxu0 %v10337_v42  ;;  %v17472_v42 = vadd.f32 %v17284_v30, %v19847_v51 }
 0xa01   :  { %v5071_v20 = vpop.f32.mrb[221].mxu1 }
 0xa02   :  { %v5072_v2 = vpop.f32.mrb[222].mxu1 }
 0xa03   :  { %v5073_v62 = vpop.f32.mrb[223].mxu1 }
 0xa04   :  { %v5251_v62 = vmax.f32 %v17456_v48, 0.0 }
 0xa06   :  { %6167 = vmatmul.mubr.bf16.gmra.mrb[4].mxu1 %v10332_v4  ;;  %v17477_v4 = vadd.f32 %v17038_v11, %v19846_v29  ;;  %v10100_v11 = vpack.i.bf16 %v5252_v16, %v5251_v62 }
 0xa07   :  { %6078 = vmatmul.mubr.bf16.gmra.mrb[8].mxu0 %v10335_v47  ;;  %7698 = vmatprep.mubr.msk.bf16.mxu1 %vm6004_vm2, %v10340_v3  ;;  %v17483_v47 = vadd.f32 %v17044_v21, %v19847_v51 }
 0xa08   :  { %6085 = vmatprep.mubr.bf16.mxu0 %v10343_v9 }
 0xa09   :  { %v5265_v21 = vmax.f32 %v17483_v47, 0.0 }
 0xa0e   :  { %6175 = vmatmul.mubr.bf16.gmra.mrb[8].mxu1 %v10338_v39  ;;  %v5264_v39 = vmax.f32 %v17467_v15, 0.0 }
 0xa0f   :  { %6086 = vmatmul.mubr.bf16.gmra.mrb[12].mxu0 %v10341_v38  ;;  %7699 = vmatprep.mubr.msk.bf16.mxu1 %vm6004_vm2, %v10346_v12  ;;  %v5266_v38 = vmax.f32 %v17472_v42, 0.0 }
 0xa10   :  { %6093 = vmatprep.mubr.bf16.mxu0 %v10349_v59  ;;  %v5250_v59 = vmax.f32 %v17477_v4, 0.0 }
 0xa16   :  { %6183 = vmatmul.mubr.bf16.gmra.mrb[12].mxu1 %v10344_v33 }
 0xa17   :  { %6094 = vmatmul.mubr.bf16.gmra.mrb[16].mxu0 %v10347_v63  ;;  %7700 = vmatprep.mubr.msk.bf16.mxu1 %vm6004_vm2, %v10352_v27  ;;  %v10110_v27 = vpack.i.bf16 %v5264_v39, %v5250_v59 }
 0xa18   :  { %6101 = vmatprep.mubr.bf16.mxu0 %v10355_v8 }
 0xa1e   :  { %6191 = vmatmul.mubr.bf16.gmra.mrb[16].mxu1 %v10350_v32 }
 0xa1f   :  { %6102 = vmatmul.mubr.bf16.gmra.mrb[20].mxu0 %v10353_v61  ;;  %7701 = vmatprep.mubr.msk.bf16.mxu1 %vm6004_vm2, %v10358_v26  ;;  %v10105_v61 = vpack.i.bf16 %v5266_v38, %v5265_v21 }
 0xa20   :  { %6109 = vmatprep.mubr.bf16.mxu0 %v10361_v37 }
 0xa26   :  { %6199 = vmatmul.mubr.bf16.gmra.mrb[20].mxu1 %v10356_v56 }
 0xa27   :  { %6110 = vmatmul.mubr.bf16.gmra.mrb[24].mxu0 %v10359_v5  ;;  %7702 = vmatprep.mubr.msk.bf16.mxu1 %vm6004_vm2, %v10364_v44 }
 0xa28   :  { %6117 = vmatprep.mubr.bf16.mxu0 %v10367_v10 }
 0xa2e   :  { %6207 = vmatmul.mubr.bf16.gmra.mrb[24].mxu1 %v10362_v45 }
 0xa2f   :  { %6118 = vmatmul.mubr.bf16.gmra.mrb[28].mxu0 %v10365_v52  ;;  %7703 = vmatprep.mubr.msk.bf16.mxu1 %vm6004_vm2, %v10370_v46 }
 0xa36   :  { %6215 = vmatmul.mubr.bf16.gmra.mrb[28].mxu1 %v10368_v28 }
 0xa4c   :  { %v5109_v22 = vpop.f32.mrb[224].mxu0 }
 0xa4d   :  { %v17425_v43 = vadd.f32 %v5109_v22, %v19846_v29  ;;  %v5111_v18 = vpop.f32.mrb[225].mxu0 }
 0xa4e   :  { %v17428_v60 = vadd.f32 %v5111_v18, %v19846_v29  ;;  %v5113_v40 = vpop.f32.mrb[226].mxu0 }
 0xa4f   :  { %v5254_v25 = vmax.f32 %v17425_v43, 0.0  ;;  %v17433_v41 = vadd.f32 %v5113_v40, %v19847_v51  ;;  %v5115_v35 = vpop.f32.mrb[227].mxu0 }
 0xa50   :  { %v5255_v58 = vmax.f32 %v17428_v60, 0.0  ;;  %v17438_v7 = vadd.f32 %v5115_v35, %v19847_v51 }
 0xa51   :  { %v10080_v17 = vpack.i.bf16 %v5254_v25, %v5253_v57  ;;  %v5268_v19 = vmax.f32 %v17433_v41, 0.0 }
 0xa52   :  { %v10085_v6 = vpack.i.bf16 %v5267_v31, %v5255_v58  ;;  %v5269_v34 = vmax.f32 %v17438_v7, 0.0 }
 0xa53   :  { %v5194_v54 = vpop.f32.mrb[224].mxu1  ;;  %10081 = vrot.lane.b32.xlu1 %v10080_v17, %s10512_s9 }
 0xa54   :  { %v10090_v23 = vpack.i.bf16 %v5269_v34, %v5268_v19  ;;  %v5195_v1 = vadd.f32 %v5194_v54, %v19846_v29  ;;  %v5196_v53 = vpop.f32.mrb[225].mxu1  ;;  %10086 = vrot.lane.b32.xlu0 %v10085_v6, %s10512_s9  ;;  %v5119_v55 = vpop.f32.mrb[228].mxu0 }
 0xa55   :  { %v5197_v13 = vpop.f32.mrb[226].mxu1  ;;  %v5120_v2 = vpop.f32.mrb[229].mxu0 }
 0xa56   :  { %v5198_v50 = vadd.f32 %v5197_v13, %v19847_v51  ;;  %v5199_v20 = vpop.f32.mrb[227].mxu1  ;;  %v5121_v0 = vpop.f32.mrb[230].mxu0  ;;  %v5256_v3 = vmax.f32 %v5195_v1, 0.0 }
 0xa57   :  { %10091 = vrot.lane.b32.xlu1 %v10090_v23, %s10512_s9  ;;  %v5122_v9 = vpop.f32.mrb[231].mxu0 }
 0xa58   :  { %v5270_v30 = vmax.f32 %v5198_v50, 0.0 }
 0xa5a   :  { %v10095_v12 = vpack.i.bf16 %v5270_v30, %v5256_v3 }
 0xa5b   :  { %10101 = vrot.lane.b32.xlu1 %v10100_v11, %s10512_s9  ;;  %v5202_v33 = vpop.f32.mrb[228].mxu1 }
 0xa5c   :  { %10096 = vrot.lane.b32.xlu0 %v10095_v12, %s10512_s9  ;;  %v5203_v63 = vpop.f32.mrb[229].mxu1 }
 0xa5d   :  { %v5125_v8 = vpop.f32.mrb[232].mxu0  ;;  %v5204_v32 = vpop.f32.mrb[230].mxu1 }
 0xa5e   :  { %v5126_v26 = vpop.f32.mrb[233].mxu0  ;;  %v5205_v37 = vpop.f32.mrb[231].mxu1 }
 0xa5f   :  { %10111 = vrot.lane.b32.xlu1 %v10110_v27, %s10512_s9  ;;  %v5127_v56 = vpop.f32.mrb[234].mxu0 }
 0xa60   :  { %10106 = vrot.lane.b32.xlu0 %v10105_v61, %s10512_s9  ;;  %v5128_v5 = vpop.f32.mrb[235].mxu0 }
 0xa63   :  { %v5208_v44 = vpop.f32.mrb[232].mxu1 }
 0xa64   :  { %v5209_v10 = vpop.f32.mrb[233].mxu1 }
 0xa65   :  { %v5131_v45 = vpop.f32.mrb[236].mxu0  ;;  %v5210_v52 = vpop.f32.mrb[234].mxu1 }
 0xa66   :  { %v5132_v46 = vpop.f32.mrb[237].mxu0  ;;  %v5211_v28 = vpop.f32.mrb[235].mxu1 }
 0xa67   :  { %v5133_v29 = vpop.f32.mrb[238].mxu0  ;;  %v10371_v28 = vld [vmem:[%s18539_s4] sm:$0xff]  }
 0xa68   :  { %v5134_v51 = vpop.f32.mrb[239].mxu0  ;;  %v5957_v29 = vpop.permute.xlu1 %5956  ;;  %7952 = vmatprep.mubr.bf16.mxu0 %v10371_v28 }
 0xa69   :  { %v17508_v51 = vpop.permute.xlu0 %5958 }
 0xa6b   :  { %v5214_v22 = vpop.f32.mrb[236].mxu1 }
 0xa6c   :  { %v5215_v18 = vpop.f32.mrb[237].mxu1  ;;  %v17510_v22 = vpop.permute.xlu1 %5960 }
 0xa6d   :  { %v5137_v40 = vpop.f32.mrb[240].mxu0  ;;  %v5216_v35 = vpop.f32.mrb[238].mxu1 }
 0xa6e   :  { %v5138_v17 = vpop.f32.mrb[241].mxu0  ;;  %v5217_v6 = vpop.f32.mrb[239].mxu1 }
 0xa6f   :  { %v5139_v54 = vpop.f32.mrb[242].mxu0  ;;  %v17512_v18 = vpop.permute.xlu0 %5962 }
 0xa70   :  { %v5140_v23 = vpop.f32.mrb[243].mxu0  ;;  %v17514_v40 = vpop.permute.xlu1 %5964 }
 0xa73   :  { %v5220_v1 = vpop.f32.mrb[240].mxu1  ;;  %v17516_v35 = vpop.permute.xlu0 %5966 }
 0xa74   :  { %v5221_v53 = vpop.f32.mrb[241].mxu1  ;;  %v17518_v17 = vpop.permute.xlu1 %5968 }
 0xa75   :  { %v5143_v13 = vpop.f32.mrb[244].mxu0  ;;  %v5222_v55 = vpop.f32.mrb[242].mxu1 }
 0xa76   :  { %v5144_v50 = vpop.f32.mrb[245].mxu0  ;;  %v5223_v20 = vpop.f32.mrb[243].mxu1 }
 0xa77   :  { %v5145_v2 = vpop.f32.mrb[246].mxu0  ;;  %v17520_v6 = vpop.permute.xlu0 %5970 }
 0xa78   :  { %v5146_v0 = vpop.f32.mrb[247].mxu0  ;;  %v17522_v54 = vpop.permute.xlu1 %5972 }
 0xa7b   :  { %v5226_v3 = vpop.f32.mrb[244].mxu1  ;;  %v17524_v23 = vpop.permute.xlu0 %5974 }
 0xa7c   :  { %v5227_v30 = vpop.f32.mrb[245].mxu1  ;;  %v17526_v1 = vpop.permute.xlu1 %5976 }
 0xa7d   :  { %v5149_v9 = vpop.f32.mrb[248].mxu0  ;;  %v5228_v11 = vpop.f32.mrb[246].mxu1 }
 0xa7e   :  { %v5150_v12 = vpop.f32.mrb[249].mxu0  ;;  %v5229_v33 = vpop.f32.mrb[247].mxu1 }
 0xa7f   :  { %v5151_v63 = vpop.f32.mrb[250].mxu0  ;;  %v17528_v53 = vpop.permute.xlu0 %5978 }
 0xa80   :  { %v5152_v27 = vpop.f32.mrb[251].mxu0  ;;  %v17530_v13 = vpop.permute.xlu1 %5980 }
 0xa83   :  { %v5232_v8 = vpop.f32.mrb[248].mxu1  ;;  %v17532_v55 = vpop.permute.xlu0 %5982 }
 0xa84   :  { %v5233_v32 = vpop.f32.mrb[249].mxu1  ;;  %v17534_v50 = vpop.permute.xlu1 %5984 }
 0xa85   :  { %v5155_v61 = vpop.f32.mrb[252].mxu0  ;;  %v5234_v26 = vpop.f32.mrb[250].mxu1 }
 0xa86   :  { %v5156_v37 = vpop.f32.mrb[253].mxu0  ;;  %v5235_v56 = vpop.f32.mrb[251].mxu1 }
 0xa87   :  { %v5157_v5 = vpop.f32.mrb[254].mxu0  ;;  %v17536_v20 = vpop.permute.xlu0 %5986 }
 0xa88   :  { %v5158_v44 = vpop.f32.mrb[255].mxu0 }
 0xa8b   :  { %v5238_v10 = vpop.f32.mrb[252].mxu1 }
 0xa8c   :  { %v5239_v45 = vpop.f32.mrb[253].mxu1 }
 0xa8d   :  { %v5240_v52 = vpop.f32.mrb[254].mxu1 }
 0xa8e   :  { %v5241_v46 = vpop.f32.mrb[255].mxu1 }
 0xac5   :  { %v10082_v2 = vpop.permute.xlu1 %10081 }
 0xac6   :  { %v10084_v0 = vunpack.i.h.bf16 %v10082_v2  ;;  %v10083_v3 = vunpack.i.l.bf16 %v10082_v2  ;;  %v17538_v30 = vpop.permute.xlu0 %10086 }
 0xac7   :  { %v10088_v9 = vunpack.i.l.bf16 %v17538_v30  ;;  %v10089_v27 = vunpack.i.h.bf16 %v17538_v30 }
 0xac8   :  { %v5364_v11 = vsel %vm161_vm1, %v10083_v3, %v10084_v0 }
 0xac9   :  { %v17544_v12 = vmax.f32 %v5253_v57, %v5364_v11  ;;  %v5365_v33 = vsel %vm161_vm1, %v10084_v0, %v10088_v9  ;;  %v10092_v63 = vpop.permute.xlu1 %10091 }
 0xaca   :  { %v17550_v8 = vmax.f32 %v5254_v25, %v5365_v33  ;;  %v10094_v32 = vunpack.i.h.bf16 %v10092_v63  ;;  %v10093_v61 = vunpack.i.l.bf16 %v10092_v63  ;;  %v7760_v26 = vpop.f32.mrb[0].mxu0 }
 0xacb   :  { %v7761_v37 = vpop.f32.mrb[1].mxu0 }
 0xacc   :  { %v5376_v56 = vsel %vm161_vm1, %v10089_v27, %v10093_v61  ;;  %v5377_v5 = vsel %vm161_vm1, %v10093_v61, %v10094_v32  ;;  %v7762_v14 = vadd.f32 %v7761_v37, %v7760_v26  ;;  %v7763_v57 = vpop.f32.mrb[2].mxu0  ;;  %v10115_v44 = vpack.i.bf16 %v17550_v8, %v17544_v12 }
 0xacd   :  { %v17558_v10 = vmax.f32 %v5267_v31, %v5376_v56  ;;  %v17562_v43 = vmax.f32 %v5268_v19, %v5377_v5  ;;  %v10102_v25 = vpop.permute.xlu1 %10101  ;;  %v7764_v45 = vpop.f32.mrb[3].mxu0 }
 0xace   :  { %v10104_v52 = vunpack.i.h.bf16 %v10102_v25  ;;  %v10103_v46 = vunpack.i.l.bf16 %v10102_v25  ;;  %v7765_v28 = vadd.f32 %v7764_v45, %v7763_v57  ;;  %v10097_v2 = vpop.permute.xlu0 %10096  ;;  %10116 = vrot.lane.b32.xlu0 %v10115_v44, %s10523_s22  ;;  %v6064_v41 = vadd.f32 %v7762_v14, %v5957_v29 }
 0xacf   :  { %v10099_v0 = vunpack.i.h.bf16 %v10097_v2  ;;  %v10098_v30 = vunpack.i.l.bf16 %v10097_v2  ;;  %v10120_v11 = vpack.i.bf16 %v17562_v43, %v17558_v10 }
 0xad0   :  { %v5362_v36 = vsel %vm161_vm1, %v10103_v46, %v10104_v52  ;;  %v5363_v31 = vsel %vm161_vm1, %v10104_v52, %v10083_v3  ;;  %v6067_v7 = vadd.f32 %v7765_v28, %v17508_v51 }
 0xad1   :  { %v17571_v19 = vmax.f32 %v5251_v62, %v5362_v36  ;;  %v17575_v33 = vmax.f32 %v5252_v16, %v5363_v31  ;;  %v5378_v63 = vsel %vm161_vm1, %v10094_v32, %v10099_v0  ;;  %v5366_v61 = vsel %vm161_vm1, %v10088_v9, %v10098_v30  ;;  %v10112_v26 = vpop.permute.xlu1 %10111  ;;  %10121 = vrot.lane.b32.xlu1 %v10120_v11, %s10523_s22  ;;  %v6160_v37 = vpop.f32.mrb[0].mxu1 }
 0xad2   :  { %v5426_v3 = vmax.f32 %v5269_v34, %v5378_v63  ;;  %v5414_v48 = vmax.f32 %v5255_v58, %v5366_v61  ;;  %v10114_v62 = vunpack.i.h.bf16 %v10112_v26  ;;  %v10113_v29 = vunpack.i.l.bf16 %v10112_v26  ;;  %v10107_v56 = vpop.permute.xlu0 %10106  ;;  %v7766_v24 = vpop.f32.mrb[4].mxu0 }
 0xad3   :  { %v6161_v16 = vadd.f32 %v6160_v37, %v6064_v41  ;;  %v10109_v5 = vunpack.i.h.bf16 %v10107_v56  ;;  %v10108_v14 = vunpack.i.l.bf16 %v10107_v56  ;;  %v6162_v32 = vpop.f32.mrb[1].mxu1  ;;  %v7767_v57 = vpop.f32.mrb[5].mxu0  ;;  %v10130_v9 = vpack.i.bf16 %v17575_v33, %v17571_v19 }
 0xad4   :  { %v5361_v44 = vsel %vm161_vm1, %v10113_v29, %v10103_v46  ;;  %v7768_v25 = vadd.f32 %v7767_v57, %v7766_v24  ;;  %v6163_v34 = vpop.f32.mrb[2].mxu1  ;;  %v7769_v60 = vpop.f32.mrb[6].mxu0  ;;  %v10125_v58 = vpack.i.bf16 %v5426_v3, %v5414_v48 }
 0xad5   :  { %v17590_v45 = vmax.f32 %v5250_v59, %v5361_v44  ;;  %v5373_v52 = vsel %vm161_vm1, %v10114_v62, %v10108_v14  ;;  %v5374_v2 = vsel %vm161_vm1, %v10108_v14, %v10109_v5  ;;  %10131 = vrot.lane.b32.xlu1 %v10130_v9, %s10523_s22  ;;  %v7770_v0 = vpop.f32.mrb[7].mxu0  ;;  %v6165_v30 = vpop.f32.mrb[3].mxu1  ;;  %v5375_v46 = vsel %vm161_vm1, %v10109_v5, %v10089_v27 }
 0xad6   :  { %v17598_v51 = vmax.f32 %v5264_v39, %v5373_v52  ;;  %v17602_v28 = vmax.f32 %v5265_v21, %v5374_v2  ;;  %v6164_v4 = vadd.f32 %v6163_v34, %v6067_v7  ;;  %10126 = vrot.lane.b32.xlu0 %v10125_v58, %s10523_s22  ;;  %v17607_v59 = vmax.f32 %v5266_v38, %v5375_v46 }
 0xad7   :  { %v7771_v11 = vadd.f32 %v7770_v0, %v7769_v60  ;;  %v6223_v36 = vmax.f32 %v6161_v16, 0.0  ;;  %v6072_v27 = vadd.f32 %v7768_v25, %v17510_v22  ;;  %vm6657_vm1 = vcmask 7168  }
 0xad8   :  { %v6224_v31 = vmax.f32 %v6164_v4, 0.0  ;;  %v10140_v15 = vpack.i.bf16 %v17598_v51, %v17590_v45  ;;  %v10135_v47 = vpack.i.bf16 %v17607_v59, %v17602_v28 }
 0xad9   :  { %v6168_v39 = vpop.f32.mrb[4].mxu1  ;;  %v6075_v38 = vadd.f32 %v7771_v11, %v17512_v18 }
 0xada   :  { %v6239_v21 = vpack.c.bf16 %v6224_v31, %v6223_v36  ;;  %v6169_v41 = vadd.f32 %v6168_v39, %v6072_v27  ;;  %10141 = vrot.lane.b32.xlu1 %v10140_v15, %s10523_s22  ;;  %v7772_v63 = vpop.f32.mrb[8].mxu0  ;;  %v6170_v42 = vpop.f32.mrb[5].mxu1  ;;  %10136 = vrot.lane.b32.xlu0 %v10135_v47, %s10523_s22 }
 0xadb   :  { %v7773_v61 = vpop.f32.mrb[9].mxu0  ;;  %v6171_v26 = vpop.f32.mrb[6].mxu1 }
 0xadc   :  { %7936 = vmatprep.subr.bf16.mxu0 %v6239_v21  ;;  %v7774_v22 = vadd.f32 %v7773_v61, %v7772_v63  ;;  %v6172_v37 = vadd.f32 %v6171_v26, %v6075_v38  ;;  %v7775_v3 = vpop.f32.mrb[10].mxu0  ;;  %v6173_v48 = vpop.f32.mrb[7].mxu1  ;;  %v6225_v29 = vmax.f32 %v6169_v41, 0.0 }
 0xadd   :  { %7937 = vmatpush3.bf16.msra.mxu0 %v6239_v21  ;;  %v7776_v62 = vpop.f32.mrb[11].mxu0 }
 0xade   :  { %v6226_v56 = vmax.f32 %v6172_v37, 0.0  ;;  %v7777_v24 = vadd.f32 %v7776_v62, %v7775_v3  ;;  %v6080_v5 = vadd.f32 %v7774_v22, %v17514_v40 }
 0xae0   :  { %v6240_v16 = vpack.c.bf16 %v6226_v56, %v6225_v29  ;;  %v6083_v9 = vadd.f32 %v7777_v24, %v17516_v35 }
 0xae1   :  { %v6176_v14 = vpop.f32.mrb[8].mxu1 }
 0xae2   :  { %v6177_v32 = vadd.f32 %v6176_v14, %v6080_v5  ;;  %v7778_v18 = vpop.f32.mrb[12].mxu0  ;;  %v6178_v57 = vpop.f32.mrb[9].mxu1  ;;  %7938 = vmatprep.subr.bf16.mxu0 %v6240_v16 }
 0xae3   :  { %v7779_v44 = vpop.f32.mrb[13].mxu0  ;;  %v6179_v25 = vpop.f32.mrb[10].mxu1  ;;  %7939 = vmatpush3.bf16.msra.mxu0 %v6240_v16 }
 0xae4   :  { %v7780_v7 = vadd.f32 %v7779_v44, %v7778_v18  ;;  %v6180_v34 = vadd.f32 %v6179_v25, %v6083_v9  ;;  %v7781_v60 = vpop.f32.mrb[14].mxu0  ;;  %v6181_v58 = vpop.f32.mrb[11].mxu1  ;;  %v6227_v2 = vmax.f32 %v6177_v32, 0.0 }
 0xae5   :  { %v7782_v52 = vpop.f32.mrb[15].mxu0 }
 0xae6   :  { %v6228_v0 = vmax.f32 %v6180_v34, 0.0  ;;  %v7783_v30 = vadd.f32 %v7782_v52, %v7781_v60  ;;  %v6088_v40 = vadd.f32 %v7780_v7, %v17518_v17 }
 0xae8   :  { %v6241_v46 = vpack.c.bf16 %v6228_v0, %v6227_v2  ;;  %v6091_v35 = vadd.f32 %v7783_v30, %v17520_v6 }
 0xae9   :  { %v6184_v4 = vpop.f32.mrb[12].mxu1 }
 0xaea   :  { %v6185_v11 = vadd.f32 %v6184_v4, %v6088_v40  ;;  %v7784_v36 = vpop.f32.mrb[16].mxu0  ;;  %v6186_v31 = vpop.f32.mrb[13].mxu1  ;;  %7940 = vmatprep.subr.bf16.mxu0 %v6241_v46 }
 0xaeb   :  { %v7785_v27 = vpop.f32.mrb[17].mxu0  ;;  %v6187_v15 = vpop.f32.mrb[14].mxu1  ;;  %7941 = vmatpush3.bf16.msra.mxu0 %v6241_v46 }
 0xaec   :  { %v7786_v39 = vadd.f32 %v7785_v27, %v7784_v36  ;;  %v6188_v47 = vadd.f32 %v6187_v15, %v6091_v35  ;;  %v7787_v21 = vpop.f32.mrb[18].mxu0  ;;  %v6189_v41 = vpop.f32.mrb[15].mxu1  ;;  %v6229_v42 = vmax.f32 %v6185_v11, 0.0 }
 0xaed   :  { %v7788_v63 = vpop.f32.mrb[19].mxu0 }
 0xaee   :  { %v6230_v38 = vmax.f32 %v6188_v47, 0.0  ;;  %v7789_v61 = vadd.f32 %v7788_v63, %v7787_v21  ;;  %v6096_v17 = vadd.f32 %v7786_v39, %v17522_v54 }
 0xaf0   :  { %v6242_v26 = vpack.c.bf16 %v6230_v38, %v6229_v42  ;;  %v6099_v6 = vadd.f32 %v7789_v61, %v17524_v23 }
 0xaf1   :  { %v6192_v22 = vpop.f32.mrb[16].mxu1 }
 0xaf2   :  { %v6193_v37 = vadd.f32 %v6192_v22, %v6096_v17  ;;  %v7790_v3 = vpop.f32.mrb[20].mxu0  ;;  %v6194_v48 = vpop.f32.mrb[17].mxu1  ;;  %7942 = vmatprep.subr.bf16.mxu0 %v6242_v26 }
 0xaf3   :  { %v7791_v62 = vpop.f32.mrb[21].mxu0  ;;  %v6195_v29 = vpop.f32.mrb[18].mxu1  ;;  %7943 = vmatpush3.bf16.msra.mxu0 %v6242_v26 }
 0xaf4   :  { %v7792_v56 = vadd.f32 %v7791_v62, %v7790_v3  ;;  %v6196_v24 = vadd.f32 %v6195_v29, %v6099_v6  ;;  %v7793_v16 = vpop.f32.mrb[22].mxu0  ;;  %v6197_v5 = vpop.f32.mrb[19].mxu1  ;;  %v6231_v32 = vmax.f32 %v6193_v37, 0.0 }
 0xaf5   :  { %v7794_v14 = vpop.f32.mrb[23].mxu0  ;;  %v10372_v5 = vld [vmem:[%s18539_s4 + $0x8] sm:$0xff]  }
 0xaf6   :  { %v6232_v18 = vmax.f32 %v6196_v24, 0.0  ;;  %v7795_v57 = vadd.f32 %v7794_v14, %v7793_v16  ;;  %v6104_v54 = vadd.f32 %v7792_v56, %v17526_v1  ;;  %v10375_v14 = vld [vmem:[%s18539_s4 + $0x20] sm:$0xff]  }
 0xaf8   :  { %v6243_v9 = vpack.c.bf16 %v6232_v18, %v6231_v32  ;;  %v6107_v23 = vadd.f32 %v7795_v57, %v17528_v53  ;;  %v10376_v32 = vld [vmem:[%s18539_s4 + $0x28] sm:$0xff]   ;;  %v10377_v18 = vld [vmem:[%s18539_s4 + $0x30] sm:$0xff]   ;;  %v10378_v57 = vld [vmem:[%s18539_s4 + $0x38] sm:$0xff]  }
 0xaf9   :  { %v6200_v44 = vpop.f32.mrb[20].mxu1 }
 0xafa   :  { %v6201_v25 = vadd.f32 %v6200_v44, %v6104_v54  ;;  %v7796_v7 = vpop.f32.mrb[24].mxu0  ;;  %v6202_v34 = vpop.f32.mrb[21].mxu1  ;;  %7944 = vmatprep.subr.bf16.mxu0 %v6243_v9 }
 0xafb   :  { %v7797_v60 = vpop.f32.mrb[25].mxu0  ;;  %v6203_v58 = vpop.f32.mrb[22].mxu1  ;;  %7945 = vmatpush3.bf16.msra.mxu0 %v6243_v9  ;;  %v10456_v9 = vld [vmem:[%s18538_s3 + $0x4] ss:$16 sps:$4 sm:$0xff]  }
 0xafc   :  { %v7798_v52 = vadd.f32 %v7797_v60, %v7796_v7  ;;  %v6204_v2 = vadd.f32 %v6203_v58, %v6107_v23  ;;  %v7799_v0 = vpop.f32.mrb[26].mxu0  ;;  %v6205_v30 = vpop.f32.mrb[23].mxu1  ;;  %v6233_v40 = vmax.f32 %v6201_v25, 0.0 }
 0xafd   :  { %v7800_v46 = vpop.f32.mrb[27].mxu0 }
 0xafe   :  { %v6234_v4 = vmax.f32 %v6204_v2, 0.0  ;;  %v7801_v11 = vadd.f32 %v7800_v46, %v7799_v0  ;;  %v6112_v1 = vadd.f32 %v7798_v52, %v17530_v13 }
 0xb00   :  { %v6244_v36 = vpack.c.bf16 %v6234_v4, %v6233_v40  ;;  %v6115_v53 = vadd.f32 %v7801_v11, %v17532_v55 }
 0xb01   :  { %v6208_v31 = vpop.f32.mrb[24].mxu1 }
 0xb02   :  { %v6209_v35 = vadd.f32 %v6208_v31, %v6112_v1  ;;  %v7802_v27 = vpop.f32.mrb[28].mxu0  ;;  %v6210_v15 = vpop.f32.mrb[25].mxu1  ;;  %7946 = vmatprep.subr.bf16.mxu0 %v6244_v36 }
 0xb03   :  { %v7803_v39 = vpop.f32.mrb[29].mxu0  ;;  %v6211_v47 = vpop.f32.mrb[26].mxu1  ;;  %7947 = vmatpush3.bf16.msra.mxu0 %v6244_v36 }
 0xb04   :  { %v7804_v21 = vadd.f32 %v7803_v39, %v7802_v27  ;;  %v6212_v41 = vadd.f32 %v6211_v47, %v6115_v53  ;;  %v7805_v63 = vpop.f32.mrb[30].mxu0  ;;  %v6213_v42 = vpop.f32.mrb[27].mxu1  ;;  %v6235_v61 = vmax.f32 %v6209_v35, 0.0 }
 0xb05   :  { %v7806_v38 = vpop.f32.mrb[31].mxu0 }
 0xb06   :  { %v6236_v26 = vmax.f32 %v6212_v41, 0.0  ;;  %v7807_v17 = vadd.f32 %v7806_v38, %v7805_v63  ;;  %v6120_v13 = vadd.f32 %v7804_v21, %v17534_v50  ;;  %v10373_v50 = vld [vmem:[%s18539_s4 + $0x10] sm:$0xff]   ;;  %v17677_v38 = vld [vmem:[%s18536_s6 + $0x8] sm:$0xff] }
 0xb08   :  { %v6245_v22 = vpack.c.bf16 %v6236_v26, %v6235_v61  ;;  %v6123_v55 = vadd.f32 %v7807_v17, %v17536_v20  ;;  %v10374_v20 = vld [vmem:[%s18539_s4 + $0x18] sm:$0xff]  }
 0xb09   :  { %v6216_v37 = vpop.f32.mrb[28].mxu1 }
 0xb0a   :  { %v6217_v3 = vadd.f32 %v6216_v37, %v6120_v13  ;;  %v6218_v48 = vpop.f32.mrb[29].mxu1  ;;  %7948 = vmatprep.subr.bf16.mxu0 %v6245_v22 }
 0xb0b   :  { %v6219_v6 = vpop.f32.mrb[30].mxu1  ;;  %7949 = vmatpush3.bf16.msra.mxu0 %v6245_v22 }
 0xb0c   :  { %v6220_v62 = vadd.f32 %v6219_v6, %v6123_v55  ;;  %v6221_v29 = vpop.f32.mrb[31].mxu1  ;;  %v6237_v56 = vmax.f32 %v6217_v3, 0.0  ;;  %v17730_v6 = vld [vmem:[%s18536_s6 + $0x10] sm:$0xff] }
 0xb0d   :  { %v17744_v29 = vld [vmem:[%s18536_s6 + $0x28] sm:$0xff] }
 0xb0e   :  { %v6238_v24 = vmax.f32 %v6220_v62, 0.0  ;;  %v17737_v62 = vld [vmem:[%s18536_s6 + $0x18] sm:$0xff] }
 0xb10   :  { %v6246_v16 = vpack.c.bf16 %v6238_v24, %v6237_v56  ;;  %v17753_v56 = vld [vmem:[%s18536_s6 + $0x20] sm:$0xff]  ;;  %v17760_v24 = vld [vmem:[%s18536_s6 + $0x30] sm:$0xff] }
 0xb12   :  { %7950 = vmatprep.subr.bf16.mxu0 %v6246_v16 }
 0xb13   :  { %7951 = vmatpush3.bf16.msra.mxu0 %v6246_v16  ;;  %v17768_v16 = vld [vmem:[%s18536_s6 + $0x40] sm:$0xff] }
 0xb16   :  { %7953 = vmatmul.mubr.bf16.vlgmr.msra.gmra.mrb[32].mxu0 %v10372_v5  ;;  %v17775_v5 = vld [vmem:[%s18536_s6 + $0x38] sm:$0xff] }
 0xb17   :  { %7956 = vmatprep.mubr.bf16.mxu0 %v10373_v50  ;;  %v17782_v50 = vld [vmem:[%s18536_s6 + $0x50] sm:$0xff] }
 0xb1e   :  { %7957 = vmatmul.mubr.bf16.gmra.mrb[36].mxu0 %v10374_v20  ;;  %v17789_v20 = vld [vmem:[%s18536_s6 + $0x48] sm:$0xff] }
 0xb1f   :  { %7960 = vmatprep.mubr.bf16.mxu0 %v10375_v14  ;;  %v17796_v14 = vld [vmem:[%s18536_s6 + $0x60] sm:$0xff] }
 0xb26   :  { %7961 = vmatmul.mubr.bf16.gmra.mrb[40].mxu0 %v10376_v32  ;;  %v17803_v32 = vld [vmem:[%s18536_s6 + $0x58] sm:$0xff] }
 0xb27   :  { %7964 = vmatprep.mubr.bf16.mxu0 %v10377_v18  ;;  %v17810_v18 = vld [vmem:[%s18536_s6 + $0x70] sm:$0xff] }
 0xb2e   :  { %7965 = vmatmul.mubr.bf16.gmra.mrb[44].mxu0 %v10378_v57  ;;  %v17817_v57 = vld [vmem:[%s18536_s6 + $0x68] sm:$0xff] }
 0xb2f   :  { %6967 = vmatprep.mubr.bf16.mxu0 %v10456_v9  ;;  %v17826_v9 = vld [vmem:[%s18536_s6 + $0x78] sm:$0xff] }
 0xb40   :  { %v10117_v54 = vpop.permute.xlu0 %10116 }
 0xb41   :  { %v10119_v44 = vunpack.i.h.bf16 %v10117_v54  ;;  %v10118_v25 = vunpack.i.l.bf16 %v10117_v54  ;;  %v17840_v54 = vld [vmem:[%s18540_s5] sm:$0xff]  }
 0xb42   :  { %19852 = vst [vmem:[#allocation26_spill] sm:$0xff] %v17840_v54  ;;  %7984 = vmatprep.mubr.bf16.mxu1 %v17840_v54 }
 0xb43   :  { %v10122_v7 = vpop.permute.xlu1 %10121  ;;  %v5507_v34 = vsel %vm697_vm10, %v10118_v25, %v10119_v44 }
 0xb44   :  { %v10124_v23 = vunpack.i.h.bf16 %v10122_v7  ;;  %v10123_v60 = vunpack.i.l.bf16 %v10122_v7  ;;  %v17656_v52 = vmax.f32 %v17544_v12, %v5507_v34 }
 0xb46   :  { %v5517_v58 = vsel %vm697_vm10, %v10123_v60, %v10124_v23  ;;  %19848 = vst [vmem:[#allocation20_spill] sm:$0xff] %v17656_v52 }
 0xb47   :  { %v17659_v2 = vmax.f32 %v17558_v10, %v5517_v58  ;;  %v10132_v0 = vpop.permute.xlu1 %10131 }
 0xb48   :  { %v10127_v30 = vpop.permute.xlu0 %10126  ;;  %v10134_v36 = vunpack.i.h.bf16 %v10132_v0  ;;  %v10133_v1 = vunpack.i.l.bf16 %v10132_v0 }
 0xb49   :  { %19849 = vst [vmem:[#allocation31_spill] sm:$0xff] %v17659_v2  ;;  %v10129_v46 = vunpack.i.h.bf16 %v10127_v30  ;;  %v10128_v40 = vunpack.i.l.bf16 %v10127_v30  ;;  %v10150_v4 = vpack.i.bf16 %v17659_v2, %v17656_v52 }
 0xb4a   :  { %v5505_v41 = vsel %vm697_vm10, %v10133_v1, %v10134_v36  ;;  %v5506_v63 = vsel %vm697_vm10, %v10134_v36, %v10118_v25 }
 0xb4b   :  { %v5518_v31 = vsel %vm697_vm10, %v10124_v23, %v10129_v46  ;;  %v5508_v12 = vsel %vm697_vm10, %v10119_v44, %v10128_v40  ;;  %10151 = vrot.lane.b32.xlu1 %v10150_v4, %s10535_s26  ;;  %10146 = vrot.lane.b32.xlu0 %v10150_v4, %s10520_s19  ;;  %v17701_v3 = vmax.f32 %v17571_v19, %v5505_v41 }
 0xb4c   :  { %v10142_v10 = vpop.permute.xlu1 %10141  ;;  %v5558_v35 = vmax.f32 %v17562_v43, %v5518_v31  ;;  %v5548_v27 = vmax.f32 %v17550_v8, %v5508_v12  ;;  %v10137_v39 = vpop.permute.xlu0 %10136 }
 0xb4d   :  { %v10144_v15 = vunpack.i.h.bf16 %v10142_v10  ;;  %v10143_v53 = vunpack.i.l.bf16 %v10142_v10  ;;  %v10139_v47 = vunpack.i.h.bf16 %v10137_v39  ;;  %v10138_v21 = vunpack.i.l.bf16 %v10137_v39  ;;  %19851 = vst [vmem:[#allocation4_spill] sm:$0xff] %v17701_v3 }
 0xb4e   :  { %v10160_v37 = vpack.i.bf16 %v5558_v35, %v5548_v27 }
 0xb4f   :  { %v5504_v42 = vsel %vm697_vm10, %v10143_v53, %v10133_v1  ;;  %6297 = vrot.lane.b32.xlu1 %v17677_v38, %s10514_s11  ;;  %v5516_v43 = vsel %vm697_vm10, %v10139_v47, %v10123_v60  ;;  %v5514_v61 = vsel %vm697_vm10, %v10144_v15, %v10138_v21  ;;  %v5515_v26 = vsel %vm697_vm10, %v10138_v21, %v10139_v47  ;;  %v17880_v47 = vld [vmem:[%s18536_s6] sm:$0xff]  ;;  %v17885_v21 = vld [vmem:[%s18536_s6 + $0x8] sm:$0xff] }
 0xb50   :  { %v17682_v8 = vmax.f32 %v17590_v45, %v5504_v42  ;;  %10156 = vrot.lane.b32.xlu0 %v10150_v4, %s10537_s27  ;;  %v17689_v17 = vmax.f32 %v17607_v59, %v5516_v43  ;;  %v17692_v22 = vmax.f32 %v17598_v51, %v5514_v61  ;;  %v17695_v13 = vmax.f32 %v17602_v28, %v5515_v26  ;;  %v17707_v59 = vld [vmem:[%s18536_s6] sm:$0xff]  ;;  %v17898_v42 = vld [vmem:[%s18536_s6 + $0x10] sm:$0xff]  ;;  %v17903_v43 = vld [vmem:[%s18536_s6 + $0x18] sm:$0xff] }
 0xb51   :  { %v17698_v45 = vmax.f32 %v17575_v33, %v5506_v63  ;;  %v17950_v28 = vld [vmem:[%s18536_s6 + $0x40] sm:$0xff] }
 0xb52   :  { %19850 = vst [vmem:[#allocation21_spill] sm:$0xff] %v17695_v13  ;;  %v10230_v33 = vpack.i.bf16 %v17692_v22, %v17682_v8  ;;  %v17719_v19 = vpack.i.bf16 %v17695_v13, %v17701_v3 }
 0xb53   :  { %10161 = vrot.lane.b32.xlu1 %v10160_v37, %s10538_s2  ;;  %v17713_v51 = vpack.i.bf16 %v17689_v17, %v17698_v45 }
 0xb54   :  { %6295 = vrot.lane.b32.xlu0 %v17707_v59, %s10514_s11 }
 0xb57   :  { %6299 = vrot.lane.b32.xlu1 %v17730_v6, %s10514_s11 }
 0xb58   :  { %6301 = vrot.lane.b32.xlu0 %v17737_v62, %s10514_s11 }
 0xb5b   :  { %6305 = vrot.lane.b32.xlu1 %v17744_v29, %s10514_s11 }
 0xb5c   :  { %10166 = vrot.lane.b32.xlu0 %v10160_v37, %s10520_s19 }
 0xb5f   :  { %10171 = vrot.lane.b32.xlu1 %v10160_v37, %s10535_s26 }
 0xb60   :  { %6303 = vrot.lane.b32.xlu0 %v17753_v56, %s10514_s11 }
 0xb63   :  { %6307 = vrot.lane.b32.xlu1 %v17760_v24, %s10514_s11 }
 0xb64   :  { %10176 = vrot.lane.b32.xlu0 %v10160_v37, %s10537_s27  ;;  %v17916_v37 = vld [vmem:[%s18536_s6 + $0x20] sm:$0xff] }
 0xb67   :  { %6311 = vrot.lane.b32.xlu1 %v17768_v16, %s10514_s11 }
 0xb68   :  { %6309 = vrot.lane.b32.xlu0 %v17775_v5, %s10514_s11 }
 0xb6b   :  { %6315 = vrot.lane.b32.xlu1 %v17782_v50, %s10514_s11 }
 0xb6c   :  { %6313 = vrot.lane.b32.xlu0 %v17789_v20, %s10514_s11 }
 0xb6f   :  { %6319 = vrot.lane.b32.xlu1 %v17796_v14, %s10514_s11 }
 0xb70   :  { %6317 = vrot.lane.b32.xlu0 %v17803_v32, %s10514_s11 }
 0xb73   :  { %6323 = vrot.lane.b32.xlu1 %v17810_v18, %s10514_s11 }
 0xb74   :  { %6321 = vrot.lane.b32.xlu0 %v17817_v57, %s10514_s11 }
 0xb77   :  { %10181 = vrot.lane.b32.xlu1 %v17719_v19, %s10537_s27 }
 0xb78   :  { %6325 = vrot.lane.b32.xlu0 %v17826_v9, %s10514_s11 }
 0xb7b   :  { %10191 = vrot.lane.b32.xlu1 %v10230_v33, %s10520_s19 }
 0xb7c   :  { %10186 = vrot.lane.b32.xlu0 %v17719_v19, %s10539_s25 }
 0xb7f   :  { %10196 = vrot.lane.b32.xlu1 %v10230_v33, %s10535_s26 }
 0xb80   :  { %10206 = vrot.lane.b32.xlu0 %v10230_v33, %s10537_s27 }
 0xb83   :  { %10201 = vrot.lane.b32.xlu1 %v17713_v51, %s10520_s19 }
 0xbbd   :  { %v10152_v44 = vpop.permute.xlu1 %10151  ;;  %v10147_v25 = vpop.permute.xlu0 %10146 }
 0xbbe   :  { %v10149_v7 = vunpack.i.h.bf16 %v10147_v25  ;;  %v10148_v34 = vunpack.i.l.bf16 %v10147_v25  ;;  %10211 = vrot.lane.b32.xlu0 %v10147_v25, %s10520_s19  ;;  %v17939_v25 = vld [vmem:[%s18536_s6 + $0x38] sm:$0xff] }
 0xbc0   :  { %v17843_v23 = vpack.c.bf16 %v10149_v7, %v10148_v34 }
 0xbc1   :  { %v17845_v60 = vpop.permute.xlu1 %6297 }
 0xbc2   :  { %v10157_v58 = vpop.permute.xlu0 %10156  ;;  %10216 = vrot.lane.b32.xlu0 %v10152_v44, %s10520_s19  ;;  %v17934_v44 = vld [vmem:[%s18536_s6 + $0x30] sm:$0xff] }
 0xbc3   :  { %10226 = vrot.lane.b32.xlu1 %v10157_v58, %s10520_s19 }
 0xbc5   :  { %v10162_v0 = vpop.permute.xlu1 %10161 }
 0xbc6   :  { %v6296_v30 = vpop.permute.xlu0 %6295  ;;  %10221 = vrot.lane.b32.xlu0 %v17713_v51, %s10535_s26 }
 0xbc7   :  { %10231 = vrot.lane.b32.xlu1 %v10230_v33, %s10539_s25 }
 0xbc9   :  { %v6300_v46 = vpop.permute.xlu1 %6299 }
 0xbca   :  { %v6302_v40 = vpop.permute.xlu0 %6301  ;;  %10241 = vrot.lane.b32.xlu0 %v10162_v0, %s10520_s19 }
 0xbcb   :  { %10236 = vrot.lane.b32.xlu1 %v17713_v51, %s10537_s27 }
 0xbcd   :  { %v17853_v4 = vpop.permute.xlu1 %6305 }
 0xbce   :  { %v10167_v36 = vpop.permute.xlu0 %10166  ;;  %10246 = vrot.lane.b32.xlu0 %v17713_v51, %s10539_s25  ;;  %v17921_v51 = vld [vmem:[%s18536_s6 + $0x28] sm:$0xff] }
 0xbcf   :  { %v10169_v1 = vunpack.i.h.bf16 %v10167_v36  ;;  %v10168_v31 = vunpack.i.l.bf16 %v10167_v36  ;;  %10251 = vrot.lane.b32.xlu1 %v17719_v19, %s10520_s19 }
 0xbd1   :  { %v17858_v12 = vpack.c.bf16 %v10169_v1, %v10168_v31  ;;  %v10172_v10 = vpop.permute.xlu1 %10171 }
 0xbd2   :  { %v17860_v35 = vpop.permute.xlu0 %6303  ;;  %10261 = vrot.lane.b32.xlu0 %v10167_v36, %s10520_s19 }
 0xbd3   :  { %19853 = vst [vmem:[#allocation22_spill] sm:$0xff] %v17858_v12  ;;  %10256 = vrot.lane.b32.xlu1 %v17719_v19, %s10535_s26  ;;  %v19854_v12 = vpack.c.bf16 %v17692_v22, %v17682_v8 }
 0xbd5   :  { %v17866_v27 = vpop.permute.xlu1 %6307 }
 0xbd6   :  { %v10177_v15 = vpop.permute.xlu0 %10176  ;;  %10266 = vrot.lane.b32.xlu0 %v10172_v10, %s10520_s19 }
 0xbd7   :  { %10271 = vrot.lane.b32.xlu1 %v10177_v15, %s10520_s19 }
 0xbd9   :  { %v17871_v53 = vpop.permute.xlu1 %6311 }
 0xbda   :  { %v17873_v39 = vpop.permute.xlu0 %6309  ;;  %6887 = vrot.lane.b32.xlu0 %v17880_v47, %s10512_s9 }
 0xbdb   :  { %6889 = vrot.lane.b32.xlu1 %v17885_v21, %s10512_s9 }
 0xbdd   :  { %v17887_v41 = vpop.permute.xlu1 %6315 }
 0xbde   :  { %v17889_v63 = vpop.permute.xlu0 %6313  ;;  %6891 = vrot.lane.b32.xlu0 %v17898_v42, %s10512_s9 }
 0xbdf   :  { %6893 = vrot.lane.b32.xlu1 %v17903_v43, %s10512_s9 }
 0xbe1   :  { %v17905_v61 = vpop.permute.xlu1 %6319 }
 0xbe2   :  { %v17907_v26 = vpop.permute.xlu0 %6317  ;;  %6895 = vrot.lane.b32.xlu0 %v17916_v37, %s10512_s9 }
 0xbe3   :  { %6897 = vrot.lane.b32.xlu1 %v17921_v51, %s10512_s9 }
 0xbe5   :  { %v17923_v33 = vpop.permute.xlu1 %6323 }
 0xbe6   :  { %v17925_v19 = vpop.permute.xlu0 %6321  ;;  %6899 = vrot.lane.b32.xlu0 %v17934_v44, %s10512_s9 }
 0xbe7   :  { %6901 = vrot.lane.b32.xlu1 %v17939_v25, %s10512_s9 }
 0xbe9   :  { %v10182_v7 = vpop.permute.xlu1 %10181  ;;  %v7954_v34 = vpop.f32.mrb[32].mxu0 }
 0xbea   :  { %v10184_v58 = vunpack.i.h.bf16 %v10182_v7  ;;  %v10183_v0 = vunpack.i.l.bf16 %v10182_v7  ;;  %v17941_v36 = vpop.permute.xlu0 %6325  ;;  %v6386_v1 = vadd.f32 %v7954_v34, %v6300_v46  ;;  %v6377_v31 = vpop.f32.mrb[33].mxu0  ;;  %6903 = vrot.lane.b32.xlu0 %v17950_v28, %s10512_s9 }
 0xbeb   :  { %v6378_v10 = vadd.f32 %v6377_v31, %v6296_v30  ;;  %v7955_v15 = vpop.f32.mrb[34].mxu0  ;;  %v17956_v30 = vld [vmem:[%s18536_s6 + $0x48] sm:$0xff] }
 0xbec   :  { %v6838_v11 = vpack.c.bf16 %v10184_v58, %v10183_v0  ;;  %v6389_v55 = vadd.f32 %v7955_v15, %v6302_v40  ;;  %v6380_v48 = vpop.f32.mrb[35].mxu0  ;;  %v6442_v34 = vmax.f32 %v6386_v1, 0.0  ;;  %6905 = vrot.lane.b32.xlu1 %v17956_v30, %s10512_s9 }
 0xbed   :  { %v6381_v7 = vadd.f32 %v6380_v48, %v17845_v60  ;;  %v10192_v46 = vpop.permute.xlu1 %10191  ;;  %v6440_v40 = vmax.f32 %v6378_v10, 0.0 }
 0xbee   :  { %v6443_v31 = vmax.f32 %v6389_v55, 0.0  ;;  %v10194_v54 = vunpack.i.h.bf16 %v10192_v46  ;;  %v10193_v52 = vunpack.i.l.bf16 %v10192_v46  ;;  %v10187_v58 = vpop.permute.xlu0 %10186  ;;  %7840 = vmatprep.subr.bf16.mxu0 %v6838_v11 }
 0xbef   :  { %v6441_v0 = vmax.f32 %v6381_v7, 0.0  ;;  %v10189_v15 = vunpack.i.h.bf16 %v10187_v58  ;;  %v10188_v2 = vunpack.i.l.bf16 %v10187_v58  ;;  %7841 = vmatpush3.bf16.msra.mxu0 %v19854_v12 }
 0xbf0   :  { %v6457_v48 = vpack.c.bf16 %v6443_v31, %v6442_v34  ;;  %v6831_v60 = vpack.c.bf16 %v10194_v54, %v10193_v52  ;;  %v17970_v52 = vld [vmem:[%s18536_s6 + $0x50] sm:$0xff]  ;;  %v19855_v31 = vpack.c.bf16 %v17689_v17, %v17698_v45 }
 0xbf1   :  { %v6456_v55 = vpack.c.bf16 %v6441_v0, %v6440_v40  ;;  %v6839_v1 = vpack.c.bf16 %v10189_v15, %v10188_v2  ;;  %v10197_v46 = vpop.permute.xlu1 %10196  ;;  %v7958_v11 = vpop.f32.mrb[36].mxu0  ;;  %v17975_v2 = vld [vmem:[%s18536_s6 + $0x58] sm:$0xff]  ;;  %6907 = vrot.lane.b32.xlu0 %v17970_v52, %s10512_s9 }
 0xbf2   :  { %v10199_v10 = vunpack.i.h.bf16 %v10197_v46  ;;  %v10198_v7 = vunpack.i.l.bf16 %v10197_v46  ;;  %v10207_v3 = vpop.permute.xlu0 %10206  ;;  %v6402_v58 = vadd.f32 %v7958_v11, %v17866_v27  ;;  %v6393_v13 = vpop.f32.mrb[37].mxu0  ;;  %6909 = vrot.lane.b32.xlu1 %v17975_v2, %s10512_s9 }
 0xbf3   :  { %v6394_v8 = vadd.f32 %v6393_v13, %v17860_v35  ;;  %7842 = vmatprep.subr.bf16.mxu0 %v6839_v1  ;;  %v7959_v22 = vpop.f32.mrb[38].mxu0  ;;  %7968 = vmatprep.subr.bf16.mxu1 %v6456_v55  ;;  %v10209_v13 = vunpack.i.h.bf16 %v10207_v3  ;;  %v10208_v0 = vunpack.i.l.bf16 %v10207_v3  ;;  %v17994_v3 = vld [vmem:[%s18536_s6 + $0x68] sm:$0xff] }
 0xbf4   :  { %v6832_v54 = vpack.c.bf16 %v10199_v10, %v10198_v7  ;;  %v6446_v12 = vmax.f32 %v6402_v58, 0.0  ;;  %v6405_v27 = vadd.f32 %v7959_v22, %v17873_v39  ;;  %7843 = vmatpush3.bf16.msra.mxu0 %v6831_v60  ;;  %v6396_v34 = vpop.f32.mrb[39].mxu0  ;;  %7969 = vmatpush3.bf16.msra.mxu1 %v6456_v55 }
 0xbf5   :  { %v6397_v35 = vadd.f32 %v6396_v34, %v17853_v4  ;;  %7844 = vmatprep.subr.bf16.mxu0 %v19855_v31  ;;  %v10202_v40 = vpop.permute.xlu1 %10201  ;;  %7970 = vmatprep.subr.bf16.mxu1 %v6457_v48  ;;  %v6444_v39 = vmax.f32 %v6394_v8, 0.0  ;;  %v17989_v4 = vld [vmem:[%s18536_s6 + $0x60] sm:$0xff]  ;;  %v6833_v10 = vpack.c.bf16 %v10209_v13, %v10208_v0 }
 0xbf6   :  { %v6447_v15 = vmax.f32 %v6405_v27, 0.0  ;;  %v10204_v1 = vunpack.i.h.bf16 %v10202_v40  ;;  %v10203_v46 = vunpack.i.l.bf16 %v10202_v40  ;;  %6911 = vrot.lane.b32.xlu0 %v17989_v4, %s10512_s9  ;;  %6913 = vrot.lane.b32.xlu1 %v17994_v3, %s10512_s9 }
 0xbf7   :  { %v6445_v60 = vmax.f32 %v6397_v35, 0.0 }
 0xbf8   :  { %v6459_v17 = vpack.c.bf16 %v6447_v15, %v6446_v12  ;;  %v6841_v45 = vpack.c.bf16 %v10204_v1, %v10203_v46  ;;  %7845 = vmatpush3.bf16.msra.mxu0 %v6832_v54  ;;  %7971 = vmatpush3.bf16.msra.mxu1 %v6457_v48  ;;  %v18005_v48 = vld [vmem:[%s18536_s6 + $0x70] sm:$0xff] }
 0xbf9   :  { %v6458_v55 = vpack.c.bf16 %v6445_v60, %v6444_v39  ;;  %v7962_v11 = vpop.f32.mrb[40].mxu0 }
 0xbfa   :  { %v6418_v7 = vadd.f32 %v7962_v11, %v17887_v41  ;;  %v6409_v58 = vpop.f32.mrb[41].mxu0  ;;  %7846 = vmatprep.subr.bf16.mxu0 %v6841_v45  ;;  %6915 = vrot.lane.b32.xlu0 %v18005_v48, %s10512_s9 }
 0xbfb   :  { %v6410_v8 = vadd.f32 %v6409_v58, %v17871_v53  ;;  %v7963_v22 = vpop.f32.mrb[42].mxu0  ;;  %7972 = vmatprep.subr.bf16.mxu1 %v6458_v55  ;;  %v18011_v53 = vld [vmem:[%s18536_s6 + $0x78] sm:$0xff]  ;;  %v18089_v58 = vld [vmem:[%s18540_s5 + $0x30] sm:$0xff]  }
 0xbfc   :  { %v6450_v54 = vmax.f32 %v6418_v7, 0.0  ;;  %v6421_v41 = vadd.f32 %v7963_v22, %v17907_v26  ;;  %7847 = vmatpush3.bf16.msra.mxu0 %v6833_v10  ;;  %v6412_v12 = vpop.f32.mrb[43].mxu0  ;;  %7973 = vmatpush3.bf16.msra.mxu1 %v6458_v55  ;;  %v18062_v10 = vld [vmem:[%s18540_s5 + $0x18] sm:$0xff]   ;;  %v18069_v7 = vld [vmem:[%s18540_s5 + $0x20] sm:$0xff]  }
 0xbfd   :  { %v6448_v27 = vmax.f32 %v6410_v8, 0.0  ;;  %v6413_v34 = vadd.f32 %v6412_v12, %v17889_v63  ;;  %7974 = vmatprep.subr.bf16.mxu1 %v6459_v17  ;;  %6917 = vrot.lane.b32.xlu1 %v18011_v53, %s10512_s9  ;;  %v18102_v8 = vld [vmem:[%s18540_s5 + $0x38] sm:$0xff]  }
 0xbfe   :  { %v6451_v13 = vmax.f32 %v6421_v41, 0.0  ;;  %7153 = vrot.lane.b32.xlu0 %v17880_v47, %s10514_s11 }
 0xbff   :  { %v6449_v35 = vmax.f32 %v6413_v34, 0.0 }
 0xc00   :  { %v6461_v26 = vpack.c.bf16 %v6451_v13, %v6450_v54  ;;  %7975 = vmatpush3.bf16.msra.mxu1 %v6459_v17 }
 0xc01   :  { %v6460_v31 = vpack.c.bf16 %v6449_v35, %v6448_v27  ;;  %v7966_v40 = vpop.f32.mrb[44].mxu0  ;;  %7155 = vrot.lane.b32.xlu1 %v17885_v21, %s10514_s11 }
 0xc02   :  { %v6434_v0 = vadd.f32 %v7966_v40, %v17923_v33  ;;  %v6425_v15 = vpop.f32.mrb[45].mxu0  ;;  %7157 = vrot.lane.b32.xlu0 %v17898_v42, %s10514_s11 }
 0xc03   :  { %v6426_v63 = vadd.f32 %v6425_v15, %v17905_v61  ;;  %v7967_v1 = vpop.f32.mrb[46].mxu0  ;;  %7976 = vmatprep.subr.bf16.mxu1 %v6460_v31 }
 0xc04   :  { %v6454_v46 = vmax.f32 %v6434_v0, 0.0  ;;  %v6437_v39 = vadd.f32 %v7967_v1, %v17941_v36  ;;  %v6428_v60 = vpop.f32.mrb[47].mxu0  ;;  %7977 = vmatpush3.bf16.msra.mxu1 %v6460_v31  ;;  %v18046_v36 = vld [vmem:[%s18540_s5 + $0x10] sm:$0xff]  }
 0xc05   :  { %v6452_v17 = vmax.f32 %v6426_v63, 0.0  ;;  %v6429_v45 = vadd.f32 %v6428_v60, %v17925_v19  ;;  %7978 = vmatprep.subr.bf16.mxu1 %v6461_v26  ;;  %7159 = vrot.lane.b32.xlu1 %v17903_v43, %s10514_s11  ;;  %v18039_v19 = vld [vmem:[%s18540_s5 + $0x8] sm:$0xff]  }
 0xc06   :  { %v6455_v33 = vmax.f32 %v6437_v39, 0.0  ;;  %7161 = vrot.lane.b32.xlu0 %v17916_v37, %s10514_s11 }
 0xc07   :  { %v6453_v55 = vmax.f32 %v6429_v45, 0.0  ;;  %v19856_v45 = vld [vmem:[#allocation21_spill] sm:$0xff] }
 0xc08   :  { %v6463_v61 = vpack.c.bf16 %v6455_v33, %v6454_v46  ;;  %7979 = vmatpush3.bf16.msra.mxu1 %v6461_v26  ;;  %v19857_v33 = vld [vmem:[#allocation4_spill] sm:$0xff] }
 0xc09   :  { %v6462_v11 = vpack.c.bf16 %v6453_v55, %v6452_v17  ;;  %7163 = vrot.lane.b32.xlu1 %v17921_v51, %s10514_s11  ;;  %v19858_v55 = vpack.c.bf16 %v19856_v45, %v19857_v33 }
 0xc0a   :  { %7165 = vrot.lane.b32.xlu0 %v17934_v44, %s10514_s11 }
 0xc0b   :  { %7980 = vmatprep.subr.bf16.mxu1 %v6462_v11 }
 0xc0c   :  { %7981 = vmatpush3.bf16.msra.mxu1 %v6462_v11 }
 0xc0d   :  { %7982 = vmatprep.subr.bf16.mxu1 %v6463_v61  ;;  %7167 = vrot.lane.b32.xlu1 %v17939_v25, %s10514_s11 }
 0xc0e   :  { %7169 = vrot.lane.b32.xlu0 %v17950_v28, %s10514_s11 }
 0xc10   :  { %7983 = vmatpush3.bf16.msra.mxu1 %v6463_v61 }
 0xc11   :  { %7032 = vmatprep.subr.bf16.mxu1 %v19842_v49  ;;  %7171 = vrot.lane.b32.xlu1 %v17956_v30, %s10514_s11 }
 0xc12   :  { %7173 = vrot.lane.b32.xlu0 %v17970_v52, %s10514_s11 }
 0xc13   :  { %7985 = vmatmul.mubr.bf16.vlgmr.msra.gmra.mrb[32].mxu1 %v18039_v19 }
 0xc14   :  { %7033 = vmatpush1.bf16.msra.mxu1 %v17843_v23  ;;  %7988 = vmatprep.mubr.bf16.mxu1 %v18046_v36  ;;  %v18082_v23 = vld [vmem:[%s18540_s5 + $0x28] sm:$0xff]  }
 0xc15   :  { %7034 = vmatprep.subr.bf16.mxu1 %v19842_v49  ;;  %7175 = vrot.lane.b32.xlu1 %v17975_v2, %s10514_s11 }
 0xc16   :  { %7177 = vrot.lane.b32.xlu0 %v17989_v4, %s10514_s11 }
 0xc19   :  { %7179 = vrot.lane.b32.xlu1 %v17994_v3, %s10514_s11 }
 0xc1a   :  { %7181 = vrot.lane.b32.xlu0 %v18005_v48, %s10514_s11 }
 0xc1b   :  { %7989 = vmatmul.mubr.bf16.gmra.mrb[36].mxu1 %v18062_v10 }
 0xc1c   :  { %7992 = vmatprep.mubr.bf16.mxu1 %v18069_v7 }
 0xc1d   :  { %7183 = vrot.lane.b32.xlu1 %v18011_v53, %s10514_s11 }
 0xc1e   :  { %6512 = vrot.lane.b32.xlu0 %v17707_v59, %s10520_s19 }
 0xc21   :  { %6514 = vrot.lane.b32.xlu1 %v17677_v38, %s10520_s19  ;;  %v10473_v38 = vld [vmem:[%s18538_s3 + $0xc] ss:$16 sps:$4 sm:$0xff]  }
 0xc22   :  { %6516 = vrot.lane.b32.xlu0 %v17730_v6, %s10520_s19 }
 0xc23   :  { %7993 = vmatmul.mubr.bf16.gmra.mrb[40].mxu1 %v18082_v23 }
 0xc24   :  { %7996 = vmatprep.mubr.bf16.mxu1 %v18089_v58 }
 0xc25   :  { %6518 = vrot.lane.b32.xlu1 %v17737_v62, %s10520_s19 }
 0xc26   :  { %6520 = vrot.lane.b32.xlu0 %v17753_v56, %s10520_s19 }
 0xc29   :  { %6522 = vrot.lane.b32.xlu1 %v17744_v29, %s10520_s19 }
 0xc2a   :  { %6524 = vrot.lane.b32.xlu0 %v17760_v24, %s10520_s19 }
 0xc2b   :  { %7997 = vmatmul.mubr.bf16.gmra.mrb[44].mxu1 %v18102_v8 }
 0xc2c   :  { %7720 = vmatprep.mubr.msk.bf16.mxu1 %vm6004_vm2, %v10473_v38 }
 0xc2d   :  { %6526 = vrot.lane.b32.xlu1 %v17775_v5, %s10520_s19 }
 0xc2e   :  { %6528 = vrot.lane.b32.xlu0 %v17768_v16, %s10520_s19 }
 0xc30   :  { %v10212_v59 = vpop.permute.xlu0 %10211 }
 0xc31   :  { %6530 = vrot.lane.b32.xlu1 %v17789_v20, %s10520_s19  ;;  %v10214_v6 = vunpack.i.h.bf16 %v10212_v59  ;;  %v10213_v62 = vunpack.i.l.bf16 %v10212_v59 }
 0xc32   :  { %6532 = vrot.lane.b32.xlu0 %v17782_v50, %s10520_s19 }
 0xc33   :  { %v6847_v29 = vpack.c.bf16 %v10214_v6, %v10213_v62 }
 0xc34   :  { %v10217_v56 = vpop.permute.xlu0 %10216 }
 0xc35   :  { %6534 = vrot.lane.b32.xlu1 %v17803_v32, %s10520_s19  ;;  %v10227_v24 = vpop.permute.xlu1 %10226  ;;  %v10219_v22 = vunpack.i.h.bf16 %v10217_v56  ;;  %v10218_v5 = vunpack.i.l.bf16 %v10217_v56  ;;  %7035 = vmatpush1.bf16.msra.mxu1 %v6847_v29  ;;  %v19859_v29 = vld [vmem:[#allocation22_spill] sm:$0xff] }
 0xc36   :  { %6536 = vrot.lane.b32.xlu0 %v17796_v14, %s10520_s19  ;;  %7036 = vmatprep.subr.bf16.mxu1 %v19842_v49  ;;  %v10229_v20 = vunpack.i.h.bf16 %v10227_v24  ;;  %v10228_v50 = vunpack.i.l.bf16 %v10227_v24 }
 0xc37   :  { %v6848_v16 = vpack.c.bf16 %v10219_v22, %v10218_v5  ;;  %v19860_v22 = vld [vmem:[#allocation31_spill] sm:$0xff]  ;;  %v19861_v5 = vld [vmem:[#allocation20_spill] sm:$0xff] }
 0xc38   :  { %v10222_v54 = vpop.permute.xlu0 %10221  ;;  %v6849_v14 = vpack.c.bf16 %v10229_v20, %v10228_v50 }
 0xc39   :  { %6538 = vrot.lane.b32.xlu1 %v17817_v57, %s10520_s19  ;;  %v10232_v41 = vpop.permute.xlu1 %10231  ;;  %v10224_v32 = vunpack.i.h.bf16 %v10222_v54  ;;  %v10223_v12 = vunpack.i.l.bf16 %v10222_v54  ;;  %7037 = vmatpush1.bf16.msra.mxu1 %v6848_v16 }
 0xc3a   :  { %v10234_v27 = vunpack.i.h.bf16 %v10232_v41  ;;  %v10233_v34 = vunpack.i.l.bf16 %v10232_v41  ;;  %6540 = vrot.lane.b32.xlu0 %v17810_v18, %s10520_s19  ;;  %7038 = vmatprep.subr.bf16.mxu1 %v19842_v49 }
 0xc3b   :  { %v6842_v57 = vpack.c.bf16 %v10224_v32, %v10223_v12 }
 0xc3c   :  { %v6834_v13 = vpack.c.bf16 %v10234_v27, %v10233_v34  ;;  %v10242_v35 = vpop.permute.xlu0 %10241  ;;  %v10487_v27 = vld [vmem:[%s18538_s3 + $0x84] ss:$16 sps:$4 sm:$0xff]   ;;  %v10488_v34 = vld [vmem:[%s18538_s3 + $0x68] ss:$16 sps:$4 sm:$0xff]  }
 0xc3d   :  { %6542 = vrot.lane.b32.xlu1 %v17826_v9, %s10520_s19  ;;  %v10237_v26 = vpop.permute.xlu1 %10236  ;;  %v10244_v31 = vunpack.i.h.bf16 %v10242_v35  ;;  %v10243_v40 = vunpack.i.l.bf16 %v10242_v35  ;;  %7848 = vmatprep.subr.bf16.mxu0 %v6842_v57  ;;  %v10490_v57 = vld [vmem:[%s18538_s3 + $0x8c] ss:$16 sps:$4 sm:$0xff]  }
 0xc3e   :  { %v10239_v0 = vunpack.i.h.bf16 %v10237_v26  ;;  %v10238_v15 = vunpack.i.l.bf16 %v10237_v26  ;;  %7039 = vmatpush1.bf16.msra.mxu1 %v6849_v14  ;;  %7849 = vmatpush3.bf16.msra.mxu0 %v6834_v13  ;;  %v10489_v14 = vld [vmem:[%s18538_s3 + $0x80] ss:$16 sps:$4 sm:$0xff]   ;;  %v10491_v13 = vld [vmem:[%s18538_s3 + $0xa4] ss:$16 sps:$4 sm:$0xff]  }
 0xc3f   :  { %7040 = vmatprep.subr.bf16.mxu1 %v19842_v49  ;;  %v6850_v18 = vpack.c.bf16 %v10244_v31, %v10243_v40  ;;  %7322 = vrot.lane.b32.xlu0 %v17880_v47, %s10520_s19  ;;  %v10492_v31 = vld [vmem:[%s18538_s3 + $0x88] ss:$16 sps:$4 sm:$0xff]   ;;  %v10493_v40 = vld [vmem:[%s18538_s3 + $0xa0] ss:$16 sps:$4 sm:$0xff]  }
 0xc40   :  { %v6843_v63 = vpack.c.bf16 %v10239_v0, %v10238_v15  ;;  %v10247_v9 = vpop.permute.xlu0 %10246  ;;  %v10494_v0 = vld [vmem:[%s18538_s3 + $0xac] ss:$16 sps:$4 sm:$0xff]  }
 0xc41   :  { %7324 = vrot.lane.b32.xlu1 %v17885_v21, %s10520_s19  ;;  %v10252_v1 = vpop.permute.xlu1 %10251  ;;  %v10249_v46 = vunpack.i.h.bf16 %v10247_v9  ;;  %v10248_v39 = vunpack.i.l.bf16 %v10247_v9 }
 0xc42   :  { %v10254_v60 = vunpack.i.h.bf16 %v10252_v1  ;;  %v10253_v17 = vunpack.i.l.bf16 %v10252_v1  ;;  %7850 = vmatprep.subr.bf16.mxu0 %v6843_v63  ;;  %7041 = vmatpush1.bf16.msra.mxu1 %v6850_v18  ;;  %v10495_v18 = vld [vmem:[%s18538_s3 + $0xc4] ss:$16 sps:$4 sm:$0xff]   ;;  %v10496_v1 = vld [vmem:[%s18538_s3 + $0xa8] ss:$16 sps:$4 sm:$0xff]  }
 0xc43   :  { %7851 = vmatpush3.bf16.msra.mxu0 %v19858_v55  ;;  %7042 = vmatprep.subr.bf16.mxu1 %v19842_v49  ;;  %v6844_v61 = vpack.c.bf16 %v10249_v46, %v10248_v39  ;;  %v10497_v46 = vld [vmem:[%s18538_s3 + $0xc0] ss:$16 sps:$4 sm:$0xff]   ;;  %v10498_v39 = vld [vmem:[%s18538_s3 + $0xcc] ss:$16 sps:$4 sm:$0xff]   ;;  %v10500_v55 = vld [vmem:[%s18538_s3 + $0xc8] ss:$16 sps:$4 sm:$0xff]  }
 0xc44   :  { %v6836_v11 = vpack.c.bf16 %v10254_v60, %v10253_v17  ;;  %7326 = vrot.lane.b32.xlu0 %v17898_v42, %s10520_s19  ;;  %v10262_v47 = vpop.permute.xlu0 %10261  ;;  %v19862_v42 = vpack.c.bf16 %v19860_v22, %v19861_v5  ;;  %v10499_v17 = vld [vmem:[%s18538_s3 + $0xe4] ss:$16 sps:$4 sm:$0xff]  }
 0xc45   :  { %7328 = vrot.lane.b32.xlu1 %v17903_v43, %s10520_s19  ;;  %v10257_v21 = vpop.permute.xlu1 %10256  ;;  %v10264_v38 = vunpack.i.h.bf16 %v10262_v47  ;;  %v10263_v59 = vunpack.i.l.bf16 %v10262_v47  ;;  %7852 = vmatprep.subr.bf16.mxu0 %v6844_v61  ;;  %v10501_v61 = vld [vmem:[%s18538_s3 + $0xe0] ss:$16 sps:$4 sm:$0xff]  }
 0xc46   :  { %v10259_v6 = vunpack.i.h.bf16 %v10257_v21  ;;  %v10258_v62 = vunpack.i.l.bf16 %v10257_v21  ;;  %7043 = vmatpush1.bf16.msra.mxu1 %v19859_v29  ;;  %v10503_v47 = vld [vmem:[%s18539_s4] sm:$0xff]  }
 0xc47   :  { %7853 = vmatpush3.bf16.msra.mxu0 %v6836_v11  ;;  %7044 = vmatprep.subr.bf16.mxu1 %v19842_v49  ;;  %v6852_v56 = vpack.c.bf16 %v10264_v38, %v10263_v59  ;;  %v10502_v11 = vld [vmem:[%s18538_s3 + $0xec] ss:$16 sps:$4 sm:$0xff]   ;;  %v10504_v59 = vld [vmem:[%s18538_s3 + $0xe8] ss:$16 sps:$4 sm:$0xff]  }
 0xc48   :  { %v6837_v24 = vpack.c.bf16 %v10259_v6, %v10258_v62  ;;  %7854 = vmatprep.subr.bf16.mxu0 %v19862_v42  ;;  %7330 = vrot.lane.b32.xlu0 %v17916_v37, %s10520_s19  ;;  %v10267_v43 = vpop.permute.xlu0 %10266  ;;  %v10474_v37 = vld [vmem:[%s18538_s3] ss:$16 sps:$4 sm:$0xff]  }
 0xc49   :  { %v10272_v16 = vpop.permute.xlu1 %10271  ;;  %7332 = vrot.lane.b32.xlu1 %v17921_v51, %s10520_s19  ;;  %v10269_v20 = vunpack.i.h.bf16 %v10267_v43  ;;  %v10268_v50 = vunpack.i.l.bf16 %v10267_v43  ;;  %v10475_v51 = vld [vmem:[%s18538_s3 + $0x24] ss:$16 sps:$4 sm:$0xff]  }
 0xc4a   :  { %7045 = vmatpush1.bf16.msra.mxu1 %v6852_v56  ;;  %v10274_v41 = vunpack.i.h.bf16 %v10272_v16  ;;  %v10273_v32 = vunpack.i.l.bf16 %v10272_v16  ;;  %v19863_v62 = vld [vmem:[#allocation26_spill] sm:$0xff] }
 0xc4b   :  { %7855 = vmatpush3.bf16.msra.mxu0 %v6837_v24  ;;  %7046 = vmatprep.subr.bf16.mxu1 %v19842_v49  ;;  %v6853_v54 = vpack.c.bf16 %v10269_v20, %v10268_v50 }
 0xc4c   :  { %7334 = vrot.lane.b32.xlu0 %v17934_v44, %s10520_s19  ;;  %v6854_v12 = vpack.c.bf16 %v10274_v41, %v10273_v32  ;;  %v10477_v44 = vld [vmem:[%s18538_s3 + $0x20] ss:$16 sps:$4 sm:$0xff]   ;;  %v18239_v35 = vpop.permute.xlu0 %6887 }
 0xc4d   :  { %7336 = vrot.lane.b32.xlu1 %v17939_v25, %s10520_s19  ;;  %v10479_v25 = vld [vmem:[%s18538_s3 + $0x44] ss:$16 sps:$4 sm:$0xff]   ;;  %v18241_v26 = vpop.permute.xlu1 %6889 }
 0xc4e   :  { %6968 = vmatmul.mubr.bf16.vlgmr.msra.gmra.mrb[48].mxu0 %v10474_v37  ;;  %7047 = vmatpush1.bf16.msra.mxu1 %v6853_v54 }
 0xc4f   :  { %7048 = vmatprep.subr.bf16.mxu1 %v19842_v49  ;;  %6975 = vmatprep.mubr.bf16.mxu0 %v10475_v51  ;;  %v10476_v49 = vld [vmem:[%s18538_s3 + $0x8] ss:$16 sps:$4 sm:$0xff]  }
 0xc50   :  { %7338 = vrot.lane.b32.xlu0 %v17950_v28, %s10520_s19  ;;  %v10478_v28 = vld [vmem:[%s18538_s3 + $0x2c] ss:$16 sps:$4 sm:$0xff]   ;;  %v18253_v15 = vpop.permute.xlu0 %6891 }
 0xc51   :  { %7340 = vrot.lane.b32.xlu1 %v17956_v30, %s10520_s19  ;;  %v10480_v30 = vld [vmem:[%s18538_s3 + $0x28] ss:$16 sps:$4 sm:$0xff]   ;;  %v18258_v63 = vpop.permute.xlu1 %6893 }
 0xc52   :  { %7049 = vmatpush1.bf16.msra.mxu1 %v6854_v12 }
 0xc54   :  { %7342 = vrot.lane.b32.xlu0 %v17970_v52, %s10520_s19  ;;  %v10481_v52 = vld [vmem:[%s18538_s3 + $0x40] ss:$16 sps:$4 sm:$0xff]   ;;  %v18260_v9 = vpop.permute.xlu0 %6895 }
 0xc55   :  { %7065 = vmatmul.mubr.bf16.vlgmr.msra.gmra.mrb[48].mxu1 %v10476_v49  ;;  %7344 = vrot.lane.b32.xlu1 %v17975_v2, %s10520_s19  ;;  %v10482_v2 = vld [vmem:[%s18538_s3 + $0x4c] ss:$16 sps:$4 sm:$0xff]   ;;  %v18272_v60 = vpop.permute.xlu1 %6897 }
 0xc56   :  { %6976 = vmatmul.mubr.bf16.gmra.mrb[52].mxu0 %v10477_v44  ;;  %7721 = vmatprep.mubr.msk.bf16.mxu1 %vm6004_vm2, %v10478_v28 }
 0xc57   :  { %6983 = vmatprep.mubr.bf16.mxu0 %v10479_v25 }
 0xc58   :  { %7346 = vrot.lane.b32.xlu0 %v17989_v4, %s10520_s19  ;;  %v10483_v4 = vld [vmem:[%s18538_s3 + $0x64] ss:$16 sps:$4 sm:$0xff]   ;;  %v18277_v45 = vpop.permute.xlu0 %6899 }
 0xc59   :  { %7348 = vrot.lane.b32.xlu1 %v17994_v3, %s10520_s19  ;;  %v10484_v3 = vld [vmem:[%s18538_s3 + $0x48] ss:$16 sps:$4 sm:$0xff]   ;;  %v18279_v33 = vpop.permute.xlu1 %6901 }
 0xc5c   :  { %7350 = vrot.lane.b32.xlu0 %v18005_v48, %s10520_s19  ;;  %v10485_v48 = vld [vmem:[%s18538_s3 + $0x60] ss:$16 sps:$4 sm:$0xff]   ;;  %v18294_v21 = vpop.permute.xlu0 %6903 }
 0xc5d   :  { %7073 = vmatmul.mubr.bf16.gmra.mrb[52].mxu1 %v10480_v30  ;;  %7352 = vrot.lane.b32.xlu1 %v18011_v53, %s10520_s19  ;;  %v10486_v53 = vld [vmem:[%s18538_s3 + $0x6c] ss:$16 sps:$4 sm:$0xff]  }
 0xc5e   :  { %6984 = vmatmul.mubr.bf16.gmra.mrb[56].mxu0 %v10481_v52  ;;  %7722 = vmatprep.mubr.msk.bf16.mxu1 %vm6004_vm2, %v10482_v2  ;;  %v18296_v38 = vpop.permute.xlu1 %6905 }
 0xc5f   :  { %6991 = vmatprep.mubr.bf16.mxu0 %v10483_v4 }
 0xc63   :  { %v18301_v6 = vpop.permute.xlu0 %6907 }
 0xc64   :  { %v18304_v29 = vpop.permute.xlu1 %6909 }
 0xc65   :  { %7081 = vmatmul.mubr.bf16.gmra.mrb[56].mxu1 %v10484_v3 }
 0xc66   :  { %6992 = vmatmul.mubr.bf16.gmra.mrb[60].mxu0 %v10485_v48  ;;  %7723 = vmatprep.mubr.msk.bf16.mxu1 %vm6004_vm2, %v10486_v53 }
 0xc67   :  { %6999 = vmatprep.mubr.bf16.mxu0 %v10487_v27 }
 0xc68   :  { %v18306_v56 = vpop.permute.xlu0 %6911  ;;  %v18308_v24 = vpop.permute.xlu1 %6913 }
 0xc6c   :  { %v18310_v22 = vpop.permute.xlu0 %6915 }
 0xc6d   :  { %7089 = vmatmul.mubr.bf16.gmra.mrb[60].mxu1 %v10488_v34 }
 0xc6e   :  { %7000 = vmatmul.mubr.bf16.gmra.mrb[64].mxu0 %v10489_v14  ;;  %7724 = vmatprep.mubr.msk.bf16.mxu1 %vm6004_vm2, %v10490_v57 }
 0xc6f   :  { %7007 = vmatprep.mubr.bf16.mxu0 %v10491_v13  ;;  %v18312_v5 = vpop.permute.xlu1 %6917 }
 0xc70   :  { %v18314_v42 = vpop.permute.xlu0 %7153 }
 0xc73   :  { %v18316_v43 = vpop.permute.xlu1 %7155 }
 0xc74   :  { %v18318_v16 = vpop.permute.xlu0 %7157 }
 0xc75   :  { %7097 = vmatmul.mubr.bf16.gmra.mrb[64].mxu1 %v10492_v31 }
 0xc76   :  { %7008 = vmatmul.mubr.bf16.gmra.mrb[68].mxu0 %v10493_v40  ;;  %7725 = vmatprep.mubr.msk.bf16.mxu1 %vm6004_vm2, %v10494_v0 }
 0xc77   :  { %7015 = vmatprep.mubr.bf16.mxu0 %v10495_v18  ;;  %v18320_v20 = vpop.permute.xlu1 %7159 }
 0xc78   :  { %v18322_v50 = vpop.permute.xlu0 %7161 }
 0xc7b   :  { %v18324_v54 = vpop.permute.xlu1 %7163 }
 0xc7c   :  { %v18326_v41 = vpop.permute.xlu0 %7165 }
 0xc7d   :  { %7105 = vmatmul.mubr.bf16.gmra.mrb[68].mxu1 %v10496_v1 }
 0xc7e   :  { %7016 = vmatmul.mubr.bf16.gmra.mrb[72].mxu0 %v10497_v46  ;;  %7726 = vmatprep.mubr.msk.bf16.mxu1 %vm6004_vm2, %v10498_v39 }
 0xc7f   :  { %7023 = vmatprep.mubr.bf16.mxu0 %v10499_v17  ;;  %v18328_v32 = vpop.permute.xlu1 %7167 }
 0xc80   :  { %v18330_v37 = vpop.permute.xlu0 %7169 }
 0xc83   :  { %v18332_v51 = vpop.permute.xlu1 %7171 }
 0xc84   :  { %v18334_v12 = vpop.permute.xlu0 %7173 }
 0xc85   :  { %7113 = vmatmul.mubr.bf16.gmra.mrb[72].mxu1 %v10500_v55 }
 0xc86   :  { %7024 = vmatmul.mubr.bf16.gmra.mrb[76].mxu0 %v10501_v61  ;;  %7727 = vmatprep.mubr.msk.bf16.mxu1 %vm6004_vm2, %v10502_v11 }
 0xc87   :  { %8016 = vmatprep.mubr.bf16.mxu0 %v10503_v47  ;;  %v18336_v49 = vpop.permute.xlu1 %7175 }
 0xc88   :  { %v18338_v44 = vpop.permute.xlu0 %7177 }
 0xc8b   :  { %v18340_v28 = vpop.permute.xlu1 %7179 }
 0xc8c   :  { %v18342_v25 = vpop.permute.xlu0 %7181 }
 0xc8d   :  { %7121 = vmatmul.mubr.bf16.gmra.mrb[76].mxu1 %v10504_v59 }
 0xc8e   :  { %8048 = vmatprep.mubr.bf16.mxu1 %v19863_v62 }
 0xc8f   :  { %v18344_v30 = vpop.permute.xlu1 %7183 }
 0xc90   :  { %v6513_v52 = vpop.permute.xlu0 %6512 }
 0xc93   :  { %v6515_v2 = vpop.permute.xlu1 %6514 }
 0xc94   :  { %v6517_v4 = vpop.permute.xlu0 %6516 }
 0xc97   :  { %v6519_v3 = vpop.permute.xlu1 %6518 }
 0xc98   :  { %v6521_v48 = vpop.permute.xlu0 %6520 }
 0xc9b   :  { %v6523_v53 = vpop.permute.xlu1 %6522 }
 0xc9c   :  { %v6525_v27 = vpop.permute.xlu0 %6524 }
 0xc9f   :  { %v6527_v14 = vpop.permute.xlu1 %6526 }
 0xca0   :  { %v6529_v46 = vpop.permute.xlu0 %6528 }
 0xca3   :  { %v6531_v39 = vpop.permute.xlu1 %6530 }
 0xca4   :  { %v6533_v59 = vpop.permute.xlu0 %6532 }
 0xce6   :  { %v7986_v34 = vpop.f32.mrb[32].mxu1 }
 0xce7   :  { %v6594_v57 = vpop.f32.mrb[33].mxu1  ;;  %v6603_v13 = vadd.f32 %v7986_v34, %v6517_v4  ;;  %v6535_v4 = vpop.permute.xlu1 %6534 }
 0xce8   :  { %v6595_v31 = vadd.f32 %v6594_v57, %v6513_v52  ;;  %v7987_v40 = vpop.f32.mrb[34].mxu1 }
 0xce9   :  { %6660 = vst.msk [vmem:[%s18541_s7 + $0x10] sm:$0xff] %vm6657_vm1, %v6603_v13  ;;  %v6606_v0 = vadd.f32 %v7987_v40, %v6519_v3  ;;  %v6597_v18 = vpop.f32.mrb[35].mxu1 }
 0xcea   :  { %6658 = vst.msk [vmem:[%s18541_s7] sm:$0xff] %vm6657_vm1, %v6595_v31  ;;  %v6598_v1 = vadd.f32 %v6597_v18, %v6515_v2 }
 0xceb   :  { %6661 = vst.msk [vmem:[%s18541_s7 + $0x18] sm:$0xff] %vm6657_vm1, %v6606_v0  ;;  %v6539_v13 = vpop.permute.xlu1 %6538 }
 0xcec   :  { %6659 = vst.msk [vmem:[%s18541_s7 + $0x8] sm:$0xff] %vm6657_vm1, %v6598_v1 }
 0xcee   :  { %v7990_v17 = vpop.f32.mrb[36].mxu1 }
 0xcef   :  { %v6610_v55 = vpop.f32.mrb[37].mxu1  ;;  %v6619_v61 = vadd.f32 %v7990_v17, %v6525_v27  ;;  %v6543_v1 = vpop.permute.xlu1 %6542 }
 0xcf0   :  { %v6611_v11 = vadd.f32 %v6610_v55, %v6521_v48  ;;  %v7991_v47 = vpop.f32.mrb[38].mxu1  ;;  %v6537_v48 = vpop.permute.xlu0 %6536 }
 0xcf1   :  { %6664 = vst.msk [vmem:[%s18541_s7 + $0x30] sm:$0xff] %vm6657_vm1, %v6619_v61  ;;  %v6622_v62 = vadd.f32 %v7991_v47, %v6527_v14  ;;  %v6613_v52 = vpop.f32.mrb[39].mxu1 }
 0xcf2   :  { %6662 = vst.msk [vmem:[%s18541_s7 + $0x20] sm:$0xff] %vm6657_vm1, %v6611_v11  ;;  %v6614_v2 = vadd.f32 %v6613_v52, %v6523_v53 }
 0xcf3   :  { %6665 = vst.msk [vmem:[%s18541_s7 + $0x38] sm:$0xff] %vm6657_vm1, %v6622_v62 }
 0xcf4   :  { %6663 = vst.msk [vmem:[%s18541_s7 + $0x28] sm:$0xff] %vm6657_vm1, %v6614_v2  ;;  %v6541_v0 = vpop.permute.xlu0 %6540 }
 0xcf6   :  { %v7994_v3 = vpop.f32.mrb[40].mxu1 }
 0xcf7   :  { %v6626_v27 = vpop.f32.mrb[41].mxu1  ;;  %v6635_v34 = vadd.f32 %v7994_v3, %v6533_v59 }
 0xcf8   :  { %v6627_v14 = vadd.f32 %v6626_v27, %v6529_v46  ;;  %v7995_v57 = vpop.f32.mrb[42].mxu1 }
 0xcf9   :  { %6668 = vst.msk [vmem:[%s18541_s7 + $0x50] sm:$0xff] %vm6657_vm1, %v6635_v34  ;;  %v6638_v53 = vadd.f32 %v7995_v57, %v6535_v4  ;;  %v6629_v31 = vpop.f32.mrb[43].mxu1 }
 0xcfa   :  { %6666 = vst.msk [vmem:[%s18541_s7 + $0x40] sm:$0xff] %vm6657_vm1, %v6627_v14  ;;  %v6630_v40 = vadd.f32 %v6629_v31, %v6531_v39 }
 0xcfb   :  { %6669 = vst.msk [vmem:[%s18541_s7 + $0x58] sm:$0xff] %vm6657_vm1, %v6638_v53 }
 0xcfc   :  { %6667 = vst.msk [vmem:[%s18541_s7 + $0x48] sm:$0xff] %vm6657_vm1, %v6630_v40 }
 0xcfe   :  { %v7998_v18 = vpop.f32.mrb[44].mxu1 }
 0xcff   :  { %v6642_v46 = vpop.f32.mrb[45].mxu1  ;;  %v6651_v17 = vadd.f32 %v7998_v18, %v6541_v0 }
 0xd00   :  { %v6643_v55 = vadd.f32 %v6642_v46, %v6537_v48  ;;  %v7999_v61 = vpop.f32.mrb[46].mxu1 }
 0xd01   :  { %6672 = vst.msk [vmem:[%s18541_s7 + $0x70] sm:$0xff] %vm6657_vm1, %v6651_v17  ;;  %v6654_v39 = vadd.f32 %v7999_v61, %v6543_v1  ;;  %v6645_v11 = vpop.f32.mrb[47].mxu1 }
 0xd02   :  { %6670 = vst.msk [vmem:[%s18541_s7 + $0x60] sm:$0xff] %vm6657_vm1, %v6643_v55  ;;  %v6646_v47 = vadd.f32 %v6645_v11, %v6539_v13 }
 0xd03   :  { %6673 = vst.msk [vmem:[%s18541_s7 + $0x78] sm:$0xff] %vm6657_vm1, %v6654_v39 }
 0xd04   :  { %6671 = vst.msk [vmem:[%s18541_s7 + $0x68] sm:$0xff] %vm6657_vm1, %v6646_v47 }
 0xd21   :  { %v7856_v59 = vpop.f32.mrb[48].mxu0 }
 0xd22   :  { %v7857_v62 = vpop.f32.mrb[49].mxu0 }
 0xd23   :  { %v7858_v52 = vadd.f32 %v7857_v62, %v7856_v59  ;;  %v7859_v2 = vpop.f32.mrb[50].mxu0 }
 0xd24   :  { %v7860_v4 = vpop.f32.mrb[51].mxu0 }
 0xd25   :  { %v7861_v3 = vadd.f32 %v7860_v4, %v7859_v2  ;;  %v6970_v48 = vadd.f32 %v7858_v52, %v18239_v35 }
 0xd27   :  { %v6973_v13 = vadd.f32 %v7861_v3, %v18241_v26 }
 0xd28   :  { %v7066_v27 = vpop.f32.mrb[48].mxu1 }
 0xd29   :  { %v7067_v34 = vadd.f32 %v7066_v27, %v6970_v48  ;;  %v7862_v14 = vpop.f32.mrb[52].mxu0  ;;  %v7068_v57 = vpop.f32.mrb[49].mxu1 }
 0xd2a   :  { %v7863_v53 = vpop.f32.mrb[53].mxu0  ;;  %v7069_v31 = vpop.f32.mrb[50].mxu1 }
 0xd2b   :  { %v7864_v40 = vadd.f32 %v7863_v53, %v7862_v14  ;;  %v7070_v0 = vadd.f32 %v7069_v31, %v6973_v13  ;;  %v7865_v18 = vpop.f32.mrb[54].mxu0  ;;  %v7071_v1 = vpop.f32.mrb[51].mxu1  ;;  %v7129_v17 = vmax.f32 %v7067_v34, 0.0 }
 0xd2c   :  { %v7866_v46 = vpop.f32.mrb[55].mxu0 }
 0xd2d   :  { %v7130_v55 = vmax.f32 %v7070_v0, 0.0  ;;  %v7867_v61 = vadd.f32 %v7866_v46, %v7865_v18  ;;  %v6978_v39 = vadd.f32 %v7864_v40, %v18253_v15 }
 0xd2f   :  { %v7145_v11 = vpack.c.bf16 %v7130_v55, %v7129_v17  ;;  %v6981_v26 = vadd.f32 %v7867_v61, %v18258_v63 }
 0xd30   :  { %v7074_v35 = vpop.f32.mrb[52].mxu1 }
 0xd31   :  { %v7075_v47 = vadd.f32 %v7074_v35, %v6978_v39  ;;  %v7868_v59 = vpop.f32.mrb[56].mxu0  ;;  %v7076_v62 = vpop.f32.mrb[53].mxu1  ;;  %8000 = vmatprep.subr.bf16.mxu0 %v7145_v11 }
 0xd32   :  { %v7869_v52 = vpop.f32.mrb[57].mxu0  ;;  %v7077_v2 = vpop.f32.mrb[54].mxu1  ;;  %8001 = vmatpush3.bf16.msra.mxu0 %v7145_v11 }
 0xd33   :  { %v7870_v4 = vadd.f32 %v7869_v52, %v7868_v59  ;;  %v7078_v3 = vadd.f32 %v7077_v2, %v6981_v26  ;;  %v7871_v48 = vpop.f32.mrb[58].mxu0  ;;  %v7079_v27 = vpop.f32.mrb[55].mxu1  ;;  %v7131_v14 = vmax.f32 %v7075_v47, 0.0 }
 0xd34   :  { %v7872_v34 = vpop.f32.mrb[59].mxu0 }
 0xd35   :  { %v7132_v57 = vmax.f32 %v7078_v3, 0.0  ;;  %v7873_v13 = vadd.f32 %v7872_v34, %v7871_v48  ;;  %v6986_v15 = vadd.f32 %v7870_v4, %v18260_v9 }
 0xd37   :  { %v7146_v53 = vpack.c.bf16 %v7132_v57, %v7131_v14  ;;  %v6989_v63 = vadd.f32 %v7873_v13, %v18272_v60 }
 0xd38   :  { %v7082_v31 = vpop.f32.mrb[56].mxu1 }
 0xd39   :  { %v7083_v40 = vadd.f32 %v7082_v31, %v6986_v15  ;;  %v7874_v0 = vpop.f32.mrb[60].mxu0  ;;  %v7084_v18 = vpop.f32.mrb[57].mxu1  ;;  %8002 = vmatprep.subr.bf16.mxu0 %v7146_v53 }
 0xd3a   :  { %v7875_v1 = vpop.f32.mrb[61].mxu0  ;;  %v7085_v46 = vpop.f32.mrb[58].mxu1  ;;  %8003 = vmatpush3.bf16.msra.mxu0 %v7146_v53 }
 0xd3b   :  { %v7876_v17 = vadd.f32 %v7875_v1, %v7874_v0  ;;  %v7086_v55 = vadd.f32 %v7085_v46, %v6989_v63  ;;  %v7877_v61 = vpop.f32.mrb[62].mxu0  ;;  %v7087_v39 = vpop.f32.mrb[59].mxu1  ;;  %v7133_v35 = vmax.f32 %v7083_v40, 0.0 }
 0xd3c   :  { %v7878_v11 = vpop.f32.mrb[63].mxu0 }
 0xd3d   :  { %v7134_v47 = vmax.f32 %v7086_v55, 0.0  ;;  %v7879_v59 = vadd.f32 %v7878_v11, %v7877_v61  ;;  %v6994_v9 = vadd.f32 %v7876_v17, %v18277_v45 }
 0xd3f   :  { %v7147_v62 = vpack.c.bf16 %v7134_v47, %v7133_v35  ;;  %v6997_v60 = vadd.f32 %v7879_v59, %v18279_v33 }
 0xd40   :  { %v7090_v26 = vpop.f32.mrb[60].mxu1 }
 0xd41   :  { %v7091_v52 = vadd.f32 %v7090_v26, %v6994_v9  ;;  %v7880_v2 = vpop.f32.mrb[64].mxu0  ;;  %v7092_v4 = vpop.f32.mrb[61].mxu1  ;;  %8004 = vmatprep.subr.bf16.mxu0 %v7147_v62 }
 0xd42   :  { %v7881_v3 = vpop.f32.mrb[65].mxu0  ;;  %v7093_v48 = vpop.f32.mrb[62].mxu1  ;;  %8005 = vmatpush3.bf16.msra.mxu0 %v7147_v62 }
 0xd43   :  { %v7882_v27 = vadd.f32 %v7881_v3, %v7880_v2  ;;  %v7094_v34 = vadd.f32 %v7093_v48, %v6997_v60  ;;  %v7883_v14 = vpop.f32.mrb[66].mxu0  ;;  %v7095_v57 = vpop.f32.mrb[63].mxu1  ;;  %v7135_v15 = vmax.f32 %v7091_v52, 0.0 }
 0xd44   :  { %v7884_v13 = vpop.f32.mrb[67].mxu0 }
 0xd45   :  { %v7136_v53 = vmax.f32 %v7094_v34, 0.0  ;;  %v7885_v31 = vadd.f32 %v7884_v13, %v7883_v14  ;;  %v7002_v45 = vadd.f32 %v7882_v27, %v18294_v21 }
 0xd47   :  { %v7148_v40 = vpack.c.bf16 %v7136_v53, %v7135_v15  ;;  %v7005_v33 = vadd.f32 %v7885_v31, %v18296_v38 }
 0xd48   :  { %v7098_v0 = vpop.f32.mrb[64].mxu1 }
 0xd49   :  { %v7099_v18 = vadd.f32 %v7098_v0, %v7002_v45  ;;  %v7886_v63 = vpop.f32.mrb[68].mxu0  ;;  %v7100_v1 = vpop.f32.mrb[65].mxu1  ;;  %8006 = vmatprep.subr.bf16.mxu0 %v7148_v40 }
 0xd4a   :  { %v7887_v46 = vpop.f32.mrb[69].mxu0  ;;  %v7101_v17 = vpop.f32.mrb[66].mxu1  ;;  %8007 = vmatpush3.bf16.msra.mxu0 %v7148_v40 }
 0xd4b   :  { %v7888_v55 = vadd.f32 %v7887_v46, %v7886_v63  ;;  %v7102_v61 = vadd.f32 %v7101_v17, %v7005_v33  ;;  %v7889_v39 = vpop.f32.mrb[70].mxu0  ;;  %v7103_v11 = vpop.f32.mrb[67].mxu1  ;;  %v7137_v47 = vmax.f32 %v7099_v18, 0.0 }
 0xd4c   :  { %v7890_v35 = vpop.f32.mrb[71].mxu0 }
 0xd4d   :  { %v7138_v59 = vmax.f32 %v7102_v61, 0.0  ;;  %v7891_v9 = vadd.f32 %v7890_v35, %v7889_v39  ;;  %v7010_v21 = vadd.f32 %v7888_v55, %v18301_v6 }
 0xd4f   :  { %v7149_v62 = vpack.c.bf16 %v7138_v59, %v7137_v47  ;;  %v7013_v38 = vadd.f32 %v7891_v9, %v18304_v29 }
 0xd50   :  { %v7106_v26 = vpop.f32.mrb[68].mxu1 }
 0xd51   :  { %v7107_v52 = vadd.f32 %v7106_v26, %v7010_v21  ;;  %v7892_v2 = vpop.f32.mrb[72].mxu0  ;;  %v7108_v4 = vpop.f32.mrb[69].mxu1  ;;  %8008 = vmatprep.subr.bf16.mxu0 %v7149_v62 }
 0xd52   :  { %v7893_v60 = vpop.f32.mrb[73].mxu0  ;;  %v7109_v3 = vpop.f32.mrb[70].mxu1  ;;  %8009 = vmatpush3.bf16.msra.mxu0 %v7149_v62 }
 0xd53   :  { %v7894_v48 = vadd.f32 %v7893_v60, %v7892_v2  ;;  %v7110_v27 = vadd.f32 %v7109_v3, %v7013_v38  ;;  %v7895_v34 = vpop.f32.mrb[74].mxu0  ;;  %v7111_v14 = vpop.f32.mrb[71].mxu1  ;;  %v7139_v13 = vmax.f32 %v7107_v52, 0.0  ;;  %v10506_v60 = vld [vmem:[%s18539_s4 + $0x10] sm:$0xff]   ;;  %v10508_v3 = vld [vmem:[%s18539_s4 + $0x20] sm:$0xff]  }
 0xd54   :  { %v7896_v57 = vpop.f32.mrb[75].mxu0 }
 0xd55   :  { %v7140_v15 = vmax.f32 %v7110_v27, 0.0  ;;  %v7897_v53 = vadd.f32 %v7896_v57, %v7895_v34  ;;  %v7018_v6 = vadd.f32 %v7894_v48, %v18306_v56  ;;  %v10509_v48 = vld [vmem:[%s18539_s4 + $0x28] sm:$0xff]   ;;  %v10510_v27 = vld [vmem:[%s18539_s4 + $0x30] sm:$0xff]   ;;  %v10511_v34 = vld [vmem:[%s18539_s4 + $0x38] sm:$0xff]  }
 0xd57   :  { %v7150_v31 = vpack.c.bf16 %v7140_v15, %v7139_v13  ;;  %v7021_v29 = vadd.f32 %v7897_v53, %v18308_v24 }
 0xd58   :  { %v7114_v45 = vpop.f32.mrb[72].mxu1 }
 0xd59   :  { %v7115_v40 = vadd.f32 %v7114_v45, %v7018_v6  ;;  %v7898_v0 = vpop.f32.mrb[76].mxu0  ;;  %v7116_v18 = vpop.f32.mrb[73].mxu1  ;;  %8010 = vmatprep.subr.bf16.mxu0 %v7150_v31 }
 0xd5a   :  { %v7899_v63 = vpop.f32.mrb[77].mxu0  ;;  %v7117_v1 = vpop.f32.mrb[74].mxu1  ;;  %8011 = vmatpush3.bf16.msra.mxu0 %v7150_v31 }
 0xd5b   :  { %v7900_v33 = vadd.f32 %v7899_v63, %v7898_v0  ;;  %v7118_v46 = vadd.f32 %v7117_v1, %v7021_v29  ;;  %v7901_v17 = vpop.f32.mrb[78].mxu0  ;;  %v7119_v55 = vpop.f32.mrb[75].mxu1  ;;  %v7141_v39 = vmax.f32 %v7115_v40, 0.0 }
 0xd5c   :  { %v7902_v61 = vpop.f32.mrb[79].mxu0 }
 0xd5d   :  { %v7142_v11 = vmax.f32 %v7118_v46, 0.0  ;;  %v7903_v35 = vadd.f32 %v7902_v61, %v7901_v17  ;;  %v7026_v56 = vadd.f32 %v7900_v33, %v18310_v22  ;;  %v10505_v22 = vld [vmem:[%s18539_s4 + $0x8] sm:$0xff]  }
 0xd5f   :  { %v7151_v47 = vpack.c.bf16 %v7142_v11, %v7141_v39  ;;  %v7029_v24 = vadd.f32 %v7903_v35, %v18312_v5  ;;  %v10507_v5 = vld [vmem:[%s18539_s4 + $0x18] sm:$0xff]  }
 0xd60   :  { %v7122_v59 = vpop.f32.mrb[76].mxu1 }
 0xd61   :  { %v7123_v9 = vadd.f32 %v7122_v59, %v7026_v56  ;;  %v7124_v21 = vpop.f32.mrb[77].mxu1  ;;  %8012 = vmatprep.subr.bf16.mxu0 %v7151_v47 }
 0xd62   :  { %v7125_v62 = vpop.f32.mrb[78].mxu1  ;;  %8013 = vmatpush3.bf16.msra.mxu0 %v7151_v47 }
 0xd63   :  { %v7126_v26 = vadd.f32 %v7125_v62, %v7029_v24  ;;  %v7127_v52 = vpop.f32.mrb[79].mxu1  ;;  %v7143_v2 = vmax.f32 %v7123_v9, 0.0 }
 0xd65   :  { %v7144_v4 = vmax.f32 %v7126_v26, 0.0 }
 0xd67   :  { %v7152_v38 = vpack.c.bf16 %v7144_v4, %v7143_v2 }
 0xd69   :  { %8014 = vmatprep.subr.bf16.mxu0 %v7152_v38 }
 0xd6a   :  { %8015 = vmatpush3.bf16.msra.mxu0 %v7152_v38 }
 0xd6d   :  { %8017 = vmatmul.mubr.bf16.vlgmr.msra.gmra.mrb[80].mxu0 %v10505_v22 }
 0xd6e   :  { %8020 = vmatprep.mubr.bf16.mxu0 %v10506_v60 }
 0xd75   :  { %8021 = vmatmul.mubr.bf16.gmra.mrb[84].mxu0 %v10507_v5 }
 0xd76   :  { %8024 = vmatprep.mubr.bf16.mxu0 %v10508_v3 }
 0xd7d   :  { %8025 = vmatmul.mubr.bf16.gmra.mrb[88].mxu0 %v10509_v48 }
 0xd7e   :  { %8028 = vmatprep.mubr.bf16.mxu0 %v10510_v27 }
 0xd85   :  { %8029 = vmatmul.mubr.bf16.gmra.mrb[92].mxu0 %v10511_v34 }
 0xe40   :  { %v8018_v14 = vpop.f32.mrb[80].mxu0 }
 0xe41   :  { %v7244_v57 = vadd.f32 %v8018_v14, %v18318_v16  ;;  %v7235_v13 = vpop.f32.mrb[81].mxu0 }
 0xe42   :  { %v7236_v15 = vadd.f32 %v7235_v13, %v18314_v42  ;;  %v8019_v53 = vpop.f32.mrb[82].mxu0 }
 0xe43   :  { %v7247_v6 = vadd.f32 %v8019_v53, %v18320_v20  ;;  %v7238_v31 = vpop.f32.mrb[83].mxu0  ;;  %v7300_v40 = vmax.f32 %v7244_v57, 0.0 }
 0xe44   :  { %v7239_v45 = vadd.f32 %v7238_v31, %v18316_v43  ;;  %v7298_v18 = vmax.f32 %v7236_v15, 0.0 }
 0xe45   :  { %v7301_v0 = vmax.f32 %v7247_v6, 0.0 }
 0xe46   :  { %v7299_v29 = vmax.f32 %v7239_v45, 0.0 }
 0xe47   :  { %v7315_v63 = vpack.c.bf16 %v7301_v0, %v7300_v40 }
 0xe48   :  { %v7314_v1 = vpack.c.bf16 %v7299_v29, %v7298_v18  ;;  %v8022_v33 = vpop.f32.mrb[84].mxu0 }
 0xe49   :  { %v7260_v46 = vadd.f32 %v8022_v33, %v18326_v41  ;;  %v7251_v17 = vpop.f32.mrb[85].mxu0 }
 0xe4a   :  { %v7252_v16 = vadd.f32 %v7251_v17, %v18322_v50  ;;  %v8023_v55 = vpop.f32.mrb[86].mxu0  ;;  %8032 = vmatprep.subr.bf16.mxu1 %v7314_v1 }
 0xe4b   :  { %v7263_v42 = vadd.f32 %v8023_v55, %v18328_v32  ;;  %v7254_v20 = vpop.f32.mrb[87].mxu0  ;;  %8033 = vmatpush3.bf16.msra.mxu1 %v7314_v1  ;;  %v7304_v61 = vmax.f32 %v7260_v46, 0.0 }
 0xe4c   :  { %v7255_v43 = vadd.f32 %v7254_v20, %v18324_v54  ;;  %8034 = vmatprep.subr.bf16.mxu1 %v7315_v63  ;;  %v7302_v11 = vmax.f32 %v7252_v16, 0.0 }
 0xe4d   :  { %v7305_v39 = vmax.f32 %v7263_v42, 0.0 }
 0xe4e   :  { %v7303_v35 = vmax.f32 %v7255_v43, 0.0 }
 0xe4f   :  { %v7317_v56 = vpack.c.bf16 %v7305_v39, %v7304_v61  ;;  %8035 = vmatpush3.bf16.msra.mxu1 %v7315_v63 }
 0xe50   :  { %v7316_v47 = vpack.c.bf16 %v7303_v35, %v7302_v11  ;;  %v8026_v41 = vpop.f32.mrb[88].mxu0 }
 0xe51   :  { %v7276_v59 = vadd.f32 %v8026_v41, %v18334_v12  ;;  %v7267_v50 = vpop.f32.mrb[89].mxu0 }
 0xe52   :  { %8036 = vmatprep.subr.bf16.mxu1 %v7316_v47  ;;  %v7268_v9 = vadd.f32 %v7267_v50, %v18330_v37  ;;  %v8027_v32 = vpop.f32.mrb[90].mxu0 }
 0xe53   :  { %8037 = vmatpush3.bf16.msra.mxu1 %v7316_v47  ;;  %v7279_v21 = vadd.f32 %v8027_v32, %v18336_v49  ;;  %v7270_v54 = vpop.f32.mrb[91].mxu0  ;;  %v7308_v62 = vmax.f32 %v7276_v59, 0.0 }
 0xe54   :  { %8038 = vmatprep.subr.bf16.mxu1 %v7317_v56  ;;  %v7271_v24 = vadd.f32 %v7270_v54, %v18332_v51  ;;  %v7306_v52 = vmax.f32 %v7268_v9, 0.0 }
 0xe55   :  { %v7309_v26 = vmax.f32 %v7279_v21, 0.0 }
 0xe56   :  { %v7307_v2 = vmax.f32 %v7271_v24, 0.0 }
 0xe57   :  { %8039 = vmatpush3.bf16.msra.mxu1 %v7317_v56  ;;  %v7319_v4 = vpack.c.bf16 %v7309_v26, %v7308_v62 }
 0xe58   :  { %v7318_v38 = vpack.c.bf16 %v7307_v2, %v7306_v52  ;;  %v8030_v12 = vpop.f32.mrb[92].mxu0 }
 0xe59   :  { %v7292_v22 = vadd.f32 %v8030_v12, %v18342_v25  ;;  %v7283_v60 = vpop.f32.mrb[93].mxu0 }
 0xe5a   :  { %8040 = vmatprep.subr.bf16.mxu1 %v7318_v38  ;;  %v7284_v37 = vadd.f32 %v7283_v60, %v18338_v44  ;;  %v8031_v5 = vpop.f32.mrb[94].mxu0  ;;  %v7323_v44 = vpop.permute.xlu0 %7322 }
 0xe5b   :  { %8041 = vmatpush3.bf16.msra.mxu1 %v7318_v38  ;;  %v7295_v49 = vadd.f32 %v8031_v5, %v18344_v30  ;;  %v7286_v3 = vpop.f32.mrb[95].mxu0  ;;  %v7312_v48 = vmax.f32 %v7292_v22, 0.0 }
 0xe5c   :  { %8042 = vmatprep.subr.bf16.mxu1 %v7319_v4  ;;  %v7287_v51 = vadd.f32 %v7286_v3, %v18340_v28  ;;  %v7310_v34 = vmax.f32 %v7284_v37, 0.0  ;;  %v7325_v28 = vpop.permute.xlu1 %7324 }
 0xe5d   :  { %v7313_v27 = vmax.f32 %v7295_v49, 0.0 }
 0xe5e   :  { %v7311_v14 = vmax.f32 %v7287_v51, 0.0  ;;  %v7327_v25 = vpop.permute.xlu0 %7326 }
 0xe5f   :  { %8043 = vmatpush3.bf16.msra.mxu1 %v7319_v4  ;;  %v7321_v57 = vpack.c.bf16 %v7313_v27, %v7312_v48 }
 0xe60   :  { %v7320_v13 = vpack.c.bf16 %v7311_v14, %v7310_v34  ;;  %v7329_v30 = vpop.permute.xlu1 %7328 }
 0xe62   :  { %8044 = vmatprep.subr.bf16.mxu1 %v7320_v13  ;;  %v7331_v15 = vpop.permute.xlu0 %7330 }
 0xe63   :  { %8045 = vmatpush3.bf16.msra.mxu1 %v7320_v13 }
 0xe64   :  { %8046 = vmatprep.subr.bf16.mxu1 %v7321_v57  ;;  %v7333_v53 = vpop.permute.xlu1 %7332 }
 0xe66   :  { %v7335_v6 = vpop.permute.xlu0 %7334 }
 0xe67   :  { %8047 = vmatpush3.bf16.msra.mxu1 %v7321_v57 }
 0xe68   :  { %v7337_v31 = vpop.permute.xlu1 %7336 }
 0xe6a   :  { %8049 = vmatmul.mubr.bf16.vlgmr.msra.gmra.mrb[80].mxu1 %v18039_v19 }
 0xe6b   :  { %8052 = vmatprep.mubr.bf16.mxu1 %v18046_v36 }
 0xe6c   :  { %v7341_v0 = vpop.permute.xlu1 %7340 }
 0xe70   :  { %v7345_v42 = vpop.permute.xlu1 %7344 }
 0xe72   :  { %8053 = vmatmul.mubr.bf16.gmra.mrb[84].mxu1 %v18062_v10 }
 0xe73   :  { %8056 = vmatprep.mubr.bf16.mxu1 %v18069_v7 }
 0xe74   :  { %v7349_v56 = vpop.permute.xlu1 %7348 }
 0xe78   :  { %v7353_v32 = vpop.permute.xlu1 %7352 }
 0xe7a   :  { %8057 = vmatmul.mubr.bf16.gmra.mrb[88].mxu1 %v18082_v23 }
 0xe7b   :  { %8060 = vmatprep.mubr.bf16.mxu1 %v18089_v58 }
 0xe82   :  { %8061 = vmatmul.mubr.bf16.gmra.mrb[92].mxu1 %v18102_v8  ;;  %v7339_v8 = vpop.permute.xlu0 %7338 }
 0xe86   :  { %v7343_v46 = vpop.permute.xlu0 %7342 }
 0xe8a   :  { %v7347_v43 = vpop.permute.xlu0 %7346 }
 0xe8e   :  { %v7351_v50 = vpop.permute.xlu0 %7350 }
 0xf3d   :  { %v8050_v19 = vpop.f32.mrb[80].mxu1 }
 0xf3e   :  { %v7404_v36 = vpop.f32.mrb[81].mxu1  ;;  %v7413_v45 = vadd.f32 %v8050_v19, %v7327_v25 }
 0xf3f   :  { %v7405_v10 = vadd.f32 %v7404_v36, %v7323_v44  ;;  %v8051_v40 = vpop.f32.mrb[82].mxu1 }
 0xf40   :  { %v7407_v7 = vpop.f32.mrb[83].mxu1  ;;  %7730 = vst.msk [vmem:[%s18541_s7 + $0x90] sm:$0xff] %vm6657_vm1, %v7413_v45  ;;  %v7416_v23 = vadd.f32 %v8051_v40, %v7329_v30 }
 0xf41   :  { %7728 = vst.msk [vmem:[%s18541_s7 + $0x80] sm:$0xff] %vm6657_vm1, %v7405_v10  ;;  %v7408_v58 = vadd.f32 %v7407_v7, %v7325_v28 }
 0xf42   :  { %7731 = vst.msk [vmem:[%s18541_s7 + $0x98] sm:$0xff] %vm6657_vm1, %v7416_v23 }
 0xf43   :  { %7729 = vst.msk [vmem:[%s18541_s7 + $0x88] sm:$0xff] %vm6657_vm1, %v7408_v58 }
 0xf45   :  { %v8054_v18 = vpop.f32.mrb[84].mxu1 }
 0xf46   :  { %v7420_v29 = vpop.f32.mrb[85].mxu1  ;;  %v7429_v63 = vadd.f32 %v8054_v18, %v7335_v6 }
 0xf47   :  { %v7421_v1 = vadd.f32 %v7420_v29, %v7331_v15  ;;  %v8055_v33 = vpop.f32.mrb[86].mxu1 }
 0xf48   :  { %v7423_v17 = vpop.f32.mrb[87].mxu1  ;;  %7734 = vst.msk [vmem:[%s18541_s7 + $0xb0] sm:$0xff] %vm6657_vm1, %v7429_v63  ;;  %v7432_v16 = vadd.f32 %v8055_v33, %v7337_v31 }
 0xf49   :  { %7732 = vst.msk [vmem:[%s18541_s7 + $0xa0] sm:$0xff] %vm6657_vm1, %v7421_v1  ;;  %v7424_v55 = vadd.f32 %v7423_v17, %v7333_v53 }
 0xf4a   :  { %7735 = vst.msk [vmem:[%s18541_s7 + $0xb8] sm:$0xff] %vm6657_vm1, %v7432_v16 }
 0xf4b   :  { %7733 = vst.msk [vmem:[%s18541_s7 + $0xa8] sm:$0xff] %vm6657_vm1, %v7424_v55 }
 0xf4d   :  { %v8058_v20 = vpop.f32.mrb[88].mxu1 }
 0xf4e   :  { %v7436_v61 = vpop.f32.mrb[89].mxu1  ;;  %v7445_v39 = vadd.f32 %v8058_v20, %v7343_v46 }
 0xf4f   :  { %v7437_v11 = vadd.f32 %v7436_v61, %v7339_v8  ;;  %v8059_v35 = vpop.f32.mrb[90].mxu1 }
 0xf50   :  { %v7439_v47 = vpop.f32.mrb[91].mxu1  ;;  %7738 = vst.msk [vmem:[%s18541_s7 + $0xd0] sm:$0xff] %vm6657_vm1, %v7445_v39  ;;  %v7448_v41 = vadd.f32 %v8059_v35, %v7345_v42 }
 0xf51   :  { %7736 = vst.msk [vmem:[%s18541_s7 + $0xc0] sm:$0xff] %vm6657_vm1, %v7437_v11  ;;  %v7440_v59 = vadd.f32 %v7439_v47, %v7341_v0 }
 0xf52   :  { %7739 = vst.msk [vmem:[%s18541_s7 + $0xd8] sm:$0xff] %vm6657_vm1, %v7448_v41 }
 0xf53   :  { %7737 = vst.msk [vmem:[%s18541_s7 + $0xc8] sm:$0xff] %vm6657_vm1, %v7440_v59 }
 0xf55   :  { %v8062_v9 = vpop.f32.mrb[92].mxu1 }
 0xf56   :  { %v7452_v21 = vpop.f32.mrb[93].mxu1  ;;  %v7461_v54 = vadd.f32 %v8062_v9, %v7351_v50 }
 0xf57   :  { %v7453_v24 = vadd.f32 %v7452_v21, %v7347_v43  ;;  %v8063_v62 = vpop.f32.mrb[94].mxu1 }
 0xf58   :  { %v7455_v26 = vpop.f32.mrb[95].mxu1  ;;  %7742 = vst.msk [vmem:[%s18541_s7 + $0xf0] sm:$0xff] %vm6657_vm1, %v7461_v54  ;;  %v7464_v52 = vadd.f32 %v8063_v62, %v7353_v32 }
 0xf59   :  { %7740 = vst.msk [vmem:[%s18541_s7 + $0xe0] sm:$0xff] %vm6657_vm1, %v7453_v24  ;;  %v7456_v2 = vadd.f32 %v7455_v26, %v7349_v56 }
 0xf5a   :  { %7743 = vst.msk [vmem:[%s18541_s7 + $0xf8] sm:$0xff] %vm6657_vm1, %v7464_v52 }
 0xf5b   :  { %7741 = vst.msk [vmem:[%s18541_s7 + $0xe8] sm:$0xff] %vm6657_vm1, %v7456_v2 }

</bundles_post_ra>
